<compile_context>
chip_gen: v6e
topology: v6e:2x2x1
jax: 0.10.0
libtpu: 0.0.40
codegen_flags: <defaults>
</compile_context>

<pallas_src>
import functools

import jax
import jax.numpy as jnp
from jax import lax
from jax.experimental import pallas as pl
from jax.experimental.pallas import tpu as pltpu

SOS_TOKEN = 1


def _gru_recur(h, gi_r, gi_z, gi_n, w_hr, w_hz, w_hn, b_hr, b_hz, b_hn):
    """Recurrent half of a PyTorch GRU cell (input projections precomputed).

    h: (1,H); gi_*: (1,H) = x @ W_i* + b_i*; w_h*: (H,H); b_h*: (1,H).
    n-gate follows PyTorch: n = tanh(gi_n + r * (h @ W_hn + b_hn)).
    """
    gh_r = jnp.dot(h, w_hr, preferred_element_type=jnp.float32) + b_hr
    gh_z = jnp.dot(h, w_hz, preferred_element_type=jnp.float32) + b_hz
    gh_n = jnp.dot(h, w_hn, preferred_element_type=jnp.float32) + b_hn
    r = jax.nn.sigmoid(gi_r + gh_r)
    z = jax.nn.sigmoid(gi_z + gh_z)
    n = jnp.tanh(gi_n + r * gh_n)
    return (1.0 - z) * n + z * h


def greedy_kernel(emb_seq_ref, emb_tbl_ref,
                  wif_ref, whf_ref, bif_ref, bhf_ref,
                  wib_ref, whb_ref, bib_ref, bhb_ref,
                  wid_ref, whd_ref, bid_ref, bhd_ref,
                  wch_ref, wcc_ref, bc_ref, wo_ref, bo_ref,
                  tok_ref, sc_ref):
    T, H = emb_seq_ref.shape
    V = emb_tbl_ref.shape[0]
    ML = tok_ref.shape[1]

    emb = emb_seq_ref[...]                       # (T, H)
    emb_tbl = emb_tbl_ref[...]                   # (V, H)

    # Per-gate weight slabs (leading index 0/1/2 = r/z/n): each is a static,
    # lane-aligned (H,H)/(1,H) VMEM load -> no lane-offset gate slicing.
    wif_r, wif_z, wif_n = wif_ref[0], wif_ref[1], wif_ref[2]
    whf_r, whf_z, whf_n = whf_ref[0], whf_ref[1], whf_ref[2]
    bif_r, bif_z, bif_n = bif_ref[0], bif_ref[1], bif_ref[2]
    bhf_r, bhf_z, bhf_n = bhf_ref[0], bhf_ref[1], bhf_ref[2]

    wib_r, wib_z, wib_n = wib_ref[0], wib_ref[1], wib_ref[2]
    whb_r, whb_z, whb_n = whb_ref[0], whb_ref[1], whb_ref[2]
    bib_r, bib_z, bib_n = bib_ref[0], bib_ref[1], bib_ref[2]
    bhb_r, bhb_z, bhb_n = bhb_ref[0], bhb_ref[1], bhb_ref[2]

    wid_r, wid_z, wid_n = wid_ref[0], wid_ref[1], wid_ref[2]
    whd_r, whd_z, whd_n = whd_ref[0], whd_ref[1], whd_ref[2]
    bid_r, bid_z, bid_n = bid_ref[0], bid_ref[1], bid_ref[2]
    bhd_r, bhd_z, bhd_n = bhd_ref[0], bhd_ref[1], bhd_ref[2]

    wch, wcc, bc = wch_ref[...], wcc_ref[...], bc_ref[...]
    wo, bo = wo_ref[...], bo_ref[...]

    # ----------------- Encoder: bidirectional GRU over (T, H) ----------------
    # Hoisted input-to-hidden projections: one well-shaped (T,H)@(H,H) matmul
    # per gate/direction instead of 2T latency-bound (1,H) matmuls.
    gi_rf = jnp.dot(emb, wif_r, preferred_element_type=jnp.float32) + bif_r
    gi_zf = jnp.dot(emb, wif_z, preferred_element_type=jnp.float32) + bif_z
    gi_nf = jnp.dot(emb, wif_n, preferred_element_type=jnp.float32) + bif_n
    gi_rb = jnp.dot(emb, wib_r, preferred_element_type=jnp.float32) + bib_r
    gi_zb = jnp.dot(emb, wib_z, preferred_element_type=jnp.float32) + bib_z
    gi_nb = jnp.dot(emb, wib_n, preferred_element_type=jnp.float32) + bib_n

    h_f = jnp.zeros((1, H), jnp.float32)
    h_b = jnp.zeros((1, H), jnp.float32)
    fwd_rows = []                  # fwd_rows[t] = forward hidden at time t
    bwd_rows = [None] * T          # bwd_rows[t] = backward hidden at time t

    # Fused fwd/bwd recurrence, fully unrolled (T small & static): the two
    # independent directions give the scheduler cross-step ILP.
    for i in range(T):
        tb = T - 1 - i
        h_f = _gru_recur(h_f, gi_rf[i:i + 1], gi_zf[i:i + 1], gi_nf[i:i + 1],
                         whf_r, whf_z, whf_n, bhf_r, bhf_z, bhf_n)
        h_b = _gru_recur(h_b, gi_rb[tb:tb + 1], gi_zb[tb:tb + 1],
                         gi_nb[tb:tb + 1],
                         whb_r, whb_z, whb_n, bhb_r, bhb_z, bhb_n)
        fwd_rows.append(h_f)
        bwd_rows[tb] = h_b

    # enc[t] = fwd_out[t] + bwd_out[t]   (== outputs[:,:,:H] + outputs[:,:,H:])
    row_ids = lax.broadcasted_iota(jnp.int32, (T, 1), 0)
    enc = jnp.zeros((T, H), jnp.float32)
    for t in range(T):
        enc = jnp.where(row_ids == t, fwd_rows[t] + bwd_rows[t], enc)

    # decoder_hidden = encoder_hidden[:n_layers] == final forward hidden
    h = h_f

    # ----------------- Decoder: greedy loop over max_length ------------------
    vocab_ids = lax.broadcasted_iota(jnp.int32, (1, V), 1)
    ml_ids = lax.broadcasted_iota(jnp.int32, (1, ML), 1)

    # TODO(synk): at realistic vocab (V~7k) switch to an SMEM token scalar +
    # dynamic embedding row read, keep embedding/w_o in HBM (pl.ANY) or bf16,
    # and tile the vocab projection (v7x 64MiB / v5e 16MiB scoped VMEM).
    onehot = (vocab_ids == SOS_TOKEN).astype(jnp.float32)     # (1, V)
    toks = jnp.zeros((1, ML), jnp.int32)
    scs = jnp.zeros((1, ML), jnp.float32)

    for step in range(ML):
        # embedding lookup of the data-dependent greedy token (onehot matmul)
        x = jnp.dot(onehot, emb_tbl, preferred_element_type=jnp.float32)   # (1,H)
        gi_r = jnp.dot(x, wid_r, preferred_element_type=jnp.float32) + bid_r
        gi_z = jnp.dot(x, wid_z, preferred_element_type=jnp.float32) + bid_z
        gi_n = jnp.dot(x, wid_n, preferred_element_type=jnp.float32) + bid_n
        h = _gru_recur(h, gi_r, gi_z, gi_n,
                       whd_r, whd_z, whd_n, bhd_r, bhd_z, bhd_n)           # (1,H)

        # "dot" attention over encoder outputs; reductions on the MXU.
        scores = lax.dot_general(h, enc, (((1,), (1,)), ((), ())),
                                 preferred_element_type=jnp.float32)       # (1,T)
        scores = scores - jnp.max(scores, axis=1, keepdims=True)
        e = jnp.exp(scores)
        attn = e * pl.reciprocal(jnp.sum(e, axis=1, keepdims=True), approx=True)
        context = jnp.dot(attn, enc, preferred_element_type=jnp.float32)   # (1,H)

        # concat layer: tanh([h, context] @ Wc + bc) in split-weight form
        concat_out = jnp.tanh(
            jnp.dot(h, wch, preferred_element_type=jnp.float32)
            + jnp.dot(context, wcc, preferred_element_type=jnp.float32) + bc)

        logits = jnp.dot(concat_out, wo,
                         preferred_element_type=jnp.float32) + bo          # (1,V)

        # torch.max(softmax(logits), dim=1): argmax(probs) == argmax(logits);
        # max prob == 1 / sum(exp(logits - max_logit)).
        m = jnp.max(logits, axis=1, keepdims=True)                         # (1,1)
        tok = jnp.min(jnp.where(logits == m, vocab_ids, V),
                      axis=1, keepdims=True)                               # (1,1) i32
        sumexp = jnp.sum(jnp.exp(logits - m), axis=1, keepdims=True)
        score = 1.0 / sumexp                                               # (1,1)

        toks = jnp.where(ml_ids == step, tok, toks)
        scs = jnp.where(ml_ids == step, score, scs)
        onehot = (vocab_ids == tok).astype(jnp.float32)

    tok_ref[...] = toks
    sc_ref[...] = scs


def _vmem_spec():
    return pl.BlockSpec(memory_space=pltpu.MemorySpace.VMEM)


@functools.partial(jax.jit, static_argnames=("max_length",))
def greedy_search_decode(input_seq, input_length, max_length, params):
    # input_length: with batch=1 and a full-length sequence,
    # pack/pad_packed_sequence is the identity, so it is not needed here.
    del input_length
    T = input_seq.shape[0]
    del T  # shape carried by emb_seq

    emb_seq = params["embedding"][input_seq]   # (T, H) trace-time gather (glue)

    tokens2d, scores2d = pl.pallas_call(
        greedy_kernel,
        out_shape=(jax.ShapeDtypeStruct((1, max_length), jnp.int32),
                   jax.ShapeDtypeStruct((1, max_length), jnp.float32)),
        in_specs=[_vmem_spec() for _ in range(19)],
        out_specs=(_vmem_spec(), _vmem_spec()),
    )(emb_seq, params["embedding"],
      params["w_ih_f"], params["w_hh_f"], params["b_ih_f"], params["b_hh_f"],
      params["w_ih_b"], params["w_hh_b"], params["b_ih_b"], params["b_hh_b"],
      params["w_ih_d"], params["w_hh_d"], params["b_ih_d"], params["b_hh_d"],
      params["w_c_h"], params["w_c_ctx"], params["b_c"],
      params["w_o"], params["b_o"])

    all_tokens = tokens2d[0]   # (max_length,) int32
    all_scores = scores2d[0]   # (max_length,) float32
    return all_tokens, all_scores


def make_params(key, vocab, hidden):
    def nrm(k, shape):
        return jax.random.normal(k, shape, jnp.float32) * 0.1

    ks = jax.random.split(key, 20)
    H, V = hidden, vocab
    return {
        "embedding": nrm(ks[0], (V, H)),
        # GRU weights stored per gate (r,z,n) stacked on the leading axis and
        # pre-transposed so every matmul is x @ W: (3, H_in, H) / (3, 1, H).
        "w_ih_f": nrm(ks[1], (3, H, H)), "w_hh_f": nrm(ks[2], (3, H, H)),
        "b_ih_f": nrm(ks[3], (3, 1, H)), "b_hh_f": nrm(ks[4], (3, 1, H)),
        "w_ih_b": nrm(ks[5], (3, H, H)), "w_hh_b": nrm(ks[6], (3, H, H)),
        "b_ih_b": nrm(ks[7], (3, 1, H)), "b_hh_b": nrm(ks[8], (3, 1, H)),
        "w_ih_d": nrm(ks[9], (3, H, H)), "w_hh_d": nrm(ks[10], (3, H, H)),
        "b_ih_d": nrm(ks[11], (3, 1, H)), "b_hh_d": nrm(ks[12], (3, 1, H)),
        # concat Linear (2H -> H) stored split: [h | context] halves.
        "w_c_h": nrm(ks[13], (H, H)), "w_c_ctx": nrm(ks[14], (H, H)),
        "b_c": jnp.zeros((1, H), jnp.float32),
        # out Linear (H -> V), pre-transposed.
        "w_o": nrm(ks[15], (H, V)), "b_o": jnp.zeros((1, V), jnp.float32),
    }


if __name__ == "__main__":
    HIDDEN = 32
    VOCAB = 64
    SEQ_LEN = 8
    MAX_LENGTH = 8

    key = jax.random.PRNGKey(0)
    k_params, k_inp = jax.random.split(key)
    params = make_params(k_params, VOCAB, HIDDEN)

    input_seq = jax.random.randint(k_inp, (SEQ_LEN,), 0, VOCAB, dtype=jnp.int32)
    input_length = jnp.array([SEQ_LEN], dtype=jnp.int32)

    all_tokens, all_scores = greedy_search_decode(
        input_seq, input_length, MAX_LENGTH, params)
    jax.block_until_ready((all_tokens, all_scores))

    assert all_tokens.shape == (MAX_LENGTH,) and all_tokens.dtype == jnp.int32
    assert all_scores.shape == (MAX_LENGTH,) and all_scores.dtype == jnp.float32
    print("KERNEL_OK")
</pallas_src>

<mosaic_0001>
module attributes {stable_mosaic.version = 11 : i64} {
  func.func @greedy_kernel(%arg0: memref<8x32xf32, #tpu.memory_space<vmem>>, %arg1: memref<64x32xf32, #tpu.memory_space<vmem>>, %arg2: memref<3x32x32xf32, #tpu.memory_space<vmem>>, %arg3: memref<3x32x32xf32, #tpu.memory_space<vmem>>, %arg4: memref<3x1x32xf32, #tpu.memory_space<vmem>>, %arg5: memref<3x1x32xf32, #tpu.memory_space<vmem>>, %arg6: memref<3x32x32xf32, #tpu.memory_space<vmem>>, %arg7: memref<3x32x32xf32, #tpu.memory_space<vmem>>, %arg8: memref<3x1x32xf32, #tpu.memory_space<vmem>>, %arg9: memref<3x1x32xf32, #tpu.memory_space<vmem>>, %arg10: memref<3x32x32xf32, #tpu.memory_space<vmem>>, %arg11: memref<3x32x32xf32, #tpu.memory_space<vmem>>, %arg12: memref<3x1x32xf32, #tpu.memory_space<vmem>>, %arg13: memref<3x1x32xf32, #tpu.memory_space<vmem>>, %arg14: memref<32x32xf32, #tpu.memory_space<vmem>>, %arg15: memref<32x32xf32, #tpu.memory_space<vmem>>, %arg16: memref<1x32xf32, #tpu.memory_space<vmem>>, %arg17: memref<32x64xf32, #tpu.memory_space<vmem>>, %arg18: memref<1x64xf32, #tpu.memory_space<vmem>>, %arg19: memref<1x8xi32, #tpu.memory_space<vmem>>, %arg20: memref<1x8xf32, #tpu.memory_space<vmem>>) attributes {dimension_semantics = [], scalar_prefetch = 0 : i64, scratch_operands = 0 : i64, tpu.core_type = #tpu.core_type<tc>} {
    %c0 = arith.constant 0 : index
    %c0_0 = arith.constant 0 : index
    %0 = vector.load %arg0[%c0, %c0_0] : memref<8x32xf32, #tpu.memory_space<vmem>>, vector<8x32xf32>
    %c0_1 = arith.constant 0 : index
    %c0_2 = arith.constant 0 : index
    %1 = vector.load %arg1[%c0_1, %c0_2] : memref<64x32xf32, #tpu.memory_space<vmem>>, vector<64x32xf32>
    %c0_3 = arith.constant 0 : index
    %c0_4 = arith.constant 0 : index
    %c0_5 = arith.constant 0 : index
    %2 = vector.load %arg2[%c0_3, %c0_4, %c0_5] : memref<3x32x32xf32, #tpu.memory_space<vmem>>, vector<1x32x32xf32>
    %3 = vector.shape_cast %2 : vector<1x32x32xf32> to vector<32x32xf32>
    %c1 = arith.constant 1 : index
    %c0_6 = arith.constant 0 : index
    %c0_7 = arith.constant 0 : index
    %4 = vector.load %arg2[%c1, %c0_6, %c0_7] : memref<3x32x32xf32, #tpu.memory_space<vmem>>, vector<1x32x32xf32>
    %5 = vector.shape_cast %4 : vector<1x32x32xf32> to vector<32x32xf32>
    %c2 = arith.constant 2 : index
    %c0_8 = arith.constant 0 : index
    %c0_9 = arith.constant 0 : index
    %6 = vector.load %arg2[%c2, %c0_8, %c0_9] : memref<3x32x32xf32, #tpu.memory_space<vmem>>, vector<1x32x32xf32>
    %7 = vector.shape_cast %6 : vector<1x32x32xf32> to vector<32x32xf32>
    %c0_10 = arith.constant 0 : index
    %c0_11 = arith.constant 0 : index
    %c0_12 = arith.constant 0 : index
    %8 = vector.load %arg3[%c0_10, %c0_11, %c0_12] : memref<3x32x32xf32, #tpu.memory_space<vmem>>, vector<1x32x32xf32>
    %9 = vector.shape_cast %8 : vector<1x32x32xf32> to vector<32x32xf32>
    %c1_13 = arith.constant 1 : index
    %c0_14 = arith.constant 0 : index
    %c0_15 = arith.constant 0 : index
    %10 = vector.load %arg3[%c1_13, %c0_14, %c0_15] : memref<3x32x32xf32, #tpu.memory_space<vmem>>, vector<1x32x32xf32>
    %11 = vector.shape_cast %10 : vector<1x32x32xf32> to vector<32x32xf32>
    %c2_16 = arith.constant 2 : index
    %c0_17 = arith.constant 0 : index
    %c0_18 = arith.constant 0 : index
    %12 = vector.load %arg3[%c2_16, %c0_17, %c0_18] : memref<3x32x32xf32, #tpu.memory_space<vmem>>, vector<1x32x32xf32>
    %13 = vector.shape_cast %12 : vector<1x32x32xf32> to vector<32x32xf32>
    %c0_19 = arith.constant 0 : index
    %c0_20 = arith.constant 0 : index
    %c0_21 = arith.constant 0 : index
    %14 = vector.load %arg4[%c0_19, %c0_20, %c0_21] : memref<3x1x32xf32, #tpu.memory_space<vmem>>, vector<1x1x32xf32>
    %15 = vector.shape_cast %14 : vector<1x1x32xf32> to vector<1x32xf32>
    %c1_22 = arith.constant 1 : index
    %c0_23 = arith.constant 0 : index
    %c0_24 = arith.constant 0 : index
    %16 = vector.load %arg4[%c1_22, %c0_23, %c0_24] : memref<3x1x32xf32, #tpu.memory_space<vmem>>, vector<1x1x32xf32>
    %17 = vector.shape_cast %16 : vector<1x1x32xf32> to vector<1x32xf32>
    %c2_25 = arith.constant 2 : index
    %c0_26 = arith.constant 0 : index
    %c0_27 = arith.constant 0 : index
    %18 = vector.load %arg4[%c2_25, %c0_26, %c0_27] : memref<3x1x32xf32, #tpu.memory_space<vmem>>, vector<1x1x32xf32>
    %19 = vector.shape_cast %18 : vector<1x1x32xf32> to vector<1x32xf32>
    %c0_28 = arith.constant 0 : index
    %c0_29 = arith.constant 0 : index
    %c0_30 = arith.constant 0 : index
    %20 = vector.load %arg5[%c0_28, %c0_29, %c0_30] : memref<3x1x32xf32, #tpu.memory_space<vmem>>, vector<1x1x32xf32>
    %21 = vector.shape_cast %20 : vector<1x1x32xf32> to vector<1x32xf32>
    %c1_31 = arith.constant 1 : index
    %c0_32 = arith.constant 0 : index
    %c0_33 = arith.constant 0 : index
    %22 = vector.load %arg5[%c1_31, %c0_32, %c0_33] : memref<3x1x32xf32, #tpu.memory_space<vmem>>, vector<1x1x32xf32>
    %23 = vector.shape_cast %22 : vector<1x1x32xf32> to vector<1x32xf32>
    %c2_34 = arith.constant 2 : index
    %c0_35 = arith.constant 0 : index
    %c0_36 = arith.constant 0 : index
    %24 = vector.load %arg5[%c2_34, %c0_35, %c0_36] : memref<3x1x32xf32, #tpu.memory_space<vmem>>, vector<1x1x32xf32>
    %25 = vector.shape_cast %24 : vector<1x1x32xf32> to vector<1x32xf32>
    %c0_37 = arith.constant 0 : index
    %c0_38 = arith.constant 0 : index
    %c0_39 = arith.constant 0 : index
    %26 = vector.load %arg6[%c0_37, %c0_38, %c0_39] : memref<3x32x32xf32, #tpu.memory_space<vmem>>, vector<1x32x32xf32>
    %27 = vector.shape_cast %26 : vector<1x32x32xf32> to vector<32x32xf32>
    %c1_40 = arith.constant 1 : index
    %c0_41 = arith.constant 0 : index
    %c0_42 = arith.constant 0 : index
    %28 = vector.load %arg6[%c1_40, %c0_41, %c0_42] : memref<3x32x32xf32, #tpu.memory_space<vmem>>, vector<1x32x32xf32>
    %29 = vector.shape_cast %28 : vector<1x32x32xf32> to vector<32x32xf32>
    %c2_43 = arith.constant 2 : index
    %c0_44 = arith.constant 0 : index
    %c0_45 = arith.constant 0 : index
    %30 = vector.load %arg6[%c2_43, %c0_44, %c0_45] : memref<3x32x32xf32, #tpu.memory_space<vmem>>, vector<1x32x32xf32>
    %31 = vector.shape_cast %30 : vector<1x32x32xf32> to vector<32x32xf32>
    %c0_46 = arith.constant 0 : index
    %c0_47 = arith.constant 0 : index
    %c0_48 = arith.constant 0 : index
    %32 = vector.load %arg7[%c0_46, %c0_47, %c0_48] : memref<3x32x32xf32, #tpu.memory_space<vmem>>, vector<1x32x32xf32>
    %33 = vector.shape_cast %32 : vector<1x32x32xf32> to vector<32x32xf32>
    %c1_49 = arith.constant 1 : index
    %c0_50 = arith.constant 0 : index
    %c0_51 = arith.constant 0 : index
    %34 = vector.load %arg7[%c1_49, %c0_50, %c0_51] : memref<3x32x32xf32, #tpu.memory_space<vmem>>, vector<1x32x32xf32>
    %35 = vector.shape_cast %34 : vector<1x32x32xf32> to vector<32x32xf32>
    %c2_52 = arith.constant 2 : index
    %c0_53 = arith.constant 0 : index
    %c0_54 = arith.constant 0 : index
    %36 = vector.load %arg7[%c2_52, %c0_53, %c0_54] : memref<3x32x32xf32, #tpu.memory_space<vmem>>, vector<1x32x32xf32>
    %37 = vector.shape_cast %36 : vector<1x32x32xf32> to vector<32x32xf32>
    %c0_55 = arith.constant 0 : index
    %c0_56 = arith.constant 0 : index
    %c0_57 = arith.constant 0 : index
    %38 = vector.load %arg8[%c0_55, %c0_56, %c0_57] : memref<3x1x32xf32, #tpu.memory_space<vmem>>, vector<1x1x32xf32>
    %39 = vector.shape_cast %38 : vector<1x1x32xf32> to vector<1x32xf32>
    %c1_58 = arith.constant 1 : index
    %c0_59 = arith.constant 0 : index
    %c0_60 = arith.constant 0 : index
    %40 = vector.load %arg8[%c1_58, %c0_59, %c0_60] : memref<3x1x32xf32, #tpu.memory_space<vmem>>, vector<1x1x32xf32>
    %41 = vector.shape_cast %40 : vector<1x1x32xf32> to vector<1x32xf32>
    %c2_61 = arith.constant 2 : index
    %c0_62 = arith.constant 0 : index
    %c0_63 = arith.constant 0 : index
    %42 = vector.load %arg8[%c2_61, %c0_62, %c0_63] : memref<3x1x32xf32, #tpu.memory_space<vmem>>, vector<1x1x32xf32>
    %43 = vector.shape_cast %42 : vector<1x1x32xf32> to vector<1x32xf32>
    %c0_64 = arith.constant 0 : index
    %c0_65 = arith.constant 0 : index
    %c0_66 = arith.constant 0 : index
    %44 = vector.load %arg9[%c0_64, %c0_65, %c0_66] : memref<3x1x32xf32, #tpu.memory_space<vmem>>, vector<1x1x32xf32>
    %45 = vector.shape_cast %44 : vector<1x1x32xf32> to vector<1x32xf32>
    %c1_67 = arith.constant 1 : index
    %c0_68 = arith.constant 0 : index
    %c0_69 = arith.constant 0 : index
    %46 = vector.load %arg9[%c1_67, %c0_68, %c0_69] : memref<3x1x32xf32, #tpu.memory_space<vmem>>, vector<1x1x32xf32>
    %47 = vector.shape_cast %46 : vector<1x1x32xf32> to vector<1x32xf32>
    %c2_70 = arith.constant 2 : index
    %c0_71 = arith.constant 0 : index
    %c0_72 = arith.constant 0 : index
    %48 = vector.load %arg9[%c2_70, %c0_71, %c0_72] : memref<3x1x32xf32, #tpu.memory_space<vmem>>, vector<1x1x32xf32>
    %49 = vector.shape_cast %48 : vector<1x1x32xf32> to vector<1x32xf32>
    %c0_73 = arith.constant 0 : index
    %c0_74 = arith.constant 0 : index
    %c0_75 = arith.constant 0 : index
    %50 = vector.load %arg10[%c0_73, %c0_74, %c0_75] : memref<3x32x32xf32, #tpu.memory_space<vmem>>, vector<1x32x32xf32>
    %51 = vector.shape_cast %50 : vector<1x32x32xf32> to vector<32x32xf32>
    %c1_76 = arith.constant 1 : index
    %c0_77 = arith.constant 0 : index
    %c0_78 = arith.constant 0 : index
    %52 = vector.load %arg10[%c1_76, %c0_77, %c0_78] : memref<3x32x32xf32, #tpu.memory_space<vmem>>, vector<1x32x32xf32>
    %53 = vector.shape_cast %52 : vector<1x32x32xf32> to vector<32x32xf32>
    %c2_79 = arith.constant 2 : index
    %c0_80 = arith.constant 0 : index
    %c0_81 = arith.constant 0 : index
    %54 = vector.load %arg10[%c2_79, %c0_80, %c0_81] : memref<3x32x32xf32, #tpu.memory_space<vmem>>, vector<1x32x32xf32>
    %55 = vector.shape_cast %54 : vector<1x32x32xf32> to vector<32x32xf32>
    %c0_82 = arith.constant 0 : index
    %c0_83 = arith.constant 0 : index
    %c0_84 = arith.constant 0 : index
    %56 = vector.load %arg11[%c0_82, %c0_83, %c0_84] : memref<3x32x32xf32, #tpu.memory_space<vmem>>, vector<1x32x32xf32>
    %57 = vector.shape_cast %56 : vector<1x32x32xf32> to vector<32x32xf32>
    %c1_85 = arith.constant 1 : index
    %c0_86 = arith.constant 0 : index
    %c0_87 = arith.constant 0 : index
    %58 = vector.load %arg11[%c1_85, %c0_86, %c0_87] : memref<3x32x32xf32, #tpu.memory_space<vmem>>, vector<1x32x32xf32>
    %59 = vector.shape_cast %58 : vector<1x32x32xf32> to vector<32x32xf32>
    %c2_88 = arith.constant 2 : index
    %c0_89 = arith.constant 0 : index
    %c0_90 = arith.constant 0 : index
    %60 = vector.load %arg11[%c2_88, %c0_89, %c0_90] : memref<3x32x32xf32, #tpu.memory_space<vmem>>, vector<1x32x32xf32>
    %61 = vector.shape_cast %60 : vector<1x32x32xf32> to vector<32x32xf32>
    %c0_91 = arith.constant 0 : index
    %c0_92 = arith.constant 0 : index
    %c0_93 = arith.constant 0 : index
    %62 = vector.load %arg12[%c0_91, %c0_92, %c0_93] : memref<3x1x32xf32, #tpu.memory_space<vmem>>, vector<1x1x32xf32>
    %63 = vector.shape_cast %62 : vector<1x1x32xf32> to vector<1x32xf32>
    %c1_94 = arith.constant 1 : index
    %c0_95 = arith.constant 0 : index
    %c0_96 = arith.constant 0 : index
    %64 = vector.load %arg12[%c1_94, %c0_95, %c0_96] : memref<3x1x32xf32, #tpu.memory_space<vmem>>, vector<1x1x32xf32>
    %65 = vector.shape_cast %64 : vector<1x1x32xf32> to vector<1x32xf32>
    %c2_97 = arith.constant 2 : index
    %c0_98 = arith.constant 0 : index
    %c0_99 = arith.constant 0 : index
    %66 = vector.load %arg12[%c2_97, %c0_98, %c0_99] : memref<3x1x32xf32, #tpu.memory_space<vmem>>, vector<1x1x32xf32>
    %67 = vector.shape_cast %66 : vector<1x1x32xf32> to vector<1x32xf32>
    %c0_100 = arith.constant 0 : index
    %c0_101 = arith.constant 0 : index
    %c0_102 = arith.constant 0 : index
    %68 = vector.load %arg13[%c0_100, %c0_101, %c0_102] : memref<3x1x32xf32, #tpu.memory_space<vmem>>, vector<1x1x32xf32>
    %69 = vector.shape_cast %68 : vector<1x1x32xf32> to vector<1x32xf32>
    %c1_103 = arith.constant 1 : index
    %c0_104 = arith.constant 0 : index
    %c0_105 = arith.constant 0 : index
    %70 = vector.load %arg13[%c1_103, %c0_104, %c0_105] : memref<3x1x32xf32, #tpu.memory_space<vmem>>, vector<1x1x32xf32>
    %71 = vector.shape_cast %70 : vector<1x1x32xf32> to vector<1x32xf32>
    %c2_106 = arith.constant 2 : index
    %c0_107 = arith.constant 0 : index
    %c0_108 = arith.constant 0 : index
    %72 = vector.load %arg13[%c2_106, %c0_107, %c0_108] : memref<3x1x32xf32, #tpu.memory_space<vmem>>, vector<1x1x32xf32>
    %73 = vector.shape_cast %72 : vector<1x1x32xf32> to vector<1x32xf32>
    %c0_109 = arith.constant 0 : index
    %c0_110 = arith.constant 0 : index
    %74 = vector.load %arg14[%c0_109, %c0_110] : memref<32x32xf32, #tpu.memory_space<vmem>>, vector<32x32xf32>
    %c0_111 = arith.constant 0 : index
    %c0_112 = arith.constant 0 : index
    %75 = vector.load %arg15[%c0_111, %c0_112] : memref<32x32xf32, #tpu.memory_space<vmem>>, vector<32x32xf32>
    %c0_113 = arith.constant 0 : index
    %c0_114 = arith.constant 0 : index
    %76 = vector.load %arg16[%c0_113, %c0_114] : memref<1x32xf32, #tpu.memory_space<vmem>>, vector<1x32xf32>
    %c0_115 = arith.constant 0 : index
    %c0_116 = arith.constant 0 : index
    %77 = vector.load %arg17[%c0_115, %c0_116] : memref<32x64xf32, #tpu.memory_space<vmem>>, vector<32x64xf32>
    %c0_117 = arith.constant 0 : index
    %c0_118 = arith.constant 0 : index
    %78 = vector.load %arg18[%c0_117, %c0_118] : memref<1x64xf32, #tpu.memory_space<vmem>>, vector<1x64xf32>
    %cst = arith.constant dense<0.000000e+00> : vector<8x32xf32>
    %79 = tpu.matmul %0, %3, %cst {dimension_numbers = #tpu.dot_dimension_numbers<[1], [0], [0], [1], [0, 0, 1, 1], [], []>} : vector<8x32xf32>, vector<32x32xf32>, vector<8x32xf32> -> vector<8x32xf32>
    %80 = vector.broadcast %15 : vector<1x32xf32> to vector<8x32xf32>
    %81 = arith.addf %79, %80 : vector<8x32xf32>
    %cst_119 = arith.constant dense<0.000000e+00> : vector<8x32xf32>
    %82 = tpu.matmul %0, %5, %cst_119 {dimension_numbers = #tpu.dot_dimension_numbers<[1], [0], [0], [1], [0, 0, 1, 1], [], []>} : vector<8x32xf32>, vector<32x32xf32>, vector<8x32xf32> -> vector<8x32xf32>
    %83 = vector.broadcast %17 : vector<1x32xf32> to vector<8x32xf32>
    %84 = arith.addf %82, %83 : vector<8x32xf32>
    %cst_120 = arith.constant dense<0.000000e+00> : vector<8x32xf32>
    %85 = tpu.matmul %0, %7, %cst_120 {dimension_numbers = #tpu.dot_dimension_numbers<[1], [0], [0], [1], [0, 0, 1, 1], [], []>} : vector<8x32xf32>, vector<32x32xf32>, vector<8x32xf32> -> vector<8x32xf32>
    %86 = vector.broadcast %19 : vector<1x32xf32> to vector<8x32xf32>
    %87 = arith.addf %85, %86 : vector<8x32xf32>
    %cst_121 = arith.constant dense<0.000000e+00> : vector<8x32xf32>
    %88 = tpu.matmul %0, %27, %cst_121 {dimension_numbers = #tpu.dot_dimension_numbers<[1], [0], [0], [1], [0, 0, 1, 1], [], []>} : vector<8x32xf32>, vector<32x32xf32>, vector<8x32xf32> -> vector<8x32xf32>
    %89 = vector.broadcast %39 : vector<1x32xf32> to vector<8x32xf32>
    %90 = arith.addf %88, %89 : vector<8x32xf32>
    %cst_122 = arith.constant dense<0.000000e+00> : vector<8x32xf32>
    %91 = tpu.matmul %0, %29, %cst_122 {dimension_numbers = #tpu.dot_dimension_numbers<[1], [0], [0], [1], [0, 0, 1, 1], [], []>} : vector<8x32xf32>, vector<32x32xf32>, vector<8x32xf32> -> vector<8x32xf32>
    %92 = vector.broadcast %41 : vector<1x32xf32> to vector<8x32xf32>
    %93 = arith.addf %91, %92 : vector<8x32xf32>
    %cst_123 = arith.constant dense<0.000000e+00> : vector<8x32xf32>
    %94 = tpu.matmul %0, %31, %cst_123 {dimension_numbers = #tpu.dot_dimension_numbers<[1], [0], [0], [1], [0, 0, 1, 1], [], []>} : vector<8x32xf32>, vector<32x32xf32>, vector<8x32xf32> -> vector<8x32xf32>
    %95 = vector.broadcast %43 : vector<1x32xf32> to vector<8x32xf32>
    %96 = arith.addf %94, %95 : vector<8x32xf32>
    %cst_124 = arith.constant 0.000000e+00 : f32
    %97 = vector.broadcast %cst_124 : f32 to vector<1x32xf32>
    %cst_125 = arith.constant 0.000000e+00 : f32
    %98 = vector.broadcast %cst_125 : f32 to vector<1x32xf32>
    %99 = vector.extract_strided_slice %81 {offsets = [0, 0], sizes = [1, 32], strides = [1, 1]} : vector<8x32xf32> to vector<1x32xf32>
    %100 = vector.extract_strided_slice %84 {offsets = [0, 0], sizes = [1, 32], strides = [1, 1]} : vector<8x32xf32> to vector<1x32xf32>
    %101 = vector.extract_strided_slice %87 {offsets = [0, 0], sizes = [1, 32], strides = [1, 1]} : vector<8x32xf32> to vector<1x32xf32>
    %cst_126 = arith.constant dense<0.000000e+00> : vector<1x32xf32>
    %102 = tpu.matmul %97, %9, %cst_126 {dimension_numbers = #tpu.dot_dimension_numbers<[1], [0], [0], [1], [0, 0, 1, 1], [], []>} : vector<1x32xf32>, vector<32x32xf32>, vector<1x32xf32> -> vector<1x32xf32>
    %103 = arith.addf %102, %21 : vector<1x32xf32>
    %cst_127 = arith.constant dense<0.000000e+00> : vector<1x32xf32>
    %104 = tpu.matmul %97, %11, %cst_127 {dimension_numbers = #tpu.dot_dimension_numbers<[1], [0], [0], [1], [0, 0, 1, 1], [], []>} : vector<1x32xf32>, vector<32x32xf32>, vector<1x32xf32> -> vector<1x32xf32>
    %105 = arith.addf %104, %23 : vector<1x32xf32>
    %cst_128 = arith.constant dense<0.000000e+00> : vector<1x32xf32>
    %106 = tpu.matmul %97, %13, %cst_128 {dimension_numbers = #tpu.dot_dimension_numbers<[1], [0], [0], [1], [0, 0, 1, 1], [], []>} : vector<1x32xf32>, vector<32x32xf32>, vector<1x32xf32> -> vector<1x32xf32>
    %107 = arith.addf %106, %25 : vector<1x32xf32>
    %108 = arith.addf %99, %103 : vector<1x32xf32>
    %109 = arith.negf %108 : vector<1x32xf32>
    %110 = math.exp %109 : vector<1x32xf32>
    %cst_129 = arith.constant 1.000000e+00 : f32
    %111 = vector.broadcast %cst_129 : f32 to vector<1x32xf32>
    %112 = arith.addf %111, %110 : vector<1x32xf32>
    %113 = arith.divf %111, %112 : vector<1x32xf32>
    %114 = arith.addf %100, %105 : vector<1x32xf32>
    %115 = arith.negf %114 : vector<1x32xf32>
    %116 = math.exp %115 : vector<1x32xf32>
    %cst_130 = arith.constant 1.000000e+00 : f32
    %117 = vector.broadcast %cst_130 : f32 to vector<1x32xf32>
    %118 = arith.addf %117, %116 : vector<1x32xf32>
    %119 = arith.divf %117, %118 : vector<1x32xf32>
    %120 = arith.mulf %113, %107 : vector<1x32xf32>
    %121 = arith.addf %101, %120 : vector<1x32xf32>
    %122 = math.tanh %121 : vector<1x32xf32>
    %cst_131 = arith.constant 1.000000e+00 : f32
    %123 = vector.broadcast %cst_131 : f32 to vector<1x32xf32>
    %124 = arith.subf %123, %119 : vector<1x32xf32>
    %125 = arith.mulf %124, %122 : vector<1x32xf32>
    %126 = arith.mulf %119, %97 : vector<1x32xf32>
    %127 = arith.addf %125, %126 : vector<1x32xf32>
    %128 = vector.extract_strided_slice %90 {offsets = [7, 0], sizes = [1, 32], strides = [1, 1]} : vector<8x32xf32> to vector<1x32xf32>
    %129 = vector.extract_strided_slice %93 {offsets = [7, 0], sizes = [1, 32], strides = [1, 1]} : vector<8x32xf32> to vector<1x32xf32>
    %130 = vector.extract_strided_slice %96 {offsets = [7, 0], sizes = [1, 32], strides = [1, 1]} : vector<8x32xf32> to vector<1x32xf32>
    %cst_132 = arith.constant dense<0.000000e+00> : vector<1x32xf32>
    %131 = tpu.matmul %98, %33, %cst_132 {dimension_numbers = #tpu.dot_dimension_numbers<[1], [0], [0], [1], [0, 0, 1, 1], [], []>} : vector<1x32xf32>, vector<32x32xf32>, vector<1x32xf32> -> vector<1x32xf32>
    %132 = arith.addf %131, %45 : vector<1x32xf32>
    %cst_133 = arith.constant dense<0.000000e+00> : vector<1x32xf32>
    %133 = tpu.matmul %98, %35, %cst_133 {dimension_numbers = #tpu.dot_dimension_numbers<[1], [0], [0], [1], [0, 0, 1, 1], [], []>} : vector<1x32xf32>, vector<32x32xf32>, vector<1x32xf32> -> vector<1x32xf32>
    %134 = arith.addf %133, %47 : vector<1x32xf32>
    %cst_134 = arith.constant dense<0.000000e+00> : vector<1x32xf32>
    %135 = tpu.matmul %98, %37, %cst_134 {dimension_numbers = #tpu.dot_dimension_numbers<[1], [0], [0], [1], [0, 0, 1, 1], [], []>} : vector<1x32xf32>, vector<32x32xf32>, vector<1x32xf32> -> vector<1x32xf32>
    %136 = arith.addf %135, %49 : vector<1x32xf32>
    %137 = arith.addf %128, %132 : vector<1x32xf32>
    %138 = arith.negf %137 : vector<1x32xf32>
    %139 = math.exp %138 : vector<1x32xf32>
    %cst_135 = arith.constant 1.000000e+00 : f32
    %140 = vector.broadcast %cst_135 : f32 to vector<1x32xf32>
    %141 = arith.addf %140, %139 : vector<1x32xf32>
    %142 = arith.divf %140, %141 : vector<1x32xf32>
    %143 = arith.addf %129, %134 : vector<1x32xf32>
    %144 = arith.negf %143 : vector<1x32xf32>
    %145 = math.exp %144 : vector<1x32xf32>
    %cst_136 = arith.constant 1.000000e+00 : f32
    %146 = vector.broadcast %cst_136 : f32 to vector<1x32xf32>
    %147 = arith.addf %146, %145 : vector<1x32xf32>
    %148 = arith.divf %146, %147 : vector<1x32xf32>
    %149 = arith.mulf %142, %136 : vector<1x32xf32>
    %150 = arith.addf %130, %149 : vector<1x32xf32>
    %151 = math.tanh %150 : vector<1x32xf32>
    %cst_137 = arith.constant 1.000000e+00 : f32
    %152 = vector.broadcast %cst_137 : f32 to vector<1x32xf32>
    %153 = arith.subf %152, %148 : vector<1x32xf32>
    %154 = arith.mulf %153, %151 : vector<1x32xf32>
    %155 = arith.mulf %148, %98 : vector<1x32xf32>
    %156 = arith.addf %154, %155 : vector<1x32xf32>
    %157 = vector.extract_strided_slice %81 {offsets = [1, 0], sizes = [1, 32], strides = [1, 1]} : vector<8x32xf32> to vector<1x32xf32>
    %158 = vector.extract_strided_slice %84 {offsets = [1, 0], sizes = [1, 32], strides = [1, 1]} : vector<8x32xf32> to vector<1x32xf32>
    %159 = vector.extract_strided_slice %87 {offsets = [1, 0], sizes = [1, 32], strides = [1, 1]} : vector<8x32xf32> to vector<1x32xf32>
    %cst_138 = arith.constant dense<0.000000e+00> : vector<1x32xf32>
    %160 = tpu.matmul %127, %9, %cst_138 {dimension_numbers = #tpu.dot_dimension_numbers<[1], [0], [0], [1], [0, 0, 1, 1], [], []>} : vector<1x32xf32>, vector<32x32xf32>, vector<1x32xf32> -> vector<1x32xf32>
    %161 = arith.addf %160, %21 : vector<1x32xf32>
    %cst_139 = arith.constant dense<0.000000e+00> : vector<1x32xf32>
    %162 = tpu.matmul %127, %11, %cst_139 {dimension_numbers = #tpu.dot_dimension_numbers<[1], [0], [0], [1], [0, 0, 1, 1], [], []>} : vector<1x32xf32>, vector<32x32xf32>, vector<1x32xf32> -> vector<1x32xf32>
    %163 = arith.addf %162, %23 : vector<1x32xf32>
    %cst_140 = arith.constant dense<0.000000e+00> : vector<1x32xf32>
    %164 = tpu.matmul %127, %13, %cst_140 {dimension_numbers = #tpu.dot_dimension_numbers<[1], [0], [0], [1], [0, 0, 1, 1], [], []>} : vector<1x32xf32>, vector<32x32xf32>, vector<1x32xf32> -> vector<1x32xf32>
    %165 = arith.addf %164, %25 : vector<1x32xf32>
    %166 = arith.addf %157, %161 : vector<1x32xf32>
    %167 = arith.negf %166 : vector<1x32xf32>
    %168 = math.exp %167 : vector<1x32xf32>
    %cst_141 = arith.constant 1.000000e+00 : f32
    %169 = vector.broadcast %cst_141 : f32 to vector<1x32xf32>
    %170 = arith.addf %169, %168 : vector<1x32xf32>
    %171 = arith.divf %169, %170 : vector<1x32xf32>
    %172 = arith.addf %158, %163 : vector<1x32xf32>
    %173 = arith.negf %172 : vector<1x32xf32>
    %174 = math.exp %173 : vector<1x32xf32>
    %cst_142 = arith.constant 1.000000e+00 : f32
    %175 = vector.broadcast %cst_142 : f32 to vector<1x32xf32>
    %176 = arith.addf %175, %174 : vector<1x32xf32>
    %177 = arith.divf %175, %176 : vector<1x32xf32>
    %178 = arith.mulf %171, %165 : vector<1x32xf32>
    %179 = arith.addf %159, %178 : vector<1x32xf32>
    %180 = math.tanh %179 : vector<1x32xf32>
    %cst_143 = arith.constant 1.000000e+00 : f32
    %181 = vector.broadcast %cst_143 : f32 to vector<1x32xf32>
    %182 = arith.subf %181, %177 : vector<1x32xf32>
    %183 = arith.mulf %182, %180 : vector<1x32xf32>
    %184 = arith.mulf %177, %127 : vector<1x32xf32>
    %185 = arith.addf %183, %184 : vector<1x32xf32>
    %186 = vector.extract_strided_slice %90 {offsets = [6, 0], sizes = [1, 32], strides = [1, 1]} : vector<8x32xf32> to vector<1x32xf32>
    %187 = vector.extract_strided_slice %93 {offsets = [6, 0], sizes = [1, 32], strides = [1, 1]} : vector<8x32xf32> to vector<1x32xf32>
    %188 = vector.extract_strided_slice %96 {offsets = [6, 0], sizes = [1, 32], strides = [1, 1]} : vector<8x32xf32> to vector<1x32xf32>
    %cst_144 = arith.constant dense<0.000000e+00> : vector<1x32xf32>
    %189 = tpu.matmul %156, %33, %cst_144 {dimension_numbers = #tpu.dot_dimension_numbers<[1], [0], [0], [1], [0, 0, 1, 1], [], []>} : vector<1x32xf32>, vector<32x32xf32>, vector<1x32xf32> -> vector<1x32xf32>
    %190 = arith.addf %189, %45 : vector<1x32xf32>
    %cst_145 = arith.constant dense<0.000000e+00> : vector<1x32xf32>
    %191 = tpu.matmul %156, %35, %cst_145 {dimension_numbers = #tpu.dot_dimension_numbers<[1], [0], [0], [1], [0, 0, 1, 1], [], []>} : vector<1x32xf32>, vector<32x32xf32>, vector<1x32xf32> -> vector<1x32xf32>
    %192 = arith.addf %191, %47 : vector<1x32xf32>
    %cst_146 = arith.constant dense<0.000000e+00> : vector<1x32xf32>
    %193 = tpu.matmul %156, %37, %cst_146 {dimension_numbers = #tpu.dot_dimension_numbers<[1], [0], [0], [1], [0, 0, 1, 1], [], []>} : vector<1x32xf32>, vector<32x32xf32>, vector<1x32xf32> -> vector<1x32xf32>
    %194 = arith.addf %193, %49 : vector<1x32xf32>
    %195 = arith.addf %186, %190 : vector<1x32xf32>
    %196 = arith.negf %195 : vector<1x32xf32>
    %197 = math.exp %196 : vector<1x32xf32>
    %cst_147 = arith.constant 1.000000e+00 : f32
    %198 = vector.broadcast %cst_147 : f32 to vector<1x32xf32>
    %199 = arith.addf %198, %197 : vector<1x32xf32>
    %200 = arith.divf %198, %199 : vector<1x32xf32>
    %201 = arith.addf %187, %192 : vector<1x32xf32>
    %202 = arith.negf %201 : vector<1x32xf32>
    %203 = math.exp %202 : vector<1x32xf32>
    %cst_148 = arith.constant 1.000000e+00 : f32
    %204 = vector.broadcast %cst_148 : f32 to vector<1x32xf32>
    %205 = arith.addf %204, %203 : vector<1x32xf32>
    %206 = arith.divf %204, %205 : vector<1x32xf32>
    %207 = arith.mulf %200, %194 : vector<1x32xf32>
    %208 = arith.addf %188, %207 : vector<1x32xf32>
    %209 = math.tanh %208 : vector<1x32xf32>
    %cst_149 = arith.constant 1.000000e+00 : f32
    %210 = vector.broadcast %cst_149 : f32 to vector<1x32xf32>
    %211 = arith.subf %210, %206 : vector<1x32xf32>
    %212 = arith.mulf %211, %209 : vector<1x32xf32>
    %213 = arith.mulf %206, %156 : vector<1x32xf32>
    %214 = arith.addf %212, %213 : vector<1x32xf32>
    %215 = vector.extract_strided_slice %81 {offsets = [2, 0], sizes = [1, 32], strides = [1, 1]} : vector<8x32xf32> to vector<1x32xf32>
    %216 = vector.extract_strided_slice %84 {offsets = [2, 0], sizes = [1, 32], strides = [1, 1]} : vector<8x32xf32> to vector<1x32xf32>
    %217 = vector.extract_strided_slice %87 {offsets = [2, 0], sizes = [1, 32], strides = [1, 1]} : vector<8x32xf32> to vector<1x32xf32>
    %cst_150 = arith.constant dense<0.000000e+00> : vector<1x32xf32>
    %218 = tpu.matmul %185, %9, %cst_150 {dimension_numbers = #tpu.dot_dimension_numbers<[1], [0], [0], [1], [0, 0, 1, 1], [], []>} : vector<1x32xf32>, vector<32x32xf32>, vector<1x32xf32> -> vector<1x32xf32>
    %219 = arith.addf %218, %21 : vector<1x32xf32>
    %cst_151 = arith.constant dense<0.000000e+00> : vector<1x32xf32>
    %220 = tpu.matmul %185, %11, %cst_151 {dimension_numbers = #tpu.dot_dimension_numbers<[1], [0], [0], [1], [0, 0, 1, 1], [], []>} : vector<1x32xf32>, vector<32x32xf32>, vector<1x32xf32> -> vector<1x32xf32>
    %221 = arith.addf %220, %23 : vector<1x32xf32>
    %cst_152 = arith.constant dense<0.000000e+00> : vector<1x32xf32>
    %222 = tpu.matmul %185, %13, %cst_152 {dimension_numbers = #tpu.dot_dimension_numbers<[1], [0], [0], [1], [0, 0, 1, 1], [], []>} : vector<1x32xf32>, vector<32x32xf32>, vector<1x32xf32> -> vector<1x32xf32>
    %223 = arith.addf %222, %25 : vector<1x32xf32>
    %224 = arith.addf %215, %219 : vector<1x32xf32>
    %225 = arith.negf %224 : vector<1x32xf32>
    %226 = math.exp %225 : vector<1x32xf32>
    %cst_153 = arith.constant 1.000000e+00 : f32
    %227 = vector.broadcast %cst_153 : f32 to vector<1x32xf32>
    %228 = arith.addf %227, %226 : vector<1x32xf32>
    %229 = arith.divf %227, %228 : vector<1x32xf32>
    %230 = arith.addf %216, %221 : vector<1x32xf32>
    %231 = arith.negf %230 : vector<1x32xf32>
    %232 = math.exp %231 : vector<1x32xf32>
    %cst_154 = arith.constant 1.000000e+00 : f32
    %233 = vector.broadcast %cst_154 : f32 to vector<1x32xf32>
    %234 = arith.addf %233, %232 : vector<1x32xf32>
    %235 = arith.divf %233, %234 : vector<1x32xf32>
    %236 = arith.mulf %229, %223 : vector<1x32xf32>
    %237 = arith.addf %217, %236 : vector<1x32xf32>
    %238 = math.tanh %237 : vector<1x32xf32>
    %cst_155 = arith.constant 1.000000e+00 : f32
    %239 = vector.broadcast %cst_155 : f32 to vector<1x32xf32>
    %240 = arith.subf %239, %235 : vector<1x32xf32>
    %241 = arith.mulf %240, %238 : vector<1x32xf32>
    %242 = arith.mulf %235, %185 : vector<1x32xf32>
    %243 = arith.addf %241, %242 : vector<1x32xf32>
    %244 = vector.extract_strided_slice %90 {offsets = [5, 0], sizes = [1, 32], strides = [1, 1]} : vector<8x32xf32> to vector<1x32xf32>
    %245 = vector.extract_strided_slice %93 {offsets = [5, 0], sizes = [1, 32], strides = [1, 1]} : vector<8x32xf32> to vector<1x32xf32>
    %246 = vector.extract_strided_slice %96 {offsets = [5, 0], sizes = [1, 32], strides = [1, 1]} : vector<8x32xf32> to vector<1x32xf32>
    %cst_156 = arith.constant dense<0.000000e+00> : vector<1x32xf32>
    %247 = tpu.matmul %214, %33, %cst_156 {dimension_numbers = #tpu.dot_dimension_numbers<[1], [0], [0], [1], [0, 0, 1, 1], [], []>} : vector<1x32xf32>, vector<32x32xf32>, vector<1x32xf32> -> vector<1x32xf32>
    %248 = arith.addf %247, %45 : vector<1x32xf32>
    %cst_157 = arith.constant dense<0.000000e+00> : vector<1x32xf32>
    %249 = tpu.matmul %214, %35, %cst_157 {dimension_numbers = #tpu.dot_dimension_numbers<[1], [0], [0], [1], [0, 0, 1, 1], [], []>} : vector<1x32xf32>, vector<32x32xf32>, vector<1x32xf32> -> vector<1x32xf32>
    %250 = arith.addf %249, %47 : vector<1x32xf32>
    %cst_158 = arith.constant dense<0.000000e+00> : vector<1x32xf32>
    %251 = tpu.matmul %214, %37, %cst_158 {dimension_numbers = #tpu.dot_dimension_numbers<[1], [0], [0], [1], [0, 0, 1, 1], [], []>} : vector<1x32xf32>, vector<32x32xf32>, vector<1x32xf32> -> vector<1x32xf32>
    %252 = arith.addf %251, %49 : vector<1x32xf32>
    %253 = arith.addf %244, %248 : vector<1x32xf32>
    %254 = arith.negf %253 : vector<1x32xf32>
    %255 = math.exp %254 : vector<1x32xf32>
    %cst_159 = arith.constant 1.000000e+00 : f32
    %256 = vector.broadcast %cst_159 : f32 to vector<1x32xf32>
    %257 = arith.addf %256, %255 : vector<1x32xf32>
    %258 = arith.divf %256, %257 : vector<1x32xf32>
    %259 = arith.addf %245, %250 : vector<1x32xf32>
    %260 = arith.negf %259 : vector<1x32xf32>
    %261 = math.exp %260 : vector<1x32xf32>
    %cst_160 = arith.constant 1.000000e+00 : f32
    %262 = vector.broadcast %cst_160 : f32 to vector<1x32xf32>
    %263 = arith.addf %262, %261 : vector<1x32xf32>
    %264 = arith.divf %262, %263 : vector<1x32xf32>
    %265 = arith.mulf %258, %252 : vector<1x32xf32>
    %266 = arith.addf %246, %265 : vector<1x32xf32>
    %267 = math.tanh %266 : vector<1x32xf32>
    %cst_161 = arith.constant 1.000000e+00 : f32
    %268 = vector.broadcast %cst_161 : f32 to vector<1x32xf32>
    %269 = arith.subf %268, %264 : vector<1x32xf32>
    %270 = arith.mulf %269, %267 : vector<1x32xf32>
    %271 = arith.mulf %264, %214 : vector<1x32xf32>
    %272 = arith.addf %270, %271 : vector<1x32xf32>
    %273 = vector.extract_strided_slice %81 {offsets = [3, 0], sizes = [1, 32], strides = [1, 1]} : vector<8x32xf32> to vector<1x32xf32>
    %274 = vector.extract_strided_slice %84 {offsets = [3, 0], sizes = [1, 32], strides = [1, 1]} : vector<8x32xf32> to vector<1x32xf32>
    %275 = vector.extract_strided_slice %87 {offsets = [3, 0], sizes = [1, 32], strides = [1, 1]} : vector<8x32xf32> to vector<1x32xf32>
    %cst_162 = arith.constant dense<0.000000e+00> : vector<1x32xf32>
    %276 = tpu.matmul %243, %9, %cst_162 {dimension_numbers = #tpu.dot_dimension_numbers<[1], [0], [0], [1], [0, 0, 1, 1], [], []>} : vector<1x32xf32>, vector<32x32xf32>, vector<1x32xf32> -> vector<1x32xf32>
    %277 = arith.addf %276, %21 : vector<1x32xf32>
    %cst_163 = arith.constant dense<0.000000e+00> : vector<1x32xf32>
    %278 = tpu.matmul %243, %11, %cst_163 {dimension_numbers = #tpu.dot_dimension_numbers<[1], [0], [0], [1], [0, 0, 1, 1], [], []>} : vector<1x32xf32>, vector<32x32xf32>, vector<1x32xf32> -> vector<1x32xf32>
    %279 = arith.addf %278, %23 : vector<1x32xf32>
    %cst_164 = arith.constant dense<0.000000e+00> : vector<1x32xf32>
    %280 = tpu.matmul %243, %13, %cst_164 {dimension_numbers = #tpu.dot_dimension_numbers<[1], [0], [0], [1], [0, 0, 1, 1], [], []>} : vector<1x32xf32>, vector<32x32xf32>, vector<1x32xf32> -> vector<1x32xf32>
    %281 = arith.addf %280, %25 : vector<1x32xf32>
    %282 = arith.addf %273, %277 : vector<1x32xf32>
    %283 = arith.negf %282 : vector<1x32xf32>
    %284 = math.exp %283 : vector<1x32xf32>
    %cst_165 = arith.constant 1.000000e+00 : f32
    %285 = vector.broadcast %cst_165 : f32 to vector<1x32xf32>
    %286 = arith.addf %285, %284 : vector<1x32xf32>
    %287 = arith.divf %285, %286 : vector<1x32xf32>
    %288 = arith.addf %274, %279 : vector<1x32xf32>
    %289 = arith.negf %288 : vector<1x32xf32>
    %290 = math.exp %289 : vector<1x32xf32>
    %cst_166 = arith.constant 1.000000e+00 : f32
    %291 = vector.broadcast %cst_166 : f32 to vector<1x32xf32>
    %292 = arith.addf %291, %290 : vector<1x32xf32>
    %293 = arith.divf %291, %292 : vector<1x32xf32>
    %294 = arith.mulf %287, %281 : vector<1x32xf32>
    %295 = arith.addf %275, %294 : vector<1x32xf32>
    %296 = math.tanh %295 : vector<1x32xf32>
    %cst_167 = arith.constant 1.000000e+00 : f32
    %297 = vector.broadcast %cst_167 : f32 to vector<1x32xf32>
    %298 = arith.subf %297, %293 : vector<1x32xf32>
    %299 = arith.mulf %298, %296 : vector<1x32xf32>
    %300 = arith.mulf %293, %243 : vector<1x32xf32>
    %301 = arith.addf %299, %300 : vector<1x32xf32>
    %302 = vector.extract_strided_slice %90 {offsets = [4, 0], sizes = [1, 32], strides = [1, 1]} : vector<8x32xf32> to vector<1x32xf32>
    %303 = vector.extract_strided_slice %93 {offsets = [4, 0], sizes = [1, 32], strides = [1, 1]} : vector<8x32xf32> to vector<1x32xf32>
    %304 = vector.extract_strided_slice %96 {offsets = [4, 0], sizes = [1, 32], strides = [1, 1]} : vector<8x32xf32> to vector<1x32xf32>
    %cst_168 = arith.constant dense<0.000000e+00> : vector<1x32xf32>
    %305 = tpu.matmul %272, %33, %cst_168 {dimension_numbers = #tpu.dot_dimension_numbers<[1], [0], [0], [1], [0, 0, 1, 1], [], []>} : vector<1x32xf32>, vector<32x32xf32>, vector<1x32xf32> -> vector<1x32xf32>
    %306 = arith.addf %305, %45 : vector<1x32xf32>
    %cst_169 = arith.constant dense<0.000000e+00> : vector<1x32xf32>
    %307 = tpu.matmul %272, %35, %cst_169 {dimension_numbers = #tpu.dot_dimension_numbers<[1], [0], [0], [1], [0, 0, 1, 1], [], []>} : vector<1x32xf32>, vector<32x32xf32>, vector<1x32xf32> -> vector<1x32xf32>
    %308 = arith.addf %307, %47 : vector<1x32xf32>
    %cst_170 = arith.constant dense<0.000000e+00> : vector<1x32xf32>
    %309 = tpu.matmul %272, %37, %cst_170 {dimension_numbers = #tpu.dot_dimension_numbers<[1], [0], [0], [1], [0, 0, 1, 1], [], []>} : vector<1x32xf32>, vector<32x32xf32>, vector<1x32xf32> -> vector<1x32xf32>
    %310 = arith.addf %309, %49 : vector<1x32xf32>
    %311 = arith.addf %302, %306 : vector<1x32xf32>
    %312 = arith.negf %311 : vector<1x32xf32>
    %313 = math.exp %312 : vector<1x32xf32>
    %cst_171 = arith.constant 1.000000e+00 : f32
    %314 = vector.broadcast %cst_171 : f32 to vector<1x32xf32>
    %315 = arith.addf %314, %313 : vector<1x32xf32>
    %316 = arith.divf %314, %315 : vector<1x32xf32>
    %317 = arith.addf %303, %308 : vector<1x32xf32>
    %318 = arith.negf %317 : vector<1x32xf32>
    %319 = math.exp %318 : vector<1x32xf32>
    %cst_172 = arith.constant 1.000000e+00 : f32
    %320 = vector.broadcast %cst_172 : f32 to vector<1x32xf32>
    %321 = arith.addf %320, %319 : vector<1x32xf32>
    %322 = arith.divf %320, %321 : vector<1x32xf32>
    %323 = arith.mulf %316, %310 : vector<1x32xf32>
    %324 = arith.addf %304, %323 : vector<1x32xf32>
    %325 = math.tanh %324 : vector<1x32xf32>
    %cst_173 = arith.constant 1.000000e+00 : f32
    %326 = vector.broadcast %cst_173 : f32 to vector<1x32xf32>
    %327 = arith.subf %326, %322 : vector<1x32xf32>
    %328 = arith.mulf %327, %325 : vector<1x32xf32>
    %329 = arith.mulf %322, %272 : vector<1x32xf32>
    %330 = arith.addf %328, %329 : vector<1x32xf32>
    %331 = vector.extract_strided_slice %81 {offsets = [4, 0], sizes = [1, 32], strides = [1, 1]} : vector<8x32xf32> to vector<1x32xf32>
    %332 = vector.extract_strided_slice %84 {offsets = [4, 0], sizes = [1, 32], strides = [1, 1]} : vector<8x32xf32> to vector<1x32xf32>
    %333 = vector.extract_strided_slice %87 {offsets = [4, 0], sizes = [1, 32], strides = [1, 1]} : vector<8x32xf32> to vector<1x32xf32>
    %cst_174 = arith.constant dense<0.000000e+00> : vector<1x32xf32>
    %334 = tpu.matmul %301, %9, %cst_174 {dimension_numbers = #tpu.dot_dimension_numbers<[1], [0], [0], [1], [0, 0, 1, 1], [], []>} : vector<1x32xf32>, vector<32x32xf32>, vector<1x32xf32> -> vector<1x32xf32>
    %335 = arith.addf %334, %21 : vector<1x32xf32>
    %cst_175 = arith.constant dense<0.000000e+00> : vector<1x32xf32>
    %336 = tpu.matmul %301, %11, %cst_175 {dimension_numbers = #tpu.dot_dimension_numbers<[1], [0], [0], [1], [0, 0, 1, 1], [], []>} : vector<1x32xf32>, vector<32x32xf32>, vector<1x32xf32> -> vector<1x32xf32>
    %337 = arith.addf %336, %23 : vector<1x32xf32>
    %cst_176 = arith.constant dense<0.000000e+00> : vector<1x32xf32>
    %338 = tpu.matmul %301, %13, %cst_176 {dimension_numbers = #tpu.dot_dimension_numbers<[1], [0], [0], [1], [0, 0, 1, 1], [], []>} : vector<1x32xf32>, vector<32x32xf32>, vector<1x32xf32> -> vector<1x32xf32>
    %339 = arith.addf %338, %25 : vector<1x32xf32>
    %340 = arith.addf %331, %335 : vector<1x32xf32>
    %341 = arith.negf %340 : vector<1x32xf32>
    %342 = math.exp %341 : vector<1x32xf32>
    %cst_177 = arith.constant 1.000000e+00 : f32
    %343 = vector.broadcast %cst_177 : f32 to vector<1x32xf32>
    %344 = arith.addf %343, %342 : vector<1x32xf32>
    %345 = arith.divf %343, %344 : vector<1x32xf32>
    %346 = arith.addf %332, %337 : vector<1x32xf32>
    %347 = arith.negf %346 : vector<1x32xf32>
    %348 = math.exp %347 : vector<1x32xf32>
    %cst_178 = arith.constant 1.000000e+00 : f32
    %349 = vector.broadcast %cst_178 : f32 to vector<1x32xf32>
    %350 = arith.addf %349, %348 : vector<1x32xf32>
    %351 = arith.divf %349, %350 : vector<1x32xf32>
    %352 = arith.mulf %345, %339 : vector<1x32xf32>
    %353 = arith.addf %333, %352 : vector<1x32xf32>
    %354 = math.tanh %353 : vector<1x32xf32>
    %cst_179 = arith.constant 1.000000e+00 : f32
    %355 = vector.broadcast %cst_179 : f32 to vector<1x32xf32>
    %356 = arith.subf %355, %351 : vector<1x32xf32>
    %357 = arith.mulf %356, %354 : vector<1x32xf32>
    %358 = arith.mulf %351, %301 : vector<1x32xf32>
    %359 = arith.addf %357, %358 : vector<1x32xf32>
    %360 = vector.extract_strided_slice %90 {offsets = [3, 0], sizes = [1, 32], strides = [1, 1]} : vector<8x32xf32> to vector<1x32xf32>
    %361 = vector.extract_strided_slice %93 {offsets = [3, 0], sizes = [1, 32], strides = [1, 1]} : vector<8x32xf32> to vector<1x32xf32>
    %362 = vector.extract_strided_slice %96 {offsets = [3, 0], sizes = [1, 32], strides = [1, 1]} : vector<8x32xf32> to vector<1x32xf32>
    %cst_180 = arith.constant dense<0.000000e+00> : vector<1x32xf32>
    %363 = tpu.matmul %330, %33, %cst_180 {dimension_numbers = #tpu.dot_dimension_numbers<[1], [0], [0], [1], [0, 0, 1, 1], [], []>} : vector<1x32xf32>, vector<32x32xf32>, vector<1x32xf32> -> vector<1x32xf32>
    %364 = arith.addf %363, %45 : vector<1x32xf32>
    %cst_181 = arith.constant dense<0.000000e+00> : vector<1x32xf32>
    %365 = tpu.matmul %330, %35, %cst_181 {dimension_numbers = #tpu.dot_dimension_numbers<[1], [0], [0], [1], [0, 0, 1, 1], [], []>} : vector<1x32xf32>, vector<32x32xf32>, vector<1x32xf32> -> vector<1x32xf32>
    %366 = arith.addf %365, %47 : vector<1x32xf32>
    %cst_182 = arith.constant dense<0.000000e+00> : vector<1x32xf32>
    %367 = tpu.matmul %330, %37, %cst_182 {dimension_numbers = #tpu.dot_dimension_numbers<[1], [0], [0], [1], [0, 0, 1, 1], [], []>} : vector<1x32xf32>, vector<32x32xf32>, vector<1x32xf32> -> vector<1x32xf32>
    %368 = arith.addf %367, %49 : vector<1x32xf32>
    %369 = arith.addf %360, %364 : vector<1x32xf32>
    %370 = arith.negf %369 : vector<1x32xf32>
    %371 = math.exp %370 : vector<1x32xf32>
    %cst_183 = arith.constant 1.000000e+00 : f32
    %372 = vector.broadcast %cst_183 : f32 to vector<1x32xf32>
    %373 = arith.addf %372, %371 : vector<1x32xf32>
    %374 = arith.divf %372, %373 : vector<1x32xf32>
    %375 = arith.addf %361, %366 : vector<1x32xf32>
    %376 = arith.negf %375 : vector<1x32xf32>
    %377 = math.exp %376 : vector<1x32xf32>
    %cst_184 = arith.constant 1.000000e+00 : f32
    %378 = vector.broadcast %cst_184 : f32 to vector<1x32xf32>
    %379 = arith.addf %378, %377 : vector<1x32xf32>
    %380 = arith.divf %378, %379 : vector<1x32xf32>
    %381 = arith.mulf %374, %368 : vector<1x32xf32>
    %382 = arith.addf %362, %381 : vector<1x32xf32>
    %383 = math.tanh %382 : vector<1x32xf32>
    %cst_185 = arith.constant 1.000000e+00 : f32
    %384 = vector.broadcast %cst_185 : f32 to vector<1x32xf32>
    %385 = arith.subf %384, %380 : vector<1x32xf32>
    %386 = arith.mulf %385, %383 : vector<1x32xf32>
    %387 = arith.mulf %380, %330 : vector<1x32xf32>
    %388 = arith.addf %386, %387 : vector<1x32xf32>
    %389 = vector.extract_strided_slice %81 {offsets = [5, 0], sizes = [1, 32], strides = [1, 1]} : vector<8x32xf32> to vector<1x32xf32>
    %390 = vector.extract_strided_slice %84 {offsets = [5, 0], sizes = [1, 32], strides = [1, 1]} : vector<8x32xf32> to vector<1x32xf32>
    %391 = vector.extract_strided_slice %87 {offsets = [5, 0], sizes = [1, 32], strides = [1, 1]} : vector<8x32xf32> to vector<1x32xf32>
    %cst_186 = arith.constant dense<0.000000e+00> : vector<1x32xf32>
    %392 = tpu.matmul %359, %9, %cst_186 {dimension_numbers = #tpu.dot_dimension_numbers<[1], [0], [0], [1], [0, 0, 1, 1], [], []>} : vector<1x32xf32>, vector<32x32xf32>, vector<1x32xf32> -> vector<1x32xf32>
    %393 = arith.addf %392, %21 : vector<1x32xf32>
    %cst_187 = arith.constant dense<0.000000e+00> : vector<1x32xf32>
    %394 = tpu.matmul %359, %11, %cst_187 {dimension_numbers = #tpu.dot_dimension_numbers<[1], [0], [0], [1], [0, 0, 1, 1], [], []>} : vector<1x32xf32>, vector<32x32xf32>, vector<1x32xf32> -> vector<1x32xf32>
    %395 = arith.addf %394, %23 : vector<1x32xf32>
    %cst_188 = arith.constant dense<0.000000e+00> : vector<1x32xf32>
    %396 = tpu.matmul %359, %13, %cst_188 {dimension_numbers = #tpu.dot_dimension_numbers<[1], [0], [0], [1], [0, 0, 1, 1], [], []>} : vector<1x32xf32>, vector<32x32xf32>, vector<1x32xf32> -> vector<1x32xf32>
    %397 = arith.addf %396, %25 : vector<1x32xf32>
    %398 = arith.addf %389, %393 : vector<1x32xf32>
    %399 = arith.negf %398 : vector<1x32xf32>
    %400 = math.exp %399 : vector<1x32xf32>
    %cst_189 = arith.constant 1.000000e+00 : f32
    %401 = vector.broadcast %cst_189 : f32 to vector<1x32xf32>
    %402 = arith.addf %401, %400 : vector<1x32xf32>
    %403 = arith.divf %401, %402 : vector<1x32xf32>
    %404 = arith.addf %390, %395 : vector<1x32xf32>
    %405 = arith.negf %404 : vector<1x32xf32>
    %406 = math.exp %405 : vector<1x32xf32>
    %cst_190 = arith.constant 1.000000e+00 : f32
    %407 = vector.broadcast %cst_190 : f32 to vector<1x32xf32>
    %408 = arith.addf %407, %406 : vector<1x32xf32>
    %409 = arith.divf %407, %408 : vector<1x32xf32>
    %410 = arith.mulf %403, %397 : vector<1x32xf32>
    %411 = arith.addf %391, %410 : vector<1x32xf32>
    %412 = math.tanh %411 : vector<1x32xf32>
    %cst_191 = arith.constant 1.000000e+00 : f32
    %413 = vector.broadcast %cst_191 : f32 to vector<1x32xf32>
    %414 = arith.subf %413, %409 : vector<1x32xf32>
    %415 = arith.mulf %414, %412 : vector<1x32xf32>
    %416 = arith.mulf %409, %359 : vector<1x32xf32>
    %417 = arith.addf %415, %416 : vector<1x32xf32>
    %418 = vector.extract_strided_slice %90 {offsets = [2, 0], sizes = [1, 32], strides = [1, 1]} : vector<8x32xf32> to vector<1x32xf32>
    %419 = vector.extract_strided_slice %93 {offsets = [2, 0], sizes = [1, 32], strides = [1, 1]} : vector<8x32xf32> to vector<1x32xf32>
    %420 = vector.extract_strided_slice %96 {offsets = [2, 0], sizes = [1, 32], strides = [1, 1]} : vector<8x32xf32> to vector<1x32xf32>
    %cst_192 = arith.constant dense<0.000000e+00> : vector<1x32xf32>
    %421 = tpu.matmul %388, %33, %cst_192 {dimension_numbers = #tpu.dot_dimension_numbers<[1], [0], [0], [1], [0, 0, 1, 1], [], []>} : vector<1x32xf32>, vector<32x32xf32>, vector<1x32xf32> -> vector<1x32xf32>
    %422 = arith.addf %421, %45 : vector<1x32xf32>
    %cst_193 = arith.constant dense<0.000000e+00> : vector<1x32xf32>
    %423 = tpu.matmul %388, %35, %cst_193 {dimension_numbers = #tpu.dot_dimension_numbers<[1], [0], [0], [1], [0, 0, 1, 1], [], []>} : vector<1x32xf32>, vector<32x32xf32>, vector<1x32xf32> -> vector<1x32xf32>
    %424 = arith.addf %423, %47 : vector<1x32xf32>
    %cst_194 = arith.constant dense<0.000000e+00> : vector<1x32xf32>
    %425 = tpu.matmul %388, %37, %cst_194 {dimension_numbers = #tpu.dot_dimension_numbers<[1], [0], [0], [1], [0, 0, 1, 1], [], []>} : vector<1x32xf32>, vector<32x32xf32>, vector<1x32xf32> -> vector<1x32xf32>
    %426 = arith.addf %425, %49 : vector<1x32xf32>
    %427 = arith.addf %418, %422 : vector<1x32xf32>
    %428 = arith.negf %427 : vector<1x32xf32>
    %429 = math.exp %428 : vector<1x32xf32>
    %cst_195 = arith.constant 1.000000e+00 : f32
    %430 = vector.broadcast %cst_195 : f32 to vector<1x32xf32>
    %431 = arith.addf %430, %429 : vector<1x32xf32>
    %432 = arith.divf %430, %431 : vector<1x32xf32>
    %433 = arith.addf %419, %424 : vector<1x32xf32>
    %434 = arith.negf %433 : vector<1x32xf32>
    %435 = math.exp %434 : vector<1x32xf32>
    %cst_196 = arith.constant 1.000000e+00 : f32
    %436 = vector.broadcast %cst_196 : f32 to vector<1x32xf32>
    %437 = arith.addf %436, %435 : vector<1x32xf32>
    %438 = arith.divf %436, %437 : vector<1x32xf32>
    %439 = arith.mulf %432, %426 : vector<1x32xf32>
    %440 = arith.addf %420, %439 : vector<1x32xf32>
    %441 = math.tanh %440 : vector<1x32xf32>
    %cst_197 = arith.constant 1.000000e+00 : f32
    %442 = vector.broadcast %cst_197 : f32 to vector<1x32xf32>
    %443 = arith.subf %442, %438 : vector<1x32xf32>
    %444 = arith.mulf %443, %441 : vector<1x32xf32>
    %445 = arith.mulf %438, %388 : vector<1x32xf32>
    %446 = arith.addf %444, %445 : vector<1x32xf32>
    %447 = vector.extract_strided_slice %81 {offsets = [6, 0], sizes = [1, 32], strides = [1, 1]} : vector<8x32xf32> to vector<1x32xf32>
    %448 = vector.extract_strided_slice %84 {offsets = [6, 0], sizes = [1, 32], strides = [1, 1]} : vector<8x32xf32> to vector<1x32xf32>
    %449 = vector.extract_strided_slice %87 {offsets = [6, 0], sizes = [1, 32], strides = [1, 1]} : vector<8x32xf32> to vector<1x32xf32>
    %cst_198 = arith.constant dense<0.000000e+00> : vector<1x32xf32>
    %450 = tpu.matmul %417, %9, %cst_198 {dimension_numbers = #tpu.dot_dimension_numbers<[1], [0], [0], [1], [0, 0, 1, 1], [], []>} : vector<1x32xf32>, vector<32x32xf32>, vector<1x32xf32> -> vector<1x32xf32>
    %451 = arith.addf %450, %21 : vector<1x32xf32>
    %cst_199 = arith.constant dense<0.000000e+00> : vector<1x32xf32>
    %452 = tpu.matmul %417, %11, %cst_199 {dimension_numbers = #tpu.dot_dimension_numbers<[1], [0], [0], [1], [0, 0, 1, 1], [], []>} : vector<1x32xf32>, vector<32x32xf32>, vector<1x32xf32> -> vector<1x32xf32>
    %453 = arith.addf %452, %23 : vector<1x32xf32>
    %cst_200 = arith.constant dense<0.000000e+00> : vector<1x32xf32>
    %454 = tpu.matmul %417, %13, %cst_200 {dimension_numbers = #tpu.dot_dimension_numbers<[1], [0], [0], [1], [0, 0, 1, 1], [], []>} : vector<1x32xf32>, vector<32x32xf32>, vector<1x32xf32> -> vector<1x32xf32>
    %455 = arith.addf %454, %25 : vector<1x32xf32>
    %456 = arith.addf %447, %451 : vector<1x32xf32>
    %457 = arith.negf %456 : vector<1x32xf32>
    %458 = math.exp %457 : vector<1x32xf32>
    %cst_201 = arith.constant 1.000000e+00 : f32
    %459 = vector.broadcast %cst_201 : f32 to vector<1x32xf32>
    %460 = arith.addf %459, %458 : vector<1x32xf32>
    %461 = arith.divf %459, %460 : vector<1x32xf32>
    %462 = arith.addf %448, %453 : vector<1x32xf32>
    %463 = arith.negf %462 : vector<1x32xf32>
    %464 = math.exp %463 : vector<1x32xf32>
    %cst_202 = arith.constant 1.000000e+00 : f32
    %465 = vector.broadcast %cst_202 : f32 to vector<1x32xf32>
    %466 = arith.addf %465, %464 : vector<1x32xf32>
    %467 = arith.divf %465, %466 : vector<1x32xf32>
    %468 = arith.mulf %461, %455 : vector<1x32xf32>
    %469 = arith.addf %449, %468 : vector<1x32xf32>
    %470 = math.tanh %469 : vector<1x32xf32>
    %cst_203 = arith.constant 1.000000e+00 : f32
    %471 = vector.broadcast %cst_203 : f32 to vector<1x32xf32>
    %472 = arith.subf %471, %467 : vector<1x32xf32>
    %473 = arith.mulf %472, %470 : vector<1x32xf32>
    %474 = arith.mulf %467, %417 : vector<1x32xf32>
    %475 = arith.addf %473, %474 : vector<1x32xf32>
    %476 = vector.extract_strided_slice %90 {offsets = [1, 0], sizes = [1, 32], strides = [1, 1]} : vector<8x32xf32> to vector<1x32xf32>
    %477 = vector.extract_strided_slice %93 {offsets = [1, 0], sizes = [1, 32], strides = [1, 1]} : vector<8x32xf32> to vector<1x32xf32>
    %478 = vector.extract_strided_slice %96 {offsets = [1, 0], sizes = [1, 32], strides = [1, 1]} : vector<8x32xf32> to vector<1x32xf32>
    %cst_204 = arith.constant dense<0.000000e+00> : vector<1x32xf32>
    %479 = tpu.matmul %446, %33, %cst_204 {dimension_numbers = #tpu.dot_dimension_numbers<[1], [0], [0], [1], [0, 0, 1, 1], [], []>} : vector<1x32xf32>, vector<32x32xf32>, vector<1x32xf32> -> vector<1x32xf32>
    %480 = arith.addf %479, %45 : vector<1x32xf32>
    %cst_205 = arith.constant dense<0.000000e+00> : vector<1x32xf32>
    %481 = tpu.matmul %446, %35, %cst_205 {dimension_numbers = #tpu.dot_dimension_numbers<[1], [0], [0], [1], [0, 0, 1, 1], [], []>} : vector<1x32xf32>, vector<32x32xf32>, vector<1x32xf32> -> vector<1x32xf32>
    %482 = arith.addf %481, %47 : vector<1x32xf32>
    %cst_206 = arith.constant dense<0.000000e+00> : vector<1x32xf32>
    %483 = tpu.matmul %446, %37, %cst_206 {dimension_numbers = #tpu.dot_dimension_numbers<[1], [0], [0], [1], [0, 0, 1, 1], [], []>} : vector<1x32xf32>, vector<32x32xf32>, vector<1x32xf32> -> vector<1x32xf32>
    %484 = arith.addf %483, %49 : vector<1x32xf32>
    %485 = arith.addf %476, %480 : vector<1x32xf32>
    %486 = arith.negf %485 : vector<1x32xf32>
    %487 = math.exp %486 : vector<1x32xf32>
    %cst_207 = arith.constant 1.000000e+00 : f32
    %488 = vector.broadcast %cst_207 : f32 to vector<1x32xf32>
    %489 = arith.addf %488, %487 : vector<1x32xf32>
    %490 = arith.divf %488, %489 : vector<1x32xf32>
    %491 = arith.addf %477, %482 : vector<1x32xf32>
    %492 = arith.negf %491 : vector<1x32xf32>
    %493 = math.exp %492 : vector<1x32xf32>
    %cst_208 = arith.constant 1.000000e+00 : f32
    %494 = vector.broadcast %cst_208 : f32 to vector<1x32xf32>
    %495 = arith.addf %494, %493 : vector<1x32xf32>
    %496 = arith.divf %494, %495 : vector<1x32xf32>
    %497 = arith.mulf %490, %484 : vector<1x32xf32>
    %498 = arith.addf %478, %497 : vector<1x32xf32>
    %499 = math.tanh %498 : vector<1x32xf32>
    %cst_209 = arith.constant 1.000000e+00 : f32
    %500 = vector.broadcast %cst_209 : f32 to vector<1x32xf32>
    %501 = arith.subf %500, %496 : vector<1x32xf32>
    %502 = arith.mulf %501, %499 : vector<1x32xf32>
    %503 = arith.mulf %496, %446 : vector<1x32xf32>
    %504 = arith.addf %502, %503 : vector<1x32xf32>
    %505 = vector.extract_strided_slice %81 {offsets = [7, 0], sizes = [1, 32], strides = [1, 1]} : vector<8x32xf32> to vector<1x32xf32>
    %506 = vector.extract_strided_slice %84 {offsets = [7, 0], sizes = [1, 32], strides = [1, 1]} : vector<8x32xf32> to vector<1x32xf32>
    %507 = vector.extract_strided_slice %87 {offsets = [7, 0], sizes = [1, 32], strides = [1, 1]} : vector<8x32xf32> to vector<1x32xf32>
    %cst_210 = arith.constant dense<0.000000e+00> : vector<1x32xf32>
    %508 = tpu.matmul %475, %9, %cst_210 {dimension_numbers = #tpu.dot_dimension_numbers<[1], [0], [0], [1], [0, 0, 1, 1], [], []>} : vector<1x32xf32>, vector<32x32xf32>, vector<1x32xf32> -> vector<1x32xf32>
    %509 = arith.addf %508, %21 : vector<1x32xf32>
    %cst_211 = arith.constant dense<0.000000e+00> : vector<1x32xf32>
    %510 = tpu.matmul %475, %11, %cst_211 {dimension_numbers = #tpu.dot_dimension_numbers<[1], [0], [0], [1], [0, 0, 1, 1], [], []>} : vector<1x32xf32>, vector<32x32xf32>, vector<1x32xf32> -> vector<1x32xf32>
    %511 = arith.addf %510, %23 : vector<1x32xf32>
    %cst_212 = arith.constant dense<0.000000e+00> : vector<1x32xf32>
    %512 = tpu.matmul %475, %13, %cst_212 {dimension_numbers = #tpu.dot_dimension_numbers<[1], [0], [0], [1], [0, 0, 1, 1], [], []>} : vector<1x32xf32>, vector<32x32xf32>, vector<1x32xf32> -> vector<1x32xf32>
    %513 = arith.addf %512, %25 : vector<1x32xf32>
    %514 = arith.addf %505, %509 : vector<1x32xf32>
    %515 = arith.negf %514 : vector<1x32xf32>
    %516 = math.exp %515 : vector<1x32xf32>
    %cst_213 = arith.constant 1.000000e+00 : f32
    %517 = vector.broadcast %cst_213 : f32 to vector<1x32xf32>
    %518 = arith.addf %517, %516 : vector<1x32xf32>
    %519 = arith.divf %517, %518 : vector<1x32xf32>
    %520 = arith.addf %506, %511 : vector<1x32xf32>
    %521 = arith.negf %520 : vector<1x32xf32>
    %522 = math.exp %521 : vector<1x32xf32>
    %cst_214 = arith.constant 1.000000e+00 : f32
    %523 = vector.broadcast %cst_214 : f32 to vector<1x32xf32>
    %524 = arith.addf %523, %522 : vector<1x32xf32>
    %525 = arith.divf %523, %524 : vector<1x32xf32>
    %526 = arith.mulf %519, %513 : vector<1x32xf32>
    %527 = arith.addf %507, %526 : vector<1x32xf32>
    %528 = math.tanh %527 : vector<1x32xf32>
    %cst_215 = arith.constant 1.000000e+00 : f32
    %529 = vector.broadcast %cst_215 : f32 to vector<1x32xf32>
    %530 = arith.subf %529, %525 : vector<1x32xf32>
    %531 = arith.mulf %530, %528 : vector<1x32xf32>
    %532 = arith.mulf %525, %475 : vector<1x32xf32>
    %533 = arith.addf %531, %532 : vector<1x32xf32>
    %534 = vector.extract_strided_slice %90 {offsets = [0, 0], sizes = [1, 32], strides = [1, 1]} : vector<8x32xf32> to vector<1x32xf32>
    %535 = vector.extract_strided_slice %93 {offsets = [0, 0], sizes = [1, 32], strides = [1, 1]} : vector<8x32xf32> to vector<1x32xf32>
    %536 = vector.extract_strided_slice %96 {offsets = [0, 0], sizes = [1, 32], strides = [1, 1]} : vector<8x32xf32> to vector<1x32xf32>
    %cst_216 = arith.constant dense<0.000000e+00> : vector<1x32xf32>
    %537 = tpu.matmul %504, %33, %cst_216 {dimension_numbers = #tpu.dot_dimension_numbers<[1], [0], [0], [1], [0, 0, 1, 1], [], []>} : vector<1x32xf32>, vector<32x32xf32>, vector<1x32xf32> -> vector<1x32xf32>
    %538 = arith.addf %537, %45 : vector<1x32xf32>
    %cst_217 = arith.constant dense<0.000000e+00> : vector<1x32xf32>
    %539 = tpu.matmul %504, %35, %cst_217 {dimension_numbers = #tpu.dot_dimension_numbers<[1], [0], [0], [1], [0, 0, 1, 1], [], []>} : vector<1x32xf32>, vector<32x32xf32>, vector<1x32xf32> -> vector<1x32xf32>
    %540 = arith.addf %539, %47 : vector<1x32xf32>
    %cst_218 = arith.constant dense<0.000000e+00> : vector<1x32xf32>
    %541 = tpu.matmul %504, %37, %cst_218 {dimension_numbers = #tpu.dot_dimension_numbers<[1], [0], [0], [1], [0, 0, 1, 1], [], []>} : vector<1x32xf32>, vector<32x32xf32>, vector<1x32xf32> -> vector<1x32xf32>
    %542 = arith.addf %541, %49 : vector<1x32xf32>
    %543 = arith.addf %534, %538 : vector<1x32xf32>
    %544 = arith.negf %543 : vector<1x32xf32>
    %545 = math.exp %544 : vector<1x32xf32>
    %cst_219 = arith.constant 1.000000e+00 : f32
    %546 = vector.broadcast %cst_219 : f32 to vector<1x32xf32>
    %547 = arith.addf %546, %545 : vector<1x32xf32>
    %548 = arith.divf %546, %547 : vector<1x32xf32>
    %549 = arith.addf %535, %540 : vector<1x32xf32>
    %550 = arith.negf %549 : vector<1x32xf32>
    %551 = math.exp %550 : vector<1x32xf32>
    %cst_220 = arith.constant 1.000000e+00 : f32
    %552 = vector.broadcast %cst_220 : f32 to vector<1x32xf32>
    %553 = arith.addf %552, %551 : vector<1x32xf32>
    %554 = arith.divf %552, %553 : vector<1x32xf32>
    %555 = arith.mulf %548, %542 : vector<1x32xf32>
    %556 = arith.addf %536, %555 : vector<1x32xf32>
    %557 = math.tanh %556 : vector<1x32xf32>
    %cst_221 = arith.constant 1.000000e+00 : f32
    %558 = vector.broadcast %cst_221 : f32 to vector<1x32xf32>
    %559 = arith.subf %558, %554 : vector<1x32xf32>
    %560 = arith.mulf %559, %557 : vector<1x32xf32>
    %561 = arith.mulf %554, %504 : vector<1x32xf32>
    %562 = arith.addf %560, %561 : vector<1x32xf32>
    %563 = tpu.iota {dimensions = array<i32: 0>} : vector<8x1xi32>
    %cst_222 = arith.constant 0.000000e+00 : f32
    %564 = vector.broadcast %cst_222 : f32 to vector<8x32xf32>
    %c0_i32 = arith.constant 0 : i32
    %565 = vector.broadcast %c0_i32 : i32 to vector<8x1xi32>
    %566 = arith.cmpi eq, %563, %565 : vector<8x1xi32>
    %567 = arith.addf %127, %562 : vector<1x32xf32>
    %568 = vector.shape_cast %566 : vector<8x1xi1> to vector<8x1xi1>
    %569 = vector.broadcast %568 : vector<8x1xi1> to vector<8x32xi1>
    %570 = vector.shape_cast %567 : vector<1x32xf32> to vector<1x32xf32>
    %571 = vector.broadcast %570 : vector<1x32xf32> to vector<8x32xf32>
    %572 = arith.select %569, %571, %564 : vector<8x32xi1>, vector<8x32xf32>
    %c1_i32 = arith.constant 1 : i32
    %573 = vector.broadcast %c1_i32 : i32 to vector<8x1xi32>
    %574 = arith.cmpi eq, %563, %573 : vector<8x1xi32>
    %575 = arith.addf %185, %504 : vector<1x32xf32>
    %576 = vector.shape_cast %574 : vector<8x1xi1> to vector<8x1xi1>
    %577 = vector.broadcast %576 : vector<8x1xi1> to vector<8x32xi1>
    %578 = vector.shape_cast %575 : vector<1x32xf32> to vector<1x32xf32>
    %579 = vector.broadcast %578 : vector<1x32xf32> to vector<8x32xf32>
    %580 = arith.select %577, %579, %572 : vector<8x32xi1>, vector<8x32xf32>
    %c2_i32 = arith.constant 2 : i32
    %581 = vector.broadcast %c2_i32 : i32 to vector<8x1xi32>
    %582 = arith.cmpi eq, %563, %581 : vector<8x1xi32>
    %583 = arith.addf %243, %446 : vector<1x32xf32>
    %584 = vector.shape_cast %582 : vector<8x1xi1> to vector<8x1xi1>
    %585 = vector.broadcast %584 : vector<8x1xi1> to vector<8x32xi1>
    %586 = vector.shape_cast %583 : vector<1x32xf32> to vector<1x32xf32>
    %587 = vector.broadcast %586 : vector<1x32xf32> to vector<8x32xf32>
    %588 = arith.select %585, %587, %580 : vector<8x32xi1>, vector<8x32xf32>
    %c3_i32 = arith.constant 3 : i32
    %589 = vector.broadcast %c3_i32 : i32 to vector<8x1xi32>
    %590 = arith.cmpi eq, %563, %589 : vector<8x1xi32>
    %591 = arith.addf %301, %388 : vector<1x32xf32>
    %592 = vector.shape_cast %590 : vector<8x1xi1> to vector<8x1xi1>
    %593 = vector.broadcast %592 : vector<8x1xi1> to vector<8x32xi1>
    %594 = vector.shape_cast %591 : vector<1x32xf32> to vector<1x32xf32>
    %595 = vector.broadcast %594 : vector<1x32xf32> to vector<8x32xf32>
    %596 = arith.select %593, %595, %588 : vector<8x32xi1>, vector<8x32xf32>
    %c4_i32 = arith.constant 4 : i32
    %597 = vector.broadcast %c4_i32 : i32 to vector<8x1xi32>
    %598 = arith.cmpi eq, %563, %597 : vector<8x1xi32>
    %599 = arith.addf %359, %330 : vector<1x32xf32>
    %600 = vector.shape_cast %598 : vector<8x1xi1> to vector<8x1xi1>
    %601 = vector.broadcast %600 : vector<8x1xi1> to vector<8x32xi1>
    %602 = vector.shape_cast %599 : vector<1x32xf32> to vector<1x32xf32>
    %603 = vector.broadcast %602 : vector<1x32xf32> to vector<8x32xf32>
    %604 = arith.select %601, %603, %596 : vector<8x32xi1>, vector<8x32xf32>
    %c5_i32 = arith.constant 5 : i32
    %605 = vector.broadcast %c5_i32 : i32 to vector<8x1xi32>
    %606 = arith.cmpi eq, %563, %605 : vector<8x1xi32>
    %607 = arith.addf %417, %272 : vector<1x32xf32>
    %608 = vector.shape_cast %606 : vector<8x1xi1> to vector<8x1xi1>
    %609 = vector.broadcast %608 : vector<8x1xi1> to vector<8x32xi1>
    %610 = vector.shape_cast %607 : vector<1x32xf32> to vector<1x32xf32>
    %611 = vector.broadcast %610 : vector<1x32xf32> to vector<8x32xf32>
    %612 = arith.select %609, %611, %604 : vector<8x32xi1>, vector<8x32xf32>
    %c6_i32 = arith.constant 6 : i32
    %613 = vector.broadcast %c6_i32 : i32 to vector<8x1xi32>
    %614 = arith.cmpi eq, %563, %613 : vector<8x1xi32>
    %615 = arith.addf %475, %214 : vector<1x32xf32>
    %616 = vector.shape_cast %614 : vector<8x1xi1> to vector<8x1xi1>
    %617 = vector.broadcast %616 : vector<8x1xi1> to vector<8x32xi1>
    %618 = vector.shape_cast %615 : vector<1x32xf32> to vector<1x32xf32>
    %619 = vector.broadcast %618 : vector<1x32xf32> to vector<8x32xf32>
    %620 = arith.select %617, %619, %612 : vector<8x32xi1>, vector<8x32xf32>
    %c7_i32 = arith.constant 7 : i32
    %621 = vector.broadcast %c7_i32 : i32 to vector<8x1xi32>
    %622 = arith.cmpi eq, %563, %621 : vector<8x1xi32>
    %623 = arith.addf %533, %156 : vector<1x32xf32>
    %624 = vector.shape_cast %622 : vector<8x1xi1> to vector<8x1xi1>
    %625 = vector.broadcast %624 : vector<8x1xi1> to vector<8x32xi1>
    %626 = vector.shape_cast %623 : vector<1x32xf32> to vector<1x32xf32>
    %627 = vector.broadcast %626 : vector<1x32xf32> to vector<8x32xf32>
    %628 = arith.select %625, %627, %620 : vector<8x32xi1>, vector<8x32xf32>
    %629 = tpu.iota {dimensions = array<i32: 1>} : vector<1x64xi32>
    %630 = tpu.iota {dimensions = array<i32: 1>} : vector<1x8xi32>
    %c1_i32_223 = arith.constant 1 : i32
    %631 = vector.broadcast %c1_i32_223 : i32 to vector<1x64xi32>
    %632 = arith.cmpi eq, %629, %631 : vector<1x64xi32>
    %633 = arith.extui %632 : vector<1x64xi1> to vector<1x64xi32>
    %634 = arith.sitofp %633 : vector<1x64xi32> to vector<1x64xf32>
    %c0_i32_224 = arith.constant 0 : i32
    %635 = vector.broadcast %c0_i32_224 : i32 to vector<1x8xi32>
    %cst_225 = arith.constant 0.000000e+00 : f32
    %636 = vector.broadcast %cst_225 : f32 to vector<1x8xf32>
    %cst_226 = arith.constant dense<0.000000e+00> : vector<1x32xf32>
    %637 = tpu.matmul %634, %1, %cst_226 {dimension_numbers = #tpu.dot_dimension_numbers<[1], [0], [0], [1], [0, 0, 1, 1], [], []>} : vector<1x64xf32>, vector<64x32xf32>, vector<1x32xf32> -> vector<1x32xf32>
    %cst_227 = arith.constant dense<0.000000e+00> : vector<1x32xf32>
    %638 = tpu.matmul %637, %51, %cst_227 {dimension_numbers = #tpu.dot_dimension_numbers<[1], [0], [0], [1], [0, 0, 1, 1], [], []>} : vector<1x32xf32>, vector<32x32xf32>, vector<1x32xf32> -> vector<1x32xf32>
    %639 = arith.addf %638, %63 : vector<1x32xf32>
    %cst_228 = arith.constant dense<0.000000e+00> : vector<1x32xf32>
    %640 = tpu.matmul %637, %53, %cst_228 {dimension_numbers = #tpu.dot_dimension_numbers<[1], [0], [0], [1], [0, 0, 1, 1], [], []>} : vector<1x32xf32>, vector<32x32xf32>, vector<1x32xf32> -> vector<1x32xf32>
    %641 = arith.addf %640, %65 : vector<1x32xf32>
    %cst_229 = arith.constant dense<0.000000e+00> : vector<1x32xf32>
    %642 = tpu.matmul %637, %55, %cst_229 {dimension_numbers = #tpu.dot_dimension_numbers<[1], [0], [0], [1], [0, 0, 1, 1], [], []>} : vector<1x32xf32>, vector<32x32xf32>, vector<1x32xf32> -> vector<1x32xf32>
    %643 = arith.addf %642, %67 : vector<1x32xf32>
    %cst_230 = arith.constant dense<0.000000e+00> : vector<1x32xf32>
    %644 = tpu.matmul %533, %57, %cst_230 {dimension_numbers = #tpu.dot_dimension_numbers<[1], [0], [0], [1], [0, 0, 1, 1], [], []>} : vector<1x32xf32>, vector<32x32xf32>, vector<1x32xf32> -> vector<1x32xf32>
    %645 = arith.addf %644, %69 : vector<1x32xf32>
    %cst_231 = arith.constant dense<0.000000e+00> : vector<1x32xf32>
    %646 = tpu.matmul %533, %59, %cst_231 {dimension_numbers = #tpu.dot_dimension_numbers<[1], [0], [0], [1], [0, 0, 1, 1], [], []>} : vector<1x32xf32>, vector<32x32xf32>, vector<1x32xf32> -> vector<1x32xf32>
    %647 = arith.addf %646, %71 : vector<1x32xf32>
    %cst_232 = arith.constant dense<0.000000e+00> : vector<1x32xf32>
    %648 = tpu.matmul %533, %61, %cst_232 {dimension_numbers = #tpu.dot_dimension_numbers<[1], [0], [0], [1], [0, 0, 1, 1], [], []>} : vector<1x32xf32>, vector<32x32xf32>, vector<1x32xf32> -> vector<1x32xf32>
    %649 = arith.addf %648, %73 : vector<1x32xf32>
    %650 = arith.addf %639, %645 : vector<1x32xf32>
    %651 = arith.negf %650 : vector<1x32xf32>
    %652 = math.exp %651 : vector<1x32xf32>
    %cst_233 = arith.constant 1.000000e+00 : f32
    %653 = vector.broadcast %cst_233 : f32 to vector<1x32xf32>
    %654 = arith.addf %653, %652 : vector<1x32xf32>
    %655 = arith.divf %653, %654 : vector<1x32xf32>
    %656 = arith.addf %641, %647 : vector<1x32xf32>
    %657 = arith.negf %656 : vector<1x32xf32>
    %658 = math.exp %657 : vector<1x32xf32>
    %cst_234 = arith.constant 1.000000e+00 : f32
    %659 = vector.broadcast %cst_234 : f32 to vector<1x32xf32>
    %660 = arith.addf %659, %658 : vector<1x32xf32>
    %661 = arith.divf %659, %660 : vector<1x32xf32>
    %662 = arith.mulf %655, %649 : vector<1x32xf32>
    %663 = arith.addf %643, %662 : vector<1x32xf32>
    %664 = math.tanh %663 : vector<1x32xf32>
    %cst_235 = arith.constant 1.000000e+00 : f32
    %665 = vector.broadcast %cst_235 : f32 to vector<1x32xf32>
    %666 = arith.subf %665, %661 : vector<1x32xf32>
    %667 = arith.mulf %666, %664 : vector<1x32xf32>
    %668 = arith.mulf %661, %533 : vector<1x32xf32>
    %669 = arith.addf %667, %668 : vector<1x32xf32>
    %cst_236 = arith.constant dense<0.000000e+00> : vector<1x8xf32>
    %670 = tpu.matmul %669, %628, %cst_236 {dimension_numbers = #tpu.dot_dimension_numbers<[1], [1], [0], [0], [0, 0, 1, 0], [], []>} : vector<1x32xf32>, vector<8x32xf32>, vector<1x8xf32> -> vector<1x8xf32>
    %cst_237 = arith.constant dense<0xFF800000> : vector<1xf32>
    %671 = vector.multi_reduction <maximumf>, %670, %cst_237 [1] : vector<1x8xf32> to vector<1xf32>
    %672 = vector.shape_cast %671 : vector<1xf32> to vector<1x1xf32>
    %673 = vector.broadcast %672 : vector<1x1xf32> to vector<1x8xf32>
    %674 = arith.subf %670, %673 : vector<1x8xf32>
    %675 = math.exp %674 : vector<1x8xf32>
    %cst_238 = arith.constant dense<0.000000e+00> : vector<1xf32>
    %676 = vector.multi_reduction <add>, %675, %cst_238 [1] : vector<1x8xf32> to vector<1xf32>
    %677 = vector.shape_cast %676 : vector<1xf32> to vector<1x1xf32>
    %678 = tpu.reciprocal %677 {approx = true} : vector<1x1xf32> -> vector<1x1xf32>
    %679 = vector.broadcast %678 : vector<1x1xf32> to vector<1x8xf32>
    %680 = arith.mulf %675, %679 : vector<1x8xf32>
    %cst_239 = arith.constant dense<0.000000e+00> : vector<1x32xf32>
    %681 = tpu.matmul %680, %628, %cst_239 {dimension_numbers = #tpu.dot_dimension_numbers<[1], [0], [0], [1], [0, 0, 1, 1], [], []>} : vector<1x8xf32>, vector<8x32xf32>, vector<1x32xf32> -> vector<1x32xf32>
    %cst_240 = arith.constant dense<0.000000e+00> : vector<1x32xf32>
    %682 = tpu.matmul %669, %74, %cst_240 {dimension_numbers = #tpu.dot_dimension_numbers<[1], [0], [0], [1], [0, 0, 1, 1], [], []>} : vector<1x32xf32>, vector<32x32xf32>, vector<1x32xf32> -> vector<1x32xf32>
    %cst_241 = arith.constant dense<0.000000e+00> : vector<1x32xf32>
    %683 = tpu.matmul %681, %75, %cst_241 {dimension_numbers = #tpu.dot_dimension_numbers<[1], [0], [0], [1], [0, 0, 1, 1], [], []>} : vector<1x32xf32>, vector<32x32xf32>, vector<1x32xf32> -> vector<1x32xf32>
    %684 = arith.addf %682, %683 : vector<1x32xf32>
    %685 = arith.addf %684, %76 : vector<1x32xf32>
    %686 = math.tanh %685 : vector<1x32xf32>
    %cst_242 = arith.constant dense<0.000000e+00> : vector<1x64xf32>
    %687 = tpu.matmul %686, %77, %cst_242 {dimension_numbers = #tpu.dot_dimension_numbers<[1], [0], [0], [1], [0, 0, 1, 1], [], []>} : vector<1x32xf32>, vector<32x64xf32>, vector<1x64xf32> -> vector<1x64xf32>
    %688 = arith.addf %687, %78 : vector<1x64xf32>
    %cst_243 = arith.constant dense<0xFF800000> : vector<1xf32>
    %689 = vector.multi_reduction <maximumf>, %688, %cst_243 [1] : vector<1x64xf32> to vector<1xf32>
    %690 = vector.shape_cast %689 : vector<1xf32> to vector<1x1xf32>
    %691 = vector.broadcast %690 : vector<1x1xf32> to vector<1x64xf32>
    %692 = arith.cmpf oeq, %688, %691 : vector<1x64xf32>
    %c64_i32 = arith.constant 64 : i32
    %693 = vector.broadcast %c64_i32 : i32 to vector<1x64xi32>
    %694 = arith.select %692, %629, %693 : vector<1x64xi1>, vector<1x64xi32>
    %cst_244 = arith.constant dense<2147483647> : vector<1xi32>
    %695 = vector.multi_reduction <minsi>, %694, %cst_244 [1] : vector<1x64xi32> to vector<1xi32>
    %696 = vector.shape_cast %695 : vector<1xi32> to vector<1x1xi32>
    %697 = vector.broadcast %690 : vector<1x1xf32> to vector<1x64xf32>
    %698 = arith.subf %688, %697 : vector<1x64xf32>
    %699 = math.exp %698 : vector<1x64xf32>
    %cst_245 = arith.constant dense<0.000000e+00> : vector<1xf32>
    %700 = vector.multi_reduction <add>, %699, %cst_245 [1] : vector<1x64xf32> to vector<1xf32>
    %701 = vector.shape_cast %700 : vector<1xf32> to vector<1x1xf32>
    %cst_246 = arith.constant 1.000000e+00 : f32
    %702 = vector.broadcast %cst_246 : f32 to vector<1x1xf32>
    %703 = arith.divf %702, %701 : vector<1x1xf32>
    %c0_i32_247 = arith.constant 0 : i32
    %704 = vector.broadcast %c0_i32_247 : i32 to vector<1x8xi32>
    %705 = arith.cmpi eq, %630, %704 : vector<1x8xi32>
    %706 = vector.shape_cast %696 : vector<1x1xi32> to vector<1x1xi32>
    %707 = vector.broadcast %706 : vector<1x1xi32> to vector<1x8xi32>
    %708 = arith.select %705, %707, %635 : vector<1x8xi1>, vector<1x8xi32>
    %c0_i32_248 = arith.constant 0 : i32
    %709 = vector.broadcast %c0_i32_248 : i32 to vector<1x8xi32>
    %710 = arith.cmpi eq, %630, %709 : vector<1x8xi32>
    %711 = vector.shape_cast %703 : vector<1x1xf32> to vector<1x1xf32>
    %712 = vector.broadcast %711 : vector<1x1xf32> to vector<1x8xf32>
    %713 = arith.select %710, %712, %636 : vector<1x8xi1>, vector<1x8xf32>
    %714 = vector.broadcast %696 : vector<1x1xi32> to vector<1x64xi32>
    %715 = arith.cmpi eq, %629, %714 : vector<1x64xi32>
    %716 = arith.extui %715 : vector<1x64xi1> to vector<1x64xi32>
    %717 = arith.sitofp %716 : vector<1x64xi32> to vector<1x64xf32>
    %cst_249 = arith.constant dense<0.000000e+00> : vector<1x32xf32>
    %718 = tpu.matmul %717, %1, %cst_249 {dimension_numbers = #tpu.dot_dimension_numbers<[1], [0], [0], [1], [0, 0, 1, 1], [], []>} : vector<1x64xf32>, vector<64x32xf32>, vector<1x32xf32> -> vector<1x32xf32>
    %cst_250 = arith.constant dense<0.000000e+00> : vector<1x32xf32>
    %719 = tpu.matmul %718, %51, %cst_250 {dimension_numbers = #tpu.dot_dimension_numbers<[1], [0], [0], [1], [0, 0, 1, 1], [], []>} : vector<1x32xf32>, vector<32x32xf32>, vector<1x32xf32> -> vector<1x32xf32>
    %720 = arith.addf %719, %63 : vector<1x32xf32>
    %cst_251 = arith.constant dense<0.000000e+00> : vector<1x32xf32>
    %721 = tpu.matmul %718, %53, %cst_251 {dimension_numbers = #tpu.dot_dimension_numbers<[1], [0], [0], [1], [0, 0, 1, 1], [], []>} : vector<1x32xf32>, vector<32x32xf32>, vector<1x32xf32> -> vector<1x32xf32>
    %722 = arith.addf %721, %65 : vector<1x32xf32>
    %cst_252 = arith.constant dense<0.000000e+00> : vector<1x32xf32>
    %723 = tpu.matmul %718, %55, %cst_252 {dimension_numbers = #tpu.dot_dimension_numbers<[1], [0], [0], [1], [0, 0, 1, 1], [], []>} : vector<1x32xf32>, vector<32x32xf32>, vector<1x32xf32> -> vector<1x32xf32>
    %724 = arith.addf %723, %67 : vector<1x32xf32>
    %cst_253 = arith.constant dense<0.000000e+00> : vector<1x32xf32>
    %725 = tpu.matmul %669, %57, %cst_253 {dimension_numbers = #tpu.dot_dimension_numbers<[1], [0], [0], [1], [0, 0, 1, 1], [], []>} : vector<1x32xf32>, vector<32x32xf32>, vector<1x32xf32> -> vector<1x32xf32>
    %726 = arith.addf %725, %69 : vector<1x32xf32>
    %cst_254 = arith.constant dense<0.000000e+00> : vector<1x32xf32>
    %727 = tpu.matmul %669, %59, %cst_254 {dimension_numbers = #tpu.dot_dimension_numbers<[1], [0], [0], [1], [0, 0, 1, 1], [], []>} : vector<1x32xf32>, vector<32x32xf32>, vector<1x32xf32> -> vector<1x32xf32>
    %728 = arith.addf %727, %71 : vector<1x32xf32>
    %cst_255 = arith.constant dense<0.000000e+00> : vector<1x32xf32>
    %729 = tpu.matmul %669, %61, %cst_255 {dimension_numbers = #tpu.dot_dimension_numbers<[1], [0], [0], [1], [0, 0, 1, 1], [], []>} : vector<1x32xf32>, vector<32x32xf32>, vector<1x32xf32> -> vector<1x32xf32>
    %730 = arith.addf %729, %73 : vector<1x32xf32>
    %731 = arith.addf %720, %726 : vector<1x32xf32>
    %732 = arith.negf %731 : vector<1x32xf32>
    %733 = math.exp %732 : vector<1x32xf32>
    %cst_256 = arith.constant 1.000000e+00 : f32
    %734 = vector.broadcast %cst_256 : f32 to vector<1x32xf32>
    %735 = arith.addf %734, %733 : vector<1x32xf32>
    %736 = arith.divf %734, %735 : vector<1x32xf32>
    %737 = arith.addf %722, %728 : vector<1x32xf32>
    %738 = arith.negf %737 : vector<1x32xf32>
    %739 = math.exp %738 : vector<1x32xf32>
    %cst_257 = arith.constant 1.000000e+00 : f32
    %740 = vector.broadcast %cst_257 : f32 to vector<1x32xf32>
    %741 = arith.addf %740, %739 : vector<1x32xf32>
    %742 = arith.divf %740, %741 : vector<1x32xf32>
    %743 = arith.mulf %736, %730 : vector<1x32xf32>
    %744 = arith.addf %724, %743 : vector<1x32xf32>
    %745 = math.tanh %744 : vector<1x32xf32>
    %cst_258 = arith.constant 1.000000e+00 : f32
    %746 = vector.broadcast %cst_258 : f32 to vector<1x32xf32>
    %747 = arith.subf %746, %742 : vector<1x32xf32>
    %748 = arith.mulf %747, %745 : vector<1x32xf32>
    %749 = arith.mulf %742, %669 : vector<1x32xf32>
    %750 = arith.addf %748, %749 : vector<1x32xf32>
    %cst_259 = arith.constant dense<0.000000e+00> : vector<1x8xf32>
    %751 = tpu.matmul %750, %628, %cst_259 {dimension_numbers = #tpu.dot_dimension_numbers<[1], [1], [0], [0], [0, 0, 1, 0], [], []>} : vector<1x32xf32>, vector<8x32xf32>, vector<1x8xf32> -> vector<1x8xf32>
    %cst_260 = arith.constant dense<0xFF800000> : vector<1xf32>
    %752 = vector.multi_reduction <maximumf>, %751, %cst_260 [1] : vector<1x8xf32> to vector<1xf32>
    %753 = vector.shape_cast %752 : vector<1xf32> to vector<1x1xf32>
    %754 = vector.broadcast %753 : vector<1x1xf32> to vector<1x8xf32>
    %755 = arith.subf %751, %754 : vector<1x8xf32>
    %756 = math.exp %755 : vector<1x8xf32>
    %cst_261 = arith.constant dense<0.000000e+00> : vector<1xf32>
    %757 = vector.multi_reduction <add>, %756, %cst_261 [1] : vector<1x8xf32> to vector<1xf32>
    %758 = vector.shape_cast %757 : vector<1xf32> to vector<1x1xf32>
    %759 = tpu.reciprocal %758 {approx = true} : vector<1x1xf32> -> vector<1x1xf32>
    %760 = vector.broadcast %759 : vector<1x1xf32> to vector<1x8xf32>
    %761 = arith.mulf %756, %760 : vector<1x8xf32>
    %cst_262 = arith.constant dense<0.000000e+00> : vector<1x32xf32>
    %762 = tpu.matmul %761, %628, %cst_262 {dimension_numbers = #tpu.dot_dimension_numbers<[1], [0], [0], [1], [0, 0, 1, 1], [], []>} : vector<1x8xf32>, vector<8x32xf32>, vector<1x32xf32> -> vector<1x32xf32>
    %cst_263 = arith.constant dense<0.000000e+00> : vector<1x32xf32>
    %763 = tpu.matmul %750, %74, %cst_263 {dimension_numbers = #tpu.dot_dimension_numbers<[1], [0], [0], [1], [0, 0, 1, 1], [], []>} : vector<1x32xf32>, vector<32x32xf32>, vector<1x32xf32> -> vector<1x32xf32>
    %cst_264 = arith.constant dense<0.000000e+00> : vector<1x32xf32>
    %764 = tpu.matmul %762, %75, %cst_264 {dimension_numbers = #tpu.dot_dimension_numbers<[1], [0], [0], [1], [0, 0, 1, 1], [], []>} : vector<1x32xf32>, vector<32x32xf32>, vector<1x32xf32> -> vector<1x32xf32>
    %765 = arith.addf %763, %764 : vector<1x32xf32>
    %766 = arith.addf %765, %76 : vector<1x32xf32>
    %767 = math.tanh %766 : vector<1x32xf32>
    %cst_265 = arith.constant dense<0.000000e+00> : vector<1x64xf32>
    %768 = tpu.matmul %767, %77, %cst_265 {dimension_numbers = #tpu.dot_dimension_numbers<[1], [0], [0], [1], [0, 0, 1, 1], [], []>} : vector<1x32xf32>, vector<32x64xf32>, vector<1x64xf32> -> vector<1x64xf32>
    %769 = arith.addf %768, %78 : vector<1x64xf32>
    %cst_266 = arith.constant dense<0xFF800000> : vector<1xf32>
    %770 = vector.multi_reduction <maximumf>, %769, %cst_266 [1] : vector<1x64xf32> to vector<1xf32>
    %771 = vector.shape_cast %770 : vector<1xf32> to vector<1x1xf32>
    %772 = vector.broadcast %771 : vector<1x1xf32> to vector<1x64xf32>
    %773 = arith.cmpf oeq, %769, %772 : vector<1x64xf32>
    %c64_i32_267 = arith.constant 64 : i32
    %774 = vector.broadcast %c64_i32_267 : i32 to vector<1x64xi32>
    %775 = arith.select %773, %629, %774 : vector<1x64xi1>, vector<1x64xi32>
    %cst_268 = arith.constant dense<2147483647> : vector<1xi32>
    %776 = vector.multi_reduction <minsi>, %775, %cst_268 [1] : vector<1x64xi32> to vector<1xi32>
    %777 = vector.shape_cast %776 : vector<1xi32> to vector<1x1xi32>
    %778 = vector.broadcast %771 : vector<1x1xf32> to vector<1x64xf32>
    %779 = arith.subf %769, %778 : vector<1x64xf32>
    %780 = math.exp %779 : vector<1x64xf32>
    %cst_269 = arith.constant dense<0.000000e+00> : vector<1xf32>
    %781 = vector.multi_reduction <add>, %780, %cst_269 [1] : vector<1x64xf32> to vector<1xf32>
    %782 = vector.shape_cast %781 : vector<1xf32> to vector<1x1xf32>
    %cst_270 = arith.constant 1.000000e+00 : f32
    %783 = vector.broadcast %cst_270 : f32 to vector<1x1xf32>
    %784 = arith.divf %783, %782 : vector<1x1xf32>
    %c1_i32_271 = arith.constant 1 : i32
    %785 = vector.broadcast %c1_i32_271 : i32 to vector<1x8xi32>
    %786 = arith.cmpi eq, %630, %785 : vector<1x8xi32>
    %787 = vector.shape_cast %777 : vector<1x1xi32> to vector<1x1xi32>
    %788 = vector.broadcast %787 : vector<1x1xi32> to vector<1x8xi32>
    %789 = arith.select %786, %788, %708 : vector<1x8xi1>, vector<1x8xi32>
    %c1_i32_272 = arith.constant 1 : i32
    %790 = vector.broadcast %c1_i32_272 : i32 to vector<1x8xi32>
    %791 = arith.cmpi eq, %630, %790 : vector<1x8xi32>
    %792 = vector.shape_cast %784 : vector<1x1xf32> to vector<1x1xf32>
    %793 = vector.broadcast %792 : vector<1x1xf32> to vector<1x8xf32>
    %794 = arith.select %791, %793, %713 : vector<1x8xi1>, vector<1x8xf32>
    %795 = vector.broadcast %777 : vector<1x1xi32> to vector<1x64xi32>
    %796 = arith.cmpi eq, %629, %795 : vector<1x64xi32>
    %797 = arith.extui %796 : vector<1x64xi1> to vector<1x64xi32>
    %798 = arith.sitofp %797 : vector<1x64xi32> to vector<1x64xf32>
    %cst_273 = arith.constant dense<0.000000e+00> : vector<1x32xf32>
    %799 = tpu.matmul %798, %1, %cst_273 {dimension_numbers = #tpu.dot_dimension_numbers<[1], [0], [0], [1], [0, 0, 1, 1], [], []>} : vector<1x64xf32>, vector<64x32xf32>, vector<1x32xf32> -> vector<1x32xf32>
    %cst_274 = arith.constant dense<0.000000e+00> : vector<1x32xf32>
    %800 = tpu.matmul %799, %51, %cst_274 {dimension_numbers = #tpu.dot_dimension_numbers<[1], [0], [0], [1], [0, 0, 1, 1], [], []>} : vector<1x32xf32>, vector<32x32xf32>, vector<1x32xf32> -> vector<1x32xf32>
    %801 = arith.addf %800, %63 : vector<1x32xf32>
    %cst_275 = arith.constant dense<0.000000e+00> : vector<1x32xf32>
    %802 = tpu.matmul %799, %53, %cst_275 {dimension_numbers = #tpu.dot_dimension_numbers<[1], [0], [0], [1], [0, 0, 1, 1], [], []>} : vector<1x32xf32>, vector<32x32xf32>, vector<1x32xf32> -> vector<1x32xf32>
    %803 = arith.addf %802, %65 : vector<1x32xf32>
    %cst_276 = arith.constant dense<0.000000e+00> : vector<1x32xf32>
    %804 = tpu.matmul %799, %55, %cst_276 {dimension_numbers = #tpu.dot_dimension_numbers<[1], [0], [0], [1], [0, 0, 1, 1], [], []>} : vector<1x32xf32>, vector<32x32xf32>, vector<1x32xf32> -> vector<1x32xf32>
    %805 = arith.addf %804, %67 : vector<1x32xf32>
    %cst_277 = arith.constant dense<0.000000e+00> : vector<1x32xf32>
    %806 = tpu.matmul %750, %57, %cst_277 {dimension_numbers = #tpu.dot_dimension_numbers<[1], [0], [0], [1], [0, 0, 1, 1], [], []>} : vector<1x32xf32>, vector<32x32xf32>, vector<1x32xf32> -> vector<1x32xf32>
    %807 = arith.addf %806, %69 : vector<1x32xf32>
    %cst_278 = arith.constant dense<0.000000e+00> : vector<1x32xf32>
    %808 = tpu.matmul %750, %59, %cst_278 {dimension_numbers = #tpu.dot_dimension_numbers<[1], [0], [0], [1], [0, 0, 1, 1], [], []>} : vector<1x32xf32>, vector<32x32xf32>, vector<1x32xf32> -> vector<1x32xf32>
    %809 = arith.addf %808, %71 : vector<1x32xf32>
    %cst_279 = arith.constant dense<0.000000e+00> : vector<1x32xf32>
    %810 = tpu.matmul %750, %61, %cst_279 {dimension_numbers = #tpu.dot_dimension_numbers<[1], [0], [0], [1], [0, 0, 1, 1], [], []>} : vector<1x32xf32>, vector<32x32xf32>, vector<1x32xf32> -> vector<1x32xf32>
    %811 = arith.addf %810, %73 : vector<1x32xf32>
    %812 = arith.addf %801, %807 : vector<1x32xf32>
    %813 = arith.negf %812 : vector<1x32xf32>
    %814 = math.exp %813 : vector<1x32xf32>
    %cst_280 = arith.constant 1.000000e+00 : f32
    %815 = vector.broadcast %cst_280 : f32 to vector<1x32xf32>
    %816 = arith.addf %815, %814 : vector<1x32xf32>
    %817 = arith.divf %815, %816 : vector<1x32xf32>
    %818 = arith.addf %803, %809 : vector<1x32xf32>
    %819 = arith.negf %818 : vector<1x32xf32>
    %820 = math.exp %819 : vector<1x32xf32>
    %cst_281 = arith.constant 1.000000e+00 : f32
    %821 = vector.broadcast %cst_281 : f32 to vector<1x32xf32>
    %822 = arith.addf %821, %820 : vector<1x32xf32>
    %823 = arith.divf %821, %822 : vector<1x32xf32>
    %824 = arith.mulf %817, %811 : vector<1x32xf32>
    %825 = arith.addf %805, %824 : vector<1x32xf32>
    %826 = math.tanh %825 : vector<1x32xf32>
    %cst_282 = arith.constant 1.000000e+00 : f32
    %827 = vector.broadcast %cst_282 : f32 to vector<1x32xf32>
    %828 = arith.subf %827, %823 : vector<1x32xf32>
    %829 = arith.mulf %828, %826 : vector<1x32xf32>
    %830 = arith.mulf %823, %750 : vector<1x32xf32>
    %831 = arith.addf %829, %830 : vector<1x32xf32>
    %cst_283 = arith.constant dense<0.000000e+00> : vector<1x8xf32>
    %832 = tpu.matmul %831, %628, %cst_283 {dimension_numbers = #tpu.dot_dimension_numbers<[1], [1], [0], [0], [0, 0, 1, 0], [], []>} : vector<1x32xf32>, vector<8x32xf32>, vector<1x8xf32> -> vector<1x8xf32>
    %cst_284 = arith.constant dense<0xFF800000> : vector<1xf32>
    %833 = vector.multi_reduction <maximumf>, %832, %cst_284 [1] : vector<1x8xf32> to vector<1xf32>
    %834 = vector.shape_cast %833 : vector<1xf32> to vector<1x1xf32>
    %835 = vector.broadcast %834 : vector<1x1xf32> to vector<1x8xf32>
    %836 = arith.subf %832, %835 : vector<1x8xf32>
    %837 = math.exp %836 : vector<1x8xf32>
    %cst_285 = arith.constant dense<0.000000e+00> : vector<1xf32>
    %838 = vector.multi_reduction <add>, %837, %cst_285 [1] : vector<1x8xf32> to vector<1xf32>
    %839 = vector.shape_cast %838 : vector<1xf32> to vector<1x1xf32>
    %840 = tpu.reciprocal %839 {approx = true} : vector<1x1xf32> -> vector<1x1xf32>
    %841 = vector.broadcast %840 : vector<1x1xf32> to vector<1x8xf32>
    %842 = arith.mulf %837, %841 : vector<1x8xf32>
    %cst_286 = arith.constant dense<0.000000e+00> : vector<1x32xf32>
    %843 = tpu.matmul %842, %628, %cst_286 {dimension_numbers = #tpu.dot_dimension_numbers<[1], [0], [0], [1], [0, 0, 1, 1], [], []>} : vector<1x8xf32>, vector<8x32xf32>, vector<1x32xf32> -> vector<1x32xf32>
    %cst_287 = arith.constant dense<0.000000e+00> : vector<1x32xf32>
    %844 = tpu.matmul %831, %74, %cst_287 {dimension_numbers = #tpu.dot_dimension_numbers<[1], [0], [0], [1], [0, 0, 1, 1], [], []>} : vector<1x32xf32>, vector<32x32xf32>, vector<1x32xf32> -> vector<1x32xf32>
    %cst_288 = arith.constant dense<0.000000e+00> : vector<1x32xf32>
    %845 = tpu.matmul %843, %75, %cst_288 {dimension_numbers = #tpu.dot_dimension_numbers<[1], [0], [0], [1], [0, 0, 1, 1], [], []>} : vector<1x32xf32>, vector<32x32xf32>, vector<1x32xf32> -> vector<1x32xf32>
    %846 = arith.addf %844, %845 : vector<1x32xf32>
    %847 = arith.addf %846, %76 : vector<1x32xf32>
    %848 = math.tanh %847 : vector<1x32xf32>
    %cst_289 = arith.constant dense<0.000000e+00> : vector<1x64xf32>
    %849 = tpu.matmul %848, %77, %cst_289 {dimension_numbers = #tpu.dot_dimension_numbers<[1], [0], [0], [1], [0, 0, 1, 1], [], []>} : vector<1x32xf32>, vector<32x64xf32>, vector<1x64xf32> -> vector<1x64xf32>
    %850 = arith.addf %849, %78 : vector<1x64xf32>
    %cst_290 = arith.constant dense<0xFF800000> : vector<1xf32>
    %851 = vector.multi_reduction <maximumf>, %850, %cst_290 [1] : vector<1x64xf32> to vector<1xf32>
    %852 = vector.shape_cast %851 : vector<1xf32> to vector<1x1xf32>
    %853 = vector.broadcast %852 : vector<1x1xf32> to vector<1x64xf32>
    %854 = arith.cmpf oeq, %850, %853 : vector<1x64xf32>
    %c64_i32_291 = arith.constant 64 : i32
    %855 = vector.broadcast %c64_i32_291 : i32 to vector<1x64xi32>
    %856 = arith.select %854, %629, %855 : vector<1x64xi1>, vector<1x64xi32>
    %cst_292 = arith.constant dense<2147483647> : vector<1xi32>
    %857 = vector.multi_reduction <minsi>, %856, %cst_292 [1] : vector<1x64xi32> to vector<1xi32>
    %858 = vector.shape_cast %857 : vector<1xi32> to vector<1x1xi32>
    %859 = vector.broadcast %852 : vector<1x1xf32> to vector<1x64xf32>
    %860 = arith.subf %850, %859 : vector<1x64xf32>
    %861 = math.exp %860 : vector<1x64xf32>
    %cst_293 = arith.constant dense<0.000000e+00> : vector<1xf32>
    %862 = vector.multi_reduction <add>, %861, %cst_293 [1] : vector<1x64xf32> to vector<1xf32>
    %863 = vector.shape_cast %862 : vector<1xf32> to vector<1x1xf32>
    %cst_294 = arith.constant 1.000000e+00 : f32
    %864 = vector.broadcast %cst_294 : f32 to vector<1x1xf32>
    %865 = arith.divf %864, %863 : vector<1x1xf32>
    %c2_i32_295 = arith.constant 2 : i32
    %866 = vector.broadcast %c2_i32_295 : i32 to vector<1x8xi32>
    %867 = arith.cmpi eq, %630, %866 : vector<1x8xi32>
    %868 = vector.shape_cast %858 : vector<1x1xi32> to vector<1x1xi32>
    %869 = vector.broadcast %868 : vector<1x1xi32> to vector<1x8xi32>
    %870 = arith.select %867, %869, %789 : vector<1x8xi1>, vector<1x8xi32>
    %c2_i32_296 = arith.constant 2 : i32
    %871 = vector.broadcast %c2_i32_296 : i32 to vector<1x8xi32>
    %872 = arith.cmpi eq, %630, %871 : vector<1x8xi32>
    %873 = vector.shape_cast %865 : vector<1x1xf32> to vector<1x1xf32>
    %874 = vector.broadcast %873 : vector<1x1xf32> to vector<1x8xf32>
    %875 = arith.select %872, %874, %794 : vector<1x8xi1>, vector<1x8xf32>
    %876 = vector.broadcast %858 : vector<1x1xi32> to vector<1x64xi32>
    %877 = arith.cmpi eq, %629, %876 : vector<1x64xi32>
    %878 = arith.extui %877 : vector<1x64xi1> to vector<1x64xi32>
    %879 = arith.sitofp %878 : vector<1x64xi32> to vector<1x64xf32>
    %cst_297 = arith.constant dense<0.000000e+00> : vector<1x32xf32>
    %880 = tpu.matmul %879, %1, %cst_297 {dimension_numbers = #tpu.dot_dimension_numbers<[1], [0], [0], [1], [0, 0, 1, 1], [], []>} : vector<1x64xf32>, vector<64x32xf32>, vector<1x32xf32> -> vector<1x32xf32>
    %cst_298 = arith.constant dense<0.000000e+00> : vector<1x32xf32>
    %881 = tpu.matmul %880, %51, %cst_298 {dimension_numbers = #tpu.dot_dimension_numbers<[1], [0], [0], [1], [0, 0, 1, 1], [], []>} : vector<1x32xf32>, vector<32x32xf32>, vector<1x32xf32> -> vector<1x32xf32>
    %882 = arith.addf %881, %63 : vector<1x32xf32>
    %cst_299 = arith.constant dense<0.000000e+00> : vector<1x32xf32>
    %883 = tpu.matmul %880, %53, %cst_299 {dimension_numbers = #tpu.dot_dimension_numbers<[1], [0], [0], [1], [0, 0, 1, 1], [], []>} : vector<1x32xf32>, vector<32x32xf32>, vector<1x32xf32> -> vector<1x32xf32>
    %884 = arith.addf %883, %65 : vector<1x32xf32>
    %cst_300 = arith.constant dense<0.000000e+00> : vector<1x32xf32>
    %885 = tpu.matmul %880, %55, %cst_300 {dimension_numbers = #tpu.dot_dimension_numbers<[1], [0], [0], [1], [0, 0, 1, 1], [], []>} : vector<1x32xf32>, vector<32x32xf32>, vector<1x32xf32> -> vector<1x32xf32>
    %886 = arith.addf %885, %67 : vector<1x32xf32>
    %cst_301 = arith.constant dense<0.000000e+00> : vector<1x32xf32>
    %887 = tpu.matmul %831, %57, %cst_301 {dimension_numbers = #tpu.dot_dimension_numbers<[1], [0], [0], [1], [0, 0, 1, 1], [], []>} : vector<1x32xf32>, vector<32x32xf32>, vector<1x32xf32> -> vector<1x32xf32>
    %888 = arith.addf %887, %69 : vector<1x32xf32>
    %cst_302 = arith.constant dense<0.000000e+00> : vector<1x32xf32>
    %889 = tpu.matmul %831, %59, %cst_302 {dimension_numbers = #tpu.dot_dimension_numbers<[1], [0], [0], [1], [0, 0, 1, 1], [], []>} : vector<1x32xf32>, vector<32x32xf32>, vector<1x32xf32> -> vector<1x32xf32>
    %890 = arith.addf %889, %71 : vector<1x32xf32>
    %cst_303 = arith.constant dense<0.000000e+00> : vector<1x32xf32>
    %891 = tpu.matmul %831, %61, %cst_303 {dimension_numbers = #tpu.dot_dimension_numbers<[1], [0], [0], [1], [0, 0, 1, 1], [], []>} : vector<1x32xf32>, vector<32x32xf32>, vector<1x32xf32> -> vector<1x32xf32>
    %892 = arith.addf %891, %73 : vector<1x32xf32>
    %893 = arith.addf %882, %888 : vector<1x32xf32>
    %894 = arith.negf %893 : vector<1x32xf32>
    %895 = math.exp %894 : vector<1x32xf32>
    %cst_304 = arith.constant 1.000000e+00 : f32
    %896 = vector.broadcast %cst_304 : f32 to vector<1x32xf32>
    %897 = arith.addf %896, %895 : vector<1x32xf32>
    %898 = arith.divf %896, %897 : vector<1x32xf32>
    %899 = arith.addf %884, %890 : vector<1x32xf32>
    %900 = arith.negf %899 : vector<1x32xf32>
    %901 = math.exp %900 : vector<1x32xf32>
    %cst_305 = arith.constant 1.000000e+00 : f32
    %902 = vector.broadcast %cst_305 : f32 to vector<1x32xf32>
    %903 = arith.addf %902, %901 : vector<1x32xf32>
    %904 = arith.divf %902, %903 : vector<1x32xf32>
    %905 = arith.mulf %898, %892 : vector<1x32xf32>
    %906 = arith.addf %886, %905 : vector<1x32xf32>
    %907 = math.tanh %906 : vector<1x32xf32>
    %cst_306 = arith.constant 1.000000e+00 : f32
    %908 = vector.broadcast %cst_306 : f32 to vector<1x32xf32>
    %909 = arith.subf %908, %904 : vector<1x32xf32>
    %910 = arith.mulf %909, %907 : vector<1x32xf32>
    %911 = arith.mulf %904, %831 : vector<1x32xf32>
    %912 = arith.addf %910, %911 : vector<1x32xf32>
    %cst_307 = arith.constant dense<0.000000e+00> : vector<1x8xf32>
    %913 = tpu.matmul %912, %628, %cst_307 {dimension_numbers = #tpu.dot_dimension_numbers<[1], [1], [0], [0], [0, 0, 1, 0], [], []>} : vector<1x32xf32>, vector<8x32xf32>, vector<1x8xf32> -> vector<1x8xf32>
    %cst_308 = arith.constant dense<0xFF800000> : vector<1xf32>
    %914 = vector.multi_reduction <maximumf>, %913, %cst_308 [1] : vector<1x8xf32> to vector<1xf32>
    %915 = vector.shape_cast %914 : vector<1xf32> to vector<1x1xf32>
    %916 = vector.broadcast %915 : vector<1x1xf32> to vector<1x8xf32>
    %917 = arith.subf %913, %916 : vector<1x8xf32>
    %918 = math.exp %917 : vector<1x8xf32>
    %cst_309 = arith.constant dense<0.000000e+00> : vector<1xf32>
    %919 = vector.multi_reduction <add>, %918, %cst_309 [1] : vector<1x8xf32> to vector<1xf32>
    %920 = vector.shape_cast %919 : vector<1xf32> to vector<1x1xf32>
    %921 = tpu.reciprocal %920 {approx = true} : vector<1x1xf32> -> vector<1x1xf32>
    %922 = vector.broadcast %921 : vector<1x1xf32> to vector<1x8xf32>
    %923 = arith.mulf %918, %922 : vector<1x8xf32>
    %cst_310 = arith.constant dense<0.000000e+00> : vector<1x32xf32>
    %924 = tpu.matmul %923, %628, %cst_310 {dimension_numbers = #tpu.dot_dimension_numbers<[1], [0], [0], [1], [0, 0, 1, 1], [], []>} : vector<1x8xf32>, vector<8x32xf32>, vector<1x32xf32> -> vector<1x32xf32>
    %cst_311 = arith.constant dense<0.000000e+00> : vector<1x32xf32>
    %925 = tpu.matmul %912, %74, %cst_311 {dimension_numbers = #tpu.dot_dimension_numbers<[1], [0], [0], [1], [0, 0, 1, 1], [], []>} : vector<1x32xf32>, vector<32x32xf32>, vector<1x32xf32> -> vector<1x32xf32>
    %cst_312 = arith.constant dense<0.000000e+00> : vector<1x32xf32>
    %926 = tpu.matmul %924, %75, %cst_312 {dimension_numbers = #tpu.dot_dimension_numbers<[1], [0], [0], [1], [0, 0, 1, 1], [], []>} : vector<1x32xf32>, vector<32x32xf32>, vector<1x32xf32> -> vector<1x32xf32>
    %927 = arith.addf %925, %926 : vector<1x32xf32>
    %928 = arith.addf %927, %76 : vector<1x32xf32>
    %929 = math.tanh %928 : vector<1x32xf32>
    %cst_313 = arith.constant dense<0.000000e+00> : vector<1x64xf32>
    %930 = tpu.matmul %929, %77, %cst_313 {dimension_numbers = #tpu.dot_dimension_numbers<[1], [0], [0], [1], [0, 0, 1, 1], [], []>} : vector<1x32xf32>, vector<32x64xf32>, vector<1x64xf32> -> vector<1x64xf32>
    %931 = arith.addf %930, %78 : vector<1x64xf32>
    %cst_314 = arith.constant dense<0xFF800000> : vector<1xf32>
    %932 = vector.multi_reduction <maximumf>, %931, %cst_314 [1] : vector<1x64xf32> to vector<1xf32>
    %933 = vector.shape_cast %932 : vector<1xf32> to vector<1x1xf32>
    %934 = vector.broadcast %933 : vector<1x1xf32> to vector<1x64xf32>
    %935 = arith.cmpf oeq, %931, %934 : vector<1x64xf32>
    %c64_i32_315 = arith.constant 64 : i32
    %936 = vector.broadcast %c64_i32_315 : i32 to vector<1x64xi32>
    %937 = arith.select %935, %629, %936 : vector<1x64xi1>, vector<1x64xi32>
    %cst_316 = arith.constant dense<2147483647> : vector<1xi32>
    %938 = vector.multi_reduction <minsi>, %937, %cst_316 [1] : vector<1x64xi32> to vector<1xi32>
    %939 = vector.shape_cast %938 : vector<1xi32> to vector<1x1xi32>
    %940 = vector.broadcast %933 : vector<1x1xf32> to vector<1x64xf32>
    %941 = arith.subf %931, %940 : vector<1x64xf32>
    %942 = math.exp %941 : vector<1x64xf32>
    %cst_317 = arith.constant dense<0.000000e+00> : vector<1xf32>
    %943 = vector.multi_reduction <add>, %942, %cst_317 [1] : vector<1x64xf32> to vector<1xf32>
    %944 = vector.shape_cast %943 : vector<1xf32> to vector<1x1xf32>
    %cst_318 = arith.constant 1.000000e+00 : f32
    %945 = vector.broadcast %cst_318 : f32 to vector<1x1xf32>
    %946 = arith.divf %945, %944 : vector<1x1xf32>
    %c3_i32_319 = arith.constant 3 : i32
    %947 = vector.broadcast %c3_i32_319 : i32 to vector<1x8xi32>
    %948 = arith.cmpi eq, %630, %947 : vector<1x8xi32>
    %949 = vector.shape_cast %939 : vector<1x1xi32> to vector<1x1xi32>
    %950 = vector.broadcast %949 : vector<1x1xi32> to vector<1x8xi32>
    %951 = arith.select %948, %950, %870 : vector<1x8xi1>, vector<1x8xi32>
    %c3_i32_320 = arith.constant 3 : i32
    %952 = vector.broadcast %c3_i32_320 : i32 to vector<1x8xi32>
    %953 = arith.cmpi eq, %630, %952 : vector<1x8xi32>
    %954 = vector.shape_cast %946 : vector<1x1xf32> to vector<1x1xf32>
    %955 = vector.broadcast %954 : vector<1x1xf32> to vector<1x8xf32>
    %956 = arith.select %953, %955, %875 : vector<1x8xi1>, vector<1x8xf32>
    %957 = vector.broadcast %939 : vector<1x1xi32> to vector<1x64xi32>
    %958 = arith.cmpi eq, %629, %957 : vector<1x64xi32>
    %959 = arith.extui %958 : vector<1x64xi1> to vector<1x64xi32>
    %960 = arith.sitofp %959 : vector<1x64xi32> to vector<1x64xf32>
    %cst_321 = arith.constant dense<0.000000e+00> : vector<1x32xf32>
    %961 = tpu.matmul %960, %1, %cst_321 {dimension_numbers = #tpu.dot_dimension_numbers<[1], [0], [0], [1], [0, 0, 1, 1], [], []>} : vector<1x64xf32>, vector<64x32xf32>, vector<1x32xf32> -> vector<1x32xf32>
    %cst_322 = arith.constant dense<0.000000e+00> : vector<1x32xf32>
    %962 = tpu.matmul %961, %51, %cst_322 {dimension_numbers = #tpu.dot_dimension_numbers<[1], [0], [0], [1], [0, 0, 1, 1], [], []>} : vector<1x32xf32>, vector<32x32xf32>, vector<1x32xf32> -> vector<1x32xf32>
    %963 = arith.addf %962, %63 : vector<1x32xf32>
    %cst_323 = arith.constant dense<0.000000e+00> : vector<1x32xf32>
    %964 = tpu.matmul %961, %53, %cst_323 {dimension_numbers = #tpu.dot_dimension_numbers<[1], [0], [0], [1], [0, 0, 1, 1], [], []>} : vector<1x32xf32>, vector<32x32xf32>, vector<1x32xf32> -> vector<1x32xf32>
    %965 = arith.addf %964, %65 : vector<1x32xf32>
    %cst_324 = arith.constant dense<0.000000e+00> : vector<1x32xf32>
    %966 = tpu.matmul %961, %55, %cst_324 {dimension_numbers = #tpu.dot_dimension_numbers<[1], [0], [0], [1], [0, 0, 1, 1], [], []>} : vector<1x32xf32>, vector<32x32xf32>, vector<1x32xf32> -> vector<1x32xf32>
    %967 = arith.addf %966, %67 : vector<1x32xf32>
    %cst_325 = arith.constant dense<0.000000e+00> : vector<1x32xf32>
    %968 = tpu.matmul %912, %57, %cst_325 {dimension_numbers = #tpu.dot_dimension_numbers<[1], [0], [0], [1], [0, 0, 1, 1], [], []>} : vector<1x32xf32>, vector<32x32xf32>, vector<1x32xf32> -> vector<1x32xf32>
    %969 = arith.addf %968, %69 : vector<1x32xf32>
    %cst_326 = arith.constant dense<0.000000e+00> : vector<1x32xf32>
    %970 = tpu.matmul %912, %59, %cst_326 {dimension_numbers = #tpu.dot_dimension_numbers<[1], [0], [0], [1], [0, 0, 1, 1], [], []>} : vector<1x32xf32>, vector<32x32xf32>, vector<1x32xf32> -> vector<1x32xf32>
    %971 = arith.addf %970, %71 : vector<1x32xf32>
    %cst_327 = arith.constant dense<0.000000e+00> : vector<1x32xf32>
    %972 = tpu.matmul %912, %61, %cst_327 {dimension_numbers = #tpu.dot_dimension_numbers<[1], [0], [0], [1], [0, 0, 1, 1], [], []>} : vector<1x32xf32>, vector<32x32xf32>, vector<1x32xf32> -> vector<1x32xf32>
    %973 = arith.addf %972, %73 : vector<1x32xf32>
    %974 = arith.addf %963, %969 : vector<1x32xf32>
    %975 = arith.negf %974 : vector<1x32xf32>
    %976 = math.exp %975 : vector<1x32xf32>
    %cst_328 = arith.constant 1.000000e+00 : f32
    %977 = vector.broadcast %cst_328 : f32 to vector<1x32xf32>
    %978 = arith.addf %977, %976 : vector<1x32xf32>
    %979 = arith.divf %977, %978 : vector<1x32xf32>
    %980 = arith.addf %965, %971 : vector<1x32xf32>
    %981 = arith.negf %980 : vector<1x32xf32>
    %982 = math.exp %981 : vector<1x32xf32>
    %cst_329 = arith.constant 1.000000e+00 : f32
    %983 = vector.broadcast %cst_329 : f32 to vector<1x32xf32>
    %984 = arith.addf %983, %982 : vector<1x32xf32>
    %985 = arith.divf %983, %984 : vector<1x32xf32>
    %986 = arith.mulf %979, %973 : vector<1x32xf32>
    %987 = arith.addf %967, %986 : vector<1x32xf32>
    %988 = math.tanh %987 : vector<1x32xf32>
    %cst_330 = arith.constant 1.000000e+00 : f32
    %989 = vector.broadcast %cst_330 : f32 to vector<1x32xf32>
    %990 = arith.subf %989, %985 : vector<1x32xf32>
    %991 = arith.mulf %990, %988 : vector<1x32xf32>
    %992 = arith.mulf %985, %912 : vector<1x32xf32>
    %993 = arith.addf %991, %992 : vector<1x32xf32>
    %cst_331 = arith.constant dense<0.000000e+00> : vector<1x8xf32>
    %994 = tpu.matmul %993, %628, %cst_331 {dimension_numbers = #tpu.dot_dimension_numbers<[1], [1], [0], [0], [0, 0, 1, 0], [], []>} : vector<1x32xf32>, vector<8x32xf32>, vector<1x8xf32> -> vector<1x8xf32>
    %cst_332 = arith.constant dense<0xFF800000> : vector<1xf32>
    %995 = vector.multi_reduction <maximumf>, %994, %cst_332 [1] : vector<1x8xf32> to vector<1xf32>
    %996 = vector.shape_cast %995 : vector<1xf32> to vector<1x1xf32>
    %997 = vector.broadcast %996 : vector<1x1xf32> to vector<1x8xf32>
    %998 = arith.subf %994, %997 : vector<1x8xf32>
    %999 = math.exp %998 : vector<1x8xf32>
    %cst_333 = arith.constant dense<0.000000e+00> : vector<1xf32>
    %1000 = vector.multi_reduction <add>, %999, %cst_333 [1] : vector<1x8xf32> to vector<1xf32>
    %1001 = vector.shape_cast %1000 : vector<1xf32> to vector<1x1xf32>
    %1002 = tpu.reciprocal %1001 {approx = true} : vector<1x1xf32> -> vector<1x1xf32>
    %1003 = vector.broadcast %1002 : vector<1x1xf32> to vector<1x8xf32>
    %1004 = arith.mulf %999, %1003 : vector<1x8xf32>
    %cst_334 = arith.constant dense<0.000000e+00> : vector<1x32xf32>
    %1005 = tpu.matmul %1004, %628, %cst_334 {dimension_numbers = #tpu.dot_dimension_numbers<[1], [0], [0], [1], [0, 0, 1, 1], [], []>} : vector<1x8xf32>, vector<8x32xf32>, vector<1x32xf32> -> vector<1x32xf32>
    %cst_335 = arith.constant dense<0.000000e+00> : vector<1x32xf32>
    %1006 = tpu.matmul %993, %74, %cst_335 {dimension_numbers = #tpu.dot_dimension_numbers<[1], [0], [0], [1], [0, 0, 1, 1], [], []>} : vector<1x32xf32>, vector<32x32xf32>, vector<1x32xf32> -> vector<1x32xf32>
    %cst_336 = arith.constant dense<0.000000e+00> : vector<1x32xf32>
    %1007 = tpu.matmul %1005, %75, %cst_336 {dimension_numbers = #tpu.dot_dimension_numbers<[1], [0], [0], [1], [0, 0, 1, 1], [], []>} : vector<1x32xf32>, vector<32x32xf32>, vector<1x32xf32> -> vector<1x32xf32>
    %1008 = arith.addf %1006, %1007 : vector<1x32xf32>
    %1009 = arith.addf %1008, %76 : vector<1x32xf32>
    %1010 = math.tanh %1009 : vector<1x32xf32>
    %cst_337 = arith.constant dense<0.000000e+00> : vector<1x64xf32>
    %1011 = tpu.matmul %1010, %77, %cst_337 {dimension_numbers = #tpu.dot_dimension_numbers<[1], [0], [0], [1], [0, 0, 1, 1], [], []>} : vector<1x32xf32>, vector<32x64xf32>, vector<1x64xf32> -> vector<1x64xf32>
    %1012 = arith.addf %1011, %78 : vector<1x64xf32>
    %cst_338 = arith.constant dense<0xFF800000> : vector<1xf32>
    %1013 = vector.multi_reduction <maximumf>, %1012, %cst_338 [1] : vector<1x64xf32> to vector<1xf32>
    %1014 = vector.shape_cast %1013 : vector<1xf32> to vector<1x1xf32>
    %1015 = vector.broadcast %1014 : vector<1x1xf32> to vector<1x64xf32>
    %1016 = arith.cmpf oeq, %1012, %1015 : vector<1x64xf32>
    %c64_i32_339 = arith.constant 64 : i32
    %1017 = vector.broadcast %c64_i32_339 : i32 to vector<1x64xi32>
    %1018 = arith.select %1016, %629, %1017 : vector<1x64xi1>, vector<1x64xi32>
    %cst_340 = arith.constant dense<2147483647> : vector<1xi32>
    %1019 = vector.multi_reduction <minsi>, %1018, %cst_340 [1] : vector<1x64xi32> to vector<1xi32>
    %1020 = vector.shape_cast %1019 : vector<1xi32> to vector<1x1xi32>
    %1021 = vector.broadcast %1014 : vector<1x1xf32> to vector<1x64xf32>
    %1022 = arith.subf %1012, %1021 : vector<1x64xf32>
    %1023 = math.exp %1022 : vector<1x64xf32>
    %cst_341 = arith.constant dense<0.000000e+00> : vector<1xf32>
    %1024 = vector.multi_reduction <add>, %1023, %cst_341 [1] : vector<1x64xf32> to vector<1xf32>
    %1025 = vector.shape_cast %1024 : vector<1xf32> to vector<1x1xf32>
    %cst_342 = arith.constant 1.000000e+00 : f32
    %1026 = vector.broadcast %cst_342 : f32 to vector<1x1xf32>
    %1027 = arith.divf %1026, %1025 : vector<1x1xf32>
    %c4_i32_343 = arith.constant 4 : i32
    %1028 = vector.broadcast %c4_i32_343 : i32 to vector<1x8xi32>
    %1029 = arith.cmpi eq, %630, %1028 : vector<1x8xi32>
    %1030 = vector.shape_cast %1020 : vector<1x1xi32> to vector<1x1xi32>
    %1031 = vector.broadcast %1030 : vector<1x1xi32> to vector<1x8xi32>
    %1032 = arith.select %1029, %1031, %951 : vector<1x8xi1>, vector<1x8xi32>
    %c4_i32_344 = arith.constant 4 : i32
    %1033 = vector.broadcast %c4_i32_344 : i32 to vector<1x8xi32>
    %1034 = arith.cmpi eq, %630, %1033 : vector<1x8xi32>
    %1035 = vector.shape_cast %1027 : vector<1x1xf32> to vector<1x1xf32>
    %1036 = vector.broadcast %1035 : vector<1x1xf32> to vector<1x8xf32>
    %1037 = arith.select %1034, %1036, %956 : vector<1x8xi1>, vector<1x8xf32>
    %1038 = vector.broadcast %1020 : vector<1x1xi32> to vector<1x64xi32>
    %1039 = arith.cmpi eq, %629, %1038 : vector<1x64xi32>
    %1040 = arith.extui %1039 : vector<1x64xi1> to vector<1x64xi32>
    %1041 = arith.sitofp %1040 : vector<1x64xi32> to vector<1x64xf32>
    %cst_345 = arith.constant dense<0.000000e+00> : vector<1x32xf32>
    %1042 = tpu.matmul %1041, %1, %cst_345 {dimension_numbers = #tpu.dot_dimension_numbers<[1], [0], [0], [1], [0, 0, 1, 1], [], []>} : vector<1x64xf32>, vector<64x32xf32>, vector<1x32xf32> -> vector<1x32xf32>
    %cst_346 = arith.constant dense<0.000000e+00> : vector<1x32xf32>
    %1043 = tpu.matmul %1042, %51, %cst_346 {dimension_numbers = #tpu.dot_dimension_numbers<[1], [0], [0], [1], [0, 0, 1, 1], [], []>} : vector<1x32xf32>, vector<32x32xf32>, vector<1x32xf32> -> vector<1x32xf32>
    %1044 = arith.addf %1043, %63 : vector<1x32xf32>
    %cst_347 = arith.constant dense<0.000000e+00> : vector<1x32xf32>
    %1045 = tpu.matmul %1042, %53, %cst_347 {dimension_numbers = #tpu.dot_dimension_numbers<[1], [0], [0], [1], [0, 0, 1, 1], [], []>} : vector<1x32xf32>, vector<32x32xf32>, vector<1x32xf32> -> vector<1x32xf32>
    %1046 = arith.addf %1045, %65 : vector<1x32xf32>
    %cst_348 = arith.constant dense<0.000000e+00> : vector<1x32xf32>
    %1047 = tpu.matmul %1042, %55, %cst_348 {dimension_numbers = #tpu.dot_dimension_numbers<[1], [0], [0], [1], [0, 0, 1, 1], [], []>} : vector<1x32xf32>, vector<32x32xf32>, vector<1x32xf32> -> vector<1x32xf32>
    %1048 = arith.addf %1047, %67 : vector<1x32xf32>
    %cst_349 = arith.constant dense<0.000000e+00> : vector<1x32xf32>
    %1049 = tpu.matmul %993, %57, %cst_349 {dimension_numbers = #tpu.dot_dimension_numbers<[1], [0], [0], [1], [0, 0, 1, 1], [], []>} : vector<1x32xf32>, vector<32x32xf32>, vector<1x32xf32> -> vector<1x32xf32>
    %1050 = arith.addf %1049, %69 : vector<1x32xf32>
    %cst_350 = arith.constant dense<0.000000e+00> : vector<1x32xf32>
    %1051 = tpu.matmul %993, %59, %cst_350 {dimension_numbers = #tpu.dot_dimension_numbers<[1], [0], [0], [1], [0, 0, 1, 1], [], []>} : vector<1x32xf32>, vector<32x32xf32>, vector<1x32xf32> -> vector<1x32xf32>
    %1052 = arith.addf %1051, %71 : vector<1x32xf32>
    %cst_351 = arith.constant dense<0.000000e+00> : vector<1x32xf32>
    %1053 = tpu.matmul %993, %61, %cst_351 {dimension_numbers = #tpu.dot_dimension_numbers<[1], [0], [0], [1], [0, 0, 1, 1], [], []>} : vector<1x32xf32>, vector<32x32xf32>, vector<1x32xf32> -> vector<1x32xf32>
    %1054 = arith.addf %1053, %73 : vector<1x32xf32>
    %1055 = arith.addf %1044, %1050 : vector<1x32xf32>
    %1056 = arith.negf %1055 : vector<1x32xf32>
    %1057 = math.exp %1056 : vector<1x32xf32>
    %cst_352 = arith.constant 1.000000e+00 : f32
    %1058 = vector.broadcast %cst_352 : f32 to vector<1x32xf32>
    %1059 = arith.addf %1058, %1057 : vector<1x32xf32>
    %1060 = arith.divf %1058, %1059 : vector<1x32xf32>
    %1061 = arith.addf %1046, %1052 : vector<1x32xf32>
    %1062 = arith.negf %1061 : vector<1x32xf32>
    %1063 = math.exp %1062 : vector<1x32xf32>
    %cst_353 = arith.constant 1.000000e+00 : f32
    %1064 = vector.broadcast %cst_353 : f32 to vector<1x32xf32>
    %1065 = arith.addf %1064, %1063 : vector<1x32xf32>
    %1066 = arith.divf %1064, %1065 : vector<1x32xf32>
    %1067 = arith.mulf %1060, %1054 : vector<1x32xf32>
    %1068 = arith.addf %1048, %1067 : vector<1x32xf32>
    %1069 = math.tanh %1068 : vector<1x32xf32>
    %cst_354 = arith.constant 1.000000e+00 : f32
    %1070 = vector.broadcast %cst_354 : f32 to vector<1x32xf32>
    %1071 = arith.subf %1070, %1066 : vector<1x32xf32>
    %1072 = arith.mulf %1071, %1069 : vector<1x32xf32>
    %1073 = arith.mulf %1066, %993 : vector<1x32xf32>
    %1074 = arith.addf %1072, %1073 : vector<1x32xf32>
    %cst_355 = arith.constant dense<0.000000e+00> : vector<1x8xf32>
    %1075 = tpu.matmul %1074, %628, %cst_355 {dimension_numbers = #tpu.dot_dimension_numbers<[1], [1], [0], [0], [0, 0, 1, 0], [], []>} : vector<1x32xf32>, vector<8x32xf32>, vector<1x8xf32> -> vector<1x8xf32>
    %cst_356 = arith.constant dense<0xFF800000> : vector<1xf32>
    %1076 = vector.multi_reduction <maximumf>, %1075, %cst_356 [1] : vector<1x8xf32> to vector<1xf32>
    %1077 = vector.shape_cast %1076 : vector<1xf32> to vector<1x1xf32>
    %1078 = vector.broadcast %1077 : vector<1x1xf32> to vector<1x8xf32>
    %1079 = arith.subf %1075, %1078 : vector<1x8xf32>
    %1080 = math.exp %1079 : vector<1x8xf32>
    %cst_357 = arith.constant dense<0.000000e+00> : vector<1xf32>
    %1081 = vector.multi_reduction <add>, %1080, %cst_357 [1] : vector<1x8xf32> to vector<1xf32>
    %1082 = vector.shape_cast %1081 : vector<1xf32> to vector<1x1xf32>
    %1083 = tpu.reciprocal %1082 {approx = true} : vector<1x1xf32> -> vector<1x1xf32>
    %1084 = vector.broadcast %1083 : vector<1x1xf32> to vector<1x8xf32>
    %1085 = arith.mulf %1080, %1084 : vector<1x8xf32>
    %cst_358 = arith.constant dense<0.000000e+00> : vector<1x32xf32>
    %1086 = tpu.matmul %1085, %628, %cst_358 {dimension_numbers = #tpu.dot_dimension_numbers<[1], [0], [0], [1], [0, 0, 1, 1], [], []>} : vector<1x8xf32>, vector<8x32xf32>, vector<1x32xf32> -> vector<1x32xf32>
    %cst_359 = arith.constant dense<0.000000e+00> : vector<1x32xf32>
    %1087 = tpu.matmul %1074, %74, %cst_359 {dimension_numbers = #tpu.dot_dimension_numbers<[1], [0], [0], [1], [0, 0, 1, 1], [], []>} : vector<1x32xf32>, vector<32x32xf32>, vector<1x32xf32> -> vector<1x32xf32>
    %cst_360 = arith.constant dense<0.000000e+00> : vector<1x32xf32>
    %1088 = tpu.matmul %1086, %75, %cst_360 {dimension_numbers = #tpu.dot_dimension_numbers<[1], [0], [0], [1], [0, 0, 1, 1], [], []>} : vector<1x32xf32>, vector<32x32xf32>, vector<1x32xf32> -> vector<1x32xf32>
    %1089 = arith.addf %1087, %1088 : vector<1x32xf32>
    %1090 = arith.addf %1089, %76 : vector<1x32xf32>
    %1091 = math.tanh %1090 : vector<1x32xf32>
    %cst_361 = arith.constant dense<0.000000e+00> : vector<1x64xf32>
    %1092 = tpu.matmul %1091, %77, %cst_361 {dimension_numbers = #tpu.dot_dimension_numbers<[1], [0], [0], [1], [0, 0, 1, 1], [], []>} : vector<1x32xf32>, vector<32x64xf32>, vector<1x64xf32> -> vector<1x64xf32>
    %1093 = arith.addf %1092, %78 : vector<1x64xf32>
    %cst_362 = arith.constant dense<0xFF800000> : vector<1xf32>
    %1094 = vector.multi_reduction <maximumf>, %1093, %cst_362 [1] : vector<1x64xf32> to vector<1xf32>
    %1095 = vector.shape_cast %1094 : vector<1xf32> to vector<1x1xf32>
    %1096 = vector.broadcast %1095 : vector<1x1xf32> to vector<1x64xf32>
    %1097 = arith.cmpf oeq, %1093, %1096 : vector<1x64xf32>
    %c64_i32_363 = arith.constant 64 : i32
    %1098 = vector.broadcast %c64_i32_363 : i32 to vector<1x64xi32>
    %1099 = arith.select %1097, %629, %1098 : vector<1x64xi1>, vector<1x64xi32>
    %cst_364 = arith.constant dense<2147483647> : vector<1xi32>
    %1100 = vector.multi_reduction <minsi>, %1099, %cst_364 [1] : vector<1x64xi32> to vector<1xi32>
    %1101 = vector.shape_cast %1100 : vector<1xi32> to vector<1x1xi32>
    %1102 = vector.broadcast %1095 : vector<1x1xf32> to vector<1x64xf32>
    %1103 = arith.subf %1093, %1102 : vector<1x64xf32>
    %1104 = math.exp %1103 : vector<1x64xf32>
    %cst_365 = arith.constant dense<0.000000e+00> : vector<1xf32>
    %1105 = vector.multi_reduction <add>, %1104, %cst_365 [1] : vector<1x64xf32> to vector<1xf32>
    %1106 = vector.shape_cast %1105 : vector<1xf32> to vector<1x1xf32>
    %cst_366 = arith.constant 1.000000e+00 : f32
    %1107 = vector.broadcast %cst_366 : f32 to vector<1x1xf32>
    %1108 = arith.divf %1107, %1106 : vector<1x1xf32>
    %c5_i32_367 = arith.constant 5 : i32
    %1109 = vector.broadcast %c5_i32_367 : i32 to vector<1x8xi32>
    %1110 = arith.cmpi eq, %630, %1109 : vector<1x8xi32>
    %1111 = vector.shape_cast %1101 : vector<1x1xi32> to vector<1x1xi32>
    %1112 = vector.broadcast %1111 : vector<1x1xi32> to vector<1x8xi32>
    %1113 = arith.select %1110, %1112, %1032 : vector<1x8xi1>, vector<1x8xi32>
    %c5_i32_368 = arith.constant 5 : i32
    %1114 = vector.broadcast %c5_i32_368 : i32 to vector<1x8xi32>
    %1115 = arith.cmpi eq, %630, %1114 : vector<1x8xi32>
    %1116 = vector.shape_cast %1108 : vector<1x1xf32> to vector<1x1xf32>
    %1117 = vector.broadcast %1116 : vector<1x1xf32> to vector<1x8xf32>
    %1118 = arith.select %1115, %1117, %1037 : vector<1x8xi1>, vector<1x8xf32>
    %1119 = vector.broadcast %1101 : vector<1x1xi32> to vector<1x64xi32>
    %1120 = arith.cmpi eq, %629, %1119 : vector<1x64xi32>
    %1121 = arith.extui %1120 : vector<1x64xi1> to vector<1x64xi32>
    %1122 = arith.sitofp %1121 : vector<1x64xi32> to vector<1x64xf32>
    %cst_369 = arith.constant dense<0.000000e+00> : vector<1x32xf32>
    %1123 = tpu.matmul %1122, %1, %cst_369 {dimension_numbers = #tpu.dot_dimension_numbers<[1], [0], [0], [1], [0, 0, 1, 1], [], []>} : vector<1x64xf32>, vector<64x32xf32>, vector<1x32xf32> -> vector<1x32xf32>
    %cst_370 = arith.constant dense<0.000000e+00> : vector<1x32xf32>
    %1124 = tpu.matmul %1123, %51, %cst_370 {dimension_numbers = #tpu.dot_dimension_numbers<[1], [0], [0], [1], [0, 0, 1, 1], [], []>} : vector<1x32xf32>, vector<32x32xf32>, vector<1x32xf32> -> vector<1x32xf32>
    %1125 = arith.addf %1124, %63 : vector<1x32xf32>
    %cst_371 = arith.constant dense<0.000000e+00> : vector<1x32xf32>
    %1126 = tpu.matmul %1123, %53, %cst_371 {dimension_numbers = #tpu.dot_dimension_numbers<[1], [0], [0], [1], [0, 0, 1, 1], [], []>} : vector<1x32xf32>, vector<32x32xf32>, vector<1x32xf32> -> vector<1x32xf32>
    %1127 = arith.addf %1126, %65 : vector<1x32xf32>
    %cst_372 = arith.constant dense<0.000000e+00> : vector<1x32xf32>
    %1128 = tpu.matmul %1123, %55, %cst_372 {dimension_numbers = #tpu.dot_dimension_numbers<[1], [0], [0], [1], [0, 0, 1, 1], [], []>} : vector<1x32xf32>, vector<32x32xf32>, vector<1x32xf32> -> vector<1x32xf32>
    %1129 = arith.addf %1128, %67 : vector<1x32xf32>
    %cst_373 = arith.constant dense<0.000000e+00> : vector<1x32xf32>
    %1130 = tpu.matmul %1074, %57, %cst_373 {dimension_numbers = #tpu.dot_dimension_numbers<[1], [0], [0], [1], [0, 0, 1, 1], [], []>} : vector<1x32xf32>, vector<32x32xf32>, vector<1x32xf32> -> vector<1x32xf32>
    %1131 = arith.addf %1130, %69 : vector<1x32xf32>
    %cst_374 = arith.constant dense<0.000000e+00> : vector<1x32xf32>
    %1132 = tpu.matmul %1074, %59, %cst_374 {dimension_numbers = #tpu.dot_dimension_numbers<[1], [0], [0], [1], [0, 0, 1, 1], [], []>} : vector<1x32xf32>, vector<32x32xf32>, vector<1x32xf32> -> vector<1x32xf32>
    %1133 = arith.addf %1132, %71 : vector<1x32xf32>
    %cst_375 = arith.constant dense<0.000000e+00> : vector<1x32xf32>
    %1134 = tpu.matmul %1074, %61, %cst_375 {dimension_numbers = #tpu.dot_dimension_numbers<[1], [0], [0], [1], [0, 0, 1, 1], [], []>} : vector<1x32xf32>, vector<32x32xf32>, vector<1x32xf32> -> vector<1x32xf32>
    %1135 = arith.addf %1134, %73 : vector<1x32xf32>
    %1136 = arith.addf %1125, %1131 : vector<1x32xf32>
    %1137 = arith.negf %1136 : vector<1x32xf32>
    %1138 = math.exp %1137 : vector<1x32xf32>
    %cst_376 = arith.constant 1.000000e+00 : f32
    %1139 = vector.broadcast %cst_376 : f32 to vector<1x32xf32>
    %1140 = arith.addf %1139, %1138 : vector<1x32xf32>
    %1141 = arith.divf %1139, %1140 : vector<1x32xf32>
    %1142 = arith.addf %1127, %1133 : vector<1x32xf32>
    %1143 = arith.negf %1142 : vector<1x32xf32>
    %1144 = math.exp %1143 : vector<1x32xf32>
    %cst_377 = arith.constant 1.000000e+00 : f32
    %1145 = vector.broadcast %cst_377 : f32 to vector<1x32xf32>
    %1146 = arith.addf %1145, %1144 : vector<1x32xf32>
    %1147 = arith.divf %1145, %1146 : vector<1x32xf32>
    %1148 = arith.mulf %1141, %1135 : vector<1x32xf32>
    %1149 = arith.addf %1129, %1148 : vector<1x32xf32>
    %1150 = math.tanh %1149 : vector<1x32xf32>
    %cst_378 = arith.constant 1.000000e+00 : f32
    %1151 = vector.broadcast %cst_378 : f32 to vector<1x32xf32>
    %1152 = arith.subf %1151, %1147 : vector<1x32xf32>
    %1153 = arith.mulf %1152, %1150 : vector<1x32xf32>
    %1154 = arith.mulf %1147, %1074 : vector<1x32xf32>
    %1155 = arith.addf %1153, %1154 : vector<1x32xf32>
    %cst_379 = arith.constant dense<0.000000e+00> : vector<1x8xf32>
    %1156 = tpu.matmul %1155, %628, %cst_379 {dimension_numbers = #tpu.dot_dimension_numbers<[1], [1], [0], [0], [0, 0, 1, 0], [], []>} : vector<1x32xf32>, vector<8x32xf32>, vector<1x8xf32> -> vector<1x8xf32>
    %cst_380 = arith.constant dense<0xFF800000> : vector<1xf32>
    %1157 = vector.multi_reduction <maximumf>, %1156, %cst_380 [1] : vector<1x8xf32> to vector<1xf32>
    %1158 = vector.shape_cast %1157 : vector<1xf32> to vector<1x1xf32>
    %1159 = vector.broadcast %1158 : vector<1x1xf32> to vector<1x8xf32>
    %1160 = arith.subf %1156, %1159 : vector<1x8xf32>
    %1161 = math.exp %1160 : vector<1x8xf32>
    %cst_381 = arith.constant dense<0.000000e+00> : vector<1xf32>
    %1162 = vector.multi_reduction <add>, %1161, %cst_381 [1] : vector<1x8xf32> to vector<1xf32>
    %1163 = vector.shape_cast %1162 : vector<1xf32> to vector<1x1xf32>
    %1164 = tpu.reciprocal %1163 {approx = true} : vector<1x1xf32> -> vector<1x1xf32>
    %1165 = vector.broadcast %1164 : vector<1x1xf32> to vector<1x8xf32>
    %1166 = arith.mulf %1161, %1165 : vector<1x8xf32>
    %cst_382 = arith.constant dense<0.000000e+00> : vector<1x32xf32>
    %1167 = tpu.matmul %1166, %628, %cst_382 {dimension_numbers = #tpu.dot_dimension_numbers<[1], [0], [0], [1], [0, 0, 1, 1], [], []>} : vector<1x8xf32>, vector<8x32xf32>, vector<1x32xf32> -> vector<1x32xf32>
    %cst_383 = arith.constant dense<0.000000e+00> : vector<1x32xf32>
    %1168 = tpu.matmul %1155, %74, %cst_383 {dimension_numbers = #tpu.dot_dimension_numbers<[1], [0], [0], [1], [0, 0, 1, 1], [], []>} : vector<1x32xf32>, vector<32x32xf32>, vector<1x32xf32> -> vector<1x32xf32>
    %cst_384 = arith.constant dense<0.000000e+00> : vector<1x32xf32>
    %1169 = tpu.matmul %1167, %75, %cst_384 {dimension_numbers = #tpu.dot_dimension_numbers<[1], [0], [0], [1], [0, 0, 1, 1], [], []>} : vector<1x32xf32>, vector<32x32xf32>, vector<1x32xf32> -> vector<1x32xf32>
    %1170 = arith.addf %1168, %1169 : vector<1x32xf32>
    %1171 = arith.addf %1170, %76 : vector<1x32xf32>
    %1172 = math.tanh %1171 : vector<1x32xf32>
    %cst_385 = arith.constant dense<0.000000e+00> : vector<1x64xf32>
    %1173 = tpu.matmul %1172, %77, %cst_385 {dimension_numbers = #tpu.dot_dimension_numbers<[1], [0], [0], [1], [0, 0, 1, 1], [], []>} : vector<1x32xf32>, vector<32x64xf32>, vector<1x64xf32> -> vector<1x64xf32>
    %1174 = arith.addf %1173, %78 : vector<1x64xf32>
    %cst_386 = arith.constant dense<0xFF800000> : vector<1xf32>
    %1175 = vector.multi_reduction <maximumf>, %1174, %cst_386 [1] : vector<1x64xf32> to vector<1xf32>
    %1176 = vector.shape_cast %1175 : vector<1xf32> to vector<1x1xf32>
    %1177 = vector.broadcast %1176 : vector<1x1xf32> to vector<1x64xf32>
    %1178 = arith.cmpf oeq, %1174, %1177 : vector<1x64xf32>
    %c64_i32_387 = arith.constant 64 : i32
    %1179 = vector.broadcast %c64_i32_387 : i32 to vector<1x64xi32>
    %1180 = arith.select %1178, %629, %1179 : vector<1x64xi1>, vector<1x64xi32>
    %cst_388 = arith.constant dense<2147483647> : vector<1xi32>
    %1181 = vector.multi_reduction <minsi>, %1180, %cst_388 [1] : vector<1x64xi32> to vector<1xi32>
    %1182 = vector.shape_cast %1181 : vector<1xi32> to vector<1x1xi32>
    %1183 = vector.broadcast %1176 : vector<1x1xf32> to vector<1x64xf32>
    %1184 = arith.subf %1174, %1183 : vector<1x64xf32>
    %1185 = math.exp %1184 : vector<1x64xf32>
    %cst_389 = arith.constant dense<0.000000e+00> : vector<1xf32>
    %1186 = vector.multi_reduction <add>, %1185, %cst_389 [1] : vector<1x64xf32> to vector<1xf32>
    %1187 = vector.shape_cast %1186 : vector<1xf32> to vector<1x1xf32>
    %cst_390 = arith.constant 1.000000e+00 : f32
    %1188 = vector.broadcast %cst_390 : f32 to vector<1x1xf32>
    %1189 = arith.divf %1188, %1187 : vector<1x1xf32>
    %c6_i32_391 = arith.constant 6 : i32
    %1190 = vector.broadcast %c6_i32_391 : i32 to vector<1x8xi32>
    %1191 = arith.cmpi eq, %630, %1190 : vector<1x8xi32>
    %1192 = vector.shape_cast %1182 : vector<1x1xi32> to vector<1x1xi32>
    %1193 = vector.broadcast %1192 : vector<1x1xi32> to vector<1x8xi32>
    %1194 = arith.select %1191, %1193, %1113 : vector<1x8xi1>, vector<1x8xi32>
    %c6_i32_392 = arith.constant 6 : i32
    %1195 = vector.broadcast %c6_i32_392 : i32 to vector<1x8xi32>
    %1196 = arith.cmpi eq, %630, %1195 : vector<1x8xi32>
    %1197 = vector.shape_cast %1189 : vector<1x1xf32> to vector<1x1xf32>
    %1198 = vector.broadcast %1197 : vector<1x1xf32> to vector<1x8xf32>
    %1199 = arith.select %1196, %1198, %1118 : vector<1x8xi1>, vector<1x8xf32>
    %1200 = vector.broadcast %1182 : vector<1x1xi32> to vector<1x64xi32>
    %1201 = arith.cmpi eq, %629, %1200 : vector<1x64xi32>
    %1202 = arith.extui %1201 : vector<1x64xi1> to vector<1x64xi32>
    %1203 = arith.sitofp %1202 : vector<1x64xi32> to vector<1x64xf32>
    %cst_393 = arith.constant dense<0.000000e+00> : vector<1x32xf32>
    %1204 = tpu.matmul %1203, %1, %cst_393 {dimension_numbers = #tpu.dot_dimension_numbers<[1], [0], [0], [1], [0, 0, 1, 1], [], []>} : vector<1x64xf32>, vector<64x32xf32>, vector<1x32xf32> -> vector<1x32xf32>
    %cst_394 = arith.constant dense<0.000000e+00> : vector<1x32xf32>
    %1205 = tpu.matmul %1204, %51, %cst_394 {dimension_numbers = #tpu.dot_dimension_numbers<[1], [0], [0], [1], [0, 0, 1, 1], [], []>} : vector<1x32xf32>, vector<32x32xf32>, vector<1x32xf32> -> vector<1x32xf32>
    %1206 = arith.addf %1205, %63 : vector<1x32xf32>
    %cst_395 = arith.constant dense<0.000000e+00> : vector<1x32xf32>
    %1207 = tpu.matmul %1204, %53, %cst_395 {dimension_numbers = #tpu.dot_dimension_numbers<[1], [0], [0], [1], [0, 0, 1, 1], [], []>} : vector<1x32xf32>, vector<32x32xf32>, vector<1x32xf32> -> vector<1x32xf32>
    %1208 = arith.addf %1207, %65 : vector<1x32xf32>
    %cst_396 = arith.constant dense<0.000000e+00> : vector<1x32xf32>
    %1209 = tpu.matmul %1204, %55, %cst_396 {dimension_numbers = #tpu.dot_dimension_numbers<[1], [0], [0], [1], [0, 0, 1, 1], [], []>} : vector<1x32xf32>, vector<32x32xf32>, vector<1x32xf32> -> vector<1x32xf32>
    %1210 = arith.addf %1209, %67 : vector<1x32xf32>
    %cst_397 = arith.constant dense<0.000000e+00> : vector<1x32xf32>
    %1211 = tpu.matmul %1155, %57, %cst_397 {dimension_numbers = #tpu.dot_dimension_numbers<[1], [0], [0], [1], [0, 0, 1, 1], [], []>} : vector<1x32xf32>, vector<32x32xf32>, vector<1x32xf32> -> vector<1x32xf32>
    %1212 = arith.addf %1211, %69 : vector<1x32xf32>
    %cst_398 = arith.constant dense<0.000000e+00> : vector<1x32xf32>
    %1213 = tpu.matmul %1155, %59, %cst_398 {dimension_numbers = #tpu.dot_dimension_numbers<[1], [0], [0], [1], [0, 0, 1, 1], [], []>} : vector<1x32xf32>, vector<32x32xf32>, vector<1x32xf32> -> vector<1x32xf32>
    %1214 = arith.addf %1213, %71 : vector<1x32xf32>
    %cst_399 = arith.constant dense<0.000000e+00> : vector<1x32xf32>
    %1215 = tpu.matmul %1155, %61, %cst_399 {dimension_numbers = #tpu.dot_dimension_numbers<[1], [0], [0], [1], [0, 0, 1, 1], [], []>} : vector<1x32xf32>, vector<32x32xf32>, vector<1x32xf32> -> vector<1x32xf32>
    %1216 = arith.addf %1215, %73 : vector<1x32xf32>
    %1217 = arith.addf %1206, %1212 : vector<1x32xf32>
    %1218 = arith.negf %1217 : vector<1x32xf32>
    %1219 = math.exp %1218 : vector<1x32xf32>
    %cst_400 = arith.constant 1.000000e+00 : f32
    %1220 = vector.broadcast %cst_400 : f32 to vector<1x32xf32>
    %1221 = arith.addf %1220, %1219 : vector<1x32xf32>
    %1222 = arith.divf %1220, %1221 : vector<1x32xf32>
    %1223 = arith.addf %1208, %1214 : vector<1x32xf32>
    %1224 = arith.negf %1223 : vector<1x32xf32>
    %1225 = math.exp %1224 : vector<1x32xf32>
    %cst_401 = arith.constant 1.000000e+00 : f32
    %1226 = vector.broadcast %cst_401 : f32 to vector<1x32xf32>
    %1227 = arith.addf %1226, %1225 : vector<1x32xf32>
    %1228 = arith.divf %1226, %1227 : vector<1x32xf32>
    %1229 = arith.mulf %1222, %1216 : vector<1x32xf32>
    %1230 = arith.addf %1210, %1229 : vector<1x32xf32>
    %1231 = math.tanh %1230 : vector<1x32xf32>
    %cst_402 = arith.constant 1.000000e+00 : f32
    %1232 = vector.broadcast %cst_402 : f32 to vector<1x32xf32>
    %1233 = arith.subf %1232, %1228 : vector<1x32xf32>
    %1234 = arith.mulf %1233, %1231 : vector<1x32xf32>
    %1235 = arith.mulf %1228, %1155 : vector<1x32xf32>
    %1236 = arith.addf %1234, %1235 : vector<1x32xf32>
    %cst_403 = arith.constant dense<0.000000e+00> : vector<1x8xf32>
    %1237 = tpu.matmul %1236, %628, %cst_403 {dimension_numbers = #tpu.dot_dimension_numbers<[1], [1], [0], [0], [0, 0, 1, 0], [], []>} : vector<1x32xf32>, vector<8x32xf32>, vector<1x8xf32> -> vector<1x8xf32>
    %cst_404 = arith.constant dense<0xFF800000> : vector<1xf32>
    %1238 = vector.multi_reduction <maximumf>, %1237, %cst_404 [1] : vector<1x8xf32> to vector<1xf32>
    %1239 = vector.shape_cast %1238 : vector<1xf32> to vector<1x1xf32>
    %1240 = vector.broadcast %1239 : vector<1x1xf32> to vector<1x8xf32>
    %1241 = arith.subf %1237, %1240 : vector<1x8xf32>
    %1242 = math.exp %1241 : vector<1x8xf32>
    %cst_405 = arith.constant dense<0.000000e+00> : vector<1xf32>
    %1243 = vector.multi_reduction <add>, %1242, %cst_405 [1] : vector<1x8xf32> to vector<1xf32>
    %1244 = vector.shape_cast %1243 : vector<1xf32> to vector<1x1xf32>
    %1245 = tpu.reciprocal %1244 {approx = true} : vector<1x1xf32> -> vector<1x1xf32>
    %1246 = vector.broadcast %1245 : vector<1x1xf32> to vector<1x8xf32>
    %1247 = arith.mulf %1242, %1246 : vector<1x8xf32>
    %cst_406 = arith.constant dense<0.000000e+00> : vector<1x32xf32>
    %1248 = tpu.matmul %1247, %628, %cst_406 {dimension_numbers = #tpu.dot_dimension_numbers<[1], [0], [0], [1], [0, 0, 1, 1], [], []>} : vector<1x8xf32>, vector<8x32xf32>, vector<1x32xf32> -> vector<1x32xf32>
    %cst_407 = arith.constant dense<0.000000e+00> : vector<1x32xf32>
    %1249 = tpu.matmul %1236, %74, %cst_407 {dimension_numbers = #tpu.dot_dimension_numbers<[1], [0], [0], [1], [0, 0, 1, 1], [], []>} : vector<1x32xf32>, vector<32x32xf32>, vector<1x32xf32> -> vector<1x32xf32>
    %cst_408 = arith.constant dense<0.000000e+00> : vector<1x32xf32>
    %1250 = tpu.matmul %1248, %75, %cst_408 {dimension_numbers = #tpu.dot_dimension_numbers<[1], [0], [0], [1], [0, 0, 1, 1], [], []>} : vector<1x32xf32>, vector<32x32xf32>, vector<1x32xf32> -> vector<1x32xf32>
    %1251 = arith.addf %1249, %1250 : vector<1x32xf32>
    %1252 = arith.addf %1251, %76 : vector<1x32xf32>
    %1253 = math.tanh %1252 : vector<1x32xf32>
    %cst_409 = arith.constant dense<0.000000e+00> : vector<1x64xf32>
    %1254 = tpu.matmul %1253, %77, %cst_409 {dimension_numbers = #tpu.dot_dimension_numbers<[1], [0], [0], [1], [0, 0, 1, 1], [], []>} : vector<1x32xf32>, vector<32x64xf32>, vector<1x64xf32> -> vector<1x64xf32>
    %1255 = arith.addf %1254, %78 : vector<1x64xf32>
    %cst_410 = arith.constant dense<0xFF800000> : vector<1xf32>
    %1256 = vector.multi_reduction <maximumf>, %1255, %cst_410 [1] : vector<1x64xf32> to vector<1xf32>
    %1257 = vector.shape_cast %1256 : vector<1xf32> to vector<1x1xf32>
    %1258 = vector.broadcast %1257 : vector<1x1xf32> to vector<1x64xf32>
    %1259 = arith.cmpf oeq, %1255, %1258 : vector<1x64xf32>
    %c64_i32_411 = arith.constant 64 : i32
    %1260 = vector.broadcast %c64_i32_411 : i32 to vector<1x64xi32>
    %1261 = arith.select %1259, %629, %1260 : vector<1x64xi1>, vector<1x64xi32>
    %cst_412 = arith.constant dense<2147483647> : vector<1xi32>
    %1262 = vector.multi_reduction <minsi>, %1261, %cst_412 [1] : vector<1x64xi32> to vector<1xi32>
    %1263 = vector.shape_cast %1262 : vector<1xi32> to vector<1x1xi32>
    %1264 = vector.broadcast %1257 : vector<1x1xf32> to vector<1x64xf32>
    %1265 = arith.subf %1255, %1264 : vector<1x64xf32>
    %1266 = math.exp %1265 : vector<1x64xf32>
    %cst_413 = arith.constant dense<0.000000e+00> : vector<1xf32>
    %1267 = vector.multi_reduction <add>, %1266, %cst_413 [1] : vector<1x64xf32> to vector<1xf32>
    %1268 = vector.shape_cast %1267 : vector<1xf32> to vector<1x1xf32>
    %cst_414 = arith.constant 1.000000e+00 : f32
    %1269 = vector.broadcast %cst_414 : f32 to vector<1x1xf32>
    %1270 = arith.divf %1269, %1268 : vector<1x1xf32>
    %c7_i32_415 = arith.constant 7 : i32
    %1271 = vector.broadcast %c7_i32_415 : i32 to vector<1x8xi32>
    %1272 = arith.cmpi eq, %630, %1271 : vector<1x8xi32>
    %1273 = vector.shape_cast %1263 : vector<1x1xi32> to vector<1x1xi32>
    %1274 = vector.broadcast %1273 : vector<1x1xi32> to vector<1x8xi32>
    %1275 = arith.select %1272, %1274, %1194 : vector<1x8xi1>, vector<1x8xi32>
    %c7_i32_416 = arith.constant 7 : i32
    %1276 = vector.broadcast %c7_i32_416 : i32 to vector<1x8xi32>
    %1277 = arith.cmpi eq, %630, %1276 : vector<1x8xi32>
    %1278 = vector.shape_cast %1270 : vector<1x1xf32> to vector<1x1xf32>
    %1279 = vector.broadcast %1278 : vector<1x1xf32> to vector<1x8xf32>
    %1280 = arith.select %1277, %1279, %1199 : vector<1x8xi1>, vector<1x8xf32>
    %c0_417 = arith.constant 0 : index
    %c0_418 = arith.constant 0 : index
    %1281 = vector.load %arg19[%c0_417, %c0_418] : memref<1x8xi32, #tpu.memory_space<vmem>>, vector<1x8xi32>
    tpu.vector_store %arg19[%c0_417, %c0_418], %1275 {strides = array<i32>} : memref<1x8xi32, #tpu.memory_space<vmem>>, vector<1x8xi32>,
    %c0_419 = arith.constant 0 : index
    %c0_420 = arith.constant 0 : index
    %1282 = vector.load %arg20[%c0_419, %c0_420] : memref<1x8xf32, #tpu.memory_space<vmem>>, vector<1x8xf32>
    tpu.vector_store %arg20[%c0_419, %c0_420], %1280 {strides = array<i32>} : memref<1x8xf32, #tpu.memory_space<vmem>>, vector<1x8xf32>,
    return
  }
}

</mosaic_0001>

<bundles_post_ra>
// kernel: greedy_search_decode.1
= control target key start
LH: loop header
LB: loop body
LE: loop exit
PB: predicated region body
PF: predicated region fallthrough
CT: control target
= control target key end

     0   :  { %s18649_s0 = inlined_call_operand.vmem [shape: f32[8,32], index: 0, kind: input, shape index: {}]   ;;  %s18650_s1 = inlined_call_operand.vmem [shape: f32[64,32], index: 1, kind: input, shape index: {}]   ;;  %s18651_s2 = inlined_call_operand.vmem [shape: f32[3,32,32], index: 2, kind: input, shape index: {}]   ;;  %s18652_s3 = inlined_call_operand.vmem [shape: f32[3,32,32], index: 3, kind: input, shape index: {}]   ;;  %s18653_s4 = inlined_call_operand.hbm [shape: f32[3,1,32], index: 4, kind: input, shape index: {}]   ;;  %s18654_s5 = inlined_call_operand.hbm [shape: f32[3,1,32], index: 5, kind: input, shape index: {}]   ;;  %s18655_s6 = inlined_call_operand.hbm [shape: f32[3,32,32], index: 6, kind: input, shape index: {}]   ;;  %s18656_s7 = inlined_call_operand.hbm [shape: f32[3,32,32], index: 7, kind: input, shape index: {}]   ;;  %s18657_s8 = inlined_call_operand.hbm [shape: f32[3,1,32], index: 8, kind: input, shape index: {}]   ;;  %s18658_s9 = inlined_call_operand.hbm [shape: f32[3,1,32], index: 9, kind: input, shape index: {}]   ;;  %s18659_s10 = inlined_call_operand.hbm [shape: f32[3,32,32], index: 10, kind: input, shape index: {}]   ;;  %s18660_s11 = inlined_call_operand.hbm [shape: f32[3,32,32], index: 11, kind: input, shape index: {}]   ;;  %s18661_s12 = inlined_call_operand.hbm [shape: f32[3,1,32], index: 12, kind: input, shape index: {}]   ;;  %s18662_s13 = inlined_call_operand.hbm [shape: f32[3,1,32], index: 13, kind: input, shape index: {}]   ;;  %s18663_s14 = inlined_call_operand.hbm [shape: f32[32,32], index: 14, kind: input, shape index: {}]   ;;  %s18664_s15 = inlined_call_operand.hbm [shape: f32[32,32], index: 15, kind: input, shape index: {}]   ;;  %s18665_s16 = inlined_call_operand.hbm [shape: f32[1,32], index: 16, kind: input, shape index: {}]   ;;  %s18666_s17 = inlined_call_operand.hbm [shape: f32[32,64], index: 17, kind: input, shape index: {}]   ;;  %s18667_s18 = inlined_call_operand.vmem [shape: f32[1,64], index: 18, kind: input, shape index: {}]   ;;  %s18668_s19 = inlined_call_operand.hbm [shape: s32[1,8], index: 19, kind: output, shape index: {0}]   ;;  %s18669_s20 = inlined_call_operand.hbm [shape: f32[1,8], index: 20, kind: output, shape index: {1}]  }
   0x1   :  { %18702 = sst [smem:[#allocation53_spill]] %s18649_s0 }
   0x2   :  { %18703 = sst [smem:[#allocation54_spill]] %s18650_s1 }
   0x3   :  { %18704 = sst [smem:[#allocation55_spill]] %s18651_s2 }
   0x4   :  { %18705 = sst [smem:[#allocation56_spill]] %s18652_s3 }
   0x5   :  { %18706 = sst [smem:[#allocation57_spill]] %s18653_s4 }
   0x6   :  { %26 = vsyncpa [#allocation3], 0 }
   0x7   :  { %27 = vsyncpa [#allocation6], 0 }
   0x8   :  { %28 = vsyncpa [#allocation9], 0 }
   0x9   :  { %29 = vsyncpa [#allocation12], 0 }
   0xa   :  { %30 = vsyncpa [#allocation15], 0 }
   0xb   :  { %31 = vsyncpa [#allocation18], 0 }
   0xc   :  { %32 = vsyncpa [#allocation21], 0 }
   0xd   :  { %33 = vsyncpa [#allocation24], 0 }
   0xe   :  { %34 = vsyncpa [#allocation4], 0 }
   0xf   :  { %35 = vsyncpa [#allocation27], 0  ;;  %s15689_s1 = smov [#allocation5]  }
  0x10   :  { %s61_s22 = sshll.u32 %s15689_s1, 4  ;;  %s62_s22 = int_to_ptr.vmem [resolvable:$true] %s61_s22 }
  0x11   :  { %s15357_s23 = scalar_lea.vmem %s62_s22, 48  ;;  %s15361_s24 = scalar_lea.vmem %s62_s22, 64 }
  0x12   :  { %p15358_p0 = scmp.ne.s32.totalorder %s62_s22, %s15357_s23  ;;  %p15362_p1 = scmp.lt.s32.totalorder %s62_s22, %s62_s22 }
  0x13   :  { %p15363_p2 = scmp.lt.s32.totalorder %s15361_s24, %s15357_s23 }
  0x15   :  { %p15364_p3 = por %p15363_p2, %p15362_p1 }
  0x17   :  { %p15365_p4 = pnand %p15364_p3, %p15358_p0 }
  0x19   :  { %15368 = shalt.err (!%p15365_p4)
}
  0x1a   :  { %s15690_s2 = smov 16   ;;  %s15691_s25 = smov 1  }
  0x1b   :  { %67 = dma.hbm_to_vmem [thread:$0]  %s18654_s5, 48, %s62_s22, [#allocation6], %s15690_s2, %s15690_s2, %s15691_s25  }
  0x1c   :  { %s15692_s27 = smov [#allocation8]   ;;  %s15693_s4 = smov [#allocation11]  }
  0x1d   :  { %s85_s28 = sshll.u32 %s15692_s27, 4  ;;  %s109_s29 = sshll.u32 %s15693_s4, 4  ;;  %s86_s28 = int_to_ptr.vmem [resolvable:$true] %s85_s28  ;;  %s110_s29 = int_to_ptr.vmem [resolvable:$true] %s109_s29 }
  0x1e   :  { %s15377_s30 = scalar_lea.vmem %s86_s28, 1536  ;;  %p15382_p6 = scmp.lt.s32.totalorder %s86_s28, %s86_s28 }
  0x1f   :  { %p15378_p5 = scmp.ne.s32.totalorder %s86_s28, %s15377_s30  ;;  %p15383_p7 = scmp.lt.s32.totalorder %s15377_s30, %s15377_s30 }
  0x21   :  { %p15384_p8 = por %p15383_p7, %p15382_p6 }
  0x23   :  { %p15385_p9 = pnand %p15384_p8, %p15378_p5 }
  0x25   :  { %15388 = shalt.err (!%p15385_p9)
}
  0x26   :  { %s15694_s0 = smov 128   ;;  %s15695_s21 = smov 8  }
  0x27   :  { %91 = dma.hbm_to_vmem [thread:$0]  %s18656_s7, 1536, %s86_s28, [#allocation9], %s15694_s0, %s15694_s0, %s15695_s21  }
  0x28   :  { %s15397_s5 = scalar_lea.vmem %s110_s29, 48  ;;  %s15401_s22 = scalar_lea.vmem %s110_s29, 64 }
  0x29   :  { %p15398_p10 = scmp.ne.s32.totalorder %s110_s29, %s15397_s5  ;;  %p15402_p11 = scmp.lt.s32.totalorder %s110_s29, %s110_s29 }
  0x2a   :  { %p15403_p12 = scmp.lt.s32.totalorder %s15401_s22, %s15397_s5 }
  0x2c   :  { %p15404_p13 = por %p15403_p12, %p15402_p11 }
  0x2e   :  { %p15405_p0 = pnand %p15404_p13, %p15398_p10 }
  0x30   :  { %15408 = shalt.err (!%p15405_p0)
}
  0x31   :  { %115 = dma.hbm_to_vmem [thread:$0]  %s18658_s9, 48, %s110_s29, [#allocation12], %s15690_s2, %s15690_s2, %s15691_s25  }
  0x32   :  { %s15696_s26 = smov [#allocation14]   ;;  %s15697_s7 = smov [#allocation17]  }
  0x33   :  { %s133_s27 = sshll.u32 %s15696_s26, 4  ;;  %s157_s28 = sshll.u32 %s15697_s7, 4  ;;  %s134_s27 = int_to_ptr.vmem [resolvable:$true] %s133_s27  ;;  %s158_s28 = int_to_ptr.vmem [resolvable:$true] %s157_s28 }
  0x34   :  { %s15417_s4 = scalar_lea.vmem %s134_s27, 1536  ;;  %p15422_p2 = scmp.lt.s32.totalorder %s134_s27, %s134_s27 }
  0x35   :  { %p15418_p1 = scmp.ne.s32.totalorder %s134_s27, %s15417_s4  ;;  %p15423_p3 = scmp.lt.s32.totalorder %s15417_s4, %s15417_s4 }
  0x37   :  { %p15424_p4 = por %p15423_p3, %p15422_p2 }
  0x39   :  { %p15425_p5 = pnand %p15424_p4, %p15418_p1 }
  0x3b   :  { %15428 = shalt.err (!%p15425_p5)
}
  0x3c   :  { %139 = dma.hbm_to_vmem [thread:$0]  %s18660_s11, 1536, %s134_s27, [#allocation15], %s15694_s0, %s15694_s0, %s15695_s21  }
  0x3d   :  { %s15437_s9 = scalar_lea.vmem %s158_s28, 48  ;;  %s15441_s29 = scalar_lea.vmem %s158_s28, 64 }
  0x3e   :  { %p15438_p6 = scmp.ne.s32.totalorder %s158_s28, %s15437_s9  ;;  %p15442_p7 = scmp.lt.s32.totalorder %s158_s28, %s158_s28 }
  0x3f   :  { %p15443_p8 = scmp.lt.s32.totalorder %s15441_s29, %s15437_s9 }
  0x41   :  { %p15444_p9 = por %p15443_p8, %p15442_p7 }
  0x43   :  { %p15445_p10 = pnand %p15444_p9, %p15438_p6 }
  0x45   :  { %15448 = shalt.err (!%p15445_p10)
}
  0x46   :  { %163 = dma.hbm_to_vmem [thread:$0]  %s18662_s13, 48, %s158_s28, [#allocation18], %s15690_s2, %s15690_s2, %s15691_s25  }
  0x47   :  { %s15698_s22 = smov [#allocation20]   ;;  %s15699_s11 = smov [#allocation2]  }
  0x48   :  { %s181_s24 = sshll.u32 %s15698_s22, 4  ;;  %s49_s3 = sshll.u32 %s15699_s11, 4  ;;  %s182_s24 = int_to_ptr.vmem [resolvable:$true] %s181_s24  ;;  %s50_s3 = int_to_ptr.vmem [resolvable:$true] %s49_s3 }
  0x49   :  { %s15457_s26 = scalar_lea.vmem %s182_s24, 512  ;;  %p15462_p12 = scmp.lt.s32.totalorder %s182_s24, %s182_s24 }
  0x4a   :  { %p15458_p11 = scmp.ne.s32.totalorder %s182_s24, %s15457_s26  ;;  %p15463_p13 = scmp.lt.s32.totalorder %s15457_s26, %s15457_s26 }
  0x4c   :  { %p15464_p0 = por %p15463_p13, %p15462_p12 }
  0x4e   :  { %p15465_p1 = pnand %p15464_p0, %p15458_p11 }
  0x50   :  { %15468 = shalt.err (!%p15465_p1)
}
  0x51   :  { %187 = dma.hbm_to_vmem [thread:$0]  %s18664_s15, 512, %s182_s24, [#allocation21], %s15694_s0, %s15694_s0, %s15695_s21  }
  0x52   :  { %s15477_s13 = scalar_lea.vmem %s50_s3, 48  ;;  %s15481_s28 = scalar_lea.vmem %s50_s3, 64 }
  0x53   :  { %p15478_p2 = scmp.ne.s32.totalorder %s50_s3, %s15477_s13  ;;  %p15482_p3 = scmp.lt.s32.totalorder %s50_s3, %s50_s3 }
  0x54   :  { %p15483_p4 = scmp.lt.s32.totalorder %s15481_s28, %s15477_s13 }
  0x56   :  { %p15484_p5 = por %p15483_p4, %p15482_p3 }
  0x58   :  { %p15485_p6 = pnand %p15484_p5, %p15478_p2 }
  0x5a   :  { %15488 = shalt.err (!%p15485_p6)
}
  0x5b   :  { %s18707_s1 = sld [smem:[#allocation57_spill]]  ;;  %s15700_s9 = smov [#allocation7]  }
  0x5c   :  { %s73_s29 = sshll.u32 %s15700_s9, 4  ;;  %s15701_s15 = smov [#allocation10]   ;;  %s74_s29 = int_to_ptr.vmem [resolvable:$true] %s73_s29 }
  0x5d   :  { %s97_s23 = sshll.u32 %s15701_s15, 4  ;;  %s15497_s5 = scalar_lea.vmem %s74_s29, 1536  ;;  %s98_s23 = int_to_ptr.vmem [resolvable:$true] %s97_s23 }
  0x5e   :  { %p15498_p7 = scmp.ne.s32.totalorder %s74_s29, %s15497_s5  ;;  %p15502_p8 = scmp.lt.s32.totalorder %s74_s29, %s74_s29 }
  0x5f   :  { %p15503_p9 = scmp.lt.s32.totalorder %s15497_s5, %s15497_s5 }
  0x61   :  { %55 = dma.hbm_to_vmem [thread:$0]  %s18707_s1, 48, %s50_s3, [#allocation3], %s15690_s2, %s15690_s2, %s15691_s25  }
  0x62   :  { %p15504_p10 = por %p15503_p9, %p15502_p8 }
  0x64   :  { %p15505_p11 = pnand %p15504_p10, %p15498_p7 }
  0x66   :  { %15508 = shalt.err (!%p15505_p11)
}
  0x67   :  { %79 = dma.hbm_to_vmem [thread:$0]  %s18655_s6, 1536, %s74_s29, [#allocation6], %s15694_s0, %s15694_s0, %s15695_s21  }
  0x68   :  { %s15517_s11 = scalar_lea.vmem %s98_s23, 48  ;;  %s15521_s3 = scalar_lea.vmem %s98_s23, 64 }
  0x69   :  { %p15518_p12 = scmp.ne.s32.totalorder %s98_s23, %s15517_s11  ;;  %p15522_p13 = scmp.lt.s32.totalorder %s98_s23, %s98_s23 }
  0x6a   :  { %p15523_p0 = scmp.lt.s32.totalorder %s15521_s3, %s15517_s11 }
  0x6c   :  { %p15524_p1 = por %p15523_p0, %p15522_p13 }
  0x6e   :  { %p15525_p2 = pnand %p15524_p1, %p15518_p12 }
  0x70   :  { %15528 = shalt.err (!%p15525_p2)
}
  0x71   :  { %103 = dma.hbm_to_vmem [thread:$0]  %s18657_s8, 48, %s98_s23, [#allocation9], %s15690_s2, %s15690_s2, %s15691_s25  }
  0x72   :  { %s15702_s7 = smov [#allocation13]   ;;  %s15703_s6 = smov [#allocation16]  }
  0x73   :  { %s121_s13 = sshll.u32 %s15702_s7, 4  ;;  %s145_s28 = sshll.u32 %s15703_s6, 4  ;;  %s122_s13 = int_to_ptr.vmem [resolvable:$true] %s121_s13  ;;  %s146_s28 = int_to_ptr.vmem [resolvable:$true] %s145_s28 }
  0x74   :  { %s15537_s4 = scalar_lea.vmem %s122_s13, 1536  ;;  %p15542_p4 = scmp.lt.s32.totalorder %s122_s13, %s122_s13 }
  0x75   :  { %p15538_p3 = scmp.ne.s32.totalorder %s122_s13, %s15537_s4  ;;  %p15543_p5 = scmp.lt.s32.totalorder %s15537_s4, %s15537_s4 }
  0x77   :  { %p15544_p6 = por %p15543_p5, %p15542_p4 }
  0x79   :  { %p15545_p7 = pnand %p15544_p6, %p15538_p3 }
  0x7b   :  { %15548 = shalt.err (!%p15545_p7)
}
  0x7c   :  { %127 = dma.hbm_to_vmem [thread:$0]  %s18659_s10, 1536, %s122_s13, [#allocation12], %s15694_s0, %s15694_s0, %s15695_s21  }
  0x7d   :  { %s15557_s8 = scalar_lea.vmem %s146_s28, 48  ;;  %s15561_s9 = scalar_lea.vmem %s146_s28, 64 }
  0x7e   :  { %p15558_p8 = scmp.ne.s32.totalorder %s146_s28, %s15557_s8  ;;  %p15562_p9 = scmp.lt.s32.totalorder %s146_s28, %s146_s28 }
  0x7f   :  { %p15563_p10 = scmp.lt.s32.totalorder %s15561_s9, %s15557_s8 }
  0x81   :  { %p15564_p11 = por %p15563_p10, %p15562_p9 }
  0x83   :  { %p15565_p12 = pnand %p15564_p11, %p15558_p8 }
  0x85   :  { %15568 = shalt.err (!%p15565_p12)
}
  0x86   :  { %151 = dma.hbm_to_vmem [thread:$0]  %s18661_s12, 48, %s146_s28, [#allocation15], %s15690_s2, %s15690_s2, %s15691_s25  }
  0x87   :  { %s15704_s23 = smov [#allocation19]   ;;  %s15705_s10 = smov [#allocation22]  }
  0x88   :  { %s169_s5 = sshll.u32 %s15704_s23, 4  ;;  %s194_s22 = sshll.u32 %s15705_s10, 4  ;;  %s170_s5 = int_to_ptr.vmem [resolvable:$true] %s169_s5  ;;  %s195_s22 = int_to_ptr.vmem [resolvable:$true] %s194_s22 }
  0x89   :  { %s15577_s24 = scalar_lea.vmem %s170_s5, 512  ;;  %p15582_p0 = scmp.lt.s32.totalorder %s170_s5, %s170_s5 }
  0x8a   :  { %p15578_p13 = scmp.ne.s32.totalorder %s170_s5, %s15577_s24  ;;  %p15583_p1 = scmp.lt.s32.totalorder %s15577_s24, %s15577_s24 }
  0x8c   :  { %p15584_p2 = por %p15583_p1, %p15582_p0 }
  0x8e   :  { %p15585_p3 = pnand %p15584_p2, %p15578_p13 }
  0x90   :  { %15588 = shalt.err (!%p15585_p3)
}
  0x91   :  { %175 = dma.hbm_to_vmem [thread:$0]  %s18663_s14, 512, %s170_s5, [#allocation18], %s15694_s0, %s15694_s0, %s15695_s21  }
  0x92   :  { %s15597_s12 = scalar_lea.vmem %s195_s22, 16  ;;  %s15601_s2 = scalar_lea.vmem %s195_s22, 32 }
  0x93   :  { %p15598_p4 = scmp.ne.s32.totalorder %s195_s22, %s15597_s12  ;;  %p15602_p5 = scmp.lt.s32.totalorder %s195_s22, %s195_s22 }
  0x94   :  { %p15603_p6 = scmp.lt.s32.totalorder %s15601_s2, %s15597_s12 }
  0x96   :  { %p15604_p7 = por %p15603_p6, %p15602_p5 }
  0x98   :  { %p15605_p8 = pnand %p15604_p7, %p15598_p4 }
  0x9a   :  { %15608 = shalt.err (!%p15605_p8)
}
  0x9b   :  { %197 = dma.hbm_to_vmem [thread:$0]  %s18665_s16, 16, %s195_s22, [#allocation21]  }
  0x9c   :  { %s15706_s27 = smov [#allocation23]  }
  0x9d   :  { %s203_s7 = sshll.u32 %s15706_s27, 4  ;;  %s204_s7 = int_to_ptr.vmem [resolvable:$true] %s203_s7 }
  0x9e   :  { %s15617_s13 = scalar_lea.vmem %s204_s7, 512  ;;  %p15622_p10 = scmp.lt.s32.totalorder %s204_s7, %s204_s7 }
  0x9f   :  { %p15618_p9 = scmp.ne.s32.totalorder %s204_s7, %s15617_s13  ;;  %p15623_p11 = scmp.lt.s32.totalorder %s15617_s13, %s15617_s13 }
  0xa1   :  { %p15624_p12 = por %p15623_p11, %p15622_p10 }
  0xa3   :  { %p15625_p13 = pnand %p15624_p12, %p15618_p9 }
  0xa5   :  { %15628 = shalt.err (!%p15625_p13)
}
  0xa6   :  { %209 = dma.hbm_to_vmem [thread:$0]  %s18666_s17, 512, %s204_s7, [#allocation24], %s15694_s0, %s15694_s0, %s15695_s21  }
  0xa7   :  { %15669 = dma.done.wait [#allocation3], 48  }
  0xa8   :  { %15670 = vsyncadd [#allocation3], 4294967248 }
  0xa9   :  { %15671 = dma.done.wait [#allocation6], 1584  }
  0xaa   :  { %15672 = vsyncadd [#allocation6], 4294965712 }
  0xab   :  { %15673 = dma.done.wait [#allocation9], 1584  }
  0xac   :  { %15674 = vsyncadd [#allocation9], 4294965712 }
  0xad   :  { %15675 = dma.done.wait [#allocation12], 1584  }
  0xae   :  { %15676 = vsyncadd [#allocation12], 4294965712 }
  0xaf   :  { %15677 = dma.done.wait [#allocation15], 1584  }
  0xb0   :  { %15678 = vsyncadd [#allocation15], 4294965712 }
  0xb1   :  { %15679 = dma.done.wait [#allocation18], 560  }
  0xb2   :  { %15680 = vsyncadd [#allocation18], 4294966736 }
  0xb3   :  { %15681 = dma.done.wait [#allocation21], 528  }
  0xb4   :  { %15682 = vsyncadd [#allocation21], 4294966768 }
  0xb5   :  { %15683 = dma.done.wait [#allocation24], 512  }
  0xb6   :  { %15684 = vsyncadd [#allocation24], 4294966784  ;;  %v18673_v0 = vmov 0.0   ;;  %vm15708_vm0 = vmmov 0   ;;  %s18708_s0 = sld [smem:[#allocation55_spill]]  ;;  %vm397_vm1 = vcmask 261120  }
  0xb7   :  { %13255 = vmatprep.subr.mxu0 %v18673_v0  ;;  %13266 = vmatprep.subr.mxu1 %v18673_v0  ;;  %s18709_s12 = sld [smem:[#allocation53_spill]]  ;;  %v304_v11 = vld [vmem:[#allocation7 + $0x18] sm:$0xff]  ;;  %v303_v13 = vld [vmem:[#allocation7 + $0x10] sm:$0xff]  ;;  %v302_v15 = vld [vmem:[#allocation7 + $0x8] sm:$0xff]  ;;  %vm4837_vm3 = vcmask 523264   ;;  %vm5436_vm12 = vcmask 57344  }
  0xb8   :  { %13263 = vmatprep.mubr.msk.f32.mxu0 %vm15708_vm0, %v18673_v0  ;;  %13274 = vmatprep.mubr.msk.f32.mxu1 %vm15708_vm0, %v18673_v0  ;;  %v301_v17 = vld [vmem:[#allocation7] sm:$0xff]  ;;  %v309_v18 = vld [vmem:[#allocation7 + $0x38] sm:$0xff]  ;;  %v308_v20 = vld [vmem:[#allocation7 + $0x30] sm:$0xff]  ;;  %s18712_s27 = sld [smem:[#allocation54_spill]]  ;;  %vm5448_vm13 = vcmask 64512   ;;  %vm5740_vm14 = vcmask 516096  }
  0xb9   :  { %v314_v19 = vld [vmem:[#allocation7 + $0x58] sm:$0xff]  ;;  %v313_v21 = vld [vmem:[#allocation7 + $0x50] sm:$0xff]  ;;  %v307_v22 = vld [vmem:[#allocation7 + $0x28] sm:$0xff] }
  0xba   :  { %v312_v23 = vld [vmem:[#allocation7 + $0x48] sm:$0xff]  ;;  %v306_v24 = vld [vmem:[#allocation7 + $0x20] sm:$0xff]  ;;  %v16051_v35 = vld [vmem:[#allocation8 + $0x18] sm:$0xff] }
  0xbb   :  { %v311_v25 = vld [vmem:[#allocation7 + $0x40] sm:$0xff]  ;;  %v16062_v37 = vld [vmem:[#allocation8 + $0x10] sm:$0xff]  ;;  %v16073_v39 = vld [vmem:[#allocation8 + $0x8] sm:$0xff] }
  0xbc   :  { %v266_v1 = vld [vmem:[%s18708_s0 + $0x18] sm:$0xff]  ;;  %v265_v3 = vld [vmem:[%s18708_s0 + $0x10] sm:$0xff]  ;;  %v264_v5 = vld [vmem:[%s18708_s0 + $0x8] sm:$0xff] }
  0xbd   :  { %v12294_v2 = vld [vmem:[%s18708_s0 + $0x38] sm:$0xff]  ;;  %13256 = vmatpush3.msra.mxu0 %v266_v1  ;;  %v12293_v4 = vld [vmem:[%s18708_s0 + $0x30] sm:$0xff]  ;;  %v12292_v6 = vld [vmem:[%s18708_s0 + $0x28] sm:$0xff] }
  0xbe   :  { %13267 = vmatpush3.msra.mxu1 %v12294_v2  ;;  %13257 = vmatprep.subr.mxu0 %v18673_v0  ;;  %v263_v7 = vld [vmem:[%s18708_s0] sm:$0xff]  ;;  %v12298_v10 = vld [vmem:[%s18708_s0 + $0x58] sm:$0xff]  ;;  %v12297_v12 = vld [vmem:[%s18708_s0 + $0x50] sm:$0xff] }
  0xbf   :  { %13268 = vmatprep.subr.mxu1 %v18673_v0  ;;  %13258 = vmatpush3.msra.mxu0 %v265_v3  ;;  %v12291_v8 = vld [vmem:[%s18708_s0 + $0x20] sm:$0xff]  ;;  %v12296_v14 = vld [vmem:[%s18708_s0 + $0x48] sm:$0xff]  ;;  %v16103_v44 = vld [vmem:[#allocation8 + $0x30] sm:$0xff] }
  0xc0   :  { %13269 = vmatpush3.msra.mxu1 %v12293_v4  ;;  %13259 = vmatprep.subr.mxu0 %v18673_v0  ;;  %v15934_v9 = vld [vmem:[%s18709_s12] sm:$0xff]  ;;  %v16084_v41 = vld [vmem:[#allocation8] sm:$0xff]  ;;  %v16109_v45 = vld [vmem:[#allocation8 + $0x50] sm:$0xff] }
  0xc1   :  { %13270 = vmatprep.subr.mxu1 %v18673_v0  ;;  %13260 = vmatpush3.msra.mxu0 %v264_v5  ;;  %v12295_v16 = vld [vmem:[%s18708_s0 + $0x40] sm:$0xff]  ;;  %s18710_s0 = sld [smem:[#allocation56_spill]]  ;;  %v16112_v46 = vld [vmem:[#allocation8 + $0x28] sm:$0xff]  ;;  %v16120_v48 = vld [vmem:[#allocation8 + $0x20] sm:$0xff] }
  0xc2   :  { %13271 = vmatpush3.msra.mxu1 %v12292_v6  ;;  %13261 = vmatprep.subr.mxu0 %v18673_v0  ;;  %v16096_v42 = vld [vmem:[#allocation8 + $0x38] sm:$0xff]  ;;  %v16117_v47 = vld [vmem:[#allocation8 + $0x48] sm:$0xff]  ;;  %v16125_v49 = vld [vmem:[#allocation8 + $0x40] sm:$0xff] }
  0xc3   :  { %13272 = vmatprep.subr.mxu1 %v18673_v0  ;;  %13262 = vmatpush3.msra.mxu0 %v263_v7  ;;  %v16100_v43 = vld [vmem:[#allocation8 + $0x58] sm:$0xff] }
  0xc4   :  { %13273 = vmatpush3.msra.mxu1 %v12291_v8  ;;  %13264 = vmatmul.mubr.msk.f32.vlgmr.msra.gmra.mxu0 %vm397_vm1, %v15934_v9  ;;  %v12307_v62 = vld [vmem:[#allocation2] ss:$0 sm:$0xff]  ;;  %v16160_v63 = vld [vmem:[#allocation5] sm:$0x1]  ;;  %v16165_v5 = vld [vmem:[#allocation5 + $0x1] sm:$0x1] }
  0xc5   :  { %13277 = vmatprep.subr.mxu0 %v18673_v0  ;;  %13288 = vmatprep.subr.mxu1 %v18673_v0 }
  0xc6   :  { %13275 = vmatmul.mubr.msk.f32.vlgmr.msra.gmra.mxu1 %vm397_vm1, %v15934_v9  ;;  %13278 = vmatpush3.msra.mxu0 %v12298_v10 }
  0xc7   :  { %13289 = vmatpush3.msra.mxu1 %v304_v11  ;;  %13279 = vmatprep.subr.mxu0 %v18673_v0  ;;  %v15985_v26 = vld [vmem:[%s18710_s0 + $0x18] sm:$0xff]  ;;  %v16001_v28 = vld [vmem:[%s18710_s0 + $0x10] sm:$0xff]  ;;  %v16015_v30 = vld [vmem:[%s18710_s0 + $0x8] sm:$0xff] }
  0xc8   :  { %13290 = vmatprep.subr.mxu1 %v18673_v0  ;;  %13280 = vmatpush3.msra.mxu0 %v12297_v12  ;;  %v15990_v27 = vld [vmem:[%s18710_s0 + $0x38] sm:$0xff]  ;;  %v16006_v29 = vld [vmem:[%s18710_s0 + $0x30] sm:$0xff]  ;;  %v16020_v31 = vld [vmem:[%s18710_s0 + $0x28] sm:$0xff] }
  0xc9   :  { %13291 = vmatpush3.msra.mxu1 %v303_v13  ;;  %13281 = vmatprep.subr.mxu0 %v18673_v0  ;;  %v16029_v32 = vld [vmem:[%s18710_s0] sm:$0xff]  ;;  %v16049_v34 = vld [vmem:[%s18710_s0 + $0x58] sm:$0xff]  ;;  %v16060_v36 = vld [vmem:[%s18710_s0 + $0x50] sm:$0xff] }
  0xca   :  { %13292 = vmatprep.subr.mxu1 %v18673_v0  ;;  %13282 = vmatpush3.msra.mxu0 %v12296_v14  ;;  %v16036_v33 = vld [vmem:[%s18710_s0 + $0x20] sm:$0xff]  ;;  %v16071_v38 = vld [vmem:[%s18710_s0 + $0x48] sm:$0xff] }
  0xcb   :  { %13293 = vmatpush3.msra.mxu1 %v302_v15  ;;  %13283 = vmatprep.subr.mxu0 %v18673_v0  ;;  %v16082_v40 = vld [vmem:[%s18710_s0 + $0x40] sm:$0xff]  ;;  %v16171_v13 = vld [vmem:[#allocation11] sm:$0x1]  ;;  %v12313_v15 = vld [vmem:[#allocation10] ss:$0 sm:$0xff] }
  0xcc   :  { %13294 = vmatprep.subr.mxu1 %v18673_v0  ;;  %13284 = vmatpush3.msra.mxu0 %v12295_v16 }
  0xcd   :  { %13285 = vmatprep.mubr.msk.f32.mxu0 %vm15708_vm0, %v18673_v0  ;;  %13295 = vmatpush3.msra.mxu1 %v301_v17 }
  0xce   :  { %13286 = vmatmul.mubr.msk.f32.vlgmr.msra.gmra.mxu0 %vm397_vm1, %v15934_v9  ;;  %13296 = vmatprep.mubr.msk.f32.mxu1 %vm15708_vm0, %v18673_v0 }
  0xcf   :  { %13299 = vmatprep.subr.mxu0 %v18673_v0  ;;  %13310 = vmatprep.subr.mxu1 %v18673_v0 }
  0xd0   :  { %13297 = vmatmul.mubr.msk.f32.vlgmr.msra.gmra.mxu1 %vm397_vm1, %v15934_v9  ;;  %13300 = vmatpush3.msra.mxu0 %v309_v18 }
  0xd1   :  { %13311 = vmatpush3.msra.mxu1 %v314_v19  ;;  %13301 = vmatprep.subr.mxu0 %v18673_v0 }
  0xd2   :  { %13312 = vmatprep.subr.mxu1 %v18673_v0  ;;  %13302 = vmatpush3.msra.mxu0 %v308_v20 }
  0xd3   :  { %13313 = vmatpush3.msra.mxu1 %v313_v21  ;;  %13303 = vmatprep.subr.mxu0 %v18673_v0 }
  0xd4   :  { %13314 = vmatprep.subr.mxu1 %v18673_v0  ;;  %13304 = vmatpush3.msra.mxu0 %v307_v22 }
  0xd5   :  { %13315 = vmatpush3.msra.mxu1 %v312_v23  ;;  %13305 = vmatprep.subr.mxu0 %v18673_v0 }
  0xd6   :  { %13316 = vmatprep.subr.mxu1 %v18673_v0  ;;  %13306 = vmatpush3.msra.mxu0 %v306_v24 }
  0xd7   :  { %13307 = vmatprep.mubr.msk.f32.mxu0 %vm15708_vm0, %v18673_v0  ;;  %13317 = vmatpush3.msra.mxu1 %v311_v25 }
  0xd8   :  { %13308 = vmatmul.mubr.msk.f32.vlgmr.msra.gmra.mxu0 %vm397_vm1, %v15934_v9  ;;  %13318 = vmatprep.mubr.msk.f32.mxu1 %vm15708_vm0, %v18673_v0 }
  0xd9   :  { %13321 = vmatprep.subr.mxu0 %v18673_v0  ;;  %13332 = vmatprep.subr.mxu1 %v18673_v0 }
  0xda   :  { %13319 = vmatmul.mubr.msk.f32.vlgmr.msra.gmra.mxu1 %vm397_vm1, %v15934_v9  ;;  %13322 = vmatpush3.msra.mxu0 %v15985_v26  ;;  %v12309_v9 = vld [vmem:[#allocation2 + $0x1] ss:$0 sm:$0xff] }
  0xdb   :  { %13333 = vmatpush3.msra.mxu1 %v15990_v27  ;;  %13323 = vmatprep.subr.mxu0 %v18673_v0 }
  0xdc   :  { %13334 = vmatprep.subr.mxu1 %v18673_v0  ;;  %13324 = vmatpush3.msra.mxu0 %v16001_v28 }
  0xdd   :  { %13335 = vmatpush3.msra.mxu1 %v16006_v29  ;;  %13325 = vmatprep.subr.mxu0 %v18673_v0 }
  0xde   :  { %13336 = vmatprep.subr.mxu1 %v18673_v0  ;;  %13326 = vmatpush3.msra.mxu0 %v16015_v30 }
  0xdf   :  { %13337 = vmatpush3.msra.mxu1 %v16020_v31  ;;  %13327 = vmatprep.subr.mxu0 %v18673_v0 }
  0xe0   :  { %13338 = vmatprep.subr.mxu1 %v18673_v0  ;;  %13328 = vmatpush3.msra.mxu0 %v16029_v32 }
  0xe1   :  { %13329 = vmatprep.mubr.msk.f32.mxu0 %vm15708_vm0, %v18673_v0  ;;  %13339 = vmatpush3.msra.mxu1 %v16036_v33 }
  0xe2   :  { %13340 = vmatprep.mubr.msk.f32.mxu1 %vm15708_vm0, %v18673_v0  ;;  %13330 = vmatmul.mubr.f32.vlgmr.msra.gmra.mxu0 %v18673_v0 }
  0xe3   :  { %13341 = vmatmul.mubr.f32.vlgmr.msra.gmra.mxu1 %v18673_v0  ;;  %13343 = vmatprep.subr.mxu0 %v18673_v0 }
  0xe4   :  { %13354 = vmatprep.subr.mxu1 %v18673_v0  ;;  %13344 = vmatpush3.msra.mxu0 %v16049_v34 }
  0xe5   :  { %13355 = vmatpush3.msra.mxu1 %v16051_v35  ;;  %13345 = vmatprep.subr.mxu0 %v18673_v0 }
  0xe6   :  { %13356 = vmatprep.subr.mxu1 %v18673_v0  ;;  %13346 = vmatpush3.msra.mxu0 %v16060_v36 }
  0xe7   :  { %13357 = vmatpush3.msra.mxu1 %v16062_v37  ;;  %13347 = vmatprep.subr.mxu0 %v18673_v0 }
  0xe8   :  { %13358 = vmatprep.subr.mxu1 %v18673_v0  ;;  %13348 = vmatpush3.msra.mxu0 %v16071_v38 }
  0xe9   :  { %13359 = vmatpush3.msra.mxu1 %v16073_v39  ;;  %13349 = vmatprep.subr.mxu0 %v18673_v0 }
  0xea   :  { %13360 = vmatprep.subr.mxu1 %v18673_v0  ;;  %13350 = vmatpush3.msra.mxu0 %v16082_v40 }
  0xeb   :  { %13361 = vmatpush3.msra.mxu1 %v16084_v41  ;;  %13362 = vmatprep.mubr.msk.f32.mxu1 %vm15708_vm0, %v18673_v0 }
  0xec   :  { %13351 = vmatprep.mubr.msk.f32.mxu0 %vm15708_vm0, %v18673_v0  ;;  %13363 = vmatmul.mubr.f32.vlgmr.msra.gmra.mxu1 %v18673_v0 }
  0xed   :  { %13365 = vmatprep.subr.mxu0 %v18673_v0  ;;  %13352 = vmatmul.mubr.f32.vlgmr.msra.gmra.mxu0 %v18673_v0 }
  0xee   :  { %13376 = vmatprep.subr.mxu1 %v18673_v0  ;;  %13366 = vmatpush3.msra.mxu0 %v16096_v42 }
  0xef   :  { %13373 = vmatprep.mubr.msk.f32.mxu0 %vm15708_vm0, %v18673_v0  ;;  %13367 = vmatprep.subr.mxu0 %v18673_v0 }
  0xf0   :  { %13377 = vmatpush3.msra.mxu1 %v16100_v43  ;;  %13368 = vmatpush3.msra.mxu0 %v16103_v44 }
  0xf1   :  { %13378 = vmatprep.subr.mxu1 %v18673_v0  ;;  %13369 = vmatprep.subr.mxu0 %v18673_v0 }
  0xf2   :  { %13379 = vmatpush3.msra.mxu1 %v16109_v45  ;;  %13370 = vmatpush3.msra.mxu0 %v16112_v46 }
  0xf3   :  { %13380 = vmatprep.subr.mxu1 %v18673_v0  ;;  %13371 = vmatprep.subr.mxu0 %v18673_v0 }
  0xf4   :  { %13381 = vmatpush3.msra.mxu1 %v16117_v47  ;;  %13372 = vmatpush3.msra.mxu0 %v16120_v48 }
  0xf5   :  { %13382 = vmatprep.subr.mxu1 %v18673_v0  ;;  %13374 = vmatmul.mubr.f32.vlgmr.msra.gmra.mxu0 %v18673_v0 }
  0xf6   :  { %13383 = vmatpush3.msra.mxu1 %v16125_v49  ;;  %13384 = vmatprep.mubr.msk.f32.mxu1 %vm15708_vm0, %v18673_v0 }
  0xf7   :  { %13387 = vmatprep.subr.mxu0 %v18673_v0  ;;  %13385 = vmatmul.mubr.f32.vlgmr.msra.gmra.mxu1 %v18673_v0 }
  0xf8   :  { %13388 = vmatpush3.msra.mxu0 %v15985_v26  ;;  %13398 = vmatprep.subr.mxu1 %v18673_v0 }
  0xf9   :  { %13389 = vmatprep.subr.mxu0 %v18673_v0  ;;  %13399 = vmatpush3.msra.mxu1 %v15990_v27 }
  0xfa   :  { %13390 = vmatpush3.msra.mxu0 %v16001_v28  ;;  %13400 = vmatprep.subr.mxu1 %v18673_v0 }
  0xfb   :  { %13391 = vmatprep.subr.mxu0 %v18673_v0  ;;  %13401 = vmatpush3.msra.mxu1 %v16006_v29 }
  0xfc   :  { %13392 = vmatpush3.msra.mxu0 %v16015_v30  ;;  %13402 = vmatprep.subr.mxu1 %v18673_v0 }
  0xfd   :  { %13393 = vmatprep.subr.mxu0 %v18673_v0  ;;  %13403 = vmatpush3.msra.mxu1 %v16020_v31 }
  0xfe   :  { %13394 = vmatpush3.msra.mxu0 %v16029_v32  ;;  %13404 = vmatprep.subr.mxu1 %v18673_v0 }
  0xff   :  { %13395 = vmatprep.mubr.msk.f32.mxu0 %vm15708_vm0, %v18673_v0  ;;  %13405 = vmatpush3.msra.mxu1 %v16036_v33 }
 0x100   :  { %13406 = vmatprep.mubr.msk.f32.mxu1 %vm15708_vm0, %v18673_v0  ;;  %13409 = vmatprep.subr.mxu0 %v18673_v0 }
 0x101   :  { %13420 = vmatprep.subr.mxu1 %v18673_v0 }
 0x184   :  { %v467_v50 = vpop.f32.mrf.mxu0 }
 0x185   :  { %v16162_v3 = vadd.f32 %v12307_v62, %v467_v50  ;;  %v16178_v50 = vld [vmem:[#allocation11 + $0x1] sm:$0x1] }
 0x186   :  { %v543_v51 = vpop.f32.mrf.mxu1  ;;  %v13265_v52 = vpop.f32.mrf.mxu0 }
 0x187   :  { %v16169_v12 = vadd.f32 %v12309_v9, %v543_v51  ;;  %v12315_v51 = vld [vmem:[#allocation10 + $0x1] ss:$0 sm:$0xff] }
 0x188   :  { %v13276_v53 = vpop.f32.mrf.mxu1 }
 0x18e   :  { %v619_v54 = vpop.f32.mrf.mxu0 }
 0x190   :  { %v13287_v55 = vpop.f32.mrf.mxu0  ;;  %v695_v56 = vpop.f32.mrf.mxu1 }
 0x191   :  { %v16175_v20 = vadd.f32 %v12313_v15, %v695_v56 }
 0x192   :  { %v13298_v57 = vpop.f32.mrf.mxu1 }
 0x198   :  { %v771_v58 = vpop.f32.mrf.mxu0 }
 0x199   :  { %v16181_v56 = vadd.f32 %v12315_v51, %v771_v58 }
 0x19a   :  { %v13309_v59 = vpop.f32.mrf.mxu0  ;;  %v16158_v60 = vpop.f32.mrf.mxu1 }
 0x19c   :  { %v13320_v61 = vpop.f32.mrf.mxu1 }
 0x1a2   :  { %v920_v1 = vpop.f32.mrf.mxu0 }
 0x1a3   :  { %v990_v2 = vpop.f32.mrf.mxu1  ;;  %v921_v4 = vadd.f32 %v920_v1, %v16160_v63 }
 0x1a4   :  { %v13331_v6 = vpop.f32.mrf.mxu0  ;;  %v991_v11 = vadd.f32 %v990_v2, %v16165_v5 }
 0x1a5   :  { %v13342_v7 = vpop.f32.mrf.mxu1  ;;  %v1064_v8 = vadd.f32 %v921_v4, %v16162_v3 }
 0x1a6   :  { %v1071_v14 = vadd.f32 %v991_v11, %v16169_v12  ;;  %v16184_v7 = vld [vmem:[#allocation5 + $0x2] sm:$0x1] }
 0x1a7   :  { %v12319_v10 = vmul.f32 -1.442695, %v1064_v8 }
 0x1a8   :  { %v12320_v21 = vmul.f32 -1.442695, %v1071_v14  ;;  %v12311_v14 = vld [vmem:[#allocation2 + $0x2] ss:$0 sm:$0xff] }
 0x1a9   :  { %14895 = vpow2.f32 %v12319_v10  ;;  %v16187_v58 = vadd.f32 %v12311_v14, %v619_v54 }
 0x1aa   :  { %14897 = vpow2.f32 %v12320_v21 }
 0x1ac   :  { %v1151_v16 = vpop.f32.mrf.mxu1 }
 0x1ad   :  { %v1152_v17 = vadd.f32 %v1151_v16, %v16171_v13  ;;  %v1060_v18 = vpop.f32.mrf.mxu0 }
 0x1ae   :  { %v13364_v19 = vpop.f32.mrf.mxu1  ;;  %v1061_v11 = vadd.f32 %v1060_v18, %v16184_v7 }
 0x1af   :  { %v1296_v22 = vrot.slane %v1152_v17, 1  ;;  %v13353_v23 = vpop.f32.mrf.mxu0  ;;  %v16189_v17 = vld [vmem:[#allocation11 + $0x2] sm:$0x1] }
 0x1b1   :  { %v1298_v24 = vadd.f32 %v1296_v22, %v16175_v20 }
 0x1b3   :  { %v12321_v25 = vmul.f32 -1.442695, %v1298_v24 }
 0x1b5   :  { %14899 = vpow2.f32 %v12321_v25  ;;  %v1221_v52 = vpop.f32.mrf.mxu0  ;;  %v12317_v25 = vld [vmem:[#allocation10 + $0x2] ss:$0 sm:$0xff] }
 0x1b6   :  { %v14896_v53 = vpop.eup %14895  ;;  %v1222_v55 = vadd.f32 %v1221_v52, %v16178_v50  ;;  %v16194_v18 = vadd.f32 %v12317_v25, %v16158_v60 }
 0x1b7   :  { %v1068_v57 = vadd.f32 1.0, %v14896_v53  ;;  %v1291_v59 = vpop.f32.mrf.mxu1  ;;  %v13375_v61 = vpop.f32.mrf.mxu0 }
 0x1b8   :  { %v1306_v62 = vrot.slane %v1222_v55, 1  ;;  %v14898_v6 = vpop.eup %14897  ;;  %v1292_v21 = vadd.f32 %v1291_v59, %v16189_v17 }
 0x1b9   :  { %14901 = vrcp.f32 %v1068_v57  ;;  %v13386_v1 = vpop.f32.mrf.mxu1  ;;  %v1075_v9 = vadd.f32 1.0, %v14898_v6 }
 0x1ba   :  { %v1308_v2 = vadd.f32 %v1306_v62, %v16181_v56  ;;  %v1316_v24 = vrot.slane %v1292_v21, 1 }
 0x1bc   :  { %v12322_v4 = vmul.f32 -1.442695, %v1308_v2 }
 0x1be   :  { %14903 = vpow2.f32 %v12322_v4 }
 0x1c2   :  { %v14900_v8 = vpop.eup %14899 }
 0x1c3   :  { %v1302_v10 = vadd.f32 1.0, %v14900_v8 }
 0x1c5   :  { %14905 = vrcp.f32 %v1302_v10 }
 0x1c6   :  { %v14902_v15 = vpop.eup %14901  ;;  %14907 = vrcp.f32 %v1075_v9 }
 0x1c7   :  { %v1078_v16 = vmul.f32 %v14902_v15, %v1061_v11 }
 0x1c9   :  { %v1079_v19 = vadd.f32 %v1078_v16, %v16187_v58 }
 0x1cb   :  { %14909 = vtanh.f32 %v1079_v19  ;;  %v14904_v22 = vpop.eup %14903 }
 0x1cc   :  { %v1312_v23 = vadd.f32 1.0, %v14904_v22 }
 0x1ce   :  { %14911 = vrcp.f32 %v1312_v23 }
 0x1d2   :  { %v14906_v51 = vpop.eup %14905 }
 0x1d3   :  { %v1318_v54 = vmul.f32 %v14906_v51, %v1316_v24  ;;  %v14908_v52 = vpop.eup %14907 }
 0x1d4   :  { %v1081_v55 = vsub.f32 1.0, %v14908_v52  ;;  %v1083_v62 = vmul.f32 0.0, %v14908_v52 }
 0x1d5   :  { %v1319_v53 = vadd.f32 %v1318_v54, %v16194_v18 }
 0x1d7   :  { %14913 = vtanh.f32 %v1319_v53 }
 0x1d8   :  { %v14910_v57 = vpop.eup %14909 }
 0x1d9   :  { %v1082_v61 = vmul.f32 %v14910_v57, %v1081_v55 }
 0x1db   :  { %v16197_v1 = vadd.f32 %v1083_v62, %v1082_v61  ;;  %v14912_v60 = vpop.eup %14911 }
 0x1dc   :  { %v1321_v59 = vsub.f32 1.0, %v14912_v60  ;;  %v1323_v6 = vmul.f32 0.0, %v14912_v60 }
 0x1dd   :  { %13396 = vmatmul.mubr.msk.f32.vlgmr.msra.gmra.mxu0 %vm397_vm1, %v16197_v1  ;;  %13407 = vmatmul.mubr.msk.f32.vlgmr.msra.gmra.mxu1 %vm397_vm1, %v16197_v1 }
 0x1de   :  { %13410 = vmatpush3.msra.mxu0 %v16049_v34  ;;  %13421 = vmatpush3.msra.mxu1 %v16051_v35 }
 0x1df   :  { %13411 = vmatprep.subr.mxu0 %v18673_v0  ;;  %13422 = vmatprep.subr.mxu1 %v18673_v0 }
 0x1e0   :  { %13412 = vmatpush3.msra.mxu0 %v16060_v36  ;;  %13417 = vmatprep.mubr.msk.f32.mxu0 %vm15708_vm0, %v18673_v0 }
 0x1e1   :  { %13413 = vmatprep.subr.mxu0 %v18673_v0  ;;  %13423 = vmatpush3.msra.mxu1 %v16062_v37 }
 0x1e2   :  { %13414 = vmatpush3.msra.mxu0 %v16071_v38  ;;  %13424 = vmatprep.subr.mxu1 %v18673_v0 }
 0x1e3   :  { %13415 = vmatprep.subr.mxu0 %v18673_v0  ;;  %13425 = vmatpush3.msra.mxu1 %v16073_v39 }
 0x1e4   :  { %v14914_v2 = vpop.eup %14913  ;;  %13416 = vmatpush3.msra.mxu0 %v16082_v40  ;;  %13426 = vmatprep.subr.mxu1 %v18673_v0 }
 0x1e5   :  { %13418 = vmatmul.mubr.msk.f32.vlgmr.msra.gmra.mxu0 %vm397_vm1, %v16197_v1  ;;  %13431 = vmatprep.subr.mxu0 %v18673_v0  ;;  %v1322_v4 = vmul.f32 %v14914_v2, %v1321_v59 }
 0x1e6   :  { %13432 = vmatpush3.msra.mxu0 %v16096_v42  ;;  %13427 = vmatpush3.msra.mxu1 %v16084_v41 }
 0x1e7   :  { %13433 = vmatprep.subr.mxu0 %v18673_v0  ;;  %13428 = vmatprep.mubr.msk.f32.mxu1 %vm15708_vm0, %v18673_v0  ;;  %v16226_v8 = vadd.f32 %v1323_v6, %v1322_v4 }
 0x1e8   :  { %13434 = vmatpush3.msra.mxu0 %v16103_v44  ;;  %13442 = vmatprep.subr.mxu1 %v18673_v0 }
 0x1e9   :  { %13435 = vmatprep.subr.mxu0 %v18673_v0  ;;  %v1571_v9 = vrot.slane %v16226_v8, 7  ;;  %13439 = vmatprep.mubr.msk.f32.mxu0 %vm15708_vm0, %v18673_v0 }
 0x1ea   :  { %13436 = vmatpush3.msra.mxu0 %v16112_v46 }
 0x1eb   :  { %13429 = vmatmul.mubr.msk.f32.vlgmr.msra.gmra.mxu1 %vm397_vm1, %v1571_v9  ;;  %13437 = vmatprep.subr.mxu0 %v18673_v0 }
 0x1ec   :  { %13443 = vmatpush3.msra.mxu1 %v16100_v43  ;;  %13438 = vmatpush3.msra.mxu0 %v16120_v48 }
 0x1ed   :  { %13444 = vmatprep.subr.mxu1 %v18673_v0  ;;  %13440 = vmatmul.mubr.msk.f32.vlgmr.msra.gmra.mxu0 %vm397_vm1, %v1571_v9 }
 0x1ee   :  { %13445 = vmatpush3.msra.mxu1 %v16109_v45  ;;  %13450 = vmatprep.mubr.msk.f32.mxu1 %vm15708_vm0, %v18673_v0 }
 0x1ef   :  { %13446 = vmatprep.subr.mxu1 %v18673_v0  ;;  %13453 = vmatprep.subr.mxu0 %v18673_v0 }
 0x1f0   :  { %13447 = vmatpush3.msra.mxu1 %v16117_v47  ;;  %13454 = vmatpush3.msra.mxu0 %v15985_v26 }
 0x1f1   :  { %13448 = vmatprep.subr.mxu1 %v18673_v0  ;;  %13455 = vmatprep.subr.mxu0 %v18673_v0 }
 0x1f2   :  { %13449 = vmatpush3.msra.mxu1 %v16125_v49  ;;  %13456 = vmatpush3.msra.mxu0 %v16001_v28 }
 0x1f3   :  { %13451 = vmatmul.mubr.msk.f32.vlgmr.msra.gmra.mxu1 %vm397_vm1, %v1571_v9  ;;  %13464 = vmatprep.subr.mxu1 %v18673_v0 }
 0x1f4   :  { %13465 = vmatpush3.msra.mxu1 %v15990_v27  ;;  %13457 = vmatprep.subr.mxu0 %v18673_v0 }
 0x1f5   :  { %13466 = vmatprep.subr.mxu1 %v18673_v0  ;;  %13458 = vmatpush3.msra.mxu0 %v16015_v30 }
 0x1f6   :  { %13467 = vmatpush3.msra.mxu1 %v16006_v29  ;;  %13459 = vmatprep.subr.mxu0 %v18673_v0 }
 0x1f7   :  { %13468 = vmatprep.subr.mxu1 %v18673_v0  ;;  %13460 = vmatpush3.msra.mxu0 %v16029_v32 }
 0x1f8   :  { %13469 = vmatpush3.msra.mxu1 %v16020_v31  ;;  %13461 = vmatprep.mubr.msk.f32.mxu0 %vm15708_vm0, %v18673_v0 }
 0x1f9   :  { %13470 = vmatprep.subr.mxu1 %v18673_v0  ;;  %13472 = vmatprep.mubr.msk.f32.mxu1 %vm15708_vm0, %v18673_v0 }
 0x1fa   :  { %13471 = vmatpush3.msra.mxu1 %v16036_v33  ;;  %13475 = vmatprep.subr.mxu0 %v18673_v0 }
 0x1fb   :  { %13486 = vmatprep.subr.mxu1 %v18673_v0 }
 0x29d   :  { %v1394_v10 = vpop.f32.mrf.mxu0  ;;  %v1464_v11 = vpop.f32.mrf.mxu1 }
 0x29e   :  { %v1395_v14 = vadd.f32 %v1394_v10, %v16160_v63  ;;  %v1465_v15 = vadd.f32 %v1464_v11, %v16165_v5 }
 0x29f   :  { %v13397_v16 = vpop.f32.mrf.mxu0  ;;  %v13408_v19 = vpop.f32.mrf.mxu1 }
 0x2a0   :  { %v1539_v21 = vrot.slane %v1395_v14, 7  ;;  %v1549_v23 = vrot.slane %v1465_v15, 7 }
 0x2a2   :  { %v1541_v22 = vadd.f32 %v1539_v21, %v16162_v3  ;;  %v1551_v51 = vadd.f32 %v1549_v23, %v16169_v12 }
 0x2a4   :  { %v12326_v24 = vmul.f32 -1.442695, %v1541_v22  ;;  %v12327_v52 = vmul.f32 -1.442695, %v1551_v51 }
 0x2a5   :  { %v1534_v25 = vpop.f32.mrf.mxu0 }
 0x2a6   :  { %14915 = vpow2.f32 %v12326_v24  ;;  %v1535_v21 = vadd.f32 %v1534_v25, %v16184_v7 }
 0x2a7   :  { %v13419_v54 = vpop.f32.mrf.mxu0  ;;  %14917 = vpow2.f32 %v12327_v52 }
 0x2a8   :  { %v1559_v24 = vrot.slane %v1535_v21, 7  ;;  %v1812_v21 = vrot.slane %v16226_v8, 1 }
 0x2ab   :  { %v1640_v53 = vpop.f32.mrf.mxu1 }
 0x2ac   :  { %v1641_v55 = vadd.f32 %v1640_v53, %v16171_v13 }
 0x2ad   :  { %v13430_v57 = vpop.f32.mrf.mxu1  ;;  %v1710_v61 = vpop.f32.mrf.mxu0 }
 0x2ae   :  { %v1785_v62 = vrot.slane %v1641_v55, 2  ;;  %v1711_v60 = vadd.f32 %v1710_v61, %v16178_v50 }
 0x2af   :  { %v13441_v59 = vpop.f32.mrf.mxu0 }
 0x2b0   :  { %v1787_v2 = vadd.f32 %v1785_v62, %v16175_v20  ;;  %v1795_v6 = vrot.slane %v1711_v60, 2 }
 0x2b2   :  { %v12331_v4 = vmul.f32 -1.442695, %v1787_v2  ;;  %v1797_v15 = vadd.f32 %v1795_v6, %v16181_v56  ;;  %v1566_v6 = vrot.slane %v16197_v1, 7 }
 0x2b3   :  { %v14916_v9 = vpop.eup %14915  ;;  %v1780_v10 = vpop.f32.mrf.mxu1 }
 0x2b4   :  { %v1545_v11 = vadd.f32 1.0, %v14916_v9  ;;  %14919 = vpow2.f32 %v12331_v4  ;;  %v12332_v16 = vmul.f32 -1.442695, %v1797_v15  ;;  %v14918_v19 = vpop.eup %14917  ;;  %v1781_v57 = vadd.f32 %v1780_v10, %v16189_v17 }
 0x2b5   :  { %v13452_v14 = vpop.f32.mrf.mxu1  ;;  %v1555_v22 = vadd.f32 1.0, %v14918_v19 }
 0x2b6   :  { %14921 = vrcp.f32 %v1545_v11  ;;  %v1805_v60 = vrot.slane %v1781_v57, 2 }
 0x2b7   :  { %14923 = vpow2.f32 %v12332_v16 }
 0x2b8   :  { %14925 = vrcp.f32 %v1555_v22 }
 0x2c1   :  { %v14920_v23 = vpop.eup %14919 }
 0x2c2   :  { %v1791_v51 = vadd.f32 1.0, %v14920_v23 }
 0x2c3   :  { %v14922_v54 = vpop.eup %14921 }
 0x2c4   :  { %v1561_v52 = vmul.f32 %v14922_v54, %v1559_v24  ;;  %14927 = vrcp.f32 %v1791_v51  ;;  %v14924_v55 = vpop.eup %14923 }
 0x2c5   :  { %v1801_v61 = vadd.f32 1.0, %v14924_v55  ;;  %v14926_v62 = vpop.eup %14925 }
 0x2c6   :  { %v1562_v53 = vadd.f32 %v1561_v52, %v16187_v58  ;;  %v1564_v4 = vsub.f32 1.0, %v14926_v62  ;;  %v1568_v14 = vmul.f32 %v14926_v62, %v1566_v6 }
 0x2c8   :  { %14929 = vtanh.f32 %v1562_v53 }
 0x2c9   :  { %14931 = vrcp.f32 %v1801_v61 }
 0x2d1   :  { %v14928_v59 = vpop.eup %14927 }
 0x2d2   :  { %v1807_v25 = vmul.f32 %v14928_v59, %v1805_v60 }
 0x2d4   :  { %v1808_v2 = vadd.f32 %v1807_v25, %v16194_v18 }
 0x2d5   :  { %v14930_v9 = vpop.eup %14929 }
 0x2d6   :  { %14933 = vtanh.f32 %v1808_v2  ;;  %v1565_v11 = vmul.f32 %v14930_v9, %v1564_v4  ;;  %v14932_v10 = vpop.eup %14931 }
 0x2d7   :  { %v1810_v19 = vsub.f32 1.0, %v14932_v10  ;;  %v1814_v24 = vmul.f32 %v14932_v10, %v1812_v21 }
 0x2d8   :  { %v16284_v15 = vadd.f32 %v1568_v14, %v1565_v11 }
 0x2da   :  { %v1817_v16 = vrot.slane %v16284_v15, 1 }
 0x2dc   :  { %13462 = vmatmul.mubr.msk.f32.vlgmr.msra.gmra.mxu0 %vm397_vm1, %v1817_v16  ;;  %13473 = vmatmul.mubr.msk.f32.vlgmr.msra.gmra.mxu1 %vm397_vm1, %v1817_v16 }
 0x2dd   :  { %13476 = vmatpush3.msra.mxu0 %v16049_v34  ;;  %13487 = vmatpush3.msra.mxu1 %v16051_v35 }
 0x2de   :  { %13477 = vmatprep.subr.mxu0 %v18673_v0  ;;  %13488 = vmatprep.subr.mxu1 %v18673_v0 }
 0x2df   :  { %13478 = vmatpush3.msra.mxu0 %v16060_v36  ;;  %13483 = vmatprep.mubr.msk.f32.mxu0 %vm15708_vm0, %v18673_v0 }
 0x2e0   :  { %13479 = vmatprep.subr.mxu0 %v18673_v0  ;;  %13489 = vmatpush3.msra.mxu1 %v16062_v37 }
 0x2e1   :  { %13480 = vmatpush3.msra.mxu0 %v16071_v38  ;;  %13490 = vmatprep.subr.mxu1 %v18673_v0 }
 0x2e2   :  { %13481 = vmatprep.subr.mxu0 %v18673_v0  ;;  %13491 = vmatpush3.msra.mxu1 %v16073_v39 }
 0x2e3   :  { %v14934_v22 = vpop.eup %14933  ;;  %13482 = vmatpush3.msra.mxu0 %v16082_v40  ;;  %13492 = vmatprep.subr.mxu1 %v18673_v0 }
 0x2e4   :  { %13484 = vmatmul.mubr.msk.f32.vlgmr.msra.gmra.mxu0 %vm397_vm1, %v1817_v16  ;;  %13497 = vmatprep.subr.mxu0 %v18673_v0  ;;  %v1811_v23 = vmul.f32 %v14934_v22, %v1810_v19 }
 0x2e5   :  { %13498 = vmatpush3.msra.mxu0 %v16096_v42  ;;  %13493 = vmatpush3.msra.mxu1 %v16084_v41 }
 0x2e6   :  { %13499 = vmatprep.subr.mxu0 %v18673_v0  ;;  %13494 = vmatprep.mubr.msk.f32.mxu1 %vm15708_vm0, %v18673_v0  ;;  %v16312_v51 = vadd.f32 %v1814_v24, %v1811_v23 }
 0x2e7   :  { %13500 = vmatpush3.msra.mxu0 %v16103_v44  ;;  %13508 = vmatprep.subr.mxu1 %v18673_v0 }
 0x2e8   :  { %13501 = vmatprep.subr.mxu0 %v18673_v0  ;;  %v2063_v54 = vrot.slane %v16312_v51, 6  ;;  %13505 = vmatprep.mubr.msk.f32.mxu0 %vm15708_vm0, %v18673_v0 }
 0x2e9   :  { %13502 = vmatpush3.msra.mxu0 %v16112_v46 }
 0x2ea   :  { %13495 = vmatmul.mubr.msk.f32.vlgmr.msra.gmra.mxu1 %vm397_vm1, %v2063_v54  ;;  %13503 = vmatprep.subr.mxu0 %v18673_v0 }
 0x2eb   :  { %13509 = vmatpush3.msra.mxu1 %v16100_v43  ;;  %13504 = vmatpush3.msra.mxu0 %v16120_v48 }
 0x2ec   :  { %13510 = vmatprep.subr.mxu1 %v18673_v0  ;;  %13506 = vmatmul.mubr.msk.f32.vlgmr.msra.gmra.mxu0 %vm397_vm1, %v2063_v54 }
 0x2ed   :  { %13511 = vmatpush3.msra.mxu1 %v16109_v45  ;;  %13516 = vmatprep.mubr.msk.f32.mxu1 %vm15708_vm0, %v18673_v0 }
 0x2ee   :  { %13512 = vmatprep.subr.mxu1 %v18673_v0  ;;  %13519 = vmatprep.subr.mxu0 %v18673_v0 }
 0x2ef   :  { %13513 = vmatpush3.msra.mxu1 %v16117_v47  ;;  %13520 = vmatpush3.msra.mxu0 %v15985_v26 }
 0x2f0   :  { %13514 = vmatprep.subr.mxu1 %v18673_v0  ;;  %13521 = vmatprep.subr.mxu0 %v18673_v0 }
 0x2f1   :  { %13515 = vmatpush3.msra.mxu1 %v16125_v49  ;;  %13522 = vmatpush3.msra.mxu0 %v16001_v28 }
 0x2f2   :  { %13517 = vmatmul.mubr.msk.f32.vlgmr.msra.gmra.mxu1 %vm397_vm1, %v2063_v54  ;;  %13530 = vmatprep.subr.mxu1 %v18673_v0 }
 0x2f3   :  { %13531 = vmatpush3.msra.mxu1 %v15990_v27  ;;  %13523 = vmatprep.subr.mxu0 %v18673_v0 }
 0x2f4   :  { %13532 = vmatprep.subr.mxu1 %v18673_v0  ;;  %13524 = vmatpush3.msra.mxu0 %v16015_v30 }
 0x2f5   :  { %13533 = vmatpush3.msra.mxu1 %v16006_v29  ;;  %13525 = vmatprep.subr.mxu0 %v18673_v0 }
 0x2f6   :  { %13534 = vmatprep.subr.mxu1 %v18673_v0  ;;  %13526 = vmatpush3.msra.mxu0 %v16029_v32 }
 0x2f7   :  { %13535 = vmatpush3.msra.mxu1 %v16020_v31  ;;  %13527 = vmatprep.mubr.msk.f32.mxu0 %vm15708_vm0, %v18673_v0 }
 0x2f8   :  { %13536 = vmatprep.subr.mxu1 %v18673_v0  ;;  %13538 = vmatprep.mubr.msk.f32.mxu1 %vm15708_vm0, %v18673_v0 }
 0x2f9   :  { %13537 = vmatpush3.msra.mxu1 %v16036_v33  ;;  %13541 = vmatprep.subr.mxu0 %v18673_v0 }
 0x2fa   :  { %13552 = vmatprep.subr.mxu1 %v18673_v0 }
 0x39c   :  { %v1886_v52 = vpop.f32.mrf.mxu0  ;;  %v1956_v53 = vpop.f32.mrf.mxu1 }
 0x39d   :  { %v1887_v55 = vadd.f32 %v1886_v52, %v16160_v63  ;;  %v1957_v57 = vadd.f32 %v1956_v53, %v16165_v5 }
 0x39e   :  { %v13463_v61 = vpop.f32.mrf.mxu0  ;;  %v13474_v62 = vpop.f32.mrf.mxu1 }
 0x39f   :  { %v2031_v60 = vrot.slane %v1887_v55, 6  ;;  %v2041_v25 = vrot.slane %v1957_v57, 6 }
 0x3a1   :  { %v2033_v59 = vadd.f32 %v2031_v60, %v16162_v3  ;;  %v2043_v6 = vadd.f32 %v2041_v25, %v16169_v12 }
 0x3a3   :  { %v12336_v2 = vmul.f32 -1.442695, %v2033_v59  ;;  %v12337_v11 = vmul.f32 -1.442695, %v2043_v6 }
 0x3a4   :  { %v2026_v4 = vpop.f32.mrf.mxu0 }
 0x3a5   :  { %14935 = vpow2.f32 %v12336_v2  ;;  %v2027_v25 = vadd.f32 %v2026_v4, %v16184_v7 }
 0x3a6   :  { %v13485_v9 = vpop.f32.mrf.mxu0  ;;  %14937 = vpow2.f32 %v12337_v11 }
 0x3a7   :  { %v2051_v9 = vrot.slane %v2027_v25, 6 }
 0x3aa   :  { %v2132_v14 = vpop.f32.mrf.mxu1 }
 0x3ab   :  { %v2133_v16 = vadd.f32 %v2132_v14, %v16171_v13 }
 0x3ac   :  { %v13496_v10 = vpop.f32.mrf.mxu1  ;;  %v2202_v19 = vpop.f32.mrf.mxu0 }
 0x3ad   :  { %v2277_v21 = vrot.slane %v2133_v16, 3  ;;  %v2203_v22 = vadd.f32 %v2202_v19, %v16178_v50 }
 0x3ae   :  { %v13507_v23 = vpop.f32.mrf.mxu0 }
 0x3af   :  { %v2279_v24 = vadd.f32 %v2277_v21, %v16175_v20  ;;  %v2287_v52 = vrot.slane %v2203_v22, 3 }
 0x3b1   :  { %v12341_v54 = vmul.f32 -1.442695, %v2279_v24  ;;  %v2289_v62 = vadd.f32 %v2287_v52, %v16181_v56 }
 0x3b2   :  { %v14936_v53 = vpop.eup %14935  ;;  %v2272_v55 = vpop.f32.mrf.mxu1 }
 0x3b3   :  { %v2037_v57 = vadd.f32 1.0, %v14936_v53  ;;  %14939 = vpow2.f32 %v12341_v54  ;;  %v12342_v60 = vmul.f32 -1.442695, %v2289_v62  ;;  %v14938_v59 = vpop.eup %14937  ;;  %v2273_v21 = vadd.f32 %v2272_v55, %v16189_v17 }
 0x3b4   :  { %v13518_v61 = vpop.f32.mrf.mxu1  ;;  %v2047_v2 = vadd.f32 1.0, %v14938_v59 }
 0x3b5   :  { %14941 = vrcp.f32 %v2037_v57  ;;  %v2297_v24 = vrot.slane %v2273_v21, 3  ;;  %v2058_v57 = vrot.slane %v16284_v15, 7 }
 0x3b6   :  { %14943 = vpow2.f32 %v12342_v60 }
 0x3b7   :  { %14945 = vrcp.f32 %v2047_v2 }
 0x3c0   :  { %v14940_v6 = vpop.eup %14939 }
 0x3c1   :  { %v2283_v11 = vadd.f32 1.0, %v14940_v6 }
 0x3c2   :  { %v14942_v14 = vpop.eup %14941 }
 0x3c3   :  { %v2053_v16 = vmul.f32 %v14942_v14, %v2051_v9  ;;  %14947 = vrcp.f32 %v2283_v11  ;;  %v14944_v19 = vpop.eup %14943 }
 0x3c4   :  { %v2293_v22 = vadd.f32 1.0, %v14944_v19  ;;  %v14946_v23 = vpop.eup %14945 }
 0x3c5   :  { %v2054_v10 = vadd.f32 %v2053_v16, %v16187_v58  ;;  %v2056_v53 = vsub.f32 1.0, %v14946_v23  ;;  %v2060_v60 = vmul.f32 %v14946_v23, %v2058_v57 }
 0x3c7   :  { %14949 = vtanh.f32 %v2054_v10 }
 0x3c8   :  { %14951 = vrcp.f32 %v2293_v22 }
 0x3d0   :  { %v14948_v54 = vpop.eup %14947 }
 0x3d1   :  { %v2299_v4 = vmul.f32 %v14948_v54, %v2297_v24 }
 0x3d3   :  { %v2300_v52 = vadd.f32 %v2299_v4, %v16194_v18 }
 0x3d4   :  { %v14950_v61 = vpop.eup %14949 }
 0x3d5   :  { %14953 = vtanh.f32 %v2300_v52  ;;  %v2057_v62 = vmul.f32 %v14950_v61, %v2056_v53  ;;  %v14952_v55 = vpop.eup %14951 }
 0x3d7   :  { %v16370_v59 = vadd.f32 %v2060_v60, %v2057_v62 }
 0x3d9   :  { %v2309_v25 = vrot.slane %v16370_v59, 2 }
 0x3db   :  { %13528 = vmatmul.mubr.msk.f32.vlgmr.msra.gmra.mxu0 %vm397_vm1, %v2309_v25  ;;  %13539 = vmatmul.mubr.msk.f32.vlgmr.msra.gmra.mxu1 %vm397_vm1, %v2309_v25 }
 0x3dc   :  { %13542 = vmatpush3.msra.mxu0 %v16049_v34  ;;  %13553 = vmatpush3.msra.mxu1 %v16051_v35  ;;  %v2302_v34 = vsub.f32 1.0, %v14952_v55  ;;  %v2304_v35 = vrot.slane %v16312_v51, 1 }
 0x3dd   :  { %13543 = vmatprep.subr.mxu0 %v18673_v0  ;;  %13554 = vmatprep.subr.mxu1 %v18673_v0 }
 0x3de   :  { %13544 = vmatpush3.msra.mxu0 %v16060_v36  ;;  %13549 = vmatprep.mubr.msk.f32.mxu0 %vm15708_vm0, %v18673_v0 }
 0x3df   :  { %13545 = vmatprep.subr.mxu0 %v18673_v0  ;;  %13555 = vmatpush3.msra.mxu1 %v16062_v37  ;;  %v2306_v37 = vmul.f32 %v14952_v55, %v2304_v35 }
 0x3e0   :  { %13546 = vmatpush3.msra.mxu0 %v16071_v38  ;;  %13556 = vmatprep.subr.mxu1 %v18673_v0 }
 0x3e1   :  { %13547 = vmatprep.subr.mxu0 %v18673_v0  ;;  %13557 = vmatpush3.msra.mxu1 %v16073_v39 }
 0x3e2   :  { %v14954_v2 = vpop.eup %14953  ;;  %13548 = vmatpush3.msra.mxu0 %v16082_v40  ;;  %13558 = vmatprep.subr.mxu1 %v18673_v0 }
 0x3e3   :  { %13550 = vmatmul.mubr.msk.f32.vlgmr.msra.gmra.mxu0 %vm397_vm1, %v2309_v25  ;;  %13563 = vmatprep.subr.mxu0 %v18673_v0  ;;  %v2303_v36 = vmul.f32 %v14954_v2, %v2302_v34 }
 0x3e4   :  { %13564 = vmatpush3.msra.mxu0 %v16096_v42  ;;  %13559 = vmatpush3.msra.mxu1 %v16084_v41 }
 0x3e5   :  { %13565 = vmatprep.subr.mxu0 %v18673_v0  ;;  %13560 = vmatprep.mubr.msk.f32.mxu1 %vm15708_vm0, %v18673_v0  ;;  %v16398_v38 = vadd.f32 %v2306_v37, %v2303_v36  ;;  %v2550_v37 = vrot.slane %v16370_v59, 7 }
 0x3e6   :  { %13566 = vmatpush3.msra.mxu0 %v16103_v44  ;;  %13574 = vmatprep.subr.mxu1 %v18673_v0 }
 0x3e7   :  { %13567 = vmatprep.subr.mxu0 %v18673_v0  ;;  %v2555_v39 = vrot.slane %v16398_v38, 5  ;;  %13571 = vmatprep.mubr.msk.f32.mxu0 %vm15708_vm0, %v18673_v0 }
 0x3e8   :  { %13568 = vmatpush3.msra.mxu0 %v16112_v46 }
 0x3e9   :  { %13561 = vmatmul.mubr.msk.f32.vlgmr.msra.gmra.mxu1 %vm397_vm1, %v2555_v39  ;;  %13569 = vmatprep.subr.mxu0 %v18673_v0 }
 0x3ea   :  { %13575 = vmatpush3.msra.mxu1 %v16100_v43  ;;  %13570 = vmatpush3.msra.mxu0 %v16120_v48 }
 0x3eb   :  { %13576 = vmatprep.subr.mxu1 %v18673_v0  ;;  %13572 = vmatmul.mubr.msk.f32.vlgmr.msra.gmra.mxu0 %vm397_vm1, %v2555_v39 }
 0x3ec   :  { %13577 = vmatpush3.msra.mxu1 %v16109_v45  ;;  %13582 = vmatprep.mubr.msk.f32.mxu1 %vm15708_vm0, %v18673_v0 }
 0x3ed   :  { %13578 = vmatprep.subr.mxu1 %v18673_v0  ;;  %13585 = vmatprep.subr.mxu0 %v18673_v0 }
 0x3ee   :  { %13579 = vmatpush3.msra.mxu1 %v16117_v47  ;;  %13586 = vmatpush3.msra.mxu0 %v15985_v26 }
 0x3ef   :  { %13580 = vmatprep.subr.mxu1 %v18673_v0  ;;  %13587 = vmatprep.subr.mxu0 %v18673_v0 }
 0x3f0   :  { %13581 = vmatpush3.msra.mxu1 %v16125_v49  ;;  %13588 = vmatpush3.msra.mxu0 %v16001_v28 }
 0x3f1   :  { %13583 = vmatmul.mubr.msk.f32.vlgmr.msra.gmra.mxu1 %vm397_vm1, %v2555_v39  ;;  %13596 = vmatprep.subr.mxu1 %v18673_v0 }
 0x3f2   :  { %13597 = vmatpush3.msra.mxu1 %v15990_v27  ;;  %13589 = vmatprep.subr.mxu0 %v18673_v0 }
 0x3f3   :  { %13598 = vmatprep.subr.mxu1 %v18673_v0  ;;  %13590 = vmatpush3.msra.mxu0 %v16015_v30 }
 0x3f4   :  { %13599 = vmatpush3.msra.mxu1 %v16006_v29  ;;  %13591 = vmatprep.subr.mxu0 %v18673_v0 }
 0x3f5   :  { %13600 = vmatprep.subr.mxu1 %v18673_v0  ;;  %13592 = vmatpush3.msra.mxu0 %v16029_v32 }
 0x3f6   :  { %13601 = vmatpush3.msra.mxu1 %v16020_v31  ;;  %13593 = vmatprep.mubr.msk.f32.mxu0 %vm15708_vm0, %v18673_v0 }
 0x3f7   :  { %13602 = vmatprep.subr.mxu1 %v18673_v0  ;;  %13604 = vmatprep.mubr.msk.f32.mxu1 %vm15708_vm0, %v18673_v0 }
 0x3f8   :  { %13603 = vmatpush3.msra.mxu1 %v16036_v33  ;;  %13607 = vmatprep.subr.mxu0 %v18673_v0 }
 0x3f9   :  { %13618 = vmatprep.subr.mxu1 %v18673_v0 }
 0x49b   :  { %v2378_v26 = vpop.f32.mrf.mxu0  ;;  %v2448_v27 = vpop.f32.mrf.mxu1 }
 0x49c   :  { %v2379_v28 = vadd.f32 %v2378_v26, %v16160_v63  ;;  %v2449_v29 = vadd.f32 %v2448_v27, %v16165_v5 }
 0x49d   :  { %v13529_v30 = vpop.f32.mrf.mxu0  ;;  %v13540_v31 = vpop.f32.mrf.mxu1 }
 0x49e   :  { %v2523_v32 = vrot.slane %v2379_v28, 5  ;;  %v2533_v41 = vrot.slane %v2449_v29, 5  ;;  %v16467_v30 = vld [vmem:[#allocation8 + $0x18] sm:$0xff] }
 0x4a0   :  { %v2525_v40 = vadd.f32 %v2523_v32, %v16162_v3  ;;  %v2535_v33 = vadd.f32 %v2533_v41, %v16169_v12  ;;  %v16475_v32 = vld [vmem:[%s18710_s0 + $0x50] sm:$0xff]  ;;  %v16487_v41 = vld [vmem:[%s18710_s0 + $0x48] sm:$0xff] }
 0x4a2   :  { %v12346_v42 = vmul.f32 -1.442695, %v2525_v40  ;;  %v12347_v45 = vmul.f32 -1.442695, %v2535_v33  ;;  %v16481_v40 = vld [vmem:[#allocation8 + $0x10] sm:$0xff]  ;;  %v2796_v33 = vrot.slane %v16398_v38, 1 }
 0x4a3   :  { %v2518_v43 = vpop.f32.mrf.mxu0 }
 0x4a4   :  { %14955 = vpow2.f32 %v12346_v42  ;;  %v2519_v24 = vadd.f32 %v2518_v43, %v16184_v7  ;;  %v16492_v42 = vld [vmem:[#allocation8 + $0x8] sm:$0xff] }
 0x4a5   :  { %v13551_v44 = vpop.f32.mrf.mxu0  ;;  %14957 = vpow2.f32 %v12347_v45  ;;  %v16499_v45 = vld [vmem:[%s18710_s0 + $0x40] sm:$0xff] }
 0x4a6   :  { %v2543_v4 = vrot.slane %v2519_v24, 5  ;;  %v16583_v24 = vld [vmem:[%s18710_s0 + $0x30] sm:$0xff] }
 0x4a9   :  { %v2624_v46 = vpop.f32.mrf.mxu1 }
 0x4aa   :  { %v2625_v47 = vadd.f32 %v2624_v46, %v16171_v13 }
 0x4ab   :  { %v13562_v48 = vpop.f32.mrf.mxu1  ;;  %v2694_v49 = vpop.f32.mrf.mxu0 }
 0x4ac   :  { %v2769_v63 = vrot.slane %v2625_v47, 4  ;;  %v2695_v5 = vadd.f32 %v2694_v49, %v16178_v50  ;;  %v16505_v48 = vld [vmem:[#allocation8 + $0x38] sm:$0xff]  ;;  %v16508_v49 = vld [vmem:[#allocation8] sm:$0xff] }
 0x4ad   :  { %v13573_v6 = vpop.f32.mrf.mxu0 }
 0x4ae   :  { %v2771_v9 = vadd.f32 %v2769_v63, %v16175_v20  ;;  %v2779_v14 = vrot.slane %v2695_v5, 4  ;;  %v16516_v5 = vld [vmem:[#allocation8 + $0x30] sm:$0xff] }
 0x4b0   :  { %v12351_v11 = vmul.f32 -1.442695, %v2771_v9  ;;  %v2781_v22 = vadd.f32 %v2779_v14, %v16181_v56  ;;  %v16524_v9 = vld [vmem:[#allocation8 + $0x28] sm:$0xff]  ;;  %v16532_v14 = vld [vmem:[#allocation8 + $0x20] sm:$0xff] }
 0x4b1   :  { %v14956_v16 = vpop.eup %14955  ;;  %v2764_v10 = vpop.f32.mrf.mxu1 }
 0x4b2   :  { %v2529_v19 = vadd.f32 1.0, %v14956_v16  ;;  %14959 = vpow2.f32 %v12351_v11  ;;  %v12352_v13 = vmul.f32 -1.442695, %v2781_v22  ;;  %v14958_v23 = vpop.eup %14957  ;;  %v2765_v60 = vadd.f32 %v2764_v10, %v16189_v17  ;;  %v16464_v17 = vld [vmem:[%s18710_s0 + $0x58] sm:$0xff]  ;;  %v16529_v11 = vld [vmem:[#allocation8 + $0x58] sm:$0xff]  ;;  %v16544_v10 = vld [vmem:[#allocation8 + $0x48] sm:$0xff] }
 0x4b3   :  { %v13584_v21 = vpop.f32.mrf.mxu1  ;;  %v2539_v50 = vadd.f32 1.0, %v14958_v23  ;;  %v16537_v16 = vld [vmem:[#allocation8 + $0x50] sm:$0xff]  ;;  %v16561_v22 = vld [vmem:[%s18710_s0 + $0x10] sm:$0xff]  ;;  %v16577_v23 = vld [vmem:[%s18710_s0 + $0x8] sm:$0xff] }
 0x4b4   :  { %14961 = vrcp.f32 %v2529_v19  ;;  %v2789_v34 = vrot.slane %v2765_v60, 4  ;;  %v16550_v19 = vld [vmem:[%s18710_s0 + $0x18] sm:$0xff]  ;;  %v16555_v21 = vld [vmem:[#allocation8 + $0x40] sm:$0xff] }
 0x4b5   :  { %14963 = vpow2.f32 %v12352_v13  ;;  %v16569_v13 = vld [vmem:[%s18710_s0 + $0x38] sm:$0xff] }
 0x4b6   :  { %14965 = vrcp.f32 %v2539_v50  ;;  %v16591_v50 = vld [vmem:[%s18710_s0] sm:$0xff] }
 0x4bf   :  { %v14960_v54 = vpop.eup %14959 }
 0x4c0   :  { %v2775_v52 = vadd.f32 1.0, %v14960_v54  ;;  %v16597_v54 = vld [vmem:[%s18710_s0 + $0x28] sm:$0xff] }
 0x4c1   :  { %v14962_v53 = vpop.eup %14961 }
 0x4c2   :  { %v2545_v57 = vmul.f32 %v14962_v53, %v2543_v4  ;;  %14967 = vrcp.f32 %v2775_v52  ;;  %v14964_v62 = vpop.eup %14963  ;;  %v16608_v4 = vld [vmem:[%s18710_s0 + $0x20] sm:$0xff] }
 0x4c3   :  { %v2785_v25 = vadd.f32 1.0, %v14964_v62  ;;  %v14966_v55 = vpop.eup %14965  ;;  %v16616_v62 = vld [vmem:[#allocation5 + $0x1] sm:$0x1] }
 0x4c4   :  { %v2546_v61 = vadd.f32 %v2545_v57, %v16187_v58  ;;  %v2548_v36 = vsub.f32 1.0, %v14966_v55  ;;  %v2552_v27 = vmul.f32 %v14966_v55, %v2550_v37  ;;  %v16613_v57 = vld [vmem:[#allocation5] sm:$0x1] }
 0x4c6   :  { %14969 = vtanh.f32 %v2546_v61 }
 0x4c7   :  { %14971 = vrcp.f32 %v2785_v25 }
 0x4cf   :  { %v14968_v35 = vpop.eup %14967 }
 0x4d0   :  { %v2791_v7 = vmul.f32 %v14968_v35, %v2789_v34 }
 0x4d2   :  { %v2792_v2 = vadd.f32 %v2791_v7, %v16194_v18 }
 0x4d3   :  { %v14970_v39 = vpop.eup %14969 }
 0x4d4   :  { %14973 = vtanh.f32 %v2792_v2  ;;  %v2549_v26 = vmul.f32 %v14970_v39, %v2548_v36  ;;  %v14972_v31 = vpop.eup %14971 }
 0x4d5   :  { %v2794_v43 = vsub.f32 1.0, %v14972_v31  ;;  %v2798_v47 = vmul.f32 %v14972_v31, %v2796_v33 }
 0x4d6   :  { %v16456_v28 = vadd.f32 %v2552_v27, %v2549_v26 }
 0x4d8   :  { %v2801_v29 = vrot.slane %v16456_v28, 3 }
 0x4da   :  { %13594 = vmatmul.mubr.msk.f32.vlgmr.msra.gmra.mxu0 %vm397_vm1, %v2801_v29  ;;  %13605 = vmatmul.mubr.msk.f32.vlgmr.msra.gmra.mxu1 %vm397_vm1, %v2801_v29 }
 0x4db   :  { %13608 = vmatpush3.msra.mxu0 %v16464_v17  ;;  %13619 = vmatpush3.msra.mxu1 %v16467_v30 }
 0x4dc   :  { %13609 = vmatprep.subr.mxu0 %v18673_v0  ;;  %13620 = vmatprep.subr.mxu1 %v18673_v0 }
 0x4dd   :  { %13610 = vmatpush3.msra.mxu0 %v16475_v32  ;;  %13615 = vmatprep.mubr.msk.f32.mxu0 %vm15708_vm0, %v18673_v0 }
 0x4de   :  { %13611 = vmatprep.subr.mxu0 %v18673_v0  ;;  %13621 = vmatpush3.msra.mxu1 %v16481_v40 }
 0x4df   :  { %13612 = vmatpush3.msra.mxu0 %v16487_v41  ;;  %13622 = vmatprep.subr.mxu1 %v18673_v0 }
 0x4e0   :  { %13613 = vmatprep.subr.mxu0 %v18673_v0  ;;  %13623 = vmatpush3.msra.mxu1 %v16492_v42 }
 0x4e1   :  { %v14974_v44 = vpop.eup %14973  ;;  %13614 = vmatpush3.msra.mxu0 %v16499_v45  ;;  %13624 = vmatprep.subr.mxu1 %v18673_v0 }
 0x4e2   :  { %13616 = vmatmul.mubr.msk.f32.vlgmr.msra.gmra.mxu0 %vm397_vm1, %v2801_v29  ;;  %13629 = vmatprep.subr.mxu0 %v18673_v0  ;;  %v2795_v46 = vmul.f32 %v14974_v44, %v2794_v43  ;;  %v16621_v29 = vld [vmem:[#allocation11] sm:$0x1] }
 0x4e3   :  { %13630 = vmatpush3.msra.mxu0 %v16505_v48  ;;  %13625 = vmatpush3.msra.mxu1 %v16508_v49 }
 0x4e4   :  { %13631 = vmatprep.subr.mxu0 %v18673_v0  ;;  %13626 = vmatprep.mubr.msk.f32.mxu1 %vm15708_vm0, %v18673_v0  ;;  %v16514_v63 = vadd.f32 %v2798_v47, %v2795_v46  ;;  %v16624_v46 = vld [vmem:[#allocation11 + $0x1] sm:$0x1] }
 0x4e5   :  { %13632 = vmatpush3.msra.mxu0 %v16516_v5  ;;  %13640 = vmatprep.subr.mxu1 %v18673_v0 }
 0x4e6   :  { %13633 = vmatprep.subr.mxu0 %v18673_v0  ;;  %v3047_v6 = vrot.slane %v16514_v63, 4  ;;  %13637 = vmatprep.mubr.msk.f32.mxu0 %vm15708_vm0, %v18673_v0 }
 0x4e7   :  { %13634 = vmatpush3.msra.mxu0 %v16524_v9 }
 0x4e8   :  { %13627 = vmatmul.mubr.msk.f32.vlgmr.msra.gmra.mxu1 %vm397_vm1, %v3047_v6  ;;  %13635 = vmatprep.subr.mxu0 %v18673_v0 }
 0x4e9   :  { %13641 = vmatpush3.msra.mxu1 %v16529_v11  ;;  %13636 = vmatpush3.msra.mxu0 %v16532_v14 }
 0x4ea   :  { %13642 = vmatprep.subr.mxu1 %v18673_v0  ;;  %13638 = vmatmul.mubr.msk.f32.vlgmr.msra.gmra.mxu0 %vm397_vm1, %v3047_v6 }
 0x4eb   :  { %13643 = vmatpush3.msra.mxu1 %v16537_v16  ;;  %13648 = vmatprep.mubr.msk.f32.mxu1 %vm15708_vm0, %v18673_v0 }
 0x4ec   :  { %13644 = vmatprep.subr.mxu1 %v18673_v0  ;;  %13651 = vmatprep.subr.mxu0 %v18673_v0 }
 0x4ed   :  { %13645 = vmatpush3.msra.mxu1 %v16544_v10  ;;  %13652 = vmatpush3.msra.mxu0 %v16550_v19 }
 0x4ee   :  { %13646 = vmatprep.subr.mxu1 %v18673_v0  ;;  %13653 = vmatprep.subr.mxu0 %v18673_v0 }
 0x4ef   :  { %13647 = vmatpush3.msra.mxu1 %v16555_v21  ;;  %13654 = vmatpush3.msra.mxu0 %v16561_v22 }
 0x4f0   :  { %13649 = vmatmul.mubr.msk.f32.vlgmr.msra.gmra.mxu1 %vm397_vm1, %v3047_v6  ;;  %13662 = vmatprep.subr.mxu1 %v18673_v0 }
 0x4f1   :  { %13663 = vmatpush3.msra.mxu1 %v16569_v13  ;;  %13655 = vmatprep.subr.mxu0 %v18673_v0 }
 0x4f2   :  { %13664 = vmatprep.subr.mxu1 %v18673_v0  ;;  %13656 = vmatpush3.msra.mxu0 %v16577_v23 }
 0x4f3   :  { %13665 = vmatpush3.msra.mxu1 %v16583_v24  ;;  %13657 = vmatprep.subr.mxu0 %v18673_v0 }
 0x4f4   :  { %13666 = vmatprep.subr.mxu1 %v18673_v0  ;;  %13658 = vmatpush3.msra.mxu0 %v16591_v50 }
 0x4f5   :  { %13667 = vmatpush3.msra.mxu1 %v16597_v54  ;;  %13659 = vmatprep.mubr.msk.f32.mxu0 %vm15708_vm0, %v18673_v0 }
 0x4f6   :  { %13668 = vmatprep.subr.mxu1 %v18673_v0  ;;  %13670 = vmatprep.mubr.msk.f32.mxu1 %vm15708_vm0, %v18673_v0 }
 0x4f7   :  { %13669 = vmatpush3.msra.mxu1 %v16608_v4  ;;  %13673 = vmatprep.subr.mxu0 %v18673_v0 }
 0x4f8   :  { %13684 = vmatprep.subr.mxu1 %v18673_v0 }
 0x59a   :  { %v2870_v52 = vpop.f32.mrf.mxu0  ;;  %v2940_v53 = vpop.f32.mrf.mxu1 }
 0x59b   :  { %v2871_v61 = vadd.f32 %v16613_v57, %v2870_v52  ;;  %v2941_v60 = vadd.f32 %v16616_v62, %v2940_v53 }
 0x59c   :  { %v13595_v25 = vpop.f32.mrf.mxu0  ;;  %v13606_v55 = vpop.f32.mrf.mxu1 }
 0x59d   :  { %v3015_v34 = vrot.slane %v2871_v61, 4  ;;  %v3025_v7 = vrot.slane %v2941_v60, 4 }
 0x59f   :  { %v3017_v35 = vadd.f32 %v3015_v34, %v16162_v3  ;;  %v3027_v37 = vadd.f32 %v3025_v7, %v16169_v12 }
 0x5a1   :  { %v12356_v2 = vmul.f32 -1.442695, %v3017_v35  ;;  %v12357_v26 = vmul.f32 -1.442695, %v3027_v37  ;;  %v16629_v37 = vld [vmem:[#allocation5 + $0x2] sm:$0x1] }
 0x5a2   :  { %v3010_v36 = vpop.f32.mrf.mxu0 }
 0x5a3   :  { %14975 = vpow2.f32 %v12356_v2 }
 0x5a4   :  { %v13617_v39 = vpop.f32.mrf.mxu0  ;;  %14977 = vpow2.f32 %v12357_v26 }
 0x5a5   :  { %v3011_v39 = vadd.f32 %v16629_v37, %v3010_v36 }
 0x5a8   :  { %v3116_v27 = vpop.f32.mrf.mxu1 }
 0x5a9   :  { %v3117_v31 = vadd.f32 %v16621_v29, %v3116_v27 }
 0x5aa   :  { %v13628_v43 = vpop.f32.mrf.mxu1  ;;  %v3186_v33 = vpop.f32.mrf.mxu0 }
 0x5ab   :  { %v3261_v44 = vrot.slane %v3117_v31, 5  ;;  %v3187_v47 = vadd.f32 %v16624_v46, %v3186_v33  ;;  %v3035_v31 = vrot.slane %v3011_v39, 4 }
 0x5ac   :  { %v13639_v6 = vpop.f32.mrf.mxu0 }
 0x5ad   :  { %v3263_v52 = vadd.f32 %v3261_v44, %v16175_v20  ;;  %v3271_v61 = vrot.slane %v3187_v47, 5 }
 0x5af   :  { %v12361_v53 = vmul.f32 -1.442695, %v3263_v52  ;;  %v3273_v35 = vadd.f32 %v3271_v61, %v16181_v56  ;;  %v16633_v52 = vld [vmem:[#allocation11 + $0x2] sm:$0x1] }
 0x5b0   :  { %v14976_v60 = vpop.eup %14975  ;;  %v3256_v25 = vpop.f32.mrf.mxu1 }
 0x5b1   :  { %v3021_v55 = vadd.f32 1.0, %v14976_v60  ;;  %14979 = vpow2.f32 %v12361_v53  ;;  %v12362_v7 = vmul.f32 -1.442695, %v3273_v35  ;;  %v14978_v2 = vpop.eup %14977  ;;  %v3257_v53 = vadd.f32 %v16633_v52, %v3256_v25 }
 0x5b2   :  { %v13650_v34 = vpop.f32.mrf.mxu1  ;;  %v3031_v26 = vadd.f32 1.0, %v14978_v2  ;;  %v3042_v2 = vrot.slane %v16456_v28, 7 }
 0x5b3   :  { %14981 = vrcp.f32 %v3021_v55  ;;  %v3281_v36 = vrot.slane %v3257_v53, 5 }
 0x5b4   :  { %14983 = vpow2.f32 %v12362_v7 }
 0x5b5   :  { %14985 = vrcp.f32 %v3031_v26 }
 0x5be   :  { %v14980_v27 = vpop.eup %14979 }
 0x5bf   :  { %v3267_v43 = vadd.f32 1.0, %v14980_v27 }
 0x5c0   :  { %v14982_v33 = vpop.eup %14981 }
 0x5c1   :  { %v3037_v44 = vmul.f32 %v14982_v33, %v3035_v31  ;;  %14987 = vrcp.f32 %v3267_v43  ;;  %v14984_v6 = vpop.eup %14983 }
 0x5c2   :  { %v3277_v61 = vadd.f32 1.0, %v14984_v6  ;;  %v14986_v60 = vpop.eup %14985 }
 0x5c3   :  { %v3038_v47 = vadd.f32 %v3037_v44, %v16187_v58  ;;  %v3040_v7 = vsub.f32 1.0, %v14986_v60  ;;  %v3044_v27 = vmul.f32 %v14986_v60, %v3042_v2  ;;  %v3288_v44 = vrot.slane %v16514_v63, 1 }
 0x5c5   :  { %14989 = vtanh.f32 %v3038_v47 }
 0x5c6   :  { %14991 = vrcp.f32 %v3277_v61 }
 0x5ce   :  { %v14988_v55 = vpop.eup %14987 }
 0x5cf   :  { %v3283_v34 = vmul.f32 %v14988_v55, %v3281_v36 }
 0x5d1   :  { %v3284_v35 = vadd.f32 %v3283_v34, %v16194_v18 }
 0x5d2   :  { %v14990_v39 = vpop.eup %14989 }
 0x5d3   :  { %14993 = vtanh.f32 %v3284_v35  ;;  %v3041_v26 = vmul.f32 %v14990_v39, %v3040_v7  ;;  %v14992_v25 = vpop.eup %14991 }
 0x5d4   :  { %v3286_v33 = vsub.f32 1.0, %v14992_v25  ;;  %v3290_v53 = vmul.f32 %v14992_v25, %v3288_v44 }
 0x5d5   :  { %v16638_v31 = vadd.f32 %v3044_v27, %v3041_v26 }
 0x5d7   :  { %v3293_v43 = vrot.slane %v16638_v31, 4 }
 0x5d9   :  { %13660 = vmatmul.mubr.msk.f32.vlgmr.msra.gmra.mxu0 %vm397_vm1, %v3293_v43  ;;  %13671 = vmatmul.mubr.msk.f32.vlgmr.msra.gmra.mxu1 %vm397_vm1, %v3293_v43 }
 0x5da   :  { %13674 = vmatpush3.msra.mxu0 %v16464_v17  ;;  %13685 = vmatpush3.msra.mxu1 %v16467_v30 }
 0x5db   :  { %13675 = vmatprep.subr.mxu0 %v18673_v0  ;;  %13686 = vmatprep.subr.mxu1 %v18673_v0 }
 0x5dc   :  { %13676 = vmatpush3.msra.mxu0 %v16475_v32  ;;  %13681 = vmatprep.mubr.msk.f32.mxu0 %vm15708_vm0, %v18673_v0 }
 0x5dd   :  { %13677 = vmatprep.subr.mxu0 %v18673_v0  ;;  %13687 = vmatpush3.msra.mxu1 %v16481_v40 }
 0x5de   :  { %13678 = vmatpush3.msra.mxu0 %v16487_v41  ;;  %13688 = vmatprep.subr.mxu1 %v18673_v0 }
 0x5df   :  { %13679 = vmatprep.subr.mxu0 %v18673_v0  ;;  %13689 = vmatpush3.msra.mxu1 %v16492_v42 }
 0x5e0   :  { %v14994_v47 = vpop.eup %14993  ;;  %13680 = vmatpush3.msra.mxu0 %v16499_v45  ;;  %13690 = vmatprep.subr.mxu1 %v18673_v0 }
 0x5e1   :  { %13682 = vmatmul.mubr.msk.f32.vlgmr.msra.gmra.mxu0 %vm397_vm1, %v3293_v43  ;;  %13695 = vmatprep.subr.mxu0 %v18673_v0  ;;  %v3287_v6 = vmul.f32 %v14994_v47, %v3286_v33 }
 0x5e2   :  { %13696 = vmatpush3.msra.mxu0 %v16505_v48  ;;  %13691 = vmatpush3.msra.mxu1 %v16508_v49 }
 0x5e3   :  { %13697 = vmatprep.subr.mxu0 %v18673_v0  ;;  %13692 = vmatprep.mubr.msk.f32.mxu1 %vm15708_vm0, %v18673_v0  ;;  %v16666_v61 = vadd.f32 %v3290_v53, %v3287_v6 }
 0x5e4   :  { %13698 = vmatpush3.msra.mxu0 %v16516_v5  ;;  %13706 = vmatprep.subr.mxu1 %v18673_v0 }
 0x5e5   :  { %13699 = vmatprep.subr.mxu0 %v18673_v0  ;;  %v3539_v60 = vrot.slane %v16666_v61, 3  ;;  %13703 = vmatprep.mubr.msk.f32.mxu0 %vm15708_vm0, %v18673_v0 }
 0x5e6   :  { %13700 = vmatpush3.msra.mxu0 %v16524_v9 }
 0x5e7   :  { %13693 = vmatmul.mubr.msk.f32.vlgmr.msra.gmra.mxu1 %vm397_vm1, %v3539_v60  ;;  %13701 = vmatprep.subr.mxu0 %v18673_v0 }
 0x5e8   :  { %13707 = vmatpush3.msra.mxu1 %v16529_v11  ;;  %13702 = vmatpush3.msra.mxu0 %v16532_v14 }
 0x5e9   :  { %13708 = vmatprep.subr.mxu1 %v18673_v0  ;;  %13704 = vmatmul.mubr.msk.f32.vlgmr.msra.gmra.mxu0 %vm397_vm1, %v3539_v60 }
 0x5ea   :  { %13709 = vmatpush3.msra.mxu1 %v16537_v16  ;;  %13714 = vmatprep.mubr.msk.f32.mxu1 %vm15708_vm0, %v18673_v0 }
 0x5eb   :  { %13710 = vmatprep.subr.mxu1 %v18673_v0  ;;  %13717 = vmatprep.subr.mxu0 %v18673_v0 }
 0x5ec   :  { %13711 = vmatpush3.msra.mxu1 %v16544_v10  ;;  %13718 = vmatpush3.msra.mxu0 %v16550_v19 }
 0x5ed   :  { %13712 = vmatprep.subr.mxu1 %v18673_v0  ;;  %13719 = vmatprep.subr.mxu0 %v18673_v0 }
 0x5ee   :  { %13713 = vmatpush3.msra.mxu1 %v16555_v21  ;;  %13720 = vmatpush3.msra.mxu0 %v16561_v22 }
 0x5ef   :  { %13715 = vmatmul.mubr.msk.f32.vlgmr.msra.gmra.mxu1 %vm397_vm1, %v3539_v60  ;;  %13728 = vmatprep.subr.mxu1 %v18673_v0 }
 0x5f0   :  { %13729 = vmatpush3.msra.mxu1 %v16569_v13  ;;  %13721 = vmatprep.subr.mxu0 %v18673_v0 }
 0x5f1   :  { %13730 = vmatprep.subr.mxu1 %v18673_v0  ;;  %13722 = vmatpush3.msra.mxu0 %v16577_v23 }
 0x5f2   :  { %13731 = vmatpush3.msra.mxu1 %v16583_v24  ;;  %13723 = vmatprep.subr.mxu0 %v18673_v0 }
 0x5f3   :  { %13732 = vmatprep.subr.mxu1 %v18673_v0  ;;  %13724 = vmatpush3.msra.mxu0 %v16591_v50 }
 0x5f4   :  { %13733 = vmatpush3.msra.mxu1 %v16597_v54  ;;  %13725 = vmatprep.mubr.msk.f32.mxu0 %vm15708_vm0, %v18673_v0 }
 0x5f5   :  { %13734 = vmatprep.subr.mxu1 %v18673_v0  ;;  %13736 = vmatprep.mubr.msk.f32.mxu1 %vm15708_vm0, %v18673_v0 }
 0x5f6   :  { %13735 = vmatpush3.msra.mxu1 %v16608_v4  ;;  %13739 = vmatprep.subr.mxu0 %v18673_v0 }
 0x5f7   :  { %13750 = vmatprep.subr.mxu1 %v18673_v0 }
 0x699   :  { %v3362_v36 = vpop.f32.mrf.mxu0  ;;  %v3432_v55 = vpop.f32.mrf.mxu1 }
 0x69a   :  { %v3363_v34 = vadd.f32 %v16613_v57, %v3362_v36  ;;  %v3433_v35 = vadd.f32 %v16616_v62, %v3432_v55 }
 0x69b   :  { %v13661_v7 = vpop.f32.mrf.mxu0  ;;  %v13672_v2 = vpop.f32.mrf.mxu1 }
 0x69c   :  { %v3507_v39 = vrot.slane %v3363_v34, 3  ;;  %v3517_v27 = vrot.slane %v3433_v35, 3 }
 0x69e   :  { %v3509_v26 = vadd.f32 %v3507_v39, %v16162_v3  ;;  %v3519_v33 = vadd.f32 %v3517_v27, %v16169_v12 }
 0x6a0   :  { %v12366_v43 = vmul.f32 -1.442695, %v3509_v26  ;;  %v12367_v47 = vmul.f32 -1.442695, %v3519_v33 }
 0x6a1   :  { %v3502_v25 = vpop.f32.mrf.mxu0 }
 0x6a2   :  { %14995 = vpow2.f32 %v12366_v43 }
 0x6a3   :  { %v13683_v44 = vpop.f32.mrf.mxu0  ;;  %14997 = vpow2.f32 %v12367_v47 }
 0x6a7   :  { %v3608_v6 = vpop.f32.mrf.mxu1 }
 0x6a8   :  { %v3609_v53 = vadd.f32 %v16621_v29, %v3608_v6 }
 0x6a9   :  { %v13694_v60 = vpop.f32.mrf.mxu1  ;;  %v3678_v36 = vpop.f32.mrf.mxu0 }
 0x6aa   :  { %v3753_v0 = vrot.slane %v3609_v53, 6  ;;  %v3679_v55 = vadd.f32 %v16624_v46, %v3678_v36  ;;  %v3503_v53 = vadd.f32 %v16629_v37, %v3502_v25 }
 0x6ab   :  { %v13705_v34 = vpop.f32.mrf.mxu0 }
 0x6ac   :  { %v3755_v7 = vadd.f32 %v3753_v0, %v16175_v20  ;;  %v3763_v2 = vrot.slane %v3679_v55, 6  ;;  %v3527_v36 = vrot.slane %v3503_v53, 3  ;;  %v3534_v53 = vrot.slane %v16638_v31, 7 }
 0x6ae   :  { %v12371_v35 = vmul.f32 -1.442695, %v3755_v7  ;;  %v3765_v33 = vadd.f32 %v3763_v2, %v16181_v56 }
 0x6af   :  { %v14996_v39 = vpop.eup %14995  ;;  %v3748_v26 = vpop.f32.mrf.mxu1 }
 0x6b0   :  { %v3513_v43 = vadd.f32 1.0, %v14996_v39  ;;  %14999 = vpow2.f32 %v12371_v35  ;;  %v12372_v44 = vmul.f32 -1.442695, %v3765_v33  ;;  %v14998_v6 = vpop.eup %14997  ;;  %v3749_v39 = vadd.f32 %v16633_v52, %v3748_v26 }
 0x6b1   :  { %v13716_v27 = vpop.f32.mrf.mxu1  ;;  %v3523_v60 = vadd.f32 1.0, %v14998_v6  ;;  %v18711_v26 = vmov 0.0  }
 0x6b2   :  { %15001 = vrcp.f32 %v3513_v43  ;;  %v3773_v27 = vrot.slane %v3749_v39, 6 }
 0x6b3   :  { %15003 = vpow2.f32 %v12372_v44 }
 0x6b4   :  { %15005 = vrcp.f32 %v3523_v60 }
 0x6bd   :  { %v15000_v47 = vpop.eup %14999 }
 0x6be   :  { %v3759_v34 = vadd.f32 1.0, %v15000_v47 }
 0x6bf   :  { %v15002_v0 = vpop.eup %15001 }
 0x6c0   :  { %v3529_v55 = vmul.f32 %v15002_v0, %v3527_v36  ;;  %15007 = vrcp.f32 %v3759_v34  ;;  %v15004_v35 = vpop.eup %15003 }
 0x6c1   :  { %v3769_v2 = vadd.f32 1.0, %v15004_v35  ;;  %v15006_v43 = vpop.eup %15005  ;;  %v3780_v35 = vrot.slane %v16666_v61, 1 }
 0x6c2   :  { %v3530_v7 = vadd.f32 %v3529_v55, %v16187_v58  ;;  %v3532_v6 = vsub.f32 1.0, %v15006_v43  ;;  %v3536_v36 = vmul.f32 %v15006_v43, %v3534_v53 }
 0x6c4   :  { %15009 = vtanh.f32 %v3530_v7 }
 0x6c5   :  { %15011 = vrcp.f32 %v3769_v2 }
 0x6cd   :  { %v15008_v33 = vpop.eup %15007 }
 0x6ce   :  { %v3775_v25 = vmul.f32 %v15008_v33, %v3773_v27 }
 0x6d0   :  { %v3776_v44 = vadd.f32 %v3775_v25, %v16194_v18 }
 0x6d1   :  { %v15010_v60 = vpop.eup %15009 }
 0x6d2   :  { %15013 = vtanh.f32 %v3776_v44  ;;  %v3533_v47 = vmul.f32 %v15010_v60, %v3532_v6  ;;  %v15012_v55 = vpop.eup %15011 }
 0x6d3   :  { %v3778_v7 = vsub.f32 1.0, %v15012_v55  ;;  %v3782_v43 = vmul.f32 %v15012_v55, %v3780_v35 }
 0x6d4   :  { %v16724_v34 = vadd.f32 %v3536_v36, %v3533_v47 }
 0x6d6   :  { %v3785_v0 = vrot.slane %v16724_v34, 5 }
 0x6d8   :  { %13726 = vmatmul.mubr.msk.f32.vlgmr.msra.gmra.mxu0 %vm397_vm1, %v3785_v0  ;;  %13737 = vmatmul.mubr.msk.f32.vlgmr.msra.gmra.mxu1 %vm397_vm1, %v3785_v0 }
 0x6d9   :  { %13740 = vmatpush3.msra.mxu0 %v16464_v17  ;;  %13751 = vmatpush3.msra.mxu1 %v16467_v30 }
 0x6da   :  { %13741 = vmatprep.subr.mxu0 %v18711_v26  ;;  %13752 = vmatprep.subr.mxu1 %v18711_v26 }
 0x6db   :  { %13742 = vmatpush3.msra.mxu0 %v16475_v32  ;;  %13747 = vmatprep.mubr.msk.f32.mxu0 %vm15708_vm0, %v18711_v26 }
 0x6dc   :  { %13743 = vmatprep.subr.mxu0 %v18711_v26  ;;  %13753 = vmatpush3.msra.mxu1 %v16481_v40 }
 0x6dd   :  { %13744 = vmatpush3.msra.mxu0 %v16487_v41  ;;  %13754 = vmatprep.subr.mxu1 %v18711_v26 }
 0x6de   :  { %13745 = vmatprep.subr.mxu0 %v18711_v26  ;;  %13755 = vmatpush3.msra.mxu1 %v16492_v42 }
 0x6df   :  { %v15014_v39 = vpop.eup %15013  ;;  %13746 = vmatpush3.msra.mxu0 %v16499_v45  ;;  %13756 = vmatprep.subr.mxu1 %v18711_v26 }
 0x6e0   :  { %13748 = vmatmul.mubr.msk.f32.vlgmr.msra.gmra.mxu0 %vm397_vm1, %v3785_v0  ;;  %13761 = vmatprep.subr.mxu0 %v18711_v26  ;;  %v3779_v2 = vmul.f32 %v15014_v39, %v3778_v7 }
 0x6e1   :  { %13762 = vmatpush3.msra.mxu0 %v16505_v48  ;;  %13757 = vmatpush3.msra.mxu1 %v16508_v49 }
 0x6e2   :  { %13763 = vmatprep.subr.mxu0 %v18711_v26  ;;  %13758 = vmatprep.mubr.msk.f32.mxu1 %vm15708_vm0, %v18711_v26  ;;  %v16752_v27 = vadd.f32 %v3782_v43, %v3779_v2 }
 0x6e3   :  { %13764 = vmatpush3.msra.mxu0 %v16516_v5  ;;  %13772 = vmatprep.subr.mxu1 %v18711_v26 }
 0x6e4   :  { %13765 = vmatprep.subr.mxu0 %v18711_v26  ;;  %v4031_v33 = vrot.slane %v16752_v27, 2  ;;  %13769 = vmatprep.mubr.msk.f32.mxu0 %vm15708_vm0, %v18711_v26 }
 0x6e5   :  { %13766 = vmatpush3.msra.mxu0 %v16524_v9 }
 0x6e6   :  { %13759 = vmatmul.mubr.msk.f32.vlgmr.msra.gmra.mxu1 %vm397_vm1, %v4031_v33  ;;  %13767 = vmatprep.subr.mxu0 %v18711_v26 }
 0x6e7   :  { %13773 = vmatpush3.msra.mxu1 %v16529_v11  ;;  %13768 = vmatpush3.msra.mxu0 %v16532_v14 }
 0x6e8   :  { %13774 = vmatprep.subr.mxu1 %v18711_v26  ;;  %13770 = vmatmul.mubr.msk.f32.vlgmr.msra.gmra.mxu0 %vm397_vm1, %v4031_v33 }
 0x6e9   :  { %13775 = vmatpush3.msra.mxu1 %v16537_v16  ;;  %13780 = vmatprep.mubr.msk.f32.mxu1 %vm15708_vm0, %v18711_v26 }
 0x6ea   :  { %13776 = vmatprep.subr.mxu1 %v18711_v26  ;;  %13783 = vmatprep.subr.mxu0 %v18711_v26 }
 0x6eb   :  { %13777 = vmatpush3.msra.mxu1 %v16544_v10  ;;  %13784 = vmatpush3.msra.mxu0 %v16550_v19 }
 0x6ec   :  { %13778 = vmatprep.subr.mxu1 %v18711_v26  ;;  %13785 = vmatprep.subr.mxu0 %v18711_v26 }
 0x6ed   :  { %13779 = vmatpush3.msra.mxu1 %v16555_v21  ;;  %13786 = vmatpush3.msra.mxu0 %v16561_v22 }
 0x6ee   :  { %13781 = vmatmul.mubr.msk.f32.vlgmr.msra.gmra.mxu1 %vm397_vm1, %v4031_v33  ;;  %13794 = vmatprep.subr.mxu1 %v18711_v26 }
 0x6ef   :  { %13795 = vmatpush3.msra.mxu1 %v16569_v13  ;;  %13787 = vmatprep.subr.mxu0 %v18711_v26 }
 0x6f0   :  { %13796 = vmatprep.subr.mxu1 %v18711_v26  ;;  %13788 = vmatpush3.msra.mxu0 %v16577_v23 }
 0x6f1   :  { %13797 = vmatpush3.msra.mxu1 %v16583_v24  ;;  %13789 = vmatprep.subr.mxu0 %v18711_v26 }
 0x6f2   :  { %13798 = vmatprep.subr.mxu1 %v18711_v26  ;;  %13790 = vmatpush3.msra.mxu0 %v16591_v50 }
 0x6f3   :  { %13799 = vmatpush3.msra.mxu1 %v16597_v54  ;;  %13791 = vmatprep.mubr.msk.f32.mxu0 %vm15708_vm0, %v18711_v26 }
 0x6f4   :  { %13800 = vmatprep.subr.mxu1 %v18711_v26  ;;  %13802 = vmatprep.mubr.msk.f32.mxu1 %vm15708_vm0, %v18711_v26 }
 0x6f5   :  { %13801 = vmatpush3.msra.mxu1 %v16608_v4  ;;  %13805 = vmatprep.subr.mxu0 %v18711_v26 }
 0x6f6   :  { %13816 = vmatprep.subr.mxu1 %v18711_v26 }
 0x798   :  { %v3854_v19 = vpop.f32.mrf.mxu0  ;;  %v3924_v22 = vpop.f32.mrf.mxu1 }
 0x799   :  { %v3855_v13 = vadd.f32 %v16613_v57, %v3854_v19  ;;  %v3925_v23 = vadd.f32 %v16616_v62, %v3924_v22 }
 0x79a   :  { %v13727_v24 = vpop.f32.mrf.mxu0  ;;  %v13738_v50 = vpop.f32.mrf.mxu1 }
 0x79b   :  { %v3999_v54 = vrot.slane %v3855_v13, 2  ;;  %v4009_v44 = vrot.slane %v3925_v23, 2 }
 0x79d   :  { %v4001_v25 = vadd.f32 %v3999_v54, %v16162_v3  ;;  %v4011_v4 = vadd.f32 %v4009_v44, %v16169_v12 }
 0x79f   :  { %v12376_v6 = vmul.f32 -1.442695, %v4001_v25  ;;  %v12377_v47 = vmul.f32 -1.442695, %v4011_v4 }
 0x7a0   :  { %v3994_v53 = vpop.f32.mrf.mxu0 }
 0x7a1   :  { %15015 = vpow2.f32 %v12376_v6  ;;  %v3995_v44 = vadd.f32 %v16629_v37, %v3994_v53 }
 0x7a2   :  { %v13749_v60 = vpop.f32.mrf.mxu0  ;;  %15017 = vpow2.f32 %v12377_v47 }
 0x7a3   :  { %v4019_v60 = vrot.slane %v3995_v44, 2 }
 0x7a6   :  { %v4100_v36 = vpop.f32.mrf.mxu1 }
 0x7a7   :  { %v4101_v0 = vadd.f32 %v16621_v29, %v4100_v36 }
 0x7a8   :  { %v13760_v55 = vpop.f32.mrf.mxu1  ;;  %v4170_v7 = vpop.f32.mrf.mxu0 }
 0x7a9   :  { %v4245_v35 = vrot.slane %v4101_v0, 7  ;;  %v4171_v39 = vadd.f32 %v16624_v46, %v4170_v7 }
 0x7aa   :  { %v13771_v2 = vpop.f32.mrf.mxu0 }
 0x7ab   :  { %v4247_v43 = vadd.f32 %v4245_v35, %v16175_v20  ;;  %v4255_v19 = vrot.slane %v4171_v39, 7 }
 0x7ad   :  { %v12381_v33 = vmul.f32 -1.442695, %v4247_v43  ;;  %v4257_v50 = vadd.f32 %v4255_v19, %v16181_v56 }
 0x7ae   :  { %v15016_v22 = vpop.eup %15015  ;;  %v4240_v13 = vpop.f32.mrf.mxu1 }
 0x7af   :  { %v4005_v23 = vadd.f32 1.0, %v15016_v22  ;;  %15019 = vpow2.f32 %v12381_v33  ;;  %v12382_v54 = vmul.f32 -1.442695, %v4257_v50  ;;  %v15018_v25 = vpop.eup %15017  ;;  %v4241_v35 = vadd.f32 %v16633_v52, %v4240_v13 }
 0x7b0   :  { %v13782_v24 = vpop.f32.mrf.mxu1  ;;  %v4015_v6 = vadd.f32 1.0, %v15018_v25 }
 0x7b1   :  { %15021 = vrcp.f32 %v4005_v23  ;;  %v4265_v43 = vrot.slane %v4241_v35, 7  ;;  %v4026_v23 = vrot.slane %v16724_v34, 7  ;;  %v16962_v35 = vld [vmem:[#allocation13 + $0x48] sm:$0xff] }
 0x7b2   :  { %15023 = vpow2.f32 %v12382_v54 }
 0x7b3   :  { %15025 = vrcp.f32 %v4015_v6 }
 0x7bc   :  { %v15020_v4 = vpop.eup %15019 }
 0x7bd   :  { %v4251_v47 = vadd.f32 1.0, %v15020_v4 }
 0x7be   :  { %v15022_v36 = vpop.eup %15021 }
 0x7bf   :  { %v4021_v0 = vmul.f32 %v15022_v36, %v4019_v60  ;;  %15027 = vrcp.f32 %v4251_v47  ;;  %v15024_v7 = vpop.eup %15023  ;;  %v16938_v60 = vld [vmem:[#allocation13 + $0x18] sm:$0xff]  ;;  %v16942_v47 = vld [vmem:[#allocation13 + $0x10] sm:$0xff]  ;;  %v16946_v36 = vld [vmem:[#allocation13 + $0x8] sm:$0xff] }
 0x7c0   :  { %v4261_v39 = vadd.f32 1.0, %v15024_v7  ;;  %v15026_v2 = vpop.eup %15025  ;;  %v16958_v7 = vld [vmem:[#allocation13 + $0x50] sm:$0xff] }
 0x7c1   :  { %v4022_v55 = vadd.f32 %v4021_v0, %v16187_v58  ;;  %v4024_v22 = vsub.f32 1.0, %v15026_v2  ;;  %v4028_v54 = vmul.f32 %v15026_v2, %v4026_v23  ;;  %v16950_v0 = vld [vmem:[#allocation13] sm:$0xff] }
 0x7c3   :  { %15029 = vtanh.f32 %v4022_v55  ;;  %v16954_v55 = vld [vmem:[#allocation13 + $0x58] sm:$0xff] }
 0x7c4   :  { %15031 = vrcp.f32 %v4261_v39  ;;  %v16966_v39 = vld [vmem:[#allocation13 + $0x40] sm:$0xff] }
 0x7cc   :  { %v15028_v33 = vpop.eup %15027 }
 0x7cd   :  { %v4267_v53 = vmul.f32 %v15028_v33, %v4265_v43 }
 0x7cf   :  { %v4268_v19 = vadd.f32 %v4267_v53, %v16194_v18 }
 0x7d0   :  { %v15030_v24 = vpop.eup %15029 }
 0x7d1   :  { %15033 = vtanh.f32 %v4268_v19  ;;  %v4025_v50 = vmul.f32 %v15030_v24, %v4024_v22  ;;  %v15032_v13 = vpop.eup %15031 }
 0x7d3   :  { %v16810_v25 = vadd.f32 %v4028_v54, %v4025_v50 }
 0x7d5   :  { %v4277_v44 = vrot.slane %v16810_v25, 6 }
 0x7d7   :  { %13792 = vmatmul.mubr.msk.f32.vlgmr.msra.gmra.mxu0 %vm397_vm1, %v4277_v44  ;;  %13803 = vmatmul.mubr.msk.f32.vlgmr.msra.gmra.mxu1 %vm397_vm1, %v4277_v44 }
 0x7d8   :  { %13806 = vmatpush3.msra.mxu0 %v16464_v17  ;;  %13817 = vmatpush3.msra.mxu1 %v16467_v30  ;;  %v4270_v17 = vsub.f32 1.0, %v15032_v13  ;;  %v4272_v30 = vrot.slane %v16752_v27, 1 }
 0x7d9   :  { %13807 = vmatprep.subr.mxu0 %v18711_v26  ;;  %13818 = vmatprep.subr.mxu1 %v18711_v26 }
 0x7da   :  { %13808 = vmatpush3.msra.mxu0 %v16475_v32  ;;  %13813 = vmatprep.mubr.msk.f32.mxu0 %vm15708_vm0, %v18711_v26 }
 0x7db   :  { %13809 = vmatprep.subr.mxu0 %v18711_v26  ;;  %13819 = vmatpush3.msra.mxu1 %v16481_v40  ;;  %v4274_v40 = vmul.f32 %v15032_v13, %v4272_v30 }
 0x7dc   :  { %13810 = vmatpush3.msra.mxu0 %v16487_v41  ;;  %13820 = vmatprep.subr.mxu1 %v18711_v26 }
 0x7dd   :  { %13811 = vmatprep.subr.mxu0 %v18711_v26  ;;  %13821 = vmatpush3.msra.mxu1 %v16492_v42 }
 0x7de   :  { %v15034_v6 = vpop.eup %15033  ;;  %13812 = vmatpush3.msra.mxu0 %v16499_v45  ;;  %13822 = vmatprep.subr.mxu1 %v18711_v26  ;;  %v16860_v45 = vld [vmem:[%s18712_s27 + $0x38] sm:$0xff] }
 0x7df   :  { %13814 = vmatmul.mubr.msk.f32.vlgmr.msra.gmra.mxu0 %vm397_vm1, %v4277_v44  ;;  %13827 = vmatprep.subr.mxu0 %v18711_v26  ;;  %v4271_v32 = vmul.f32 %v15034_v6, %v4270_v17 }
 0x7e0   :  { %13828 = vmatpush3.msra.mxu0 %v16505_v48  ;;  %13823 = vmatpush3.msra.mxu1 %v16508_v49  ;;  %v16870_v48 = vld [vmem:[%s18712_s27 + $0x30] sm:$0xff]  ;;  %v16879_v49 = vld [vmem:[%s18712_s27 + $0x28] sm:$0xff] }
 0x7e1   :  { %13829 = vmatprep.subr.mxu0 %v18711_v26  ;;  %13824 = vmatprep.mubr.msk.f32.mxu1 %vm15708_vm0, %v18711_v26  ;;  %v16838_v41 = vadd.f32 %v4274_v40, %v4271_v32 }
 0x7e2   :  { %13830 = vmatpush3.msra.mxu0 %v16516_v5  ;;  %13838 = vmatprep.subr.mxu1 %v18711_v26  ;;  %v4758_v5 = vlaneseq }
 0x7e3   :  { %13831 = vmatprep.subr.mxu0 %v18711_v26  ;;  %v16844_v42 = vrot.slane %v16838_v41, 1  ;;  %13835 = vmatprep.mubr.msk.f32.mxu0 %vm15708_vm0, %v18711_v26 }
 0x7e4   :  { %13832 = vmatpush3.msra.mxu0 %v16524_v9  ;;  %v16889_v9 = vld [vmem:[%s18712_s27 + $0x20] sm:$0xff] }
 0x7e5   :  { %13825 = vmatmul.mubr.msk.f32.vlgmr.msra.gmra.mxu1 %vm397_vm1, %v16844_v42  ;;  %13833 = vmatprep.subr.mxu0 %v18711_v26 }
 0x7e6   :  { %13839 = vmatpush3.msra.mxu1 %v16529_v11  ;;  %13834 = vmatpush3.msra.mxu0 %v16532_v14  ;;  %v16895_v11 = vand.u32 127, %v4758_v5  ;;  %v16901_v14 = vld [vmem:[%s18712_s27 + $0x18] sm:$0xff] }
 0x7e7   :  { %13840 = vmatprep.subr.mxu1 %v18711_v26  ;;  %13836 = vmatmul.mubr.msk.f32.vlgmr.msra.gmra.mxu0 %vm397_vm1, %v16844_v42 }
 0x7e8   :  { %13841 = vmatpush3.msra.mxu1 %v16537_v16  ;;  %13846 = vmatprep.mubr.msk.f32.mxu1 %vm15708_vm0, %v18711_v26  ;;  %v16911_v16 = vld [vmem:[%s18712_s27 + $0x10] sm:$0xff]  ;;  %vm4834_vm2 = vcmp.eq.s32.totalorder %v16895_v11, 1 }
 0x7e9   :  { %13842 = vmatprep.subr.mxu1 %v18711_v26  ;;  %13849 = vmatprep.subr.mxu0 %v18711_v26  ;;  %v12393_v4 = vsel %vm4834_vm2, 1.0, %v18711_v26 }
 0x7ea   :  { %13843 = vmatpush3.msra.mxu1 %v16544_v10  ;;  %13850 = vmatpush3.msra.mxu0 %v16860_v45  ;;  %v16918_v10 = vld [vmem:[%s18712_s27 + $0x8] sm:$0xff] }
 0x7eb   :  { %13844 = vmatprep.subr.mxu1 %v18711_v26  ;;  %13851 = vmatprep.subr.mxu0 %v18711_v26 }
 0x7ec   :  { %13845 = vmatpush3.msra.mxu1 %v16555_v21  ;;  %13852 = vmatpush3.msra.mxu0 %v16870_v48  ;;  %v16926_v21 = vld [vmem:[%s18712_s27] sm:$0xff] }
 0x7ed   :  { %13847 = vmatmul.mubr.msk.f32.vlgmr.msra.gmra.mxu1 %vm397_vm1, %v16844_v42  ;;  %13853 = vmatprep.subr.mxu0 %v18711_v26 }
 0x7ee   :  { %13854 = vmatpush3.msra.mxu0 %v16879_v49  ;;  %13865 = vmatprep.mubr.msk.f32.mxu0 %vm15708_vm0, %v18711_v26 }
 0x7ef   :  { %13855 = vmatprep.subr.mxu0 %v18711_v26  ;;  %13868 = vmatprep.subr.mxu1 %v18711_v26 }
 0x7f0   :  { %13856 = vmatpush3.msra.mxu0 %v16889_v9  ;;  %13876 = vmatprep.mubr.msk.f32.mxu1 %vm15708_vm0, %v18711_v26 }
 0x7f1   :  { %13857 = vmatprep.subr.mxu0 %v18711_v26  ;;  %13869 = vmatpush3.msra.mxu1 %v16938_v60 }
 0x7f2   :  { %13858 = vmatpush3.msra.mxu0 %v16901_v14  ;;  %13870 = vmatprep.subr.mxu1 %v18711_v26 }
 0x7f3   :  { %13859 = vmatprep.subr.mxu0 %v18711_v26  ;;  %13871 = vmatpush3.msra.mxu1 %v16942_v47 }
 0x7f4   :  { %13860 = vmatpush3.msra.mxu0 %v16911_v16  ;;  %13872 = vmatprep.subr.mxu1 %v18711_v26 }
 0x7f5   :  { %13861 = vmatprep.subr.mxu0 %v18711_v26  ;;  %13873 = vmatpush3.msra.mxu1 %v16946_v36 }
 0x7f6   :  { %13862 = vmatpush3.msra.mxu0 %v16918_v10  ;;  %13874 = vmatprep.subr.mxu1 %v18711_v26 }
 0x7f7   :  { %13863 = vmatprep.subr.mxu0 %v18711_v26  ;;  %13875 = vmatpush3.msra.mxu1 %v16950_v0 }
 0x7f8   :  { %13864 = vmatpush3.msra.mxu0 %v16926_v21  ;;  %13879 = vmatprep.subr.mxu1 %v18711_v26 }
 0x7f9   :  { %13866 = vmatmul.mubr.msk.f32.vlgmr.msra.gmra.mxu0 %vm4837_vm3, %v12393_v4  ;;  %13890 = vmatprep.subr.mxu0 %v18711_v26 }
 0x7fa   :  { %13898 = vmatprep.mubr.msk.f32.mxu0 %vm15708_vm0, %v18711_v26  ;;  %13891 = vmatpush3.msra.mxu0 %v16954_v55 }
 0x7fb   :  { %13892 = vmatprep.subr.mxu0 %v18711_v26 }
 0x7fc   :  { %13893 = vmatpush3.msra.mxu0 %v16958_v7 }
 0x7fd   :  { %13894 = vmatprep.subr.mxu0 %v18711_v26 }
 0x7fe   :  { %13895 = vmatpush3.msra.mxu0 %v16962_v35 }
 0x7ff   :  { %13896 = vmatprep.subr.mxu0 %v18711_v26 }
 0x800   :  { %13897 = vmatpush3.msra.mxu0 %v16966_v39 }
 0x801   :  { %13912 = vmatprep.subr.mxu0 %v18711_v26 }
 0x897   :  { %v4346_v2 = vpop.f32.mrf.mxu0  ;;  %v4416_v43 = vpop.f32.mrf.mxu1 }
 0x898   :  { %v4347_v33 = vadd.f32 %v16613_v57, %v4346_v2  ;;  %v4417_v23 = vadd.f32 %v16616_v62, %v4416_v43 }
 0x899   :  { %v13793_v53 = vpop.f32.mrf.mxu0  ;;  %v13804_v19 = vpop.f32.mrf.mxu1 }
 0x89a   :  { %v4491_v22 = vrot.slane %v4347_v33, 1  ;;  %v4501_v54 = vrot.slane %v4417_v23, 1 }
 0x89c   :  { %v4493_v24 = vadd.f32 %v4491_v22, %v16162_v3  ;;  %v4503_v17 = vadd.f32 %v4501_v54, %v16169_v12  ;;  %v16981_v54 = vld [vmem:[#allocation14 + $0x38] sm:$0xff] }
 0x89e   :  { %v12386_v50 = vmul.f32 -1.442695, %v4493_v24  ;;  %v12387_v6 = vmul.f32 -1.442695, %v4503_v17  ;;  %v16979_v24 = vld [vmem:[#allocation13 + $0x38] sm:$0xff]  ;;  %v16984_v17 = vld [vmem:[#allocation13 + $0x30] sm:$0xff] }
 0x89f   :  { %v4486_v44 = vpop.f32.mrf.mxu0 }
 0x8a0   :  { %15035 = vpow2.f32 %v12386_v50  ;;  %v4487_v23 = vadd.f32 %v16629_v37, %v4486_v44  ;;  %v16990_v37 = vld [vmem:[#allocation14 + $0x30] sm:$0xff] }
 0x8a1   :  { %v13815_v13 = vpop.f32.mrf.mxu0  ;;  %15037 = vpow2.f32 %v12387_v6 }
 0x8a2   :  { %v4511_v44 = vrot.slane %v4487_v23, 1 }
 0x8a5   :  { %v4592_v30 = vpop.f32.mrf.mxu1 }
 0x8a6   :  { %v4593_v32 = vadd.f32 %v16621_v29, %v4592_v30  ;;  %v16993_v30 = vld [vmem:[#allocation13 + $0x28] sm:$0xff] }
 0x8a7   :  { %v13826_v40 = vpop.f32.mrf.mxu1  ;;  %v4662_v57 = vpop.f32.mrf.mxu0 }
 0x8a8   :  { %v4736_v4 = vadd.f32 %v4593_v32, %v16175_v20  ;;  %v4663_v3 = vadd.f32 %v16624_v46, %v4662_v57  ;;  %v16998_v32 = vld [vmem:[#allocation14 + $0x28] sm:$0xff]  ;;  %v17001_v57 = vld [vmem:[#allocation13 + $0x20] sm:$0xff] }
 0x8a9   :  { %v13837_v2 = vpop.f32.mrf.mxu0 }
 0x8aa   :  { %v12391_v62 = vmul.f32 -1.442695, %v4736_v4  ;;  %v4743_v19 = vadd.f32 %v4663_v3, %v16181_v56  ;;  %v17008_v2 = vld [vmem:[#allocation14 + $0x18] sm:$0xff]  ;;  %v17017_v3 = vld [vmem:[#allocation14 + $0x10] sm:$0xff] }
 0x8ac   :  { %15039 = vpow2.f32 %v12391_v62  ;;  %v12392_v22 = vmul.f32 -1.442695, %v4743_v19  ;;  %v17013_v62 = vld [vmem:[#allocation14 + $0x20] sm:$0xff] }
 0x8ad   :  { %v15036_v43 = vpop.eup %15035  ;;  %v4732_v33 = vpop.f32.mrf.mxu1  ;;  %v17030_v19 = vld [vmem:[#allocation14] sm:$0xff] }
 0x8ae   :  { %v4497_v53 = vadd.f32 1.0, %v15036_v43  ;;  %v15038_v29 = vpop.eup %15037  ;;  %v17023_v43 = vld [vmem:[#allocation14 + $0x8] sm:$0xff] }
 0x8af   :  { %v13848_v12 = vpop.f32.mrf.mxu1  ;;  %v4507_v46 = vadd.f32 1.0, %v15038_v29 }
 0x8b0   :  { %15041 = vrcp.f32 %v4497_v53  ;;  %v4733_v12 = vadd.f32 %v16633_v52, %v4732_v33 }
 0x8b1   :  { %15043 = vpow2.f32 %v12392_v22 }
 0x8b9   :  { %v15040_v20 = vpop.eup %15039  ;;  %v4907_v50 = vpop.f32.mrf.mxu0 }
 0x8ba   :  { %v4740_v13 = vadd.f32 1.0, %v15040_v20  ;;  %13877 = vmatmul.mubr.msk.f32.vlgmr.msra.gmra.mxu1 %vm397_vm1, %v4907_v50  ;;  %13899 = vmatmul.mubr.msk.f32.vlgmr.msra.gmra.mxu0 %vm397_vm1, %v4907_v50 }
 0x8bb   :  { %13880 = vmatpush3.msra.mxu1 %v16979_v24  ;;  %13887 = vmatprep.mubr.msk.f32.mxu1 %vm15708_vm0, %v18711_v26  ;;  %v13867_v56 = vpop.f32.mrf.mxu0 }
 0x8bc   :  { %15045 = vrcp.f32 %v4740_v13  ;;  %13881 = vmatprep.subr.mxu1 %v18711_v26  ;;  %13913 = vmatpush3.msra.mxu0 %v16981_v54 }
 0x8bd   :  { %v15042_v6 = vpop.eup %15041  ;;  %13882 = vmatpush3.msra.mxu1 %v16984_v17  ;;  %13914 = vmatprep.subr.mxu0 %v18711_v26  ;;  %15047 = vrcp.f32 %v4507_v46  ;;  %v4518_v46 = vrot.slane %v16810_v25, 7 }
 0x8be   :  { %v4513_v40 = vmul.f32 %v15042_v6, %v4511_v44  ;;  %13883 = vmatprep.subr.mxu1 %v18711_v26  ;;  %13915 = vmatpush3.msra.mxu0 %v16990_v37  ;;  %v17042_v6 = vld [vmem:[#allocation14 + $0x58] sm:$0xff] }
 0x8bf   :  { %13884 = vmatpush3.msra.mxu1 %v16993_v30  ;;  %13916 = vmatprep.subr.mxu0 %v18711_v26 }
 0x8c0   :  { %v4514_v4 = vadd.f32 %v4513_v40, %v16187_v58  ;;  %13885 = vmatprep.subr.mxu1 %v18711_v26  ;;  %13917 = vmatpush3.msra.mxu0 %v16998_v32  ;;  %v15044_v58 = vpop.eup %15043  ;;  %v17048_v40 = vld [vmem:[#allocation14 + $0x50] sm:$0xff] }
 0x8c1   :  { %13886 = vmatpush3.msra.mxu1 %v17001_v57  ;;  %13918 = vmatprep.subr.mxu0 %v18711_v26  ;;  %v4747_v53 = vadd.f32 1.0, %v15044_v58 }
 0x8c2   :  { %15049 = vtanh.f32 %v4514_v4  ;;  %13888 = vmatmul.mubr.msk.f32.vlgmr.msra.gmra.mxu1 %vm397_vm1, %v4907_v50  ;;  %13901 = vmatprep.subr.mxu1 %v18711_v26  ;;  %v17054_v4 = vld [vmem:[#allocation14 + $0x48] sm:$0xff] }
 0x8c3   :  { %13902 = vmatpush3.msra.mxu1 %v17008_v2  ;;  %13909 = vmatprep.mubr.msk.f32.mxu1 %vm15708_vm0, %v18711_v26  ;;  %15051 = vrcp.f32 %v4747_v53  ;;  %v17060_v53 = vld [vmem:[#allocation14 + $0x40] sm:$0xff] }
 0x8c4   :  { %13903 = vmatprep.subr.mxu1 %v18711_v26  ;;  %13919 = vmatpush3.msra.mxu0 %v17013_v62 }
 0x8c5   :  { %13904 = vmatpush3.msra.mxu1 %v17017_v3  ;;  %13920 = vmatprep.mubr.msk.f32.mxu0 %vm15708_vm0, %v18711_v26 }
 0x8c6   :  { %13905 = vmatprep.subr.mxu1 %v18711_v26  ;;  %13944 = vmatprep.subr.mxu0 %v18711_v26 }
 0x8c7   :  { %13906 = vmatpush3.msra.mxu1 %v17023_v43 }
 0x8c8   :  { %13907 = vmatprep.subr.mxu1 %v18711_v26 }
 0x8c9   :  { %v15046_v22 = vpop.eup %15045  ;;  %13908 = vmatpush3.msra.mxu1 %v17030_v19 }
 0x8ca   :  { %v4750_v29 = vmul.f32 %v15046_v22, %v4733_v12  ;;  %13923 = vmatprep.subr.mxu1 %v18711_v26  ;;  %v15048_v23 = vpop.eup %15047  ;;  %v4759_v22 = vshrl.u32 %v4758_v5, 7  ;;  %v4779_v5 = vadd.f32 %v16752_v27, %v16370_v59  ;;  %v4806_v59 = vadd.f32 %v16724_v34, %v16398_v38 }
 0x8cb   :  { %v4516_v50 = vsub.f32 1.0, %v15048_v23  ;;  %v4520_v44 = vmul.f32 %v15048_v23, %v4518_v46 }
 0x8cc   :  { %v4751_v20 = vadd.f32 %v4750_v29, %v16194_v18  ;;  %vm4760_vm4 = vcmp.eq.s32.totalorder %v4759_v22, 0  ;;  %vm4769_vm5 = vcmp.eq.s32.totalorder %v4759_v22, 1  ;;  %vm4778_vm6 = vcmp.eq.s32.totalorder %v4759_v22, 2 }
 0x8cd   :  { %vm4787_vm7 = vcmp.eq.s32.totalorder %v4759_v22, 3  ;;  %vm4796_vm8 = vcmp.eq.s32.totalorder %v4759_v22, 4  ;;  %vm4805_vm9 = vcmp.eq.s32.totalorder %v4759_v22, 5  ;;  %vm4814_vm10 = vcmp.eq.s32.totalorder %v4759_v22, 6 }
 0x8ce   :  { %15053 = vtanh.f32 %v4751_v20  ;;  %v4788_v20 = vadd.f32 %v16666_v61, %v16456_v28  ;;  %v4797_v61 = vadd.f32 %v16638_v31, %v16514_v63  ;;  %v4829_v31 = vsub.s32 7, %v4759_v22 }
 0x8cf   :  { %v15050_v13 = vpop.eup %15049  ;;  %vm4823_vm11 = vcmp.eq.s32.totalorder %v4759_v22, 7 }
 0x8d0   :  { %v4517_v56 = vmul.f32 %v15050_v13, %v4516_v50  ;;  %v15052_v18 = vpop.eup %15051  ;;  %v4793_v50 = vsub.s32 3, %v4759_v22  ;;  %v4766_v13 = vsub.s32 0, %v4759_v22 }
 0x8d1   :  { %v4753_v58 = vsub.f32 1.0, %v15052_v18  ;;  %v4756_v29 = vmul.f32 %v15052_v18, %v16844_v42  ;;  %v4784_v42 = vsub.s32 2, %v4759_v22  ;;  %v4802_v18 = vsub.s32 4, %v4759_v22 }
 0x8d2   :  { %v4521_v52 = vadd.f32 %v4520_v44, %v4517_v56  ;;  %v4770_v56 = vadd.f32 %v16838_v41, %v16284_v15  ;;  %v4775_v44 = vsub.s32 1, %v4759_v22  ;;  %v4815_v41 = vadd.f32 %v16810_v25, %v16312_v51 }
 0x8d3   :  { %v4785_v27 = vrot.slane %v4779_v5, %v4784_v42 }
 0x8d4   :  { %v17040_v33 = vrot.slane %v4521_v52, 7  ;;  %v4776_v15 = vrot.slane %v4770_v56, %v4775_v44  ;;  %v4824_v63 = vadd.f32 %v4521_v52, %v16226_v8 }
 0x8d6   :  { %13910 = vmatmul.mubr.msk.f32.vlgmr.msra.gmra.mxu1 %vm397_vm1, %v17040_v33  ;;  %13921 = vmatmul.mubr.msk.f32.vlgmr.msra.gmra.mxu0 %vm397_vm1, %v17040_v33  ;;  %v4830_v42 = vrot.slane %v4824_v63, %v4829_v31 }
 0x8d7   :  { %13924 = vmatpush3.msra.mxu1 %v17042_v6  ;;  %13931 = vmatprep.mubr.msk.f32.mxu1 %vm15708_vm0, %v18711_v26 }
 0x8d8   :  { %13925 = vmatprep.subr.mxu1 %v18711_v26  ;;  %13952 = vmatprep.mubr.msk.f32.mxu0 %vm15708_vm0, %v18711_v26 }
 0x8d9   :  { %13926 = vmatpush3.msra.mxu1 %v17048_v40 }
 0x8da   :  { %13927 = vmatprep.subr.mxu1 %v18711_v26 }
 0x8db   :  { %v15054_v12 = vpop.eup %15053  ;;  %13928 = vmatpush3.msra.mxu1 %v17054_v4 }
 0x8dc   :  { %v4754_v23 = vmul.f32 %v15054_v12, %v4753_v58  ;;  %13929 = vmatprep.subr.mxu1 %v18711_v26  ;;  %v4794_v58 = vrot.slane %v4788_v20, %v4793_v50  ;;  %v4811_v12 = vsub.s32 5, %v4759_v22  ;;  %v4803_v20 = vrot.slane %v4797_v61, %v4802_v18 }
 0x8dd   :  { %13930 = vmatpush3.msra.mxu1 %v17060_v53 }
 0x8de   :  { %v4757_v46 = vadd.f32 %v4756_v29, %v4754_v23  ;;  %13932 = vmatmul.mubr.msk.f32.vlgmr.msra.gmra.mxu1 %vm397_vm1, %v17040_v33  ;;  %13934 = vmatprep.subr.mxu1 %v18711_v26  ;;  %v4820_v23 = vsub.s32 6, %v4759_v22 }
 0x8df   :  { %13936 = vmatprep.mubr.msk.f32.mxu1 %vm15708_vm0, %v18711_v26 }
 0x8e0   :  { %v4761_v28 = vadd.f32 %v4757_v46, %v16197_v1  ;;  %v4821_v38 = vrot.slane %v4815_v41, %v4820_v23 }
 0x8e2   :  { %v4767_v29 = vrot.slane %v4761_v28, %v4766_v13  ;;  %v4812_v13 = vrot.slane %v4806_v59, %v4811_v12  ;;  %v17093_v12 = vld [vmem:[#allocation17] sm:$0x1] }
 0x8e4   :  { %v4768_v1 = vsel %vm4760_vm4, %v4767_v29, 0.0 }
 0x8e5   :  { %v4777_v46 = vsel %vm4769_vm5, %v4776_v15, %v4768_v1  ;;  %v17097_v15 = vld [vmem:[#allocation17 + $0x1] sm:$0x1] }
 0x8e6   :  { %v4786_v50 = vsel %vm4778_vm6, %v4785_v27, %v4777_v46  ;;  %v17099_v46 = vld [vmem:[#allocation16 + $0x1] sm:$0x1] }
 0x8e7   :  { %v4795_v28 = vsel %vm4787_vm7, %v4794_v58, %v4786_v50  ;;  %v17091_v58 = vld [vmem:[#allocation16] sm:$0x1] }
 0x8e8   :  { %v4804_v34 = vsel %vm4796_vm8, %v4803_v20, %v4795_v28  ;;  %vm5769_vm8 = vcmp.eq.s32.totalorder %v16895_v11, 0 }
 0x8e9   :  { %v4813_v5 = vsel %vm4805_vm9, %v4812_v13, %v4804_v34 }
 0x8ea   :  { %v4822_v51 = vsel %vm4814_vm10, %v4821_v38, %v4813_v5 }
 0x8eb   :  { %v17086_v25 = vsel %vm4823_vm11, %v4830_v42, %v4822_v51  ;;  %v17103_v51 = vld [vmem:[#allocation17 + $0x2] sm:$0x1] }
 0x8ec   :  { %13935 = vmatpush3.xpose.msk.msra.mxu1 %vm397_vm1, %v17086_v25 }
 0x8ed   :  { %13939 = vmatprep.subr.mxu1 %v18711_v26 }
 0x97a   :  { %v4980_v8 = vpop.f32.mrf.mxu1  ;;  %v5120_v52 = vpop.f32.mrf.mxu0 }
 0x97b   :  { %v4981_v59 = vadd.f32 %v4980_v8, %v17091_v58 }
 0x97c   :  { %v13878_v56 = vpop.f32.mrf.mxu1  ;;  %v13900_v44 = vpop.f32.mrf.mxu0 }
 0x97d   :  { %v17105_v56 = vld [vmem:[#allocation16 + $0x2] sm:$0x1] }
 0x982   :  { %v5050_v61 = vpop.f32.mrf.mxu1 }
 0x983   :  { %v5051_v20 = vadd.f32 %v5050_v61, %v17099_v46  ;;  %v5121_v61 = vadd.f32 %v5120_v52, %v17105_v56 }
 0x984   :  { %v13889_v18 = vpop.f32.mrf.mxu1 }
 0x996   :  { %v5194_v22 = vpop.f32.mrf.mxu1  ;;  %v5264_v29 = vpop.f32.mrf.mxu0 }
 0x997   :  { %v5195_v27 = vadd.f32 %v5194_v22, %v17093_v12  ;;  %v5265_v31 = vadd.f32 %v5264_v29, %v17097_v15 }
 0x998   :  { %v13911_v41 = vpop.f32.mrf.mxu1  ;;  %v13922_v23 = vpop.f32.mrf.mxu0 }
 0x999   :  { %v5338_v1 = vadd.f32 %v5195_v27, %v4981_v59  ;;  %v5345_v13 = vadd.f32 %v5265_v31, %v5051_v20 }
 0x99b   :  { %v12401_v63 = vmul.f32 -1.442695, %v5338_v1  ;;  %v12402_v38 = vmul.f32 -1.442695, %v5345_v13 }
 0x99d   :  { %15055 = vpow2.f32 %v12401_v63 }
 0x99e   :  { %v5334_v50 = vpop.f32.mrf.mxu1  ;;  %15057 = vpow2.f32 %v12402_v38 }
 0x99f   :  { %v5335_v44 = vadd.f32 %v5334_v50, %v17103_v51 }
 0x9a0   :  { %v13933_v28 = vpop.f32.mrf.mxu1 }
 0x9aa   :  { %v15056_v34 = vpop.eup %15055 }
 0x9ab   :  { %v5342_v5 = vadd.f32 1.0, %v15056_v34  ;;  %v15058_v42 = vpop.eup %15057  ;;  %v17120_v34 = vld [vmem:[#allocation20 + $0x18] sm:$0xff] }
 0x9ac   :  { %v5349_v8 = vadd.f32 1.0, %v15058_v42  ;;  %13945 = vmatpush3.msra.mxu0 %v17120_v34  ;;  %v17126_v42 = vld [vmem:[#allocation20 + $0x8] sm:$0xff] }
 0x9ad   :  { %15059 = vrcp.f32 %v5342_v5  ;;  %v17122_v5 = vld [vmem:[#allocation20 + $0x10] sm:$0xff]  ;;  %13946 = vmatprep.subr.mxu0 %v18711_v26 }
 0x9ae   :  { %15061 = vrcp.f32 %v5349_v8  ;;  %13947 = vmatpush3.msra.mxu0 %v17122_v5 }
 0x9af   :  { %13948 = vmatprep.subr.mxu0 %v18711_v26 }
 0x9b0   :  { %13949 = vmatpush3.msra.mxu0 %v17126_v42 }
 0x9b1   :  { %13950 = vmatprep.subr.mxu0 %v18711_v26 }
 0x9ba   :  { %v15060_v18 = vpop.eup %15059 }
 0x9bb   :  { %v5352_v22 = vmul.f32 %v15060_v18, %v5335_v44  ;;  %v15062_v59 = vpop.eup %15061 }
 0x9bc   :  { %v5355_v27 = vsub.f32 1.0, %v15062_v59  ;;  %v5358_v1 = vmul.f32 %v15062_v59, %v17040_v33  ;;  %v17145_v59 = vld [vmem:[#allocation19] sm:$0xff] }
 0x9bd   :  { %v5353_v29 = vadd.f32 %v5352_v22, %v5121_v61  ;;  %v17132_v61 = vld [vmem:[#allocation19 + $0x18] sm:$0xff]  ;;  %v17135_v22 = vld [vmem:[#allocation19 + $0x10] sm:$0xff] }
 0x9bf   :  { %15063 = vtanh.f32 %v5353_v29  ;;  %v17141_v29 = vld [vmem:[#allocation19 + $0x8] sm:$0xff] }
 0x9cc   :  { %v15064_v41 = vpop.eup %15063 }
 0x9cd   :  { %v5356_v23 = vmul.f32 %v15064_v41, %v5355_v27  ;;  %v17188_v27 = vld [vmem:[#allocation23] sm:$0xff]  ;;  %v17194_v41 = vld [vmem:[#allocation22] sm:$0x1] }
 0x9cf   :  { %v17110_v63 = vadd.f32 %v5358_v1, %v5356_v23 }
 0x9d1   :  { %13937 = vmatmul.mubr.msk.f32.vlgmr.msra.gmra.mxu1 %vm397_vm1, %v17110_v63 }
 0x9d2   :  { %13940 = vmatpush3.msra.mxu1 %v17086_v25  ;;  %13941 = vmatprep.mubr.msk.f32.mxu1 %vm15708_vm0, %v18711_v26 }
 0x9d3   :  { %13955 = vmatprep.subr.mxu1 %v18711_v26 }
 0xa91   :  { %v5432_v52 = vpop.f32.mrf.mxu1 }
 0xa92   :  { %v5437_v31 = vsel %vm5436_vm12, %v5432_v52, -inf }
 0xa93   :  { %5438 = vmax.xlane.f32.xlu0 %v5437_v31  ;;  %v13938_v20 = vpop.f32.mrf.mxu1 }
 0xb1c   :  { %v5439_v50 = vpop.xlane.xlu0 %5438 }
 0xb1d   :  { %v5440_v33 = vsub.f32 %v5432_v52, %v5439_v50 }
 0xb1f   :  { %v5441_v13 = vmul.f32 1.442695, %v5440_v33 }
 0xb21   :  { %15065 = vpow2.f32 %v5441_v13 }
 0xb2e   :  { %v15066_v28 = vpop.eup %15065 }
 0xb2f   :  { %v5443_v38 = vsel %vm5436_vm12, %v15066_v28, 0.0 }
 0xb30   :  { %5444 = vadd.xlane.f32.xlu0 %v5443_v38 }
 0xbb9   :  { %v5445_v8 = vpop.xlane.xlu0 %5444 }
 0xbba   :  { %15067 = vrcp.f32 %v5445_v8 }
 0xbc7   :  { %v15068_v44 = vpop.eup %15067 }
 0xbc8   :  { %v5447_v18 = vmul.f32 %v15068_v44, %v15066_v28 }
 0xbca   :  { %13942 = vmatmul.mubr.msk.f32.vlgmr.msra.gmra.mxu1 %vm5448_vm13, %v5447_v18 }
 0xbcb   :  { %13956 = vmatpush3.msra.mxu1 %v17132_v61  ;;  %13963 = vmatprep.mubr.msk.f32.mxu1 %vm15708_vm0, %v18711_v26 }
 0xbcc   :  { %13957 = vmatprep.subr.mxu1 %v18711_v26 }
 0xbcd   :  { %13958 = vmatpush3.msra.mxu1 %v17135_v22 }
 0xbce   :  { %13959 = vmatprep.subr.mxu1 %v18711_v26 }
 0xbcf   :  { %13960 = vmatpush3.msra.mxu1 %v17141_v29 }
 0xbd0   :  { %13961 = vmatprep.subr.mxu1 %v18711_v26 }
 0xbd1   :  { %13962 = vmatpush3.msra.mxu1 %v17145_v59 }
 0xbd2   :  { %13964 = vmatmul.mubr.msk.f32.vlgmr.msra.gmra.mxu1 %vm397_vm1, %v17110_v63  ;;  %13977 = vmatprep.subr.mxu1 %v18711_v26 }
 0xbd3   :  { %13978 = vmatpush3.msra.mxu1 %v16860_v45  ;;  %13993 = vmatprep.mubr.msk.f32.mxu1 %vm15708_vm0, %v18711_v26  ;;  %v17171_v45 = vld [vmem:[#allocation20] sm:$0xff] }
 0xbd4   :  { %13979 = vmatprep.subr.mxu1 %v18711_v26  ;;  %13951 = vmatpush3.msra.mxu0 %v17171_v45 }
 0xbd5   :  { %13980 = vmatpush3.msra.mxu1 %v16870_v48  ;;  %13966 = vmatprep.subr.mxu0 %v18711_v26 }
 0xbd6   :  { %13981 = vmatprep.subr.mxu1 %v18711_v26 }
 0xbd7   :  { %13982 = vmatpush3.msra.mxu1 %v16879_v49 }
 0xbd8   :  { %13983 = vmatprep.subr.mxu1 %v18711_v26 }
 0xbd9   :  { %13984 = vmatpush3.msra.mxu1 %v16889_v9 }
 0xbda   :  { %13985 = vmatprep.subr.mxu1 %v18711_v26 }
 0xbdb   :  { %13986 = vmatpush3.msra.mxu1 %v16901_v14 }
 0xbdc   :  { %13987 = vmatprep.subr.mxu1 %v18711_v26 }
 0xbdd   :  { %13988 = vmatpush3.msra.mxu1 %v16911_v16  ;;  %v17178_v16 = vld [vmem:[#allocation23 + $0x18] sm:$0xff] }
 0xbde   :  { %13989 = vmatprep.subr.mxu1 %v18711_v26 }
 0xbdf   :  { %13990 = vmatpush3.msra.mxu1 %v16918_v10  ;;  %v17180_v10 = vld [vmem:[#allocation23 + $0x10] sm:$0xff] }
 0xbe0   :  { %13991 = vmatprep.subr.mxu1 %v18711_v26 }
 0xbe1   :  { %13992 = vmatpush3.msra.mxu1 %v16926_v21  ;;  %v17184_v21 = vld [vmem:[#allocation23 + $0x8] sm:$0xff] }
 0xbe2   :  { %14018 = vmatprep.subr.mxu1 %v18711_v26 }
 0xc8a   :  { %v5518_v48 = vpop.f32.mrf.mxu1 }
 0xc8b   :  { %13953 = vmatmul.mubr.msk.f32.vlgmr.msra.gmra.mxu0 %vm397_vm1, %v5518_v48 }
 0xc8c   :  { %v13943_v49 = vpop.f32.mrf.mxu1  ;;  %13974 = vmatprep.mubr.msk.f32.mxu0 %vm15708_vm0, %v18711_v26  ;;  %13967 = vmatpush3.msra.mxu0 %v17178_v16 }
 0xc8d   :  { %13968 = vmatprep.subr.mxu0 %v18711_v26 }
 0xc8e   :  { %13969 = vmatpush3.msra.mxu0 %v17180_v10 }
 0xc8f   :  { %13970 = vmatprep.subr.mxu0 %v18711_v26 }
 0xc90   :  { %13971 = vmatpush3.msra.mxu0 %v17184_v21 }
 0xc91   :  { %13972 = vmatprep.subr.mxu0 %v18711_v26 }
 0xc92   :  { %v5661_v9 = vpop.f32.mrf.mxu1  ;;  %13973 = vmatpush3.msra.mxu0 %v17188_v27 }
 0xc93   :  { %13996 = vmatprep.subr.mxu0 %v18711_v26 }
 0xc94   :  { %v13965_v14 = vpop.f32.mrf.mxu1 }
 0xd4b   :  { %v5591_v23 = vpop.f32.mrf.mxu0 }
 0xd4c   :  { %v5662_v1 = vadd.f32 %v5661_v9, %v5591_v23 }
 0xd4d   :  { %v13954_v52 = vpop.f32.mrf.mxu0 }
 0xd4e   :  { %v5665_v31 = vadd.f32 %v5662_v1, %v17194_v41 }
 0xd50   :  { %15069 = vtanh.f32 %v5665_v31 }
 0xd5d   :  { %v15070_v20 = vpop.eup %15069 }
 0xd5e   :  { %13975 = vmatmul.mubr.msk.f32.vlgmr.msra.gmra.mxu0 %vm397_vm1, %v15070_v20 }
 0xd5f   :  { %13997 = vmatpush3.msra.mxu0 %v16938_v60  ;;  %14004 = vmatprep.mubr.msk.f32.mxu0 %vm15708_vm0, %v18711_v26  ;;  %v17211_v60 = vld [vmem:[%s18667_s18] sm:$0x1] }
 0xd60   :  { %13998 = vmatprep.subr.mxu0 %v18711_v26 }
 0xd61   :  { %13999 = vmatpush3.msra.mxu0 %v16942_v47 }
 0xd62   :  { %14000 = vmatprep.subr.mxu0 %v18711_v26 }
 0xd63   :  { %14001 = vmatpush3.msra.mxu0 %v16946_v36 }
 0xd64   :  { %14002 = vmatprep.subr.mxu0 %v18711_v26 }
 0xd65   :  { %14003 = vmatpush3.msra.mxu0 %v16950_v0 }
 0xd66   :  { %14007 = vmatprep.subr.mxu0 %v18711_v26 }
 0xe1e   :  { %v5736_v50 = vpop.f32.mrf.mxu0 }
 0xe1f   :  { %v17214_v33 = vadd.f32 %v5736_v50, %v17211_v60 }
 0xe20   :  { %v13976_v47 = vpop.f32.mrf.mxu0 }
 0xe21   :  { %18713 = vst [vmem:[#allocation38_spill] sm:$0xff] %v17214_v33  ;;  %v5741_v36 = vsel %vm5740_vm14, %v17214_v33, -inf }
 0xe22   :  { %5742 = vmax.xlane.f32.xlu1 %v5741_v36 }
 0xeab   :  { %v17218_v13 = vpop.xlane.xlu1 %5742 }
 0xeac   :  { %18714 = vst [vmem:[#allocation39_spill] sm:$0xff] %v17218_v13  ;;  %vm5744_vm15 = vcmp.eq.f32.partialorder %v17214_v33, %v17218_v13 }
 0xead   :  { %v5745_v0 = vsel %vm5744_vm15, %v16895_v11, 64  ;;  %vm7620_vm15 = vcmp.eq.s32.totalorder %v16895_v11, 2 }
 0xeae   :  { %v5746_v28 = vsel %vm5740_vm14, %v5745_v0, 2147483647 }
 0xeaf   :  { %v5748_v38 = vshra.s32 %v5746_v28, 16  ;;  %v5747_v44 = vand.u32 65535, %v5746_v28 }
 0xeb1   :  { %v5750_v8 = vcvt.s32.f32 %v5748_v38  ;;  %v5749_v48 = vcvt.s32.f32 %v5747_v44 }
 0xeb3   :  { %5751 = vmin.xlane.f32.xlu1 %v5750_v8 }
 0xf3c   :  { %v5752_v18 = vpop.xlane.xlu1 %5751 }
 0xf3d   :  { %vm5753_vm4 = vcmp.eq.f32.partialorder %v5750_v8, %v5752_v18  ;;  %v5758_v9 = vcvt.f32.s32 %v5752_v18 }
 0xf3e   :  { %v5754_v49 = vsel %vm5753_vm4, %v5749_v48, inf }
 0xf3f   :  { %5755 = vmin.xlane.f32.xlu0 %v5754_v49  ;;  %v5759_v23 = vshll.u32 %v5758_v9, 16 }
 0xfc8   :  { %v5756_v14 = vpop.xlane.xlu0 %5755 }
 0xfc9   :  { %v5757_v1 = vcvt.f32.s32 %v5756_v14 }
 0xfcb   :  { %v17224_v52 = vadd.s32 %v5759_v23, %v5757_v1 }
 0xfcd   :  { %vm5772_vm5 = vcmp.eq.s32.totalorder %v16895_v11, %v17224_v52 }
 0xfce   :  { %v12409_v31 = vsel %vm5772_vm5, 1.0, %v18711_v26 }
 0xfcf   :  { %13994 = vmatmul.mubr.msk.f32.vlgmr.msra.gmra.mxu1 %vm4837_vm3, %v12409_v31 }
 0xfd0   :  { %14019 = vmatpush3.msra.mxu1 %v16954_v55  ;;  %14026 = vmatprep.mubr.msk.f32.mxu1 %vm15708_vm0, %v18711_v26 }
 0xfd1   :  { %14020 = vmatprep.subr.mxu1 %v18711_v26 }
 0xfd2   :  { %14021 = vmatpush3.msra.mxu1 %v16958_v7 }
 0xfd3   :  { %14022 = vmatprep.subr.mxu1 %v18711_v26 }
 0xfd4   :  { %14023 = vmatpush3.msra.mxu1 %v16962_v35 }
 0xfd5   :  { %14024 = vmatprep.subr.mxu1 %v18711_v26 }
 0xfd6   :  { %14025 = vmatpush3.msra.mxu1 %v16966_v39 }
 0xfd7   :  { %14040 = vmatprep.subr.mxu1 %v18711_v26 }
0x108f   :  { %v5844_v20 = vpop.f32.mrf.mxu1 }
0x1090   :  { %14005 = vmatmul.mubr.msk.f32.vlgmr.msra.gmra.mxu0 %vm397_vm1, %v5844_v20  ;;  %14027 = vmatmul.mubr.msk.f32.vlgmr.msra.gmra.mxu1 %vm397_vm1, %v5844_v20 }
0x1091   :  { %14008 = vmatpush3.msra.mxu0 %v16979_v24  ;;  %14041 = vmatpush3.msra.mxu1 %v16981_v54  ;;  %v13995_v55 = vpop.f32.mrf.mxu1 }
0x1092   :  { %14009 = vmatprep.subr.mxu0 %v18711_v26  ;;  %14042 = vmatprep.subr.mxu1 %v18711_v26 }
0x1093   :  { %14010 = vmatpush3.msra.mxu0 %v16984_v17  ;;  %14043 = vmatpush3.msra.mxu1 %v16990_v37 }
0x1094   :  { %14011 = vmatprep.subr.mxu0 %v18711_v26  ;;  %14044 = vmatprep.subr.mxu1 %v18711_v26 }
0x1095   :  { %14012 = vmatpush3.msra.mxu0 %v16993_v30  ;;  %14045 = vmatpush3.msra.mxu1 %v16998_v32 }
0x1096   :  { %14013 = vmatprep.subr.mxu0 %v18711_v26  ;;  %14046 = vmatprep.subr.mxu1 %v18711_v26 }
0x1097   :  { %14014 = vmatpush3.msra.mxu0 %v17001_v57  ;;  %14015 = vmatprep.mubr.msk.f32.mxu0 %vm15708_vm0, %v18711_v26 }
0x1098   :  { %14047 = vmatpush3.msra.mxu1 %v17013_v62  ;;  %14048 = vmatprep.mubr.msk.f32.mxu1 %vm15708_vm0, %v18711_v26 }
0x1099   :  { %14016 = vmatmul.mubr.msk.f32.vlgmr.msra.gmra.mxu0 %vm397_vm1, %v5844_v20  ;;  %14029 = vmatprep.subr.mxu0 %v18711_v26 }
0x109a   :  { %14049 = vmatmul.mubr.msk.f32.vlgmr.msra.gmra.mxu1 %vm397_vm1, %v17110_v63  ;;  %14062 = vmatprep.subr.mxu1 %v18711_v26 }
0x109b   :  { %14030 = vmatpush3.msra.mxu0 %v17008_v2  ;;  %14063 = vmatpush3.xpose.msk.msra.mxu1 %vm397_vm1, %v17086_v25 }
0x109c   :  { %14031 = vmatprep.subr.mxu0 %v18711_v26  ;;  %14037 = vmatprep.mubr.msk.f32.mxu0 %vm15708_vm0, %v18711_v26 }
0x109d   :  { %14032 = vmatpush3.msra.mxu0 %v17017_v3  ;;  %14064 = vmatprep.mubr.msk.f32.mxu1 %vm15708_vm0, %v18711_v26 }
0x109e   :  { %14033 = vmatprep.subr.mxu0 %v18711_v26  ;;  %14067 = vmatprep.subr.mxu1 %v18711_v26 }
0x109f   :  { %14034 = vmatpush3.msra.mxu0 %v17023_v43 }
0x10a0   :  { %14035 = vmatprep.subr.mxu0 %v18711_v26 }
0x10a1   :  { %14036 = vmatpush3.msra.mxu0 %v17030_v19 }
0x10a2   :  { %14038 = vmatmul.mubr.msk.f32.vlgmr.msra.gmra.mxu0 %vm397_vm1, %v17110_v63  ;;  %14051 = vmatprep.subr.mxu0 %v18711_v26 }
0x10a3   :  { %14052 = vmatpush3.msra.mxu0 %v17042_v6  ;;  %14059 = vmatprep.mubr.msk.f32.mxu0 %vm15708_vm0, %v18711_v26 }
0x10a4   :  { %14053 = vmatprep.subr.mxu0 %v18711_v26 }
0x10a5   :  { %14054 = vmatpush3.msra.mxu0 %v17048_v40 }
0x10a6   :  { %14055 = vmatprep.subr.mxu0 %v18711_v26 }
0x10a7   :  { %14056 = vmatpush3.msra.mxu0 %v17054_v4 }
0x10a8   :  { %14057 = vmatprep.subr.mxu0 %v18711_v26 }
0x10a9   :  { %14058 = vmatpush3.msra.mxu0 %v17060_v53 }
0x10aa   :  { %14060 = vmatmul.mubr.msk.f32.vlgmr.msra.gmra.mxu0 %vm397_vm1, %v17110_v63  ;;  %14072 = vmatprep.subr.mxu0 %v18711_v26 }
0x10ab   :  { %14073 = vmatpush3.msra.mxu0 %v17120_v34  ;;  %14080 = vmatprep.mubr.msk.f32.mxu0 %vm15708_vm0, %v18711_v26 }
0x10ac   :  { %14074 = vmatprep.subr.mxu0 %v18711_v26 }
0x10ad   :  { %14075 = vmatpush3.msra.mxu0 %v17122_v5 }
0x10ae   :  { %14076 = vmatprep.subr.mxu0 %v18711_v26 }
0x10af   :  { %14077 = vmatpush3.msra.mxu0 %v17126_v42 }
0x10b0   :  { %14078 = vmatprep.subr.mxu0 %v18711_v26 }
0x10b1   :  { %14079 = vmatpush3.msra.mxu0 %v17171_v45 }
0x10b2   :  { %14094 = vmatprep.subr.mxu0 %v18711_v26 }
0x1150   :  { %v5917_v7 = vpop.f32.mrf.mxu0  ;;  %v6057_v35 = vpop.f32.mrf.mxu1 }
0x1151   :  { %v5918_v57 = vadd.f32 %v5917_v7, %v17091_v58  ;;  %v6058_v9 = vadd.f32 %v6057_v35, %v17105_v56 }
0x1152   :  { %v14006_v39 = vpop.f32.mrf.mxu0  ;;  %v14028_v24 = vpop.f32.mrf.mxu1 }
0x1159   :  { %v5987_v54 = vpop.f32.mrf.mxu0 }
0x115a   :  { %v6197_v17 = vpop.f32.mrf.mxu1  ;;  %v5988_v43 = vadd.f32 %v5987_v54, %v17099_v46 }
0x115b   :  { %v14017_v37 = vpop.f32.mrf.mxu0  ;;  %v6198_v19 = vadd.f32 %v6197_v17, %v17097_v15 }
0x115c   :  { %v14050_v30 = vpop.f32.mrf.mxu1 }
0x115d   :  { %v6278_v36 = vadd.f32 %v6198_v19, %v5988_v43  ;;  %v17346_v43 = vld [vmem:[%s18712_s27 + $0x30] sm:$0xff]  ;;  %v17353_v19 = vld [vmem:[%s18712_s27 + $0x28] sm:$0xff] }
0x115f   :  { %v12418_v28 = vmul.f32 -1.442695, %v6278_v36  ;;  %v17374_v36 = vld [vmem:[%s18712_s27 + $0x10] sm:$0xff] }
0x1162   :  { %v6127_v32 = vpop.f32.mrf.mxu0 }
0x1163   :  { %v6128_v2 = vadd.f32 %v6127_v32, %v17093_v12 }
0x1164   :  { %v14039_v62 = vpop.f32.mrf.mxu0 }
0x1165   :  { %v6271_v3 = vadd.f32 %v6128_v2, %v5918_v57 }
0x1167   :  { %v12417_v50 = vmul.f32 -1.442695, %v6271_v3  ;;  %v17337_v3 = vld [vmem:[%s18712_s27 + $0x38] sm:$0xff] }
0x1169   :  { %15071 = vpow2.f32 %v12417_v50  ;;  %v17360_v50 = vld [vmem:[%s18712_s27 + $0x20] sm:$0xff] }
0x116a   :  { %v6267_v47 = vpop.f32.mrf.mxu0  ;;  %15073 = vpow2.f32 %v12418_v28  ;;  %v17388_v28 = vld [vmem:[%s18712_s27] sm:$0xff] }
0x116b   :  { %v6268_v48 = vadd.f32 %v6267_v47, %v17103_v51  ;;  %v17367_v47 = vld [vmem:[%s18712_s27 + $0x18] sm:$0xff] }
0x116c   :  { %v14061_v0 = vpop.f32.mrf.mxu0 }
0x116d   :  { %v17381_v0 = vld [vmem:[%s18712_s27 + $0x8] sm:$0xff] }
0x1176   :  { %v15072_v38 = vpop.eup %15071 }
0x1177   :  { %v6275_v8 = vadd.f32 1.0, %v15072_v38  ;;  %v15074_v44 = vpop.eup %15073 }
0x1178   :  { %v6282_v18 = vadd.f32 1.0, %v15074_v44 }
0x1179   :  { %15075 = vrcp.f32 %v6275_v8 }
0x117a   :  { %15077 = vrcp.f32 %v6282_v18 }
0x1186   :  { %v15076_v49 = vpop.eup %15075 }
0x1187   :  { %v6285_v14 = vmul.f32 %v15076_v49, %v6268_v48  ;;  %v15078_v1 = vpop.eup %15077 }
0x1188   :  { %v6288_v31 = vsub.f32 1.0, %v15078_v1  ;;  %v6290_v7 = vmul.f32 %v15078_v1, %v17110_v63  ;;  %v17405_v1 = vld [vmem:[#allocation13 + $0x18] sm:$0xff] }
0x1189   :  { %v6286_v23 = vadd.f32 %v6285_v14, %v6058_v9 }
0x118b   :  { %15079 = vtanh.f32 %v6286_v23 }
0x1198   :  { %v15080_v20 = vpop.eup %15079 }
0x1199   :  { %v6289_v55 = vmul.f32 %v15080_v20, %v6288_v31  ;;  %v17411_v31 = vld [vmem:[#allocation13 + $0x10] sm:$0xff]  ;;  %v17415_v20 = vld [vmem:[#allocation13 + $0x8] sm:$0xff] }
0x119b   :  { %v17311_v39 = vadd.f32 %v6290_v7, %v6289_v55  ;;  %v17419_v55 = vld [vmem:[#allocation13] sm:$0xff] }
0x119d   :  { %14065 = vmatmul.mubr.msk.f32.vlgmr.msra.gmra.mxu1 %vm397_vm1, %v17311_v39 }
0x119e   :  { %14068 = vmatpush3.msra.mxu1 %v17086_v25  ;;  %14069 = vmatprep.mubr.msk.f32.mxu1 %vm15708_vm0, %v18711_v26 }
0x119f   :  { %14083 = vmatprep.subr.mxu1 %v18711_v26 }
0x125d   :  { %v6361_v35 = vpop.f32.mrf.mxu1 }
0x125e   :  { %v6365_v24 = vsel %vm5436_vm12, %v6361_v35, -inf }
0x125f   :  { %6366 = vmax.xlane.f32.xlu1 %v6365_v24  ;;  %v14066_v54 = vpop.f32.mrf.mxu1 }
0x12e8   :  { %v6367_v17 = vpop.xlane.xlu1 %6366 }
0x12e9   :  { %v6368_v37 = vsub.f32 %v6361_v35, %v6367_v17 }
0x12eb   :  { %v6369_v63 = vmul.f32 1.442695, %v6368_v37 }
0x12ed   :  { %15081 = vpow2.f32 %v6369_v63 }
0x12fa   :  { %v15082_v30 = vpop.eup %15081 }
0x12fb   :  { %v6371_v32 = vsel %vm5436_vm12, %v15082_v30, 0.0 }
0x12fc   :  { %6372 = vadd.xlane.f32.xlu0 %v6371_v32 }
0x1385   :  { %v6373_v57 = vpop.xlane.xlu0 %6372 }
0x1386   :  { %15083 = vrcp.f32 %v6373_v57 }
0x1393   :  { %v15084_v2 = vpop.eup %15083 }
0x1394   :  { %v6375_v62 = vmul.f32 %v15084_v2, %v15082_v30 }
0x1396   :  { %14070 = vmatmul.mubr.msk.f32.vlgmr.msra.gmra.mxu1 %vm5448_vm13, %v6375_v62 }
0x1397   :  { %14084 = vmatpush3.msra.mxu1 %v17132_v61  ;;  %14091 = vmatprep.mubr.msk.f32.mxu1 %vm15708_vm0, %v18711_v26 }
0x1398   :  { %14085 = vmatprep.subr.mxu1 %v18711_v26 }
0x1399   :  { %14086 = vmatpush3.msra.mxu1 %v17135_v22 }
0x139a   :  { %14087 = vmatprep.subr.mxu1 %v18711_v26 }
0x139b   :  { %14088 = vmatpush3.msra.mxu1 %v17141_v29 }
0x139c   :  { %14089 = vmatprep.subr.mxu1 %v18711_v26 }
0x139d   :  { %14090 = vmatpush3.msra.mxu1 %v17145_v59 }
0x139e   :  { %14092 = vmatmul.mubr.msk.f32.vlgmr.msra.gmra.mxu1 %vm397_vm1, %v17311_v39  ;;  %14105 = vmatprep.subr.mxu1 %v18711_v26 }
0x139f   :  { %14106 = vmatpush3.msra.mxu1 %v17337_v3  ;;  %14121 = vmatprep.mubr.msk.f32.mxu1 %vm15708_vm0, %v18711_v26 }
0x13a0   :  { %14107 = vmatprep.subr.mxu1 %v18711_v26 }
0x13a1   :  { %14108 = vmatpush3.msra.mxu1 %v17346_v43 }
0x13a2   :  { %14109 = vmatprep.subr.mxu1 %v18711_v26 }
0x13a3   :  { %14110 = vmatpush3.msra.mxu1 %v17353_v19 }
0x13a4   :  { %14111 = vmatprep.subr.mxu1 %v18711_v26 }
0x13a5   :  { %14112 = vmatpush3.msra.mxu1 %v17360_v50 }
0x13a6   :  { %14113 = vmatprep.subr.mxu1 %v18711_v26 }
0x13a7   :  { %14114 = vmatpush3.msra.mxu1 %v17367_v47 }
0x13a8   :  { %14115 = vmatprep.subr.mxu1 %v18711_v26 }
0x13a9   :  { %14116 = vmatpush3.msra.mxu1 %v17374_v36 }
0x13aa   :  { %14117 = vmatprep.subr.mxu1 %v18711_v26 }
0x13ab   :  { %14118 = vmatpush3.msra.mxu1 %v17381_v0 }
0x13ac   :  { %14119 = vmatprep.subr.mxu1 %v18711_v26 }
0x13ad   :  { %14120 = vmatpush3.msra.mxu1 %v17388_v28 }
0x13ae   :  { %14146 = vmatprep.subr.mxu1 %v18711_v26 }
0x1456   :  { %v6445_v38 = vpop.f32.mrf.mxu1 }
0x1457   :  { %14081 = vmatmul.mubr.msk.f32.vlgmr.msra.gmra.mxu0 %vm397_vm1, %v6445_v38 }
0x1458   :  { %v14071_v8 = vpop.f32.mrf.mxu1  ;;  %14095 = vmatpush3.msra.mxu0 %v17178_v16  ;;  %14102 = vmatprep.mubr.msk.f32.mxu0 %vm15708_vm0, %v18711_v26 }
0x1459   :  { %14096 = vmatprep.subr.mxu0 %v18711_v26 }
0x145a   :  { %14097 = vmatpush3.msra.mxu0 %v17180_v10 }
0x145b   :  { %14098 = vmatprep.subr.mxu0 %v18711_v26 }
0x145c   :  { %14099 = vmatpush3.msra.mxu0 %v17184_v21 }
0x145d   :  { %14100 = vmatprep.subr.mxu0 %v18711_v26 }
0x145e   :  { %v6588_v44 = vpop.f32.mrf.mxu1  ;;  %14101 = vmatpush3.msra.mxu0 %v17188_v27 }
0x145f   :  { %14124 = vmatprep.subr.mxu0 %v18711_v26 }
0x1460   :  { %v14093_v18 = vpop.f32.mrf.mxu1 }
0x1517   :  { %v6518_v48 = vpop.f32.mrf.mxu0 }
0x1518   :  { %v6589_v49 = vadd.f32 %v6588_v44, %v6518_v48 }
0x1519   :  { %v14082_v9 = vpop.f32.mrf.mxu0 }
0x151a   :  { %v6592_v14 = vadd.f32 %v6589_v49, %v17194_v41  ;;  %v5770_v9 = vsel %vm5769_vm8, %v17224_v52, 0  ;;  %v17451_v52 = vld [vmem:[#allocation13 + $0x50] sm:$0xff] }
0x151c   :  { %15085 = vtanh.f32 %v6592_v14 }
0x1529   :  { %v15086_v23 = vpop.eup %15085 }
0x152a   :  { %14103 = vmatmul.mubr.msk.f32.vlgmr.msra.gmra.mxu0 %vm397_vm1, %v15086_v23 }
0x152b   :  { %14125 = vmatpush3.msra.mxu0 %v17405_v1  ;;  %14132 = vmatprep.mubr.msk.f32.mxu0 %vm15708_vm0, %v18711_v26 }
0x152c   :  { %14126 = vmatprep.subr.mxu0 %v18711_v26 }
0x152d   :  { %14127 = vmatpush3.msra.mxu0 %v17411_v31 }
0x152e   :  { %14128 = vmatprep.subr.mxu0 %v18711_v26 }
0x152f   :  { %14129 = vmatpush3.msra.mxu0 %v17415_v20 }
0x1530   :  { %14130 = vmatprep.subr.mxu0 %v18711_v26 }
0x1531   :  { %14131 = vmatpush3.msra.mxu0 %v17419_v55 }
0x1532   :  { %14135 = vmatprep.subr.mxu0 %v18711_v26 }
0x15ea   :  { %v6663_v7 = vpop.f32.mrf.mxu0 }
0x15eb   :  { %v17424_v35 = vadd.f32 %v6663_v7, %v17211_v60  ;;  %v17445_v7 = vld [vmem:[#allocation13 + $0x58] sm:$0xff] }
0x15ec   :  { %v14104_v24 = vpop.f32.mrf.mxu0 }
0x15ed   :  { %18715 = vst [vmem:[#allocation40_spill] sm:$0xff] %v17424_v35  ;;  %v6667_v54 = vsel %vm5740_vm14, %v17424_v35, -inf  ;;  %v17455_v24 = vld [vmem:[#allocation13 + $0x48] sm:$0xff] }
0x15ee   :  { %6668 = vmax.xlane.f32.xlu1 %v6667_v54  ;;  %v17459_v54 = vld [vmem:[#allocation13 + $0x40] sm:$0xff] }
0x1677   :  { %v17428_v17 = vpop.xlane.xlu1 %6668 }
0x1678   :  { %18716 = vst [vmem:[#allocation41_spill] sm:$0xff] %v17428_v17  ;;  %vm6670_vm6 = vcmp.eq.f32.partialorder %v17424_v35, %v17428_v17 }
0x1679   :  { %v6671_v37 = vsel %vm6670_vm6, %v16895_v11, 64 }
0x167a   :  { %v6672_v63 = vsel %vm5740_vm14, %v6671_v37, 2147483647 }
0x167b   :  { %v6674_v30 = vshra.s32 %v6672_v63, 16  ;;  %v6673_v57 = vand.u32 65535, %v6672_v63  ;;  %v17465_v63 = vld [vmem:[#allocation13 + $0x38] sm:$0xff] }
0x167d   :  { %v6676_v32 = vcvt.s32.f32 %v6674_v30  ;;  %v6675_v62 = vcvt.s32.f32 %v6673_v57  ;;  %v17468_v30 = vld [vmem:[#allocation14 + $0x38] sm:$0xff]  ;;  %v17473_v57 = vld [vmem:[#allocation13 + $0x30] sm:$0xff] }
0x167f   :  { %6677 = vmin.xlane.f32.xlu0 %v6676_v32 }
0x1708   :  { %v6678_v2 = vpop.xlane.xlu0 %6677 }
0x1709   :  { %vm6679_vm7 = vcmp.eq.f32.partialorder %v6676_v32, %v6678_v2  ;;  %v6684_v8 = vcvt.f32.s32 %v6678_v2  ;;  %v17476_v2 = vld [vmem:[#allocation14 + $0x30] sm:$0xff] }
0x170a   :  { %v6680_v38 = vsel %vm6679_vm7, %v6675_v62, inf  ;;  %v17481_v62 = vld [vmem:[#allocation13 + $0x28] sm:$0xff]  ;;  %vm8546_vm7 = vcmp.eq.s32.totalorder %v16895_v11, 3 }
0x170b   :  { %6681 = vmin.xlane.f32.xlu1 %v6680_v38  ;;  %v6685_v18 = vshll.u32 %v6684_v8, 16  ;;  %v17484_v38 = vld [vmem:[#allocation14 + $0x28] sm:$0xff]  ;;  %v17489_v8 = vld [vmem:[#allocation13 + $0x20] sm:$0xff] }
0x1794   :  { %v6682_v44 = vpop.xlane.xlu1 %6681 }
0x1795   :  { %v6683_v48 = vcvt.f32.s32 %v6682_v44  ;;  %v17494_v44 = vld [vmem:[#allocation14 + $0x20] sm:$0xff] }
0x1797   :  { %v6686_v49 = vadd.s32 %v6685_v18, %v6683_v48  ;;  %v17504_v18 = vld [vmem:[#allocation14 + $0x18] sm:$0xff]  ;;  %v17512_v48 = vld [vmem:[#allocation14 + $0x10] sm:$0xff] }
0x1798   :  { %18717 = vst [vmem:[#allocation42_spill] sm:$0xff] %v17504_v18  ;;  %18718 = vst [vmem:[#allocation43_spill] sm:$0xff] %v17512_v48 }
0x1799   :  { %v17440_v14 = vsel %vm4834_vm2, %v6686_v49, %v5770_v9  ;;  %vm6697_vm9 = vcmp.eq.s32.totalorder %v16895_v11, %v6686_v49  ;;  %v17519_v49 = vld [vmem:[#allocation14 + $0x8] sm:$0xff]  ;;  %v17523_v9 = vld [vmem:[#allocation14] sm:$0xff] }
0x179a   :  { %v12425_v23 = vsel %vm6697_vm9, 1.0, %v18711_v26  ;;  %18719 = vst [vmem:[#allocation44_spill] sm:$0xff] %v17519_v49  ;;  %18720 = vst [vmem:[#allocation45_spill] sm:$0xff] %v17523_v9 }
0x179b   :  { %14122 = vmatmul.mubr.msk.f32.vlgmr.msra.gmra.mxu1 %vm4837_vm3, %v12425_v23 }
0x179c   :  { %14147 = vmatpush3.msra.mxu1 %v17445_v7  ;;  %14154 = vmatprep.mubr.msk.f32.mxu1 %vm15708_vm0, %v18711_v26 }
0x179d   :  { %14148 = vmatprep.subr.mxu1 %v18711_v26 }
0x179e   :  { %14149 = vmatpush3.msra.mxu1 %v17451_v52 }
0x179f   :  { %14150 = vmatprep.subr.mxu1 %v18711_v26 }
0x17a0   :  { %14151 = vmatpush3.msra.mxu1 %v17455_v24 }
0x17a1   :  { %14152 = vmatprep.subr.mxu1 %v18711_v26 }
0x17a2   :  { %14153 = vmatpush3.msra.mxu1 %v17459_v54 }
0x17a3   :  { %14168 = vmatprep.subr.mxu1 %v18711_v26 }
0x185b   :  { %v6769_v37 = vpop.f32.mrf.mxu1 }
0x185c   :  { %14133 = vmatmul.mubr.msk.f32.vlgmr.msra.gmra.mxu0 %vm397_vm1, %v6769_v37  ;;  %14155 = vmatmul.mubr.msk.f32.vlgmr.msra.gmra.mxu1 %vm397_vm1, %v6769_v37 }
0x185d   :  { %14136 = vmatpush3.msra.mxu0 %v17465_v63  ;;  %14169 = vmatpush3.msra.mxu1 %v17468_v30  ;;  %v14123_v32 = vpop.f32.mrf.mxu1 }
0x185e   :  { %14137 = vmatprep.subr.mxu0 %v18711_v26  ;;  %14170 = vmatprep.subr.mxu1 %v18711_v26 }
0x185f   :  { %14138 = vmatpush3.msra.mxu0 %v17473_v57  ;;  %14171 = vmatpush3.msra.mxu1 %v17476_v2 }
0x1860   :  { %14139 = vmatprep.subr.mxu0 %v18711_v26  ;;  %14172 = vmatprep.subr.mxu1 %v18711_v26 }
0x1861   :  { %14140 = vmatpush3.msra.mxu0 %v17481_v62  ;;  %14173 = vmatpush3.msra.mxu1 %v17484_v38 }
0x1862   :  { %14141 = vmatprep.subr.mxu0 %v18711_v26  ;;  %14174 = vmatprep.subr.mxu1 %v18711_v26 }
0x1863   :  { %14142 = vmatpush3.msra.mxu0 %v17489_v8  ;;  %14143 = vmatprep.mubr.msk.f32.mxu0 %vm15708_vm0, %v18711_v26 }
0x1864   :  { %14175 = vmatpush3.msra.mxu1 %v17494_v44  ;;  %14176 = vmatprep.mubr.msk.f32.mxu1 %vm15708_vm0, %v18711_v26 }
0x1865   :  { %14144 = vmatmul.mubr.msk.f32.vlgmr.msra.gmra.mxu0 %vm397_vm1, %v6769_v37  ;;  %14157 = vmatprep.subr.mxu0 %v18711_v26 }
0x1866   :  { %14177 = vmatmul.mubr.msk.f32.vlgmr.msra.gmra.mxu1 %vm397_vm1, %v17311_v39  ;;  %14190 = vmatprep.subr.mxu1 %v18711_v26 }
0x1867   :  { %14158 = vmatpush3.msra.mxu0 %v17504_v18  ;;  %14191 = vmatpush3.xpose.msk.msra.mxu1 %vm397_vm1, %v17086_v25 }
0x1868   :  { %14159 = vmatprep.subr.mxu0 %v18711_v26  ;;  %14165 = vmatprep.mubr.msk.f32.mxu0 %vm15708_vm0, %v18711_v26 }
0x1869   :  { %14160 = vmatpush3.msra.mxu0 %v17512_v48  ;;  %14192 = vmatprep.mubr.msk.f32.mxu1 %vm15708_vm0, %v18711_v26 }
0x186a   :  { %14161 = vmatprep.subr.mxu0 %v18711_v26  ;;  %14195 = vmatprep.subr.mxu1 %v18711_v26 }
0x186b   :  { %14162 = vmatpush3.msra.mxu0 %v17519_v49 }
0x186c   :  { %14163 = vmatprep.subr.mxu0 %v18711_v26 }
0x186d   :  { %14164 = vmatpush3.msra.mxu0 %v17523_v9 }
0x186e   :  { %14166 = vmatmul.mubr.msk.f32.vlgmr.msra.gmra.mxu0 %vm397_vm1, %v17311_v39  ;;  %14179 = vmatprep.subr.mxu0 %v18711_v26 }
0x186f   :  { %14180 = vmatpush3.msra.mxu0 %v17042_v6  ;;  %14187 = vmatprep.mubr.msk.f32.mxu0 %vm15708_vm0, %v18711_v26 }
0x1870   :  { %14181 = vmatprep.subr.mxu0 %v18711_v26 }
0x1871   :  { %14182 = vmatpush3.msra.mxu0 %v17048_v40 }
0x1872   :  { %14183 = vmatprep.subr.mxu0 %v18711_v26 }
0x1873   :  { %14184 = vmatpush3.msra.mxu0 %v17054_v4 }
0x1874   :  { %14185 = vmatprep.subr.mxu0 %v18711_v26 }
0x1875   :  { %14186 = vmatpush3.msra.mxu0 %v17060_v53 }
0x1876   :  { %14188 = vmatmul.mubr.msk.f32.vlgmr.msra.gmra.mxu0 %vm397_vm1, %v17311_v39  ;;  %14200 = vmatprep.subr.mxu0 %v18711_v26 }
0x1877   :  { %14201 = vmatpush3.msra.mxu0 %v17120_v34  ;;  %14208 = vmatprep.mubr.msk.f32.mxu0 %vm15708_vm0, %v18711_v26 }
0x1878   :  { %14202 = vmatprep.subr.mxu0 %v18711_v26 }
0x1879   :  { %14203 = vmatpush3.msra.mxu0 %v17122_v5 }
0x187a   :  { %14204 = vmatprep.subr.mxu0 %v18711_v26 }
0x187b   :  { %14205 = vmatpush3.msra.mxu0 %v17126_v42 }
0x187c   :  { %14206 = vmatprep.subr.mxu0 %v18711_v26 }
0x187d   :  { %14207 = vmatpush3.msra.mxu0 %v17171_v45 }
0x187e   :  { %14222 = vmatprep.subr.mxu0 %v18711_v26 }
0x191c   :  { %v6842_v6 = vpop.f32.mrf.mxu0  ;;  %v6982_v40 = vpop.f32.mrf.mxu1 }
0x191d   :  { %v6843_v5 = vadd.f32 %v6842_v6, %v17091_v58 }
0x191e   :  { %v14134_v4 = vpop.f32.mrf.mxu0  ;;  %v14156_v53 = vpop.f32.mrf.mxu1 }
0x1925   :  { %v6912_v34 = vpop.f32.mrf.mxu0 }
0x1926   :  { %v7122_v23 = vpop.f32.mrf.mxu1  ;;  %v6913_v13 = vadd.f32 %v6912_v34, %v17099_v46 }
0x1927   :  { %v14145_v37 = vpop.f32.mrf.mxu0  ;;  %v7123_v45 = vadd.f32 %v7122_v23, %v17097_v15 }
0x1928   :  { %v14178_v32 = vpop.f32.mrf.mxu1 }
0x1929   :  { %v7203_v4 = vadd.f32 %v7123_v45, %v6913_v13 }
0x192b   :  { %v12434_v48 = vmul.f32 -1.442695, %v7203_v4 }
0x192e   :  { %v7052_v35 = vpop.f32.mrf.mxu0 }
0x192f   :  { %v7053_v17 = vadd.f32 %v7052_v35, %v17093_v12 }
0x1930   :  { %v14167_v42 = vpop.f32.mrf.mxu0 }
0x1931   :  { %v7196_v33 = vadd.f32 %v7053_v17, %v6843_v5  ;;  %v6983_v17 = vadd.f32 %v6982_v40, %v17105_v56 }
0x1933   :  { %v12433_v9 = vmul.f32 -1.442695, %v7196_v33 }
0x1935   :  { %15087 = vpow2.f32 %v12433_v9 }
0x1936   :  { %v7192_v49 = vpop.f32.mrf.mxu0  ;;  %15089 = vpow2.f32 %v12434_v48 }
0x1937   :  { %v7193_v12 = vadd.f32 %v7192_v49, %v17103_v51 }
0x1938   :  { %v14189_v53 = vpop.f32.mrf.mxu0 }
0x1942   :  { %v15088_v37 = vpop.eup %15087 }
0x1943   :  { %v7200_v32 = vadd.f32 1.0, %v15088_v37  ;;  %v15090_v18 = vpop.eup %15089 }
0x1944   :  { %v7207_v58 = vadd.f32 1.0, %v15090_v18 }
0x1945   :  { %15091 = vrcp.f32 %v7200_v32 }
0x1946   :  { %15093 = vrcp.f32 %v7207_v58 }
0x1952   :  { %v15092_v35 = vpop.eup %15091 }
0x1953   :  { %v7210_v46 = vmul.f32 %v15092_v35, %v7193_v12  ;;  %v15094_v33 = vpop.eup %15093 }
0x1954   :  { %v7213_v9 = vsub.f32 1.0, %v15094_v33  ;;  %v7215_v48 = vmul.f32 %v15094_v33, %v17311_v39 }
0x1955   :  { %v7211_v15 = vadd.f32 %v7210_v46, %v6983_v17 }
0x1957   :  { %15095 = vtanh.f32 %v7211_v15 }
0x1964   :  { %v15096_v13 = vpop.eup %15095 }
0x1965   :  { %v7214_v6 = vmul.f32 %v15096_v13, %v7213_v9 }
0x1967   :  { %v17558_v34 = vadd.f32 %v7215_v48, %v7214_v6 }
0x1969   :  { %14193 = vmatmul.mubr.msk.f32.vlgmr.msra.gmra.mxu1 %vm397_vm1, %v17558_v34 }
0x196a   :  { %14196 = vmatpush3.msra.mxu1 %v17086_v25  ;;  %14197 = vmatprep.mubr.msk.f32.mxu1 %vm15708_vm0, %v18711_v26 }
0x196b   :  { %14211 = vmatprep.subr.mxu1 %v18711_v26 }
0x1a29   :  { %v7286_v51 = vpop.f32.mrf.mxu1 }
0x1a2a   :  { %v7290_v56 = vsel %vm5436_vm12, %v7286_v51, -inf }
0x1a2b   :  { %7291 = vmax.xlane.f32.xlu0 %v7290_v56  ;;  %v14194_v18 = vpop.f32.mrf.mxu1 }
0x1ab4   :  { %v7292_v49 = vpop.xlane.xlu0 %7291 }
0x1ab5   :  { %v7293_v40 = vsub.f32 %v7286_v51, %v7292_v49 }
0x1ab7   :  { %v7294_v39 = vmul.f32 1.442695, %v7293_v40 }
0x1ab9   :  { %15097 = vpow2.f32 %v7294_v39 }
0x1ac6   :  { %v15098_v23 = vpop.eup %15097 }
0x1ac7   :  { %v7296_v5 = vsel %vm5436_vm12, %v15098_v23, 0.0 }
0x1ac8   :  { %7297 = vadd.xlane.f32.xlu1 %v7296_v5  ;;  %v18724_v5 = vld [vmem:[#allocation43_spill] sm:$0xff] }
0x1b51   :  { %v7298_v42 = vpop.xlane.xlu1 %7297 }
0x1b52   :  { %15099 = vrcp.f32 %v7298_v42  ;;  %v18725_v42 = vld [vmem:[#allocation44_spill] sm:$0xff] }
0x1b5f   :  { %v15100_v45 = vpop.eup %15099 }
0x1b60   :  { %v7300_v4 = vmul.f32 %v15100_v45, %v15098_v23  ;;  %v18723_v23 = vld [vmem:[#allocation42_spill] sm:$0xff]  ;;  %v18726_v45 = vld [vmem:[#allocation45_spill] sm:$0xff] }
0x1b62   :  { %14198 = vmatmul.mubr.msk.f32.vlgmr.msra.gmra.mxu1 %vm5448_vm13, %v7300_v4  ;;  %v17694_v4 = vld [vmem:[#allocation14 + $0x58] sm:$0xff] }
0x1b63   :  { %14212 = vmatpush3.msra.mxu1 %v17132_v61  ;;  %14219 = vmatprep.mubr.msk.f32.mxu1 %vm15708_vm0, %v18711_v26 }
0x1b64   :  { %14213 = vmatprep.subr.mxu1 %v18711_v26 }
0x1b65   :  { %14214 = vmatpush3.msra.mxu1 %v17135_v22 }
0x1b66   :  { %14215 = vmatprep.subr.mxu1 %v18711_v26 }
0x1b67   :  { %14216 = vmatpush3.msra.mxu1 %v17141_v29 }
0x1b68   :  { %14217 = vmatprep.subr.mxu1 %v18711_v26 }
0x1b69   :  { %14218 = vmatpush3.msra.mxu1 %v17145_v59 }
0x1b6a   :  { %14220 = vmatmul.mubr.msk.f32.vlgmr.msra.gmra.mxu1 %vm397_vm1, %v17558_v34  ;;  %14233 = vmatprep.subr.mxu1 %v18711_v26 }
0x1b6b   :  { %14234 = vmatpush3.msra.mxu1 %v17337_v3  ;;  %14249 = vmatprep.mubr.msk.f32.mxu1 %vm15708_vm0, %v18711_v26 }
0x1b6c   :  { %14235 = vmatprep.subr.mxu1 %v18711_v26 }
0x1b6d   :  { %14236 = vmatpush3.msra.mxu1 %v17346_v43 }
0x1b6e   :  { %14237 = vmatprep.subr.mxu1 %v18711_v26 }
0x1b6f   :  { %14238 = vmatpush3.msra.mxu1 %v17353_v19 }
0x1b70   :  { %14239 = vmatprep.subr.mxu1 %v18711_v26 }
0x1b71   :  { %14240 = vmatpush3.msra.mxu1 %v17360_v50 }
0x1b72   :  { %14241 = vmatprep.subr.mxu1 %v18711_v26 }
0x1b73   :  { %14242 = vmatpush3.msra.mxu1 %v17367_v47 }
0x1b74   :  { %14243 = vmatprep.subr.mxu1 %v18711_v26 }
0x1b75   :  { %14244 = vmatpush3.msra.mxu1 %v17374_v36 }
0x1b76   :  { %14245 = vmatprep.subr.mxu1 %v18711_v26 }
0x1b77   :  { %14246 = vmatpush3.msra.mxu1 %v17381_v0 }
0x1b78   :  { %14247 = vmatprep.subr.mxu1 %v18711_v26 }
0x1b79   :  { %14248 = vmatpush3.msra.mxu1 %v17388_v28 }
0x1b7a   :  { %14274 = vmatprep.subr.mxu1 %v18711_v26 }
0x1c22   :  { %v7370_v61 = vpop.f32.mrf.mxu1 }
0x1c23   :  { %14209 = vmatmul.mubr.msk.f32.vlgmr.msra.gmra.mxu0 %vm397_vm1, %v7370_v61  ;;  %v17700_v61 = vld [vmem:[#allocation14 + $0x50] sm:$0xff] }
0x1c24   :  { %v14199_v22 = vpop.f32.mrf.mxu1  ;;  %14223 = vmatpush3.msra.mxu0 %v17178_v16  ;;  %14230 = vmatprep.mubr.msk.f32.mxu0 %vm15708_vm0, %v18711_v26 }
0x1c25   :  { %14224 = vmatprep.subr.mxu0 %v18711_v26  ;;  %v17704_v22 = vld [vmem:[#allocation14 + $0x48] sm:$0xff] }
0x1c26   :  { %14225 = vmatpush3.msra.mxu0 %v17180_v10 }
0x1c27   :  { %14226 = vmatprep.subr.mxu0 %v18711_v26 }
0x1c28   :  { %14227 = vmatpush3.msra.mxu0 %v17184_v21 }
0x1c29   :  { %14228 = vmatprep.subr.mxu0 %v18711_v26 }
0x1c2a   :  { %v7513_v29 = vpop.f32.mrf.mxu1  ;;  %14229 = vmatpush3.msra.mxu0 %v17188_v27 }
0x1c2b   :  { %14252 = vmatprep.subr.mxu0 %v18711_v26 }
0x1c2c   :  { %v14221_v59 = vpop.f32.mrf.mxu1 }
0x1c2d   :  { %v17714_v59 = vld [vmem:[#allocation20 + $0x18] sm:$0xff] }
0x1ce3   :  { %v7443_v16 = vpop.f32.mrf.mxu0 }
0x1ce4   :  { %v7514_v53 = vadd.f32 %v7513_v29, %v7443_v16  ;;  %v17708_v29 = vld [vmem:[#allocation14 + $0x40] sm:$0xff]  ;;  %v17720_v16 = vld [vmem:[#allocation20 + $0x10] sm:$0xff] }
0x1ce5   :  { %v14210_v37 = vpop.f32.mrf.mxu0 }
0x1ce6   :  { %v7517_v32 = vadd.f32 %v7514_v53, %v17194_v41  ;;  %v17724_v53 = vld [vmem:[#allocation20 + $0x8] sm:$0xff]  ;;  %v17728_v37 = vld [vmem:[#allocation20] sm:$0xff] }
0x1ce8   :  { %15101 = vtanh.f32 %v7517_v32 }
0x1cf5   :  { %v15102_v58 = vpop.eup %15101 }
0x1cf6   :  { %14231 = vmatmul.mubr.msk.f32.vlgmr.msra.gmra.mxu0 %vm397_vm1, %v15102_v58 }
0x1cf7   :  { %14253 = vmatpush3.msra.mxu0 %v17405_v1  ;;  %14260 = vmatprep.mubr.msk.f32.mxu0 %vm15708_vm0, %v18711_v26 }
0x1cf8   :  { %14254 = vmatprep.subr.mxu0 %v18711_v26 }
0x1cf9   :  { %14255 = vmatpush3.msra.mxu0 %v17411_v31 }
0x1cfa   :  { %14256 = vmatprep.subr.mxu0 %v18711_v26 }
0x1cfb   :  { %14257 = vmatpush3.msra.mxu0 %v17415_v20 }
0x1cfc   :  { %14258 = vmatprep.subr.mxu0 %v18711_v26 }
0x1cfd   :  { %14259 = vmatpush3.msra.mxu0 %v17419_v55 }
0x1cfe   :  { %14263 = vmatprep.subr.mxu0 %v18711_v26 }
0x1db6   :  { %v7588_v10 = vpop.f32.mrf.mxu0 }
0x1db7   :  { %v17623_v21 = vadd.f32 %v7588_v10, %v17211_v60 }
0x1db8   :  { %v14232_v27 = vpop.f32.mrf.mxu0 }
0x1db9   :  { %18721 = vst [vmem:[#allocation46_spill] sm:$0xff] %v17623_v21  ;;  %v7592_v41 = vsel %vm5740_vm14, %v17623_v21, -inf }
0x1dba   :  { %7593 = vmax.xlane.f32.xlu0 %v7592_v41 }
0x1e43   :  { %v17627_v12 = vpop.xlane.xlu0 %7593 }
0x1e44   :  { %18722 = vst [vmem:[#allocation47_spill] sm:$0xff] %v17627_v12  ;;  %vm7595_vm10 = vcmp.eq.f32.partialorder %v17623_v21, %v17627_v12  ;;  %v17747_v21 = vld [vmem:[#allocation16 + $0x2] sm:$0x1] }
0x1e45   :  { %v7596_v35 = vsel %vm7595_vm10, %v16895_v11, 64 }
0x1e46   :  { %v7597_v17 = vsel %vm5740_vm14, %v7596_v35, 2147483647 }
0x1e47   :  { %v7599_v46 = vshra.s32 %v7597_v17, 16  ;;  %v7598_v33 = vand.u32 65535, %v7597_v17 }
0x1e49   :  { %v7601_v15 = vcvt.s32.f32 %v7599_v46  ;;  %v7600_v9 = vcvt.s32.f32 %v7598_v33  ;;  %v17732_v33 = vld [vmem:[#allocation16] sm:$0x1] }
0x1e4b   :  { %7602 = vmin.xlane.f32.xlu1 %v7601_v15 }
0x1ed4   :  { %v7603_v60 = vpop.xlane.xlu1 %7602 }
0x1ed5   :  { %vm7604_vm11 = vcmp.eq.f32.partialorder %v7601_v15, %v7603_v60  ;;  %v7609_v6 = vcvt.f32.s32 %v7603_v60 }
0x1ed6   :  { %v7605_v13 = vsel %vm7604_vm11, %v7600_v9, inf  ;;  %v17735_v9 = vld [vmem:[#allocation17] sm:$0x1] }
0x1ed7   :  { %7606 = vmin.xlane.f32.xlu0 %v7605_v13  ;;  %v7610_v51 = vshll.u32 %v7609_v6, 16 }
0x1f60   :  { %v7607_v48 = vpop.xlane.xlu0 %7606 }
0x1f61   :  { %v7608_v56 = vcvt.f32.s32 %v7607_v48 }
0x1f63   :  { %v7611_v18 = vadd.s32 %v7610_v51, %v7608_v56  ;;  %v17738_v51 = vld [vmem:[#allocation16 + $0x1] sm:$0x1] }
0x1f65   :  { %v17637_v49 = vsel %vm7620_vm15, %v7611_v18, %v17440_v14  ;;  %vm7623_vm4 = vcmp.eq.s32.totalorder %v16895_v11, %v7611_v18  ;;  %v17741_v18 = vld [vmem:[#allocation17 + $0x1] sm:$0x1] }
0x1f66   :  { %v12441_v40 = vsel %vm7623_vm4, 1.0, %v18711_v26  ;;  %vm9472_vm4 = vcmp.eq.s32.totalorder %v16895_v11, 4 }
0x1f67   :  { %14250 = vmatmul.mubr.msk.f32.vlgmr.msra.gmra.mxu1 %vm4837_vm3, %v12441_v40 }
0x1f68   :  { %14275 = vmatpush3.msra.mxu1 %v17445_v7  ;;  %14282 = vmatprep.mubr.msk.f32.mxu1 %vm15708_vm0, %v18711_v26 }
0x1f69   :  { %14276 = vmatprep.subr.mxu1 %v18711_v26 }
0x1f6a   :  { %14277 = vmatpush3.msra.mxu1 %v17451_v52 }
0x1f6b   :  { %14278 = vmatprep.subr.mxu1 %v18711_v26 }
0x1f6c   :  { %14279 = vmatpush3.msra.mxu1 %v17455_v24 }
0x1f6d   :  { %14280 = vmatprep.subr.mxu1 %v18711_v26 }
0x1f6e   :  { %14281 = vmatpush3.msra.mxu1 %v17459_v54 }
0x1f6f   :  { %14296 = vmatprep.subr.mxu1 %v18711_v26 }
0x2027   :  { %v7695_v14 = vpop.f32.mrf.mxu1 }
0x2028   :  { %14261 = vmatmul.mubr.msk.f32.vlgmr.msra.gmra.mxu0 %vm397_vm1, %v7695_v14  ;;  %14283 = vmatmul.mubr.msk.f32.vlgmr.msra.gmra.mxu1 %vm397_vm1, %v7695_v14 }
0x2029   :  { %14264 = vmatpush3.msra.mxu0 %v17465_v63  ;;  %14297 = vmatpush3.msra.mxu1 %v17468_v30  ;;  %v14251_v39 = vpop.f32.mrf.mxu1 }
0x202a   :  { %14265 = vmatprep.subr.mxu0 %v18711_v26  ;;  %14298 = vmatprep.subr.mxu1 %v18711_v26 }
0x202b   :  { %14266 = vmatpush3.msra.mxu0 %v17473_v57  ;;  %14299 = vmatpush3.msra.mxu1 %v17476_v2 }
0x202c   :  { %14267 = vmatprep.subr.mxu0 %v18711_v26  ;;  %14300 = vmatprep.subr.mxu1 %v18711_v26 }
0x202d   :  { %14268 = vmatpush3.msra.mxu0 %v17481_v62  ;;  %14301 = vmatpush3.msra.mxu1 %v17484_v38 }
0x202e   :  { %14269 = vmatprep.subr.mxu0 %v18711_v26  ;;  %14302 = vmatprep.subr.mxu1 %v18711_v26 }
0x202f   :  { %14270 = vmatpush3.msra.mxu0 %v17489_v8  ;;  %14271 = vmatprep.mubr.msk.f32.mxu0 %vm15708_vm0, %v18711_v26 }
0x2030   :  { %14303 = vmatpush3.msra.mxu1 %v17494_v44  ;;  %14304 = vmatprep.mubr.msk.f32.mxu1 %vm15708_vm0, %v18711_v26 }
0x2031   :  { %14272 = vmatmul.mubr.msk.f32.vlgmr.msra.gmra.mxu0 %vm397_vm1, %v7695_v14  ;;  %14285 = vmatprep.subr.mxu0 %v18711_v26 }
0x2032   :  { %14305 = vmatmul.mubr.msk.f32.vlgmr.msra.gmra.mxu1 %vm397_vm1, %v17558_v34  ;;  %14318 = vmatprep.subr.mxu1 %v18711_v26 }
0x2033   :  { %14286 = vmatpush3.msra.mxu0 %v18723_v23  ;;  %14319 = vmatpush3.xpose.msk.msra.mxu1 %vm397_vm1, %v17086_v25 }
0x2034   :  { %14287 = vmatprep.subr.mxu0 %v18711_v26  ;;  %14293 = vmatprep.mubr.msk.f32.mxu0 %vm15708_vm0, %v18711_v26 }
0x2035   :  { %14288 = vmatpush3.msra.mxu0 %v18724_v5  ;;  %14320 = vmatprep.mubr.msk.f32.mxu1 %vm15708_vm0, %v18711_v26 }
0x2036   :  { %14289 = vmatprep.subr.mxu0 %v18711_v26  ;;  %14323 = vmatprep.subr.mxu1 %v18711_v26 }
0x2037   :  { %14290 = vmatpush3.msra.mxu0 %v18725_v42 }
0x2038   :  { %14291 = vmatprep.subr.mxu0 %v18711_v26 }
0x2039   :  { %14292 = vmatpush3.msra.mxu0 %v18726_v45 }
0x203a   :  { %14294 = vmatmul.mubr.msk.f32.vlgmr.msra.gmra.mxu0 %vm397_vm1, %v17558_v34  ;;  %14307 = vmatprep.subr.mxu0 %v18711_v26 }
0x203b   :  { %14308 = vmatpush3.msra.mxu0 %v17694_v4  ;;  %14315 = vmatprep.mubr.msk.f32.mxu0 %vm15708_vm0, %v18711_v26 }
0x203c   :  { %14309 = vmatprep.subr.mxu0 %v18711_v26 }
0x203d   :  { %14310 = vmatpush3.msra.mxu0 %v17700_v61 }
0x203e   :  { %14311 = vmatprep.subr.mxu0 %v18711_v26 }
0x203f   :  { %14312 = vmatpush3.msra.mxu0 %v17704_v22 }
0x2040   :  { %14313 = vmatprep.subr.mxu0 %v18711_v26 }
0x2041   :  { %14314 = vmatpush3.msra.mxu0 %v17708_v29 }
0x2042   :  { %14316 = vmatmul.mubr.msk.f32.vlgmr.msra.gmra.mxu0 %vm397_vm1, %v17558_v34  ;;  %14328 = vmatprep.subr.mxu0 %v18711_v26 }
0x2043   :  { %14329 = vmatpush3.msra.mxu0 %v17714_v59  ;;  %14336 = vmatprep.mubr.msk.f32.mxu0 %vm15708_vm0, %v18711_v26 }
0x2044   :  { %14330 = vmatprep.subr.mxu0 %v18711_v26 }
0x2045   :  { %14331 = vmatpush3.msra.mxu0 %v17720_v16 }
0x2046   :  { %14332 = vmatprep.subr.mxu0 %v18711_v26 }
0x2047   :  { %14333 = vmatpush3.msra.mxu0 %v17724_v53 }
0x2048   :  { %14334 = vmatprep.subr.mxu0 %v18711_v26 }
0x2049   :  { %14335 = vmatpush3.msra.mxu0 %v17728_v37 }
0x204a   :  { %14350 = vmatprep.subr.mxu0 %v18711_v26 }
0x20e8   :  { %v7768_v32 = vpop.f32.mrf.mxu0  ;;  %v7908_v58 = vpop.f32.mrf.mxu1 }
0x20e9   :  { %v7769_v60 = vadd.f32 %v17732_v33, %v7768_v32 }
0x20ea   :  { %v14262_v10 = vpop.f32.mrf.mxu0  ;;  %v14284_v27 = vpop.f32.mrf.mxu1 }
0x20f1   :  { %v7838_v41 = vpop.f32.mrf.mxu0 }
0x20f2   :  { %v8048_v35 = vpop.f32.mrf.mxu1  ;;  %v7839_v56 = vadd.f32 %v17738_v51, %v7838_v41 }
0x20f3   :  { %v14273_v17 = vpop.f32.mrf.mxu0  ;;  %v8049_v40 = vadd.f32 %v17741_v18, %v8048_v35  ;;  %v7909_v35 = vadd.f32 %v17747_v21, %v7908_v58 }
0x20f4   :  { %v14306_v46 = vpop.f32.mrf.mxu1 }
0x20f5   :  { %v8129_v10 = vadd.f32 %v8049_v40, %v7839_v56 }
0x20f7   :  { %v12450_v32 = vmul.f32 -1.442695, %v8129_v10 }
0x20fa   :  { %v7978_v15 = vpop.f32.mrf.mxu0 }
0x20fb   :  { %v7979_v13 = vadd.f32 %v17735_v9, %v7978_v15 }
0x20fc   :  { %v14295_v6 = vpop.f32.mrf.mxu0 }
0x20fd   :  { %v8122_v48 = vadd.f32 %v7979_v13, %v7769_v60  ;;  %v17744_v13 = vld [vmem:[#allocation17 + $0x2] sm:$0x1] }
0x20ff   :  { %v12449_v14 = vmul.f32 -1.442695, %v8122_v48 }
0x2101   :  { %15103 = vpow2.f32 %v12449_v14 }
0x2102   :  { %v8118_v39 = vpop.f32.mrf.mxu0  ;;  %15105 = vpow2.f32 %v12450_v32 }
0x2103   :  { %v8119_v41 = vadd.f32 %v17744_v13, %v8118_v39 }
0x2104   :  { %v14317_v27 = vpop.f32.mrf.mxu0 }
0x210e   :  { %v15104_v17 = vpop.eup %15103 }
0x210f   :  { %v8126_v46 = vadd.f32 1.0, %v15104_v17  ;;  %v15106_v15 = vpop.eup %15105 }
0x2110   :  { %v8133_v60 = vadd.f32 1.0, %v15106_v15 }
0x2111   :  { %15107 = vrcp.f32 %v8126_v46 }
0x2112   :  { %15109 = vrcp.f32 %v8133_v60 }
0x211e   :  { %v15108_v6 = vpop.eup %15107 }
0x211f   :  { %v8136_v48 = vmul.f32 %v15108_v6, %v8119_v41  ;;  %v15110_v40 = vpop.eup %15109 }
0x2120   :  { %v8139_v14 = vsub.f32 1.0, %v15110_v40  ;;  %v8141_v32 = vmul.f32 %v15110_v40, %v17558_v34  ;;  %v17762_v40 = vld [vmem:[#allocation19 + $0x18] sm:$0xff] }
0x2121   :  { %v8137_v56 = vadd.f32 %v8136_v48, %v7909_v35 }
0x2123   :  { %15111 = vtanh.f32 %v8137_v56 }
0x2130   :  { %v15112_v10 = vpop.eup %15111 }
0x2131   :  { %v8140_v27 = vmul.f32 %v15112_v10, %v8139_v14  ;;  %v17768_v14 = vld [vmem:[#allocation19 + $0x10] sm:$0xff]  ;;  %v17772_v10 = vld [vmem:[#allocation19 + $0x8] sm:$0xff] }
0x2133   :  { %v17751_v17 = vadd.f32 %v8141_v32, %v8140_v27  ;;  %v17776_v27 = vld [vmem:[#allocation19] sm:$0xff] }
0x2135   :  { %14321 = vmatmul.mubr.msk.f32.vlgmr.msra.gmra.mxu1 %vm397_vm1, %v17751_v17 }
0x2136   :  { %14324 = vmatpush3.msra.mxu1 %v17086_v25  ;;  %14325 = vmatprep.mubr.msk.f32.mxu1 %vm15708_vm0, %v18711_v26 }
0x2137   :  { %14339 = vmatprep.subr.mxu1 %v18711_v26 }
0x21f5   :  { %v8212_v58 = vpop.f32.mrf.mxu1 }
0x21f6   :  { %v8216_v39 = vsel %vm5436_vm12, %v8212_v58, -inf }
0x21f7   :  { %8217 = vmax.xlane.f32.xlu1 %v8216_v39  ;;  %v14322_v46 = vpop.f32.mrf.mxu1 }
0x21f8   :  { %v17819_v46 = vld [vmem:[#allocation22] sm:$0x1] }
0x2280   :  { %v8218_v15 = vpop.xlane.xlu1 %8217 }
0x2281   :  { %v8219_v60 = vsub.f32 %v8212_v58, %v8218_v15 }
0x2283   :  { %v8220_v34 = vmul.f32 1.442695, %v8219_v60 }
0x2285   :  { %15113 = vpow2.f32 %v8220_v34 }
0x2292   :  { %v15114_v41 = vpop.eup %15113 }
0x2293   :  { %v8222_v6 = vsel %vm5436_vm12, %v15114_v41, 0.0 }
0x2294   :  { %8223 = vadd.xlane.f32.xlu0 %v8222_v6 }
0x231d   :  { %v8224_v35 = vpop.xlane.xlu0 %8223 }
0x231e   :  { %15115 = vrcp.f32 %v8224_v35 }
0x232b   :  { %v15116_v48 = vpop.eup %15115 }
0x232c   :  { %v8226_v56 = vmul.f32 %v15116_v48, %v15114_v41 }
0x232e   :  { %14326 = vmatmul.mubr.msk.f32.vlgmr.msra.gmra.mxu1 %vm5448_vm13, %v8226_v56 }
0x232f   :  { %14340 = vmatpush3.msra.mxu1 %v17762_v40  ;;  %14347 = vmatprep.mubr.msk.f32.mxu1 %vm15708_vm0, %v18711_v26 }
0x2330   :  { %14341 = vmatprep.subr.mxu1 %v18711_v26 }
0x2331   :  { %14342 = vmatpush3.msra.mxu1 %v17768_v14 }
0x2332   :  { %14343 = vmatprep.subr.mxu1 %v18711_v26 }
0x2333   :  { %14344 = vmatpush3.msra.mxu1 %v17772_v10 }
0x2334   :  { %14345 = vmatprep.subr.mxu1 %v18711_v26 }
0x2335   :  { %14346 = vmatpush3.msra.mxu1 %v17776_v27 }
0x2336   :  { %14348 = vmatmul.mubr.msk.f32.vlgmr.msra.gmra.mxu1 %vm397_vm1, %v17751_v17  ;;  %14361 = vmatprep.subr.mxu1 %v18711_v26 }
0x2337   :  { %14362 = vmatpush3.msra.mxu1 %v17337_v3  ;;  %14377 = vmatprep.mubr.msk.f32.mxu1 %vm15708_vm0, %v18711_v26 }
0x2338   :  { %14363 = vmatprep.subr.mxu1 %v18711_v26 }
0x2339   :  { %14364 = vmatpush3.msra.mxu1 %v17346_v43 }
0x233a   :  { %14365 = vmatprep.subr.mxu1 %v18711_v26 }
0x233b   :  { %14366 = vmatpush3.msra.mxu1 %v17353_v19  ;;  %v17801_v19 = vld [vmem:[#allocation23 + $0x18] sm:$0xff] }
0x233c   :  { %14367 = vmatprep.subr.mxu1 %v18711_v26 }
0x233d   :  { %14368 = vmatpush3.msra.mxu1 %v17360_v50  ;;  %v17807_v50 = vld [vmem:[#allocation23 + $0x10] sm:$0xff] }
0x233e   :  { %14369 = vmatprep.subr.mxu1 %v18711_v26 }
0x233f   :  { %14370 = vmatpush3.msra.mxu1 %v17367_v47  ;;  %v17811_v47 = vld [vmem:[#allocation23 + $0x8] sm:$0xff] }
0x2340   :  { %14371 = vmatprep.subr.mxu1 %v18711_v26 }
0x2341   :  { %14372 = vmatpush3.msra.mxu1 %v17374_v36 }
0x2342   :  { %14373 = vmatprep.subr.mxu1 %v18711_v26 }
0x2343   :  { %14374 = vmatpush3.msra.mxu1 %v17381_v0  ;;  %v17815_v0 = vld [vmem:[#allocation23] sm:$0xff] }
0x2344   :  { %14375 = vmatprep.subr.mxu1 %v18711_v26 }
0x2345   :  { %14376 = vmatpush3.msra.mxu1 %v17388_v28 }
0x2346   :  { %14402 = vmatprep.subr.mxu1 %v18711_v26 }
0x23ee   :  { %v8296_v3 = vpop.f32.mrf.mxu1 }
0x23ef   :  { %14337 = vmatmul.mubr.msk.f32.vlgmr.msra.gmra.mxu0 %vm397_vm1, %v8296_v3 }
0x23f0   :  { %v14327_v43 = vpop.f32.mrf.mxu1  ;;  %14351 = vmatpush3.msra.mxu0 %v17801_v19  ;;  %14358 = vmatprep.mubr.msk.f32.mxu0 %vm15708_vm0, %v18711_v26 }
0x23f1   :  { %14352 = vmatprep.subr.mxu0 %v18711_v26 }
0x23f2   :  { %14353 = vmatpush3.msra.mxu0 %v17807_v50 }
0x23f3   :  { %14354 = vmatprep.subr.mxu0 %v18711_v26 }
0x23f4   :  { %14355 = vmatpush3.msra.mxu0 %v17811_v47 }
0x23f5   :  { %14356 = vmatprep.subr.mxu0 %v18711_v26 }
0x23f6   :  { %v8439_v36 = vpop.f32.mrf.mxu1  ;;  %14357 = vmatpush3.msra.mxu0 %v17815_v0 }
0x23f7   :  { %14380 = vmatprep.subr.mxu0 %v18711_v26 }
0x23f8   :  { %v14349_v28 = vpop.f32.mrf.mxu1 }
0x24af   :  { %v8369_v32 = vpop.f32.mrf.mxu0 }
0x24b0   :  { %v8440_v58 = vadd.f32 %v8439_v36, %v8369_v32 }
0x24b1   :  { %v14338_v39 = vpop.f32.mrf.mxu0 }
0x24b2   :  { %v8443_v15 = vadd.f32 %v17819_v46, %v8440_v58 }
0x24b4   :  { %15117 = vtanh.f32 %v8443_v15 }
0x24c1   :  { %v15118_v60 = vpop.eup %15117 }
0x24c2   :  { %14359 = vmatmul.mubr.msk.f32.vlgmr.msra.gmra.mxu0 %vm397_vm1, %v15118_v60 }
0x24c3   :  { %14381 = vmatpush3.msra.mxu0 %v17405_v1  ;;  %14388 = vmatprep.mubr.msk.f32.mxu0 %vm15708_vm0, %v18711_v26  ;;  %v17836_v1 = vld [vmem:[%s18667_s18] sm:$0x1] }
0x24c4   :  { %14382 = vmatprep.subr.mxu0 %v18711_v26 }
0x24c5   :  { %14383 = vmatpush3.msra.mxu0 %v17411_v31 }
0x24c6   :  { %14384 = vmatprep.subr.mxu0 %v18711_v26 }
0x24c7   :  { %14385 = vmatpush3.msra.mxu0 %v17415_v20 }
0x24c8   :  { %14386 = vmatprep.subr.mxu0 %v18711_v26 }
0x24c9   :  { %14387 = vmatpush3.msra.mxu0 %v17419_v55 }
0x24ca   :  { %14391 = vmatprep.subr.mxu0 %v18711_v26 }
0x2582   :  { %v8514_v34 = vpop.f32.mrf.mxu0 }
0x2583   :  { %v17839_v41 = vadd.f32 %v17836_v1, %v8514_v34 }
0x2584   :  { %v14360_v31 = vpop.f32.mrf.mxu0 }
0x2585   :  { %18727 = vst [vmem:[#allocation42_spill] sm:$0xff] %v17839_v41  ;;  %v8518_v6 = vsel %vm5740_vm14, %v17839_v41, -inf }
0x2586   :  { %8519 = vmax.xlane.f32.xlu1 %v8518_v6 }
0x260f   :  { %v17843_v20 = vpop.xlane.xlu1 %8519 }
0x2610   :  { %18728 = vst [vmem:[#allocation43_spill] sm:$0xff] %v17843_v20  ;;  %vm8521_vm5 = vcmp.eq.f32.partialorder %v17839_v41, %v17843_v20 }
0x2611   :  { %v8522_v55 = vsel %vm8521_vm5, %v16895_v11, 64 }
0x2612   :  { %v8523_v35 = vsel %vm5740_vm14, %v8522_v55, 2147483647 }
0x2613   :  { %v8525_v48 = vshra.s32 %v8523_v35, 16  ;;  %v8524_v3 = vand.u32 65535, %v8523_v35 }
0x2615   :  { %v8527_v56 = vcvt.s32.f32 %v8525_v48  ;;  %v8526_v36 = vcvt.s32.f32 %v8524_v3 }
0x2617   :  { %8528 = vmin.xlane.f32.xlu0 %v8527_v56 }
0x26a0   :  { %v8529_v43 = vpop.xlane.xlu0 %8528 }
0x26a1   :  { %vm8530_vm6 = vcmp.eq.f32.partialorder %v8527_v56, %v8529_v43  ;;  %v8535_v32 = vcvt.f32.s32 %v8529_v43 }
0x26a2   :  { %v8531_v28 = vsel %vm8530_vm6, %v8526_v36, inf }
0x26a3   :  { %8532 = vmin.xlane.f32.xlu1 %v8531_v28  ;;  %v8536_v39 = vshll.u32 %v8535_v32, 16 }
0x272c   :  { %v8533_v58 = vpop.xlane.xlu1 %8532 }
0x272d   :  { %v8534_v15 = vcvt.f32.s32 %v8533_v58 }
0x272f   :  { %v8537_v60 = vadd.s32 %v8536_v39, %v8534_v15 }
0x2731   :  { %v17853_v34 = vsel %vm8546_vm7, %v8537_v60, %v17637_v49  ;;  %vm8549_vm9 = vcmp.eq.s32.totalorder %v16895_v11, %v8537_v60 }
0x2732   :  { %v12457_v31 = vsel %vm8549_vm9, 1.0, %v18711_v26 }
0x2733   :  { %14378 = vmatmul.mubr.msk.f32.vlgmr.msra.gmra.mxu1 %vm4837_vm3, %v12457_v31 }
0x2734   :  { %14403 = vmatpush3.msra.mxu1 %v17445_v7  ;;  %14410 = vmatprep.mubr.msk.f32.mxu1 %vm15708_vm0, %v18711_v26 }
0x2735   :  { %14404 = vmatprep.subr.mxu1 %v18711_v26 }
0x2736   :  { %14405 = vmatpush3.msra.mxu1 %v17451_v52 }
0x2737   :  { %14406 = vmatprep.subr.mxu1 %v18711_v26 }
0x2738   :  { %14407 = vmatpush3.msra.mxu1 %v17455_v24 }
0x2739   :  { %14408 = vmatprep.subr.mxu1 %v18711_v26 }
0x273a   :  { %14409 = vmatpush3.msra.mxu1 %v17459_v54 }
0x273b   :  { %14424 = vmatprep.subr.mxu1 %v18711_v26 }
0x27f3   :  { %v8621_v49 = vpop.f32.mrf.mxu1 }
0x27f4   :  { %14389 = vmatmul.mubr.msk.f32.vlgmr.msra.gmra.mxu0 %vm397_vm1, %v8621_v49  ;;  %14411 = vmatmul.mubr.msk.f32.vlgmr.msra.gmra.mxu1 %vm397_vm1, %v8621_v49 }
0x27f5   :  { %14392 = vmatpush3.msra.mxu0 %v17465_v63  ;;  %14425 = vmatpush3.msra.mxu1 %v17468_v30  ;;  %v14379_v7 = vpop.f32.mrf.mxu1 }
0x27f6   :  { %14393 = vmatprep.subr.mxu0 %v18711_v26  ;;  %14426 = vmatprep.subr.mxu1 %v18711_v26 }
0x27f7   :  { %14394 = vmatpush3.msra.mxu0 %v17473_v57  ;;  %14427 = vmatpush3.msra.mxu1 %v17476_v2 }
0x27f8   :  { %14395 = vmatprep.subr.mxu0 %v18711_v26  ;;  %14428 = vmatprep.subr.mxu1 %v18711_v26 }
0x27f9   :  { %14396 = vmatpush3.msra.mxu0 %v17481_v62  ;;  %14429 = vmatpush3.msra.mxu1 %v17484_v38 }
0x27fa   :  { %14397 = vmatprep.subr.mxu0 %v18711_v26  ;;  %14430 = vmatprep.subr.mxu1 %v18711_v26 }
0x27fb   :  { %14398 = vmatpush3.msra.mxu0 %v17489_v8  ;;  %14399 = vmatprep.mubr.msk.f32.mxu0 %vm15708_vm0, %v18711_v26 }
0x27fc   :  { %14431 = vmatpush3.msra.mxu1 %v17494_v44  ;;  %14432 = vmatprep.mubr.msk.f32.mxu1 %vm15708_vm0, %v18711_v26 }
0x27fd   :  { %14400 = vmatmul.mubr.msk.f32.vlgmr.msra.gmra.mxu0 %vm397_vm1, %v8621_v49  ;;  %14413 = vmatprep.subr.mxu0 %v18711_v26 }
0x27fe   :  { %14433 = vmatmul.mubr.msk.f32.vlgmr.msra.gmra.mxu1 %vm397_vm1, %v17751_v17  ;;  %14446 = vmatprep.subr.mxu1 %v18711_v26 }
0x27ff   :  { %14414 = vmatpush3.msra.mxu0 %v18723_v23  ;;  %14447 = vmatpush3.xpose.msk.msra.mxu1 %vm397_vm1, %v17086_v25 }
0x2800   :  { %14415 = vmatprep.subr.mxu0 %v18711_v26  ;;  %14421 = vmatprep.mubr.msk.f32.mxu0 %vm15708_vm0, %v18711_v26 }
0x2801   :  { %14416 = vmatpush3.msra.mxu0 %v18724_v5  ;;  %14448 = vmatprep.mubr.msk.f32.mxu1 %vm15708_vm0, %v18711_v26 }
0x2802   :  { %14417 = vmatprep.subr.mxu0 %v18711_v26  ;;  %14451 = vmatprep.subr.mxu1 %v18711_v26 }
0x2803   :  { %14418 = vmatpush3.msra.mxu0 %v18725_v42 }
0x2804   :  { %14419 = vmatprep.subr.mxu0 %v18711_v26 }
0x2805   :  { %14420 = vmatpush3.msra.mxu0 %v18726_v45 }
0x2806   :  { %14422 = vmatmul.mubr.msk.f32.vlgmr.msra.gmra.mxu0 %vm397_vm1, %v17751_v17  ;;  %14435 = vmatprep.subr.mxu0 %v18711_v26 }
0x2807   :  { %14436 = vmatpush3.msra.mxu0 %v17694_v4  ;;  %14443 = vmatprep.mubr.msk.f32.mxu0 %vm15708_vm0, %v18711_v26 }
0x2808   :  { %14437 = vmatprep.subr.mxu0 %v18711_v26 }
0x2809   :  { %14438 = vmatpush3.msra.mxu0 %v17700_v61 }
0x280a   :  { %14439 = vmatprep.subr.mxu0 %v18711_v26 }
0x280b   :  { %14440 = vmatpush3.msra.mxu0 %v17704_v22 }
0x280c   :  { %14441 = vmatprep.subr.mxu0 %v18711_v26 }
0x280d   :  { %14442 = vmatpush3.msra.mxu0 %v17708_v29 }
0x280e   :  { %14444 = vmatmul.mubr.msk.f32.vlgmr.msra.gmra.mxu0 %vm397_vm1, %v17751_v17  ;;  %14456 = vmatprep.subr.mxu0 %v18711_v26 }
0x280f   :  { %14457 = vmatpush3.msra.mxu0 %v17714_v59  ;;  %14464 = vmatprep.mubr.msk.f32.mxu0 %vm15708_vm0, %v18711_v26 }
0x2810   :  { %14458 = vmatprep.subr.mxu0 %v18711_v26 }
0x2811   :  { %14459 = vmatpush3.msra.mxu0 %v17720_v16 }
0x2812   :  { %14460 = vmatprep.subr.mxu0 %v18711_v26 }
0x2813   :  { %14461 = vmatpush3.msra.mxu0 %v17724_v53 }
0x2814   :  { %14462 = vmatprep.subr.mxu0 %v18711_v26 }
0x2815   :  { %14463 = vmatpush3.msra.mxu0 %v17728_v37 }
0x2816   :  { %14478 = vmatprep.subr.mxu0 %v18711_v26 }
0x28b4   :  { %v8694_v52 = vpop.f32.mrf.mxu0  ;;  %v8834_v24 = vpop.f32.mrf.mxu1 }
0x28b5   :  { %v8695_v8 = vadd.f32 %v17732_v33, %v8694_v52  ;;  %v8835_v39 = vadd.f32 %v17747_v21, %v8834_v24 }
0x28b6   :  { %v14390_v54 = vpop.f32.mrf.mxu0  ;;  %v14412_v63 = vpop.f32.mrf.mxu1 }
0x28bd   :  { %v8764_v30 = vpop.f32.mrf.mxu0 }
0x28be   :  { %v8974_v57 = vpop.f32.mrf.mxu1  ;;  %v8765_v42 = vadd.f32 %v17738_v51, %v8764_v30 }
0x28bf   :  { %v14401_v2 = vpop.f32.mrf.mxu0  ;;  %v8975_v45 = vadd.f32 %v17741_v18, %v8974_v57 }
0x28c0   :  { %v14434_v62 = vpop.f32.mrf.mxu1 }
0x28c1   :  { %v9055_v35 = vadd.f32 %v8975_v45, %v8765_v42  ;;  %v17965_v42 = vld [vmem:[%s18712_s27 + $0x38] sm:$0xff]  ;;  %v17974_v45 = vld [vmem:[%s18712_s27 + $0x30] sm:$0xff] }
0x28c3   :  { %v12466_v56 = vmul.f32 -1.442695, %v9055_v35  ;;  %v17995_v35 = vld [vmem:[%s18712_s27 + $0x18] sm:$0xff] }
0x28c6   :  { %v8904_v38 = vpop.f32.mrf.mxu0 }
0x28c7   :  { %v8905_v44 = vadd.f32 %v17735_v9, %v8904_v38 }
0x28c8   :  { %v14423_v23 = vpop.f32.mrf.mxu0 }
0x28c9   :  { %v9048_v5 = vadd.f32 %v8905_v44, %v8695_v8 }
0x28cb   :  { %v12465_v6 = vmul.f32 -1.442695, %v9048_v5 }
0x28cd   :  { %15119 = vpow2.f32 %v12465_v6  ;;  %v17981_v6 = vld [vmem:[%s18712_s27 + $0x28] sm:$0xff] }
0x28ce   :  { %v9044_v55 = vpop.f32.mrf.mxu0  ;;  %15121 = vpow2.f32 %v12466_v56  ;;  %v18009_v56 = vld [vmem:[%s18712_s27 + $0x8] sm:$0xff] }
0x28cf   :  { %v9045_v32 = vadd.f32 %v17744_v13, %v9044_v55  ;;  %v17988_v55 = vld [vmem:[%s18712_s27 + $0x20] sm:$0xff] }
0x28d0   :  { %v14445_v48 = vpop.f32.mrf.mxu0 }
0x28d1   :  { %v18002_v48 = vld [vmem:[%s18712_s27 + $0x10] sm:$0xff] }
0x28da   :  { %v15120_v3 = vpop.eup %15119 }
0x28db   :  { %v9052_v43 = vadd.f32 1.0, %v15120_v3  ;;  %v15122_v36 = vpop.eup %15121  ;;  %v18016_v3 = vld [vmem:[%s18712_s27] sm:$0xff] }
0x28dc   :  { %v9059_v28 = vadd.f32 1.0, %v15122_v36 }
0x28dd   :  { %15123 = vrcp.f32 %v9052_v43 }
0x28de   :  { %15125 = vrcp.f32 %v9059_v28 }
0x28ea   :  { %v15124_v58 = vpop.eup %15123 }
0x28eb   :  { %v9062_v15 = vmul.f32 %v15124_v58, %v9045_v32  ;;  %v15126_v31 = vpop.eup %15125 }
0x28ec   :  { %v9065_v49 = vsub.f32 1.0, %v15126_v31  ;;  %v9067_v54 = vmul.f32 %v15126_v31, %v17751_v17 }
0x28ed   :  { %v9063_v60 = vadd.f32 %v9062_v15, %v8835_v39 }
0x28ef   :  { %15127 = vtanh.f32 %v9063_v60 }
0x28fc   :  { %v15128_v7 = vpop.eup %15127 }
0x28fd   :  { %v9066_v52 = vmul.f32 %v15128_v7, %v9065_v49  ;;  %v18033_v49 = vld [vmem:[#allocation13 + $0x18] sm:$0xff]  ;;  %v18039_v7 = vld [vmem:[#allocation13 + $0x10] sm:$0xff] }
0x28ff   :  { %v17939_v63 = vadd.f32 %v9067_v54, %v9066_v52  ;;  %v18043_v52 = vld [vmem:[#allocation13 + $0x8] sm:$0xff]  ;;  %v18047_v54 = vld [vmem:[#allocation13] sm:$0xff] }
0x2901   :  { %14449 = vmatmul.mubr.msk.f32.vlgmr.msra.gmra.mxu1 %vm397_vm1, %v17939_v63 }
0x2902   :  { %14452 = vmatpush3.msra.mxu1 %v17086_v25  ;;  %14453 = vmatprep.mubr.msk.f32.mxu1 %vm15708_vm0, %v18711_v26 }
0x2903   :  { %14467 = vmatprep.subr.mxu1 %v18711_v26 }
0x29c1   :  { %v9138_v24 = vpop.f32.mrf.mxu1 }
0x29c2   :  { %v9142_v30 = vsel %vm5436_vm12, %v9138_v24, -inf }
0x29c3   :  { %9143 = vmax.xlane.f32.xlu0 %v9142_v30  ;;  %v14450_v57 = vpop.f32.mrf.mxu1 }
0x2a4c   :  { %v9144_v2 = vpop.xlane.xlu0 %9143 }
0x2a4d   :  { %v9145_v62 = vsub.f32 %v9138_v24, %v9144_v2 }
0x2a4f   :  { %v9146_v17 = vmul.f32 1.442695, %v9145_v62 }
0x2a51   :  { %15129 = vpow2.f32 %v9146_v17 }
0x2a5e   :  { %v15130_v38 = vpop.eup %15129 }
0x2a5f   :  { %v9148_v8 = vsel %vm5436_vm12, %v15130_v38, 0.0 }
0x2a60   :  { %9149 = vadd.xlane.f32.xlu1 %v9148_v8 }
0x2ae9   :  { %v9150_v44 = vpop.xlane.xlu1 %9149 }
0x2aea   :  { %15131 = vrcp.f32 %v9150_v44 }
0x2af7   :  { %v15132_v23 = vpop.eup %15131 }
0x2af8   :  { %v9152_v5 = vmul.f32 %v15132_v23, %v15130_v38 }
0x2afa   :  { %14454 = vmatmul.mubr.msk.f32.vlgmr.msra.gmra.mxu1 %vm5448_vm13, %v9152_v5 }
0x2afb   :  { %14468 = vmatpush3.msra.mxu1 %v17762_v40  ;;  %14475 = vmatprep.mubr.msk.f32.mxu1 %vm15708_vm0, %v18711_v26 }
0x2afc   :  { %14469 = vmatprep.subr.mxu1 %v18711_v26 }
0x2afd   :  { %14470 = vmatpush3.msra.mxu1 %v17768_v14 }
0x2afe   :  { %14471 = vmatprep.subr.mxu1 %v18711_v26 }
0x2aff   :  { %14472 = vmatpush3.msra.mxu1 %v17772_v10 }
0x2b00   :  { %14473 = vmatprep.subr.mxu1 %v18711_v26 }
0x2b01   :  { %14474 = vmatpush3.msra.mxu1 %v17776_v27 }
0x2b02   :  { %14476 = vmatmul.mubr.msk.f32.vlgmr.msra.gmra.mxu1 %vm397_vm1, %v17939_v63  ;;  %14489 = vmatprep.subr.mxu1 %v18711_v26 }
0x2b03   :  { %14490 = vmatpush3.msra.mxu1 %v17965_v42  ;;  %14505 = vmatprep.mubr.msk.f32.mxu1 %vm15708_vm0, %v18711_v26 }
0x2b04   :  { %14491 = vmatprep.subr.mxu1 %v18711_v26 }
0x2b05   :  { %14492 = vmatpush3.msra.mxu1 %v17974_v45 }
0x2b06   :  { %14493 = vmatprep.subr.mxu1 %v18711_v26 }
0x2b07   :  { %14494 = vmatpush3.msra.mxu1 %v17981_v6 }
0x2b08   :  { %14495 = vmatprep.subr.mxu1 %v18711_v26 }
0x2b09   :  { %14496 = vmatpush3.msra.mxu1 %v17988_v55 }
0x2b0a   :  { %14497 = vmatprep.subr.mxu1 %v18711_v26 }
0x2b0b   :  { %14498 = vmatpush3.msra.mxu1 %v17995_v35 }
0x2b0c   :  { %14499 = vmatprep.subr.mxu1 %v18711_v26 }
0x2b0d   :  { %14500 = vmatpush3.msra.mxu1 %v18002_v48 }
0x2b0e   :  { %14501 = vmatprep.subr.mxu1 %v18711_v26 }
0x2b0f   :  { %14502 = vmatpush3.msra.mxu1 %v18009_v56 }
0x2b10   :  { %14503 = vmatprep.subr.mxu1 %v18711_v26 }
0x2b11   :  { %14504 = vmatpush3.msra.mxu1 %v18016_v3 }
0x2b12   :  { %14530 = vmatprep.subr.mxu1 %v18711_v26 }
0x2bba   :  { %v9222_v43 = vpop.f32.mrf.mxu1 }
0x2bbb   :  { %14465 = vmatmul.mubr.msk.f32.vlgmr.msra.gmra.mxu0 %vm397_vm1, %v9222_v43 }
0x2bbc   :  { %v14455_v36 = vpop.f32.mrf.mxu1  ;;  %14479 = vmatpush3.msra.mxu0 %v17801_v19  ;;  %14486 = vmatprep.mubr.msk.f32.mxu0 %vm15708_vm0, %v18711_v26 }
0x2bbd   :  { %14480 = vmatprep.subr.mxu0 %v18711_v26 }
0x2bbe   :  { %14481 = vmatpush3.msra.mxu0 %v17807_v50 }
0x2bbf   :  { %14482 = vmatprep.subr.mxu0 %v18711_v26 }
0x2bc0   :  { %14483 = vmatpush3.msra.mxu0 %v17811_v47 }
0x2bc1   :  { %14484 = vmatprep.subr.mxu0 %v18711_v26 }
0x2bc2   :  { %v9365_v28 = vpop.f32.mrf.mxu1  ;;  %14485 = vmatpush3.msra.mxu0 %v17815_v0 }
0x2bc3   :  { %14508 = vmatprep.subr.mxu0 %v18711_v26 }
0x2bc4   :  { %v14477_v32 = vpop.f32.mrf.mxu1 }
0x2c7b   :  { %v9295_v58 = vpop.f32.mrf.mxu0 }
0x2c7c   :  { %v9366_v39 = vadd.f32 %v9365_v28, %v9295_v58 }
0x2c7d   :  { %v14466_v15 = vpop.f32.mrf.mxu0 }
0x2c7e   :  { %v9369_v60 = vadd.f32 %v17819_v46, %v9366_v39 }
0x2c80   :  { %15133 = vtanh.f32 %v9369_v60 }
0x2c8d   :  { %v15134_v31 = vpop.eup %15133 }
0x2c8e   :  { %14487 = vmatmul.mubr.msk.f32.vlgmr.msra.gmra.mxu0 %vm397_vm1, %v15134_v31 }
0x2c8f   :  { %14509 = vmatpush3.msra.mxu0 %v18033_v49  ;;  %14516 = vmatprep.mubr.msk.f32.mxu0 %vm15708_vm0, %v18711_v26 }
0x2c90   :  { %14510 = vmatprep.subr.mxu0 %v18711_v26 }
0x2c91   :  { %14511 = vmatpush3.msra.mxu0 %v18039_v7 }
0x2c92   :  { %14512 = vmatprep.subr.mxu0 %v18711_v26 }
0x2c93   :  { %14513 = vmatpush3.msra.mxu0 %v18043_v52 }
0x2c94   :  { %14514 = vmatprep.subr.mxu0 %v18711_v26 }
0x2c95   :  { %14515 = vmatpush3.msra.mxu0 %v18047_v54 }
0x2c96   :  { %14519 = vmatprep.subr.mxu0 %v18711_v26 }
0x2d4e   :  { %v9440_v24 = vpop.f32.mrf.mxu0 }
0x2d4f   :  { %v18052_v30 = vadd.f32 %v17836_v1, %v9440_v24  ;;  %v18071_v24 = vld [vmem:[#allocation13 + $0x58] sm:$0xff] }
0x2d50   :  { %v14488_v57 = vpop.f32.mrf.mxu0 }
0x2d51   :  { %18729 = vst [vmem:[#allocation44_spill] sm:$0xff] %v18052_v30  ;;  %v9444_v2 = vsel %vm5740_vm14, %v18052_v30, -inf  ;;  %v18077_v57 = vld [vmem:[#allocation13 + $0x50] sm:$0xff] }
0x2d52   :  { %9445 = vmax.xlane.f32.xlu0 %v9444_v2  ;;  %v18085_v2 = vld [vmem:[#allocation13 + $0x40] sm:$0xff] }
0x2ddb   :  { %v18056_v62 = vpop.xlane.xlu0 %9445 }
0x2ddc   :  { %18730 = vst [vmem:[#allocation45_spill] sm:$0xff] %v18056_v62  ;;  %vm9447_vm10 = vcmp.eq.f32.partialorder %v18052_v30, %v18056_v62 }
0x2ddd   :  { %v9448_v17 = vsel %vm9447_vm10, %v16895_v11, 64  ;;  %vm10398_vm10 = vcmp.eq.s32.totalorder %v16895_v11, 5 }
0x2dde   :  { %v9449_v38 = vsel %vm5740_vm14, %v9448_v17, 2147483647 }
0x2ddf   :  { %v9451_v8 = vshra.s32 %v9449_v38, 16  ;;  %v9450_v23 = vand.u32 65535, %v9449_v38  ;;  %v18091_v38 = vld [vmem:[#allocation13 + $0x38] sm:$0xff] }
0x2de1   :  { %v9453_v44 = vcvt.s32.f32 %v9451_v8  ;;  %v9452_v43 = vcvt.s32.f32 %v9450_v23  ;;  %v18094_v8 = vld [vmem:[#allocation14 + $0x38] sm:$0xff]  ;;  %v18099_v23 = vld [vmem:[#allocation13 + $0x30] sm:$0xff] }
0x2de3   :  { %9454 = vmin.xlane.f32.xlu1 %v9453_v44 }
0x2e6c   :  { %v9455_v5 = vpop.xlane.xlu1 %9454 }
0x2e6d   :  { %vm9456_vm11 = vcmp.eq.f32.partialorder %v9453_v44, %v9455_v5  ;;  %v9461_v28 = vcvt.f32.s32 %v9455_v5  ;;  %v18102_v5 = vld [vmem:[#allocation14 + $0x30] sm:$0xff] }
0x2e6e   :  { %v9457_v36 = vsel %vm9456_vm11, %v9452_v43, inf  ;;  %v18107_v43 = vld [vmem:[#allocation13 + $0x28] sm:$0xff] }
0x2e6f   :  { %9458 = vmin.xlane.f32.xlu0 %v9457_v36  ;;  %v9462_v58 = vshll.u32 %v9461_v28, 16  ;;  %v18110_v36 = vld [vmem:[#allocation14 + $0x28] sm:$0xff]  ;;  %v18115_v28 = vld [vmem:[#allocation13 + $0x20] sm:$0xff] }
0x2ef8   :  { %v9459_v32 = vpop.xlane.xlu0 %9458 }
0x2ef9   :  { %v9460_v39 = vcvt.f32.s32 %v9459_v32  ;;  %v18120_v32 = vld [vmem:[#allocation14 + $0x20] sm:$0xff] }
0x2efb   :  { %v9463_v15 = vadd.s32 %v9462_v58, %v9460_v39  ;;  %v18130_v58 = vld [vmem:[#allocation14 + $0x18] sm:$0xff]  ;;  %v18138_v39 = vld [vmem:[#allocation14 + $0x10] sm:$0xff] }
0x2efc   :  { %18731 = vst [vmem:[#allocation48_spill] sm:$0xff] %v18130_v58  ;;  %18732 = vst [vmem:[#allocation49_spill] sm:$0xff] %v18138_v39 }
0x2efd   :  { %v18066_v60 = vsel %vm9472_vm4, %v9463_v15, %v17853_v34  ;;  %vm9475_vm5 = vcmp.eq.s32.totalorder %v16895_v11, %v9463_v15  ;;  %v18081_v34 = vld [vmem:[#allocation13 + $0x48] sm:$0xff] }
0x2efe   :  { %v12473_v31 = vsel %vm9475_vm5, 1.0, %v18711_v26  ;;  %v18145_v15 = vld [vmem:[#allocation14 + $0x8] sm:$0xff] }
0x2eff   :  { %14506 = vmatmul.mubr.msk.f32.vlgmr.msra.gmra.mxu1 %vm4837_vm3, %v12473_v31  ;;  %18733 = vst [vmem:[#allocation50_spill] sm:$0xff] %v18145_v15  ;;  %v18149_v31 = vld [vmem:[#allocation14] sm:$0xff] }
0x2f00   :  { %14531 = vmatpush3.msra.mxu1 %v18071_v24  ;;  %14538 = vmatprep.mubr.msk.f32.mxu1 %vm15708_vm0, %v18711_v26  ;;  %18734 = vst [vmem:[#allocation51_spill] sm:$0xff] %v18149_v31 }
0x2f01   :  { %14532 = vmatprep.subr.mxu1 %v18711_v26 }
0x2f02   :  { %14533 = vmatpush3.msra.mxu1 %v18077_v57 }
0x2f03   :  { %14534 = vmatprep.subr.mxu1 %v18711_v26 }
0x2f04   :  { %14535 = vmatpush3.msra.mxu1 %v18081_v34 }
0x2f05   :  { %14536 = vmatprep.subr.mxu1 %v18711_v26 }
0x2f06   :  { %14537 = vmatpush3.msra.mxu1 %v18085_v2 }
0x2f07   :  { %14552 = vmatprep.subr.mxu1 %v18711_v26 }
0x2fbf   :  { %v9547_v17 = vpop.f32.mrf.mxu1 }
0x2fc0   :  { %14517 = vmatmul.mubr.msk.f32.vlgmr.msra.gmra.mxu0 %vm397_vm1, %v9547_v17  ;;  %14539 = vmatmul.mubr.msk.f32.vlgmr.msra.gmra.mxu1 %vm397_vm1, %v9547_v17 }
0x2fc1   :  { %14520 = vmatpush3.msra.mxu0 %v18091_v38  ;;  %14553 = vmatpush3.msra.mxu1 %v18094_v8  ;;  %v14507_v44 = vpop.f32.mrf.mxu1 }
0x2fc2   :  { %14521 = vmatprep.subr.mxu0 %v18711_v26  ;;  %14554 = vmatprep.subr.mxu1 %v18711_v26 }
0x2fc3   :  { %14522 = vmatpush3.msra.mxu0 %v18099_v23  ;;  %14555 = vmatpush3.msra.mxu1 %v18102_v5 }
0x2fc4   :  { %14523 = vmatprep.subr.mxu0 %v18711_v26  ;;  %14556 = vmatprep.subr.mxu1 %v18711_v26 }
0x2fc5   :  { %14524 = vmatpush3.msra.mxu0 %v18107_v43  ;;  %14557 = vmatpush3.msra.mxu1 %v18110_v36 }
0x2fc6   :  { %14525 = vmatprep.subr.mxu0 %v18711_v26  ;;  %14558 = vmatprep.subr.mxu1 %v18711_v26 }
0x2fc7   :  { %14526 = vmatpush3.msra.mxu0 %v18115_v28  ;;  %14527 = vmatprep.mubr.msk.f32.mxu0 %vm15708_vm0, %v18711_v26 }
0x2fc8   :  { %14559 = vmatpush3.msra.mxu1 %v18120_v32  ;;  %14560 = vmatprep.mubr.msk.f32.mxu1 %vm15708_vm0, %v18711_v26 }
0x2fc9   :  { %14528 = vmatmul.mubr.msk.f32.vlgmr.msra.gmra.mxu0 %vm397_vm1, %v9547_v17  ;;  %14541 = vmatprep.subr.mxu0 %v18711_v26 }
0x2fca   :  { %14561 = vmatmul.mubr.msk.f32.vlgmr.msra.gmra.mxu1 %vm397_vm1, %v17939_v63  ;;  %14574 = vmatprep.subr.mxu1 %v18711_v26 }
0x2fcb   :  { %14542 = vmatpush3.msra.mxu0 %v18130_v58  ;;  %14575 = vmatpush3.xpose.msk.msra.mxu1 %vm397_vm1, %v17086_v25 }
0x2fcc   :  { %14543 = vmatprep.subr.mxu0 %v18711_v26  ;;  %14549 = vmatprep.mubr.msk.f32.mxu0 %vm15708_vm0, %v18711_v26 }
0x2fcd   :  { %14544 = vmatpush3.msra.mxu0 %v18138_v39  ;;  %14576 = vmatprep.mubr.msk.f32.mxu1 %vm15708_vm0, %v18711_v26 }
0x2fce   :  { %14545 = vmatprep.subr.mxu0 %v18711_v26  ;;  %14579 = vmatprep.subr.mxu1 %v18711_v26 }
0x2fcf   :  { %14546 = vmatpush3.msra.mxu0 %v18145_v15 }
0x2fd0   :  { %14547 = vmatprep.subr.mxu0 %v18711_v26 }
0x2fd1   :  { %14548 = vmatpush3.msra.mxu0 %v18149_v31 }
0x2fd2   :  { %14550 = vmatmul.mubr.msk.f32.vlgmr.msra.gmra.mxu0 %vm397_vm1, %v17939_v63  ;;  %14563 = vmatprep.subr.mxu0 %v18711_v26 }
0x2fd3   :  { %14564 = vmatpush3.msra.mxu0 %v17694_v4  ;;  %14571 = vmatprep.mubr.msk.f32.mxu0 %vm15708_vm0, %v18711_v26 }
0x2fd4   :  { %14565 = vmatprep.subr.mxu0 %v18711_v26 }
0x2fd5   :  { %14566 = vmatpush3.msra.mxu0 %v17700_v61 }
0x2fd6   :  { %14567 = vmatprep.subr.mxu0 %v18711_v26 }
0x2fd7   :  { %14568 = vmatpush3.msra.mxu0 %v17704_v22 }
0x2fd8   :  { %14569 = vmatprep.subr.mxu0 %v18711_v26 }
0x2fd9   :  { %14570 = vmatpush3.msra.mxu0 %v17708_v29 }
0x2fda   :  { %14572 = vmatmul.mubr.msk.f32.vlgmr.msra.gmra.mxu0 %vm397_vm1, %v17939_v63  ;;  %14584 = vmatprep.subr.mxu0 %v18711_v26 }
0x2fdb   :  { %14585 = vmatpush3.msra.mxu0 %v17714_v59  ;;  %14592 = vmatprep.mubr.msk.f32.mxu0 %vm15708_vm0, %v18711_v26 }
0x2fdc   :  { %14586 = vmatprep.subr.mxu0 %v18711_v26 }
0x2fdd   :  { %14587 = vmatpush3.msra.mxu0 %v17720_v16 }
0x2fde   :  { %14588 = vmatprep.subr.mxu0 %v18711_v26 }
0x2fdf   :  { %14589 = vmatpush3.msra.mxu0 %v17724_v53 }
0x2fe0   :  { %14590 = vmatprep.subr.mxu0 %v18711_v26 }
0x2fe1   :  { %14591 = vmatpush3.msra.mxu0 %v17728_v37 }
0x2fe2   :  { %14606 = vmatprep.subr.mxu0 %v18711_v26 }
0x3080   :  { %v9620_v4 = vpop.f32.mrf.mxu0  ;;  %v9760_v61 = vpop.f32.mrf.mxu1 }
0x3081   :  { %v9621_v16 = vadd.f32 %v17732_v33, %v9620_v4 }
0x3082   :  { %v14518_v22 = vpop.f32.mrf.mxu0  ;;  %v14540_v29 = vpop.f32.mrf.mxu1 }
0x3089   :  { %v9690_v59 = vpop.f32.mrf.mxu0 }
0x308a   :  { %v9900_v17 = vpop.f32.mrf.mxu1  ;;  %v9691_v12 = vadd.f32 %v17738_v51, %v9690_v59 }
0x308b   :  { %v14529_v44 = vpop.f32.mrf.mxu0  ;;  %v9901_v37 = vadd.f32 %v17741_v18, %v9900_v17 }
0x308c   :  { %v14562_v41 = vpop.f32.mrf.mxu1 }
0x308d   :  { %v9981_v22 = vadd.f32 %v9901_v37, %v9691_v12 }
0x308f   :  { %v12482_v39 = vmul.f32 -1.442695, %v9981_v22 }
0x3092   :  { %v9830_v20 = vpop.f32.mrf.mxu0 }
0x3093   :  { %v9831_v30 = vadd.f32 %v17735_v9, %v9830_v20 }
0x3094   :  { %v14551_v53 = vpop.f32.mrf.mxu0 }
0x3095   :  { %v9974_v62 = vadd.f32 %v9831_v30, %v9621_v16  ;;  %v9761_v30 = vadd.f32 %v17747_v21, %v9760_v61 }
0x3097   :  { %v12481_v31 = vmul.f32 -1.442695, %v9974_v62 }
0x3099   :  { %15135 = vpow2.f32 %v12481_v31 }
0x309a   :  { %v9970_v15 = vpop.f32.mrf.mxu0  ;;  %15137 = vpow2.f32 %v12482_v39 }
0x309b   :  { %v9971_v9 = vadd.f32 %v17744_v13, %v9970_v15 }
0x309c   :  { %v14573_v29 = vpop.f32.mrf.mxu0 }
0x30a6   :  { %v15136_v44 = vpop.eup %15135 }
0x30a7   :  { %v9978_v41 = vadd.f32 1.0, %v15136_v44  ;;  %v15138_v58 = vpop.eup %15137 }
0x30a8   :  { %v9985_v33 = vadd.f32 1.0, %v15138_v58 }
0x30a9   :  { %15139 = vrcp.f32 %v9978_v41 }
0x30aa   :  { %15141 = vrcp.f32 %v9985_v33 }
0x30b6   :  { %v15140_v20 = vpop.eup %15139 }
0x30b7   :  { %v9988_v51 = vmul.f32 %v15140_v20, %v9971_v9  ;;  %v15142_v62 = vpop.eup %15141 }
0x30b8   :  { %v9991_v31 = vsub.f32 1.0, %v15142_v62  ;;  %v9993_v39 = vmul.f32 %v15142_v62, %v17939_v63 }
0x30b9   :  { %v9989_v18 = vadd.f32 %v9988_v51, %v9761_v30 }
0x30bb   :  { %15143 = vtanh.f32 %v9989_v18 }
0x30c8   :  { %v15144_v12 = vpop.eup %15143 }
0x30c9   :  { %v9992_v4 = vmul.f32 %v15144_v12, %v9991_v31 }
0x30cb   :  { %v18184_v59 = vadd.f32 %v9993_v39, %v9992_v4 }
0x30cd   :  { %14577 = vmatmul.mubr.msk.f32.vlgmr.msra.gmra.mxu1 %vm397_vm1, %v18184_v59 }
0x30ce   :  { %14580 = vmatpush3.msra.mxu1 %v17086_v25  ;;  %14581 = vmatprep.mubr.msk.f32.mxu1 %vm15708_vm0, %v18711_v26 }
0x30cf   :  { %14595 = vmatprep.subr.mxu1 %v18711_v26 }
0x318d   :  { %v10064_v21 = vpop.f32.mrf.mxu1 }
0x318e   :  { %v10068_v13 = vsel %vm5436_vm12, %v10064_v21, -inf }
0x318f   :  { %10069 = vmax.xlane.f32.xlu1 %v10068_v13  ;;  %v14578_v58 = vpop.f32.mrf.mxu1 }
0x3218   :  { %v10070_v15 = vpop.xlane.xlu1 %10069 }
0x3219   :  { %v10071_v61 = vsub.f32 %v10064_v21, %v10070_v15 }
0x321b   :  { %v10072_v63 = vmul.f32 1.442695, %v10071_v61 }
0x321d   :  { %15145 = vpow2.f32 %v10072_v63 }
0x322a   :  { %v15146_v17 = vpop.eup %15145 }
0x322b   :  { %v10074_v16 = vsel %vm5436_vm12, %v15146_v17, 0.0 }
0x322c   :  { %10075 = vadd.xlane.f32.xlu0 %v10074_v16  ;;  %v18737_v16 = vld [vmem:[#allocation49_spill] sm:$0xff] }
0x32b5   :  { %v10076_v53 = vpop.xlane.xlu0 %10075 }
0x32b6   :  { %15147 = vrcp.f32 %v10076_v53  ;;  %v18738_v53 = vld [vmem:[#allocation50_spill] sm:$0xff] }
0x32c3   :  { %v15148_v37 = vpop.eup %15147 }
0x32c4   :  { %v10078_v22 = vmul.f32 %v15148_v37, %v15146_v17  ;;  %v18736_v17 = vld [vmem:[#allocation48_spill] sm:$0xff]  ;;  %v18739_v37 = vld [vmem:[#allocation51_spill] sm:$0xff] }
0x32c6   :  { %14582 = vmatmul.mubr.msk.f32.vlgmr.msra.gmra.mxu1 %vm5448_vm13, %v10078_v22  ;;  %v18320_v22 = vld [vmem:[#allocation14 + $0x58] sm:$0xff] }
0x32c7   :  { %14596 = vmatpush3.msra.mxu1 %v17762_v40  ;;  %14603 = vmatprep.mubr.msk.f32.mxu1 %vm15708_vm0, %v18711_v26 }
0x32c8   :  { %14597 = vmatprep.subr.mxu1 %v18711_v26 }
0x32c9   :  { %14598 = vmatpush3.msra.mxu1 %v17768_v14 }
0x32ca   :  { %14599 = vmatprep.subr.mxu1 %v18711_v26 }
0x32cb   :  { %14600 = vmatpush3.msra.mxu1 %v17772_v10 }
0x32cc   :  { %14601 = vmatprep.subr.mxu1 %v18711_v26 }
0x32cd   :  { %14602 = vmatpush3.msra.mxu1 %v17776_v27 }
0x32ce   :  { %14604 = vmatmul.mubr.msk.f32.vlgmr.msra.gmra.mxu1 %vm397_vm1, %v18184_v59  ;;  %14617 = vmatprep.subr.mxu1 %v18711_v26 }
0x32cf   :  { %14618 = vmatpush3.msra.mxu1 %v17965_v42  ;;  %14633 = vmatprep.mubr.msk.f32.mxu1 %vm15708_vm0, %v18711_v26 }
0x32d0   :  { %14619 = vmatprep.subr.mxu1 %v18711_v26 }
0x32d1   :  { %14620 = vmatpush3.msra.mxu1 %v17974_v45 }
0x32d2   :  { %14621 = vmatprep.subr.mxu1 %v18711_v26 }
0x32d3   :  { %14622 = vmatpush3.msra.mxu1 %v17981_v6 }
0x32d4   :  { %14623 = vmatprep.subr.mxu1 %v18711_v26 }
0x32d5   :  { %14624 = vmatpush3.msra.mxu1 %v17988_v55 }
0x32d6   :  { %14625 = vmatprep.subr.mxu1 %v18711_v26 }
0x32d7   :  { %14626 = vmatpush3.msra.mxu1 %v17995_v35 }
0x32d8   :  { %14627 = vmatprep.subr.mxu1 %v18711_v26 }
0x32d9   :  { %14628 = vmatpush3.msra.mxu1 %v18002_v48 }
0x32da   :  { %14629 = vmatprep.subr.mxu1 %v18711_v26 }
0x32db   :  { %14630 = vmatpush3.msra.mxu1 %v18009_v56 }
0x32dc   :  { %14631 = vmatprep.subr.mxu1 %v18711_v26 }
0x32dd   :  { %14632 = vmatpush3.msra.mxu1 %v18016_v3 }
0x32de   :  { %14658 = vmatprep.subr.mxu1 %v18711_v26 }
0x3386   :  { %v10148_v40 = vpop.f32.mrf.mxu1 }
0x3387   :  { %14593 = vmatmul.mubr.msk.f32.vlgmr.msra.gmra.mxu0 %vm397_vm1, %v10148_v40  ;;  %v18326_v40 = vld [vmem:[#allocation14 + $0x50] sm:$0xff] }
0x3388   :  { %v14583_v14 = vpop.f32.mrf.mxu1  ;;  %14607 = vmatpush3.msra.mxu0 %v17801_v19  ;;  %14614 = vmatprep.mubr.msk.f32.mxu0 %vm15708_vm0, %v18711_v26 }
0x3389   :  { %14608 = vmatprep.subr.mxu0 %v18711_v26  ;;  %v18330_v14 = vld [vmem:[#allocation14 + $0x48] sm:$0xff] }
0x338a   :  { %14609 = vmatpush3.msra.mxu0 %v17807_v50 }
0x338b   :  { %14610 = vmatprep.subr.mxu0 %v18711_v26 }
0x338c   :  { %14611 = vmatpush3.msra.mxu0 %v17811_v47 }
0x338d   :  { %14612 = vmatprep.subr.mxu0 %v18711_v26 }
0x338e   :  { %v10291_v10 = vpop.f32.mrf.mxu1  ;;  %14613 = vmatpush3.msra.mxu0 %v17815_v0 }
0x338f   :  { %14636 = vmatprep.subr.mxu0 %v18711_v26 }
0x3390   :  { %v14605_v27 = vpop.f32.mrf.mxu1 }
0x3391   :  { %v18340_v27 = vld [vmem:[#allocation20 + $0x18] sm:$0xff] }
0x3447   :  { %v10221_v19 = vpop.f32.mrf.mxu0 }
0x3448   :  { %v10292_v29 = vadd.f32 %v10291_v10, %v10221_v19  ;;  %v18334_v10 = vld [vmem:[#allocation14 + $0x40] sm:$0xff]  ;;  %v18346_v19 = vld [vmem:[#allocation20 + $0x10] sm:$0xff] }
0x3449   :  { %v14594_v44 = vpop.f32.mrf.mxu0 }
0x344a   :  { %v10295_v41 = vadd.f32 %v17819_v46, %v10292_v29  ;;  %v18350_v29 = vld [vmem:[#allocation20 + $0x8] sm:$0xff]  ;;  %v18354_v44 = vld [vmem:[#allocation20] sm:$0xff] }
0x344c   :  { %15149 = vtanh.f32 %v10295_v41 }
0x3459   :  { %v15150_v33 = vpop.eup %15149 }
0x345a   :  { %14615 = vmatmul.mubr.msk.f32.vlgmr.msra.gmra.mxu0 %vm397_vm1, %v15150_v33 }
0x345b   :  { %14637 = vmatpush3.msra.mxu0 %v18033_v49  ;;  %14644 = vmatprep.mubr.msk.f32.mxu0 %vm15708_vm0, %v18711_v26 }
0x345c   :  { %14638 = vmatprep.subr.mxu0 %v18711_v26 }
0x345d   :  { %14639 = vmatpush3.msra.mxu0 %v18039_v7 }
0x345e   :  { %14640 = vmatprep.subr.mxu0 %v18711_v26 }
0x345f   :  { %14641 = vmatpush3.msra.mxu0 %v18043_v52 }
0x3460   :  { %14642 = vmatprep.subr.mxu0 %v18711_v26 }
0x3461   :  { %14643 = vmatpush3.msra.mxu0 %v18047_v54 }
0x3462   :  { %14647 = vmatprep.subr.mxu0 %v18711_v26 }
0x351a   :  { %v10366_v50 = vpop.f32.mrf.mxu0 }
0x351b   :  { %v18249_v47 = vadd.f32 %v17836_v1, %v10366_v50 }
0x351c   :  { %v14616_v0 = vpop.f32.mrf.mxu0 }
0x351d   :  { %18735 = vst [vmem:[#allocation52_spill] sm:$0xff] %v18249_v47  ;;  %v10370_v46 = vsel %vm5740_vm14, %v18249_v47, -inf }
0x351e   :  { %10371 = vmax.xlane.f32.xlu1 %v10370_v46 }
0x35a7   :  { %v18253_v9 = vpop.xlane.xlu1 %10371 }
0x35a8   :  { %vm10373_vm6 = vcmp.eq.f32.partialorder %v18249_v47, %v18253_v9  ;;  %v18373_v47 = vld [vmem:[#allocation16 + $0x2] sm:$0x1] }
0x35a9   :  { %v10374_v20 = vsel %vm10373_vm6, %v16895_v11, 64 }
0x35aa   :  { %v10375_v30 = vsel %vm5740_vm14, %v10374_v20, 2147483647 }
0x35ab   :  { %v10377_v51 = vshra.s32 %v10375_v30, 16  ;;  %v10376_v62 = vand.u32 65535, %v10375_v30 }
0x35ad   :  { %v10379_v18 = vcvt.s32.f32 %v10377_v51  ;;  %v10378_v31 = vcvt.s32.f32 %v10376_v62  ;;  %v18358_v62 = vld [vmem:[#allocation16] sm:$0x1] }
0x35af   :  { %10380 = vmin.xlane.f32.xlu0 %v10379_v18 }
0x3638   :  { %v10381_v1 = vpop.xlane.xlu0 %10380 }
0x3639   :  { %vm10382_vm9 = vcmp.eq.f32.partialorder %v10379_v18, %v10381_v1  ;;  %v10387_v4 = vcvt.f32.s32 %v10381_v1 }
0x363a   :  { %v10383_v12 = vsel %vm10382_vm9, %v10378_v31, inf  ;;  %v18361_v31 = vld [vmem:[#allocation17] sm:$0x1]  ;;  %vm11324_vm9 = vcmp.eq.s32.totalorder %v16895_v11, 6 }
0x363b   :  { %10384 = vmin.xlane.f32.xlu1 %v10383_v12  ;;  %v10388_v21 = vshll.u32 %v10387_v4, 16 }
0x36c4   :  { %v10385_v39 = vpop.xlane.xlu1 %10384 }
0x36c5   :  { %v10386_v13 = vcvt.f32.s32 %v10385_v39 }
0x36c7   :  { %v10389_v58 = vadd.s32 %v10388_v21, %v10386_v13  ;;  %v18364_v21 = vld [vmem:[#allocation16 + $0x1] sm:$0x1] }
0x36c9   :  { %v18263_v15 = vsel %vm10398_vm10, %v10389_v58, %v18066_v60  ;;  %vm10401_vm11 = vcmp.eq.s32.totalorder %v16895_v11, %v10389_v58  ;;  %v18367_v58 = vld [vmem:[#allocation17 + $0x1] sm:$0x1] }
0x36ca   :  { %v12489_v61 = vsel %vm10401_vm11, 1.0, %v18711_v26 }
0x36cb   :  { %14634 = vmatmul.mubr.msk.f32.vlgmr.msra.gmra.mxu1 %vm4837_vm3, %v12489_v61 }
0x36cc   :  { %14659 = vmatpush3.msra.mxu1 %v18071_v24  ;;  %14666 = vmatprep.mubr.msk.f32.mxu1 %vm15708_vm0, %v18711_v26 }
0x36cd   :  { %14660 = vmatprep.subr.mxu1 %v18711_v26 }
0x36ce   :  { %14661 = vmatpush3.msra.mxu1 %v18077_v57 }
0x36cf   :  { %14662 = vmatprep.subr.mxu1 %v18711_v26 }
0x36d0   :  { %14663 = vmatpush3.msra.mxu1 %v18081_v34 }
0x36d1   :  { %14664 = vmatprep.subr.mxu1 %v18711_v26 }
0x36d2   :  { %14665 = vmatpush3.msra.mxu1 %v18085_v2 }
0x36d3   :  { %14680 = vmatprep.subr.mxu1 %v18711_v26 }
0x378b   :  { %v10473_v60 = vpop.f32.mrf.mxu1 }
0x378c   :  { %14645 = vmatmul.mubr.msk.f32.vlgmr.msra.gmra.mxu0 %vm397_vm1, %v10473_v60  ;;  %14667 = vmatmul.mubr.msk.f32.vlgmr.msra.gmra.mxu1 %vm397_vm1, %v10473_v60 }
0x378d   :  { %14648 = vmatpush3.msra.mxu0 %v18091_v38  ;;  %14681 = vmatpush3.msra.mxu1 %v18094_v8  ;;  %v14635_v63 = vpop.f32.mrf.mxu1 }
0x378e   :  { %14649 = vmatprep.subr.mxu0 %v18711_v26  ;;  %14682 = vmatprep.subr.mxu1 %v18711_v26 }
0x378f   :  { %14650 = vmatpush3.msra.mxu0 %v18099_v23  ;;  %14683 = vmatpush3.msra.mxu1 %v18102_v5 }
0x3790   :  { %14651 = vmatprep.subr.mxu0 %v18711_v26  ;;  %14684 = vmatprep.subr.mxu1 %v18711_v26 }
0x3791   :  { %14652 = vmatpush3.msra.mxu0 %v18107_v43  ;;  %14685 = vmatpush3.msra.mxu1 %v18110_v36 }
0x3792   :  { %14653 = vmatprep.subr.mxu0 %v18711_v26  ;;  %14686 = vmatprep.subr.mxu1 %v18711_v26 }
0x3793   :  { %14654 = vmatpush3.msra.mxu0 %v18115_v28  ;;  %14655 = vmatprep.mubr.msk.f32.mxu0 %vm15708_vm0, %v18711_v26 }
0x3794   :  { %14687 = vmatpush3.msra.mxu1 %v18120_v32  ;;  %14688 = vmatprep.mubr.msk.f32.mxu1 %vm15708_vm0, %v18711_v26 }
0x3795   :  { %14656 = vmatmul.mubr.msk.f32.vlgmr.msra.gmra.mxu0 %vm397_vm1, %v10473_v60  ;;  %14669 = vmatprep.subr.mxu0 %v18711_v26 }
0x3796   :  { %14689 = vmatmul.mubr.msk.f32.vlgmr.msra.gmra.mxu1 %vm397_vm1, %v18184_v59  ;;  %14702 = vmatprep.subr.mxu1 %v18711_v26 }
0x3797   :  { %14670 = vmatpush3.msra.mxu0 %v18736_v17  ;;  %14703 = vmatpush3.xpose.msk.msra.mxu1 %vm397_vm1, %v17086_v25 }
0x3798   :  { %14671 = vmatprep.subr.mxu0 %v18711_v26  ;;  %14677 = vmatprep.mubr.msk.f32.mxu0 %vm15708_vm0, %v18711_v26 }
0x3799   :  { %14672 = vmatpush3.msra.mxu0 %v18737_v16  ;;  %14704 = vmatprep.mubr.msk.f32.mxu1 %vm15708_vm0, %v18711_v26 }
0x379a   :  { %14673 = vmatprep.subr.mxu0 %v18711_v26  ;;  %14707 = vmatprep.subr.mxu1 %v18711_v26 }
0x379b   :  { %14674 = vmatpush3.msra.mxu0 %v18738_v53 }
0x379c   :  { %14675 = vmatprep.subr.mxu0 %v18711_v26 }
0x379d   :  { %14676 = vmatpush3.msra.mxu0 %v18739_v37 }
0x379e   :  { %14678 = vmatmul.mubr.msk.f32.vlgmr.msra.gmra.mxu0 %vm397_vm1, %v18184_v59  ;;  %14691 = vmatprep.subr.mxu0 %v18711_v26 }
0x379f   :  { %14692 = vmatpush3.msra.mxu0 %v18320_v22  ;;  %14699 = vmatprep.mubr.msk.f32.mxu0 %vm15708_vm0, %v18711_v26 }
0x37a0   :  { %14693 = vmatprep.subr.mxu0 %v18711_v26 }
0x37a1   :  { %14694 = vmatpush3.msra.mxu0 %v18326_v40 }
0x37a2   :  { %14695 = vmatprep.subr.mxu0 %v18711_v26 }
0x37a3   :  { %14696 = vmatpush3.msra.mxu0 %v18330_v14 }
0x37a4   :  { %14697 = vmatprep.subr.mxu0 %v18711_v26 }
0x37a5   :  { %14698 = vmatpush3.msra.mxu0 %v18334_v10 }
0x37a6   :  { %14700 = vmatmul.mubr.msk.f32.vlgmr.msra.gmra.mxu0 %vm397_vm1, %v18184_v59  ;;  %14712 = vmatprep.subr.mxu0 %v18711_v26 }
0x37a7   :  { %14713 = vmatpush3.msra.mxu0 %v18340_v27  ;;  %14720 = vmatprep.mubr.msk.f32.mxu0 %vm15708_vm0, %v18711_v26 }
0x37a8   :  { %14714 = vmatprep.subr.mxu0 %v18711_v26 }
0x37a9   :  { %14715 = vmatpush3.msra.mxu0 %v18346_v19 }
0x37aa   :  { %14716 = vmatprep.subr.mxu0 %v18711_v26 }
0x37ab   :  { %14717 = vmatpush3.msra.mxu0 %v18350_v29 }
0x37ac   :  { %14718 = vmatprep.subr.mxu0 %v18711_v26 }
0x37ad   :  { %14719 = vmatpush3.msra.mxu0 %v18354_v44 }
0x37ae   :  { %14734 = vmatprep.subr.mxu0 %v18711_v26 }
0x384c   :  { %v10546_v41 = vpop.f32.mrf.mxu0  ;;  %v10686_v33 = vpop.f32.mrf.mxu1 }
0x384d   :  { %v10547_v1 = vadd.f32 %v18358_v62, %v10546_v41 }
0x384e   :  { %v14646_v50 = vpop.f32.mrf.mxu0  ;;  %v14668_v0 = vpop.f32.mrf.mxu1 }
0x3855   :  { %v10616_v46 = vpop.f32.mrf.mxu0 }
0x3856   :  { %v10826_v20 = vpop.f32.mrf.mxu1  ;;  %v10617_v13 = vadd.f32 %v18364_v21, %v10616_v46 }
0x3857   :  { %v14657_v30 = vpop.f32.mrf.mxu0  ;;  %v10827_v61 = vadd.f32 %v18367_v58, %v10826_v20  ;;  %v10687_v20 = vadd.f32 %v18373_v47, %v10686_v33 }
0x3858   :  { %v14690_v51 = vpop.f32.mrf.mxu1 }
0x3859   :  { %v10907_v50 = vadd.f32 %v10827_v61, %v10617_v13 }
0x385b   :  { %v12498_v41 = vmul.f32 -1.442695, %v10907_v50 }
0x385e   :  { %v10756_v18 = vpop.f32.mrf.mxu0 }
0x385f   :  { %v10757_v12 = vadd.f32 %v18361_v31, %v10756_v18 }
0x3860   :  { %v14679_v4 = vpop.f32.mrf.mxu0 }
0x3861   :  { %v10900_v39 = vadd.f32 %v10757_v12, %v10547_v1  ;;  %v18370_v12 = vld [vmem:[#allocation17 + $0x2] sm:$0x1] }
0x3863   :  { %v12497_v60 = vmul.f32 -1.442695, %v10900_v39 }
0x3865   :  { %15151 = vpow2.f32 %v12497_v60 }
0x3866   :  { %v10896_v63 = vpop.f32.mrf.mxu0  ;;  %15153 = vpow2.f32 %v12498_v41 }
0x3867   :  { %v10897_v46 = vadd.f32 %v18370_v12, %v10896_v63 }
0x3868   :  { %v14701_v0 = vpop.f32.mrf.mxu0 }
0x3872   :  { %v15152_v30 = vpop.eup %15151 }
0x3873   :  { %v10904_v51 = vadd.f32 1.0, %v15152_v30  ;;  %v15154_v18 = vpop.eup %15153 }
0x3874   :  { %v10911_v1 = vadd.f32 1.0, %v15154_v18 }
0x3875   :  { %15155 = vrcp.f32 %v10904_v51 }
0x3876   :  { %15157 = vrcp.f32 %v10911_v1 }
0x3882   :  { %v15156_v4 = vpop.eup %15155 }
0x3883   :  { %v10914_v39 = vmul.f32 %v15156_v4, %v10897_v46  ;;  %v15158_v61 = vpop.eup %15157 }
0x3884   :  { %v10917_v60 = vsub.f32 1.0, %v15158_v61  ;;  %v10919_v41 = vmul.f32 %v15158_v61, %v18184_v59  ;;  %v18388_v61 = vld [vmem:[#allocation19 + $0x18] sm:$0xff] }
0x3885   :  { %v10915_v13 = vadd.f32 %v10914_v39, %v10687_v20 }
0x3887   :  { %15159 = vtanh.f32 %v10915_v13 }
0x3894   :  { %v15160_v50 = vpop.eup %15159 }
0x3895   :  { %v10918_v0 = vmul.f32 %v15160_v50, %v10917_v60  ;;  %v18394_v60 = vld [vmem:[#allocation19 + $0x10] sm:$0xff]  ;;  %v18398_v50 = vld [vmem:[#allocation19 + $0x8] sm:$0xff] }
0x3897   :  { %v18377_v30 = vadd.f32 %v10919_v41, %v10918_v0  ;;  %v18402_v0 = vld [vmem:[#allocation19] sm:$0xff] }
0x3899   :  { %14705 = vmatmul.mubr.msk.f32.vlgmr.msra.gmra.mxu1 %vm397_vm1, %v18377_v30 }
0x389a   :  { %14708 = vmatpush3.msra.mxu1 %v17086_v25  ;;  %14709 = vmatprep.mubr.msk.f32.mxu1 %vm15708_vm0, %v18711_v26 }
0x389b   :  { %14723 = vmatprep.subr.mxu1 %v18711_v26 }
0x3959   :  { %v10990_v33 = vpop.f32.mrf.mxu1 }
0x395a   :  { %v10994_v63 = vsel %vm5436_vm12, %v10990_v33, -inf }
0x395b   :  { %10995 = vmax.xlane.f32.xlu0 %v10994_v63  ;;  %v14706_v51 = vpop.f32.mrf.mxu1 }
0x395c   :  { %v18445_v51 = vld [vmem:[#allocation22] sm:$0x1] }
0x39e4   :  { %v10996_v18 = vpop.xlane.xlu0 %10995 }
0x39e5   :  { %v10997_v1 = vsub.f32 %v10990_v33, %v10996_v18 }
0x39e7   :  { %v10998_v59 = vmul.f32 1.442695, %v10997_v1 }
0x39e9   :  { %15161 = vpow2.f32 %v10998_v59 }
0x39f6   :  { %v15162_v46 = vpop.eup %15161 }
0x39f7   :  { %v11000_v4 = vsel %vm5436_vm12, %v15162_v46, 0.0 }
0x39f8   :  { %11001 = vadd.xlane.f32.xlu1 %v11000_v4 }
0x3a81   :  { %v11002_v20 = vpop.xlane.xlu1 %11001 }
0x3a82   :  { %15163 = vrcp.f32 %v11002_v20 }
0x3a8f   :  { %v15164_v39 = vpop.eup %15163 }
0x3a90   :  { %v11004_v13 = vmul.f32 %v15164_v39, %v15162_v46 }
0x3a92   :  { %14710 = vmatmul.mubr.msk.f32.vlgmr.msra.gmra.mxu1 %vm5448_vm13, %v11004_v13 }
0x3a93   :  { %14724 = vmatpush3.msra.mxu1 %v18388_v61  ;;  %14731 = vmatprep.mubr.msk.f32.mxu1 %vm15708_vm0, %v18711_v26 }
0x3a94   :  { %14725 = vmatprep.subr.mxu1 %v18711_v26 }
0x3a95   :  { %14726 = vmatpush3.msra.mxu1 %v18394_v60 }
0x3a96   :  { %14727 = vmatprep.subr.mxu1 %v18711_v26 }
0x3a97   :  { %14728 = vmatpush3.msra.mxu1 %v18398_v50 }
0x3a98   :  { %14729 = vmatprep.subr.mxu1 %v18711_v26 }
0x3a99   :  { %14730 = vmatpush3.msra.mxu1 %v18402_v0 }
0x3a9a   :  { %14732 = vmatmul.mubr.msk.f32.vlgmr.msra.gmra.mxu1 %vm397_vm1, %v18377_v30  ;;  %14745 = vmatprep.subr.mxu1 %v18711_v26 }
0x3a9b   :  { %14746 = vmatpush3.msra.mxu1 %v17965_v42  ;;  %14761 = vmatprep.mubr.msk.f32.mxu1 %vm15708_vm0, %v18711_v26 }
0x3a9c   :  { %14747 = vmatprep.subr.mxu1 %v18711_v26 }
0x3a9d   :  { %14748 = vmatpush3.msra.mxu1 %v17974_v45 }
0x3a9e   :  { %14749 = vmatprep.subr.mxu1 %v18711_v26 }
0x3a9f   :  { %14750 = vmatpush3.msra.mxu1 %v17981_v6  ;;  %v18427_v6 = vld [vmem:[#allocation23 + $0x18] sm:$0xff] }
0x3aa0   :  { %14751 = vmatprep.subr.mxu1 %v18711_v26 }
0x3aa1   :  { %14752 = vmatpush3.msra.mxu1 %v17988_v55  ;;  %v18433_v55 = vld [vmem:[#allocation23 + $0x10] sm:$0xff] }
0x3aa2   :  { %14753 = vmatprep.subr.mxu1 %v18711_v26 }
0x3aa3   :  { %14754 = vmatpush3.msra.mxu1 %v17995_v35  ;;  %v18437_v35 = vld [vmem:[#allocation23 + $0x8] sm:$0xff] }
0x3aa4   :  { %14755 = vmatprep.subr.mxu1 %v18711_v26 }
0x3aa5   :  { %14756 = vmatpush3.msra.mxu1 %v18002_v48 }
0x3aa6   :  { %14757 = vmatprep.subr.mxu1 %v18711_v26 }
0x3aa7   :  { %14758 = vmatpush3.msra.mxu1 %v18009_v56  ;;  %v18441_v56 = vld [vmem:[#allocation23] sm:$0xff] }
0x3aa8   :  { %14759 = vmatprep.subr.mxu1 %v18711_v26 }
0x3aa9   :  { %14760 = vmatpush3.msra.mxu1 %v18016_v3 }
0x3aaa   :  { %14786 = vmatprep.subr.mxu1 %v18711_v26 }
0x3b52   :  { %v11074_v42 = vpop.f32.mrf.mxu1 }
0x3b53   :  { %14721 = vmatmul.mubr.msk.f32.vlgmr.msra.gmra.mxu0 %vm397_vm1, %v11074_v42 }
0x3b54   :  { %v14711_v45 = vpop.f32.mrf.mxu1  ;;  %14735 = vmatpush3.msra.mxu0 %v18427_v6  ;;  %14742 = vmatprep.mubr.msk.f32.mxu0 %vm15708_vm0, %v18711_v26 }
0x3b55   :  { %14736 = vmatprep.subr.mxu0 %v18711_v26 }
0x3b56   :  { %14737 = vmatpush3.msra.mxu0 %v18433_v55 }
0x3b57   :  { %14738 = vmatprep.subr.mxu0 %v18711_v26 }
0x3b58   :  { %14739 = vmatpush3.msra.mxu0 %v18437_v35 }
0x3b59   :  { %14740 = vmatprep.subr.mxu0 %v18711_v26 }
0x3b5a   :  { %v11217_v48 = vpop.f32.mrf.mxu1  ;;  %14741 = vmatpush3.msra.mxu0 %v18441_v56 }
0x3b5b   :  { %14764 = vmatprep.subr.mxu0 %v18711_v26 }
0x3b5c   :  { %v14733_v3 = vpop.f32.mrf.mxu1 }
0x3c13   :  { %v11147_v41 = vpop.f32.mrf.mxu0 }
0x3c14   :  { %v11218_v33 = vadd.f32 %v11217_v48, %v11147_v41 }
0x3c15   :  { %v14722_v63 = vpop.f32.mrf.mxu0 }
0x3c16   :  { %v11221_v18 = vadd.f32 %v18445_v51, %v11218_v33 }
0x3c18   :  { %15165 = vtanh.f32 %v11221_v18 }
0x3c25   :  { %v15166_v1 = vpop.eup %15165 }
0x3c26   :  { %14743 = vmatmul.mubr.msk.f32.vlgmr.msra.gmra.mxu0 %vm397_vm1, %v15166_v1 }
0x3c27   :  { %14765 = vmatpush3.msra.mxu0 %v18033_v49  ;;  %14772 = vmatprep.mubr.msk.f32.mxu0 %vm15708_vm0, %v18711_v26  ;;  %v18462_v49 = vld [vmem:[%s18667_s18] sm:$0x1]  ;;  %s15709_s18 = smov [#allocation26]  }
0x3c28   :  { %14766 = vmatprep.subr.mxu0 %v18711_v26  ;;  %s12271_s25 = sshll.u32 %s15709_s18, 4  ;;  %s12272_s25 = int_to_ptr.vmem [resolvable:$true] %s12271_s25 }
0x3c29   :  { %14767 = vmatpush3.msra.mxu0 %v18039_v7  ;;  %s15629_s0 = scalar_lea.vmem %s12272_s25, 16  ;;  %s15633_s26 = scalar_lea.vmem %s12272_s25, 32 }
0x3c2a   :  { %14768 = vmatprep.subr.mxu0 %v18711_v26  ;;  %p15630_p0 = scmp.ne.s32.totalorder %s12272_s25, %s15629_s0  ;;  %p15634_p1 = scmp.lt.s32.totalorder %s12272_s25, %s12272_s25 }
0x3c2b   :  { %14769 = vmatpush3.msra.mxu0 %v18043_v52  ;;  %p15635_p2 = scmp.lt.s32.totalorder %s15633_s26, %s15629_s0 }
0x3c2c   :  { %14770 = vmatprep.subr.mxu0 %v18711_v26 }
0x3c2d   :  { %14771 = vmatpush3.msra.mxu0 %v18047_v54  ;;  %p15636_p3 = por %p15635_p2, %p15634_p1 }
0x3c2e   :  { %14775 = vmatprep.subr.mxu0 %v18711_v26 }
0x3c2f   :  { %p15637_p4 = pnand %p15636_p3, %p15630_p0 }
0x3ce6   :  { %v11292_v59 = vpop.f32.mrf.mxu0 }
0x3ce7   :  { %v18465_v46 = vadd.f32 %v18462_v49, %v11292_v59 }
0x3ce8   :  { %v14744_v7 = vpop.f32.mrf.mxu0 }
0x3ce9   :  { %v11296_v4 = vsel %vm5740_vm14, %v18465_v46, -inf }
0x3cea   :  { %11297 = vmax.xlane.f32.xlu0 %v11296_v4 }
0x3d73   :  { %v18469_v52 = vpop.xlane.xlu0 %11297 }
0x3d74   :  { %vm11299_vm5 = vcmp.eq.f32.partialorder %v18465_v46, %v18469_v52 }
0x3d75   :  { %v11300_v54 = vsel %vm11299_vm5, %v16895_v11, 64 }
0x3d76   :  { %v11301_v20 = vsel %vm5740_vm14, %v11300_v54, 2147483647 }
0x3d77   :  { %v11303_v39 = vshra.s32 %v11301_v20, 16  ;;  %v11302_v42 = vand.u32 65535, %v11301_v20 }
0x3d79   :  { %v11305_v13 = vcvt.s32.f32 %v11303_v39  ;;  %v11304_v48 = vcvt.s32.f32 %v11302_v42 }
0x3d7b   :  { %11306 = vmin.xlane.f32.xlu1 %v11305_v13 }
0x3e04   :  { %v11307_v45 = vpop.xlane.xlu1 %11306 }
0x3e05   :  { %vm11308_vm6 = vcmp.eq.f32.partialorder %v11305_v13, %v11307_v45  ;;  %v11313_v41 = vcvt.f32.s32 %v11307_v45 }
0x3e06   :  { %v11309_v3 = vsel %vm11308_vm6, %v11304_v48, inf }
0x3e07   :  { %11310 = vmin.xlane.f32.xlu0 %v11309_v3  ;;  %v11314_v63 = vshll.u32 %v11313_v41, 16 }
0x3e90   :  { %v11311_v33 = vpop.xlane.xlu0 %11310 }
0x3e91   :  { %v11312_v18 = vcvt.f32.s32 %v11311_v33 }
0x3e93   :  { %v11315_v1 = vadd.s32 %v11314_v63, %v11312_v18 }
0x3e95   :  { %vm11327_vm11 = vcmp.eq.s32.totalorder %v16895_v11, %v11315_v1  ;;  %v18480_v59 = vsel %vm11324_vm9, %v11315_v1, %v18263_v15 }
0x3e96   :  { %v12505_v7 = vsel %vm11327_vm11, 1.0, %v18711_v26 }
0x3e97   :  { %14762 = vmatmul.mubr.msk.f32.vlgmr.msra.gmra.mxu1 %vm4837_vm3, %v12505_v7 }
0x3e98   :  { %14787 = vmatpush3.msra.mxu1 %v18071_v24  ;;  %14794 = vmatprep.mubr.msk.f32.mxu1 %vm15708_vm0, %v18711_v26 }
0x3e99   :  { %14788 = vmatprep.subr.mxu1 %v18711_v26 }
0x3e9a   :  { %14789 = vmatpush3.msra.mxu1 %v18077_v57 }
0x3e9b   :  { %14790 = vmatprep.subr.mxu1 %v18711_v26 }
0x3e9c   :  { %14791 = vmatpush3.msra.mxu1 %v18081_v34 }
0x3e9d   :  { %14792 = vmatprep.subr.mxu1 %v18711_v26 }
0x3e9e   :  { %14793 = vmatpush3.msra.mxu1 %v18085_v2 }
0x3e9f   :  { %14808 = vmatprep.subr.mxu1 %v18711_v26 }
0x3f57   :  { %v11399_v15 = vpop.f32.mrf.mxu1 }
0x3f58   :  { %14773 = vmatmul.mubr.msk.f32.vlgmr.msra.gmra.mxu0 %vm397_vm1, %v11399_v15  ;;  %14795 = vmatmul.mubr.msk.f32.vlgmr.msra.gmra.mxu1 %vm397_vm1, %v11399_v15 }
0x3f59   :  { %14776 = vmatpush3.msra.mxu0 %v18091_v38  ;;  %14809 = vmatpush3.msra.mxu1 %v18094_v8  ;;  %v14763_v24 = vpop.f32.mrf.mxu1 }
0x3f5a   :  { %14777 = vmatprep.subr.mxu0 %v18711_v26  ;;  %14810 = vmatprep.subr.mxu1 %v18711_v26 }
0x3f5b   :  { %14778 = vmatpush3.msra.mxu0 %v18099_v23  ;;  %14811 = vmatpush3.msra.mxu1 %v18102_v5 }
0x3f5c   :  { %14779 = vmatprep.subr.mxu0 %v18711_v26  ;;  %14812 = vmatprep.subr.mxu1 %v18711_v26 }
0x3f5d   :  { %14780 = vmatpush3.msra.mxu0 %v18107_v43  ;;  %14813 = vmatpush3.msra.mxu1 %v18110_v36 }
0x3f5e   :  { %14781 = vmatprep.subr.mxu0 %v18711_v26  ;;  %14814 = vmatprep.subr.mxu1 %v18711_v26 }
0x3f5f   :  { %14782 = vmatpush3.msra.mxu0 %v18115_v28  ;;  %14783 = vmatprep.mubr.msk.f32.mxu0 %vm15708_vm0, %v18711_v26 }
0x3f60   :  { %14815 = vmatpush3.msra.mxu1 %v18120_v32  ;;  %14816 = vmatprep.mubr.msk.f32.mxu1 %vm15708_vm0, %v18711_v26 }
0x3f61   :  { %14784 = vmatmul.mubr.msk.f32.vlgmr.msra.gmra.mxu0 %vm397_vm1, %v11399_v15  ;;  %14797 = vmatprep.subr.mxu0 %v18711_v26 }
0x3f62   :  { %14817 = vmatmul.mubr.msk.f32.vlgmr.msra.gmra.mxu1 %vm397_vm1, %v18377_v30  ;;  %14830 = vmatprep.subr.mxu1 %v18711_v26 }
0x3f63   :  { %14798 = vmatpush3.msra.mxu0 %v18736_v17  ;;  %14831 = vmatpush3.xpose.msk.msra.mxu1 %vm397_vm1, %v17086_v25 }
0x3f64   :  { %14799 = vmatprep.subr.mxu0 %v18711_v26  ;;  %14805 = vmatprep.mubr.msk.f32.mxu0 %vm15708_vm0, %v18711_v26 }
0x3f65   :  { %14800 = vmatpush3.msra.mxu0 %v18737_v16  ;;  %14832 = vmatprep.mubr.msk.f32.mxu1 %vm15708_vm0, %v18711_v26 }
0x3f66   :  { %14801 = vmatprep.subr.mxu0 %v18711_v26  ;;  %14835 = vmatprep.subr.mxu1 %v18711_v26 }
0x3f67   :  { %14802 = vmatpush3.msra.mxu0 %v18738_v53 }
0x3f68   :  { %14803 = vmatprep.subr.mxu0 %v18711_v26 }
0x3f69   :  { %14804 = vmatpush3.msra.mxu0 %v18739_v37 }
0x3f6a   :  { %14806 = vmatmul.mubr.msk.f32.vlgmr.msra.gmra.mxu0 %vm397_vm1, %v18377_v30  ;;  %14819 = vmatprep.subr.mxu0 %v18711_v26 }
0x3f6b   :  { %14820 = vmatpush3.msra.mxu0 %v18320_v22  ;;  %14827 = vmatprep.mubr.msk.f32.mxu0 %vm15708_vm0, %v18711_v26 }
0x3f6c   :  { %14821 = vmatprep.subr.mxu0 %v18711_v26 }
0x3f6d   :  { %14822 = vmatpush3.msra.mxu0 %v18326_v40 }
0x3f6e   :  { %14823 = vmatprep.subr.mxu0 %v18711_v26 }
0x3f6f   :  { %14824 = vmatpush3.msra.mxu0 %v18330_v14 }
0x3f70   :  { %14825 = vmatprep.subr.mxu0 %v18711_v26 }
0x3f71   :  { %14826 = vmatpush3.msra.mxu0 %v18334_v10 }
0x3f72   :  { %14828 = vmatmul.mubr.msk.f32.vlgmr.msra.gmra.mxu0 %vm397_vm1, %v18377_v30  ;;  %14840 = vmatprep.subr.mxu0 %v18711_v26 }
0x3f73   :  { %14841 = vmatpush3.msra.mxu0 %v18340_v27  ;;  %14848 = vmatprep.mubr.msk.f32.mxu0 %vm15708_vm0, %v18711_v26 }
0x3f74   :  { %14842 = vmatprep.subr.mxu0 %v18711_v26 }
0x3f75   :  { %14843 = vmatpush3.msra.mxu0 %v18346_v19 }
0x3f76   :  { %14844 = vmatprep.subr.mxu0 %v18711_v26 }
0x3f77   :  { %14845 = vmatpush3.msra.mxu0 %v18350_v29 }
0x3f78   :  { %14846 = vmatprep.subr.mxu0 %v18711_v26 }
0x3f79   :  { %14847 = vmatpush3.msra.mxu0 %v18354_v44 }
0x3f7a   :  { %14862 = vmatprep.subr.mxu0 %v18711_v26 }
0x4018   :  { %v11472_v57 = vpop.f32.mrf.mxu0  ;;  %v11612_v34 = vpop.f32.mrf.mxu1 }
0x4019   :  { %v11473_v28 = vadd.f32 %v18358_v62, %v11472_v57  ;;  %v11613_v54 = vadd.f32 %v18373_v47, %v11612_v34 }
0x401a   :  { %v14774_v2 = vpop.f32.mrf.mxu0  ;;  %v14796_v38 = vpop.f32.mrf.mxu1 }
0x401b   :  { %v18741_v2 = vld [vmem:[#allocation38_spill] sm:$0xff] }
0x4021   :  { %v11542_v8 = vpop.f32.mrf.mxu0 }
0x4022   :  { %v11752_v23 = vpop.f32.mrf.mxu1  ;;  %v11543_v53 = vadd.f32 %v18364_v21, %v11542_v8 }
0x4023   :  { %v14785_v5 = vpop.f32.mrf.mxu0  ;;  %v11753_v37 = vadd.f32 %v18367_v58, %v11752_v23  ;;  %v18743_v23 = vld [vmem:[#allocation46_spill] sm:$0xff] }
0x4024   :  { %v14818_v43 = vpop.f32.mrf.mxu1 }
0x4025   :  { %v11833_v14 = vadd.f32 %v11753_v37, %v11543_v53  ;;  %v18745_v43 = vld [vmem:[#allocation44_spill] sm:$0xff] }
0x4027   :  { %v12514_v27 = vmul.f32 -1.442695, %v11833_v14 }
0x402a   :  { %v11682_v36 = vpop.f32.mrf.mxu0 }
0x402b   :  { %v11683_v32 = vadd.f32 %v18361_v31, %v11682_v36 }
0x402c   :  { %v14807_v17 = vpop.f32.mrf.mxu0 }
0x402d   :  { %v11826_v16 = vadd.f32 %v11683_v32, %v11473_v28 }
0x402f   :  { %v12513_v22 = vmul.f32 -1.442695, %v11826_v16 }
0x4031   :  { %15167 = vpow2.f32 %v12513_v22 }
0x4032   :  { %v11822_v40 = vpop.f32.mrf.mxu0  ;;  %15169 = vpow2.f32 %v12514_v27 }
0x4033   :  { %v11823_v31 = vadd.f32 %v18370_v12, %v11822_v40 }
0x4034   :  { %v14829_v10 = vpop.f32.mrf.mxu0 }
0x403e   :  { %v15168_v19 = vpop.eup %15167 }
0x403f   :  { %v11830_v29 = vadd.f32 1.0, %v15168_v19  ;;  %v15170_v44 = vpop.eup %15169  ;;  %v18746_v19 = vld [vmem:[#allocation41_spill] sm:$0xff] }
0x4040   :  { %v11837_v62 = vadd.f32 1.0, %v15170_v44 }
0x4041   :  { %15171 = vrcp.f32 %v11830_v29  ;;  %v18747_v29 = vld [vmem:[#allocation40_spill] sm:$0xff] }
0x4042   :  { %15173 = vrcp.f32 %v11837_v62  ;;  %v6687_v44 = vsub.f32 %v18747_v29, %v18746_v19 }
0x4044   :  { %v6688_v62 = vmul.f32 1.442695, %v6687_v44 }
0x404e   :  { %v15172_v4 = vpop.eup %15171 }
0x404f   :  { %v11840_v21 = vmul.f32 %v15172_v4, %v11823_v31  ;;  %v15174_v20 = vpop.eup %15173  ;;  %v18748_v31 = vld [vmem:[#allocation43_spill] sm:$0xff]  ;;  %v18749_v4 = vld [vmem:[#allocation42_spill] sm:$0xff] }
0x4050   :  { %v11843_v39 = vsub.f32 1.0, %v15174_v20  ;;  %v11845_v45 = vmul.f32 %v15174_v20, %v18377_v30 }
0x4051   :  { %v11841_v58 = vadd.f32 %v11840_v21, %v11613_v54  ;;  %v8538_v54 = vsub.f32 %v18749_v4, %v18748_v31 }
0x4053   :  { %15175 = vtanh.f32 %v11841_v58  ;;  %v8539_v21 = vmul.f32 1.442695, %v8538_v54  ;;  %v18750_v58 = vld [vmem:[#allocation52_spill] sm:$0xff] }
0x4054   :  { %v10390_v20 = vsub.f32 %v18750_v58, %v18253_v9 }
0x4060   :  { %v15176_v13 = vpop.eup %15175 }
0x4061   :  { %v11844_v42 = vmul.f32 %v15176_v13, %v11843_v39  ;;  %v10391_v39 = vmul.f32 1.442695, %v10390_v20 }
0x4063   :  { %v11846_v48 = vadd.f32 %v11845_v45, %v11844_v42 }
0x4065   :  { %14833 = vmatmul.mubr.msk.f32.vlgmr.msra.gmra.mxu1 %vm397_vm1, %v11846_v48 }
0x4066   :  { %14836 = vmatpush3.msra.mxu1 %v17086_v25  ;;  %14837 = vmatprep.mubr.msk.f32.mxu1 %vm15708_vm0, %v18711_v26 }
0x4067   :  { %14851 = vmatprep.subr.mxu1 %v18711_v26 }
0x4125   :  { %v11916_v47 = vpop.f32.mrf.mxu1 }
0x4126   :  { %v11920_v12 = vsel %vm5436_vm12, %v11916_v47, -inf }
0x4127   :  { %11921 = vmax.xlane.f32.xlu1 %v11920_v12  ;;  %v14834_v3 = vpop.f32.mrf.mxu1 }
0x41b0   :  { %v11922_v41 = vpop.xlane.xlu1 %11921 }
0x41b1   :  { %v11923_v33 = vsub.f32 %v11916_v47, %v11922_v41 }
0x41b3   :  { %v11924_v63 = vmul.f32 1.442695, %v11923_v33 }
0x41b5   :  { %15177 = vpow2.f32 %v11924_v63 }
0x41c2   :  { %v15178_v30 = vpop.eup %15177 }
0x41c3   :  { %v11926_v18 = vsel %vm5436_vm12, %v15178_v30, 0.0 }
0x41c4   :  { %11927 = vadd.xlane.f32.xlu0 %v11926_v18 }
0x424d   :  { %v11928_v1 = vpop.xlane.xlu0 %11927 }
0x424e   :  { %15179 = vrcp.f32 %v11928_v1 }
0x425b   :  { %v15180_v25 = vpop.eup %15179 }
0x425c   :  { %v11930_v7 = vmul.f32 %v15180_v25, %v15178_v30 }
0x425e   :  { %14838 = vmatmul.mubr.msk.f32.vlgmr.msra.gmra.mxu1 %vm5448_vm13, %v11930_v7 }
0x425f   :  { %14852 = vmatpush3.msra.mxu1 %v18388_v61  ;;  %14859 = vmatprep.mubr.msk.f32.mxu1 %vm15708_vm0, %v18711_v26 }
0x4260   :  { %14853 = vmatprep.subr.mxu1 %v18711_v26 }
0x4261   :  { %14854 = vmatpush3.msra.mxu1 %v18394_v60 }
0x4262   :  { %14855 = vmatprep.subr.mxu1 %v18711_v26 }
0x4263   :  { %14856 = vmatpush3.msra.mxu1 %v18398_v50 }
0x4264   :  { %14857 = vmatprep.subr.mxu1 %v18711_v26 }
0x4265   :  { %14858 = vmatpush3.msra.mxu1 %v18402_v0 }
0x4266   :  { %14860 = vmatmul.mubr.msk.f32.vlgmr.msra.gmra.mxu1 %vm397_vm1, %v11846_v48 }
0x431e   :  { %v12000_v15 = vpop.f32.mrf.mxu1 }
0x431f   :  { %14849 = vmatmul.mubr.msk.f32.vlgmr.msra.gmra.mxu0 %vm397_vm1, %v12000_v15 }
0x4320   :  { %v14839_v61 = vpop.f32.mrf.mxu1  ;;  %14863 = vmatpush3.msra.mxu0 %v18427_v6  ;;  %14870 = vmatprep.mubr.msk.f32.mxu0 %vm15708_vm0, %v18711_v26 }
0x4321   :  { %14864 = vmatprep.subr.mxu0 %v18711_v26 }
0x4322   :  { %14865 = vmatpush3.msra.mxu0 %v18433_v55  ;;  %v18740_v55 = vld [vmem:[#allocation39_spill] sm:$0xff] }
0x4323   :  { %14866 = vmatprep.subr.mxu0 %v18711_v26  ;;  %v5761_v38 = vsub.f32 %v18741_v2, %v18740_v55 }
0x4324   :  { %14867 = vmatpush3.msra.mxu0 %v18437_v35  ;;  %v18742_v35 = vld [vmem:[#allocation47_spill] sm:$0xff] }
0x4325   :  { %14868 = vmatprep.subr.mxu0 %v18711_v26  ;;  %v5762_v8 = vmul.f32 1.442695, %v5761_v38  ;;  %v7612_v26 = vsub.f32 %v18743_v23, %v18742_v35 }
0x4326   :  { %v12143_v60 = vpop.f32.mrf.mxu1  ;;  %14869 = vmatpush3.msra.mxu0 %v18441_v56  ;;  %v18744_v56 = vld [vmem:[#allocation45_spill] sm:$0xff] }
0x4327   :  { %v7613_v5 = vmul.f32 1.442695, %v7612_v26  ;;  %v9464_v36 = vsub.f32 %v18745_v43, %v18744_v56 }
0x4328   :  { %v14861_v50 = vpop.f32.mrf.mxu1 }
0x4329   :  { %v9465_v28 = vmul.f32 1.442695, %v9464_v36 }
0x43df   :  { %v12073_v0 = vpop.f32.mrf.mxu0 }
0x43e0   :  { %v12144_v24 = vadd.f32 %v12143_v60, %v12073_v0 }
0x43e1   :  { %v14850_v6 = vpop.f32.mrf.mxu0 }
0x43e2   :  { %v12147_v57 = vadd.f32 %v18445_v51, %v12144_v24  ;;  %v11316_v51 = vsub.f32 %v18465_v46, %v18469_v52 }
0x43e4   :  { %15181 = vtanh.f32 %v12147_v57  ;;  %v11317_v32 = vmul.f32 1.442695, %v11316_v51 }
0x43e5   :  { %15183 = vpow2.f32 %v5762_v8 }
0x43e6   :  { %15185 = vpow2.f32 %v7613_v5 }
0x43e7   :  { %15187 = vpow2.f32 %v9465_v28 }
0x43e8   :  { %15189 = vpow2.f32 %v11317_v32 }
0x43e9   :  { %15191 = vpow2.f32 %v6688_v62 }
0x43ea   :  { %15193 = vpow2.f32 %v8539_v21 }
0x43eb   :  { %15195 = vpow2.f32 %v10391_v39 }
0x43f1   :  { %v15182_v34 = vpop.eup %15181 }
0x43f2   :  { %14871 = vmatmul.mubr.msk.f32.vlgmr.msra.gmra.mxu0 %vm397_vm1, %v15182_v34  ;;  %v15184_v22 = vpop.eup %15183 }
0x43f3   :  { %v5764_v40 = vsel %vm5740_vm14, %v15184_v22, 0.0  ;;  %v15186_v14 = vpop.eup %15185 }
0x43f4   :  { %v7615_v10 = vsel %vm5740_vm14, %v15186_v14, 0.0  ;;  %v15188_v27 = vpop.eup %15187 }
0x43f5   :  { %v9467_v46 = vsel %vm5740_vm14, %v15188_v27, 0.0  ;;  %v15190_v52 = vpop.eup %15189 }
0x43f6   :  { %v15192_v41 = vpop.eup %15191 }
0x43f7   :  { %v6690_v33 = vsel %vm5740_vm14, %v15192_v41, 0.0  ;;  %v15194_v63 = vpop.eup %15193 }
0x43f8   :  { %v8541_v9 = vsel %vm5740_vm14, %v15194_v63, 0.0  ;;  %v15196_v30 = vpop.eup %15195 }
0x43f9   :  { %v10393_v18 = vsel %vm5740_vm14, %v15196_v30, 0.0 }
0x44b2   :  { %v12218_v17 = vpop.f32.mrf.mxu0 }
0x44b3   :  { %v12219_v16 = vadd.f32 %v18462_v49, %v12218_v17  ;;  %v11319_v49 = vsel %vm5740_vm14, %v15190_v52, 0.0 }
0x44b4   :  { %v14872_v53 = vpop.f32.mrf.mxu0 }
0x44b5   :  { %v12222_v37 = vsel %vm5740_vm14, %v12219_v16, -inf }
0x44b6   :  { %12223 = vmax.xlane.f32.xlu1 %v12222_v37 }
0x44ba   :  { %5765 = vadd.xlane.f32.xlu1 %v5764_v40 }
0x44be   :  { %7616 = vadd.xlane.f32.xlu1 %v7615_v10 }
0x44c2   :  { %9468 = vadd.xlane.f32.xlu1 %v9467_v46 }
0x44c6   :  { %11320 = vadd.xlane.f32.xlu1 %v11319_v49 }
0x453f   :  { %v12224_v13 = vpop.xlane.xlu1 %12223 }
0x4540   :  { %vm12225_vm0 = vcmp.eq.f32.partialorder %v12219_v16, %v12224_v13  ;;  %v12242_v42 = vsub.f32 %v12219_v16, %v12224_v13 }
0x4541   :  { %v12226_v45 = vsel %vm12225_vm0, %v16895_v11, 64 }
0x4542   :  { %v12243_v48 = vmul.f32 1.442695, %v12242_v42  ;;  %v12227_v47 = vsel %vm5740_vm14, %v12226_v45, 2147483647 }
0x4543   :  { %v12229_v12 = vshra.s32 %v12227_v47, 16  ;;  %v5766_v7 = vpop.xlane.xlu1 %5765  ;;  %v12228_v15 = vand.u32 65535, %v12227_v47 }
0x4544   :  { %15197 = vpow2.f32 %v12243_v48 }
0x4545   :  { %v12231_v3 = vcvt.s32.f32 %v12229_v12  ;;  %v12230_v60 = vcvt.s32.f32 %v12228_v15  ;;  %15199 = vrcp.f32 %v5766_v7 }
0x4547   :  { %12232 = vmin.xlane.f32.xlu0 %v12231_v3  ;;  %v7617_v50 = vpop.xlane.xlu1 %7616 }
0x454b   :  { %6691 = vadd.xlane.f32.xlu0 %v6690_v33  ;;  %v9469_v6 = vpop.xlane.xlu1 %9468 }
0x454f   :  { %8542 = vadd.xlane.f32.xlu0 %v8541_v9  ;;  %v11321_v55 = vpop.xlane.xlu1 %11320 }
0x4551   :  { %v15198_v1 = vpop.eup %15197 }
0x4552   :  { %v12245_v25 = vsel %vm5740_vm14, %v15198_v1, 0.0  ;;  %v15200_v2 = vpop.eup %15199 }
0x4553   :  { %10394 = vadd.xlane.f32.xlu0 %v10393_v18  ;;  %v5771_v35 = vsel %vm5769_vm8, %v15200_v2, 0.0 }
0x4557   :  { %12246 = vadd.xlane.f32.xlu0 %v12245_v25 }
0x45d0   :  { %v12233_v61 = vpop.xlane.xlu0 %12232 }
0x45d1   :  { %vm12234_vm1 = vcmp.eq.f32.partialorder %v12231_v3, %v12233_v61 }
0x45d2   :  { %v12235_v0 = vsel %vm12234_vm1, %v12230_v60, inf }
0x45d3   :  { %12236 = vmin.xlane.f32.xlu1 %v12235_v0 }
0x45d4   :  { %v6692_v24 = vpop.xlane.xlu0 %6691 }
0x45d5   :  { %15201 = vrcp.f32 %v6692_v24 }
0x45d6   :  { %15203 = vrcp.f32 %v7617_v50 }
0x45d8   :  { %v8543_v57 = vpop.xlane.xlu0 %8542 }
0x45d9   :  { %15205 = vrcp.f32 %v8543_v57 }
0x45da   :  { %15207 = vrcp.f32 %v9469_v6 }
0x45dc   :  { %v10395_v34 = vpop.xlane.xlu0 %10394 }
0x45dd   :  { %15209 = vrcp.f32 %v10395_v34 }
0x45de   :  { %15211 = vrcp.f32 %v11321_v55 }
0x45e0   :  { %v12247_v38 = vpop.xlane.xlu0 %12246 }
0x45e1   :  { %15213 = vrcp.f32 %v12247_v38 }
0x45e2   :  { %v15202_v8 = vpop.eup %15201 }
0x45e3   :  { %v6696_v23 = vsel %vm4834_vm2, %v15202_v8, %v5771_v35  ;;  %v15204_v26 = vpop.eup %15203  ;;  %vm12250_vm2 = vcmp.eq.s32.totalorder %v16895_v11, 7 }
0x45e4   :  { %v7622_v56 = vsel %vm7620_vm15, %v15204_v26, %v6696_v23 }
0x45e6   :  { %v15206_v5 = vpop.eup %15205 }
0x45e7   :  { %v8548_v43 = vsel %vm8546_vm7, %v15206_v5, %v7622_v56  ;;  %v15208_v36 = vpop.eup %15207 }
0x45e8   :  { %v9474_v51 = vsel %vm9472_vm4, %v15208_v36, %v8548_v43 }
0x45ea   :  { %v15210_v28 = vpop.eup %15209 }
0x45eb   :  { %v10400_v32 = vsel %vm10398_vm10, %v15210_v28, %v9474_v51  ;;  %v15212_v17 = vpop.eup %15211 }
0x45ec   :  { %v11326_v53 = vsel %vm11324_vm9, %v15212_v17, %v10400_v32 }
0x45ee   :  { %v15214_v16 = vpop.eup %15213 }
0x45ef   :  { %v12252_v37 = vsel %vm12250_vm2, %v15214_v16, %v11326_v53 }
0x45f0   :  { %12254 = vst.msk [vmem:[#allocation26] sm:$0x1] %vm5436_vm12, %v12252_v37 }
0x45f1   :  { %15640 = shalt.err (!%p15637_p4)
}
0x45f2   :  { %12274 = dma.vmem_to_hbm [thread:$0]  %s12272_s25, 16, %s18669_s20, [#allocation27]   ;;  %v12239_v22 = vcvt.f32.s32 %v12233_v61 }
0x45f3   :  { %s15710_s14 = smov [#allocation25]  }
0x45f4   :  { %v12240_v14 = vshll.u32 %v12239_v22, 16  ;;  %s12261_s6 = sshll.u32 %s15710_s14, 4  ;;  %s12262_s6 = int_to_ptr.vmem [resolvable:$true] %s12261_s6 }
0x45f5   :  { %s15649_s16 = scalar_lea.vmem %s12262_s6, 16  ;;  %s15653_s17 = scalar_lea.vmem %s12262_s6, 32 }
0x45f6   :  { %p15650_p5 = scmp.ne.s32.totalorder %s12262_s6, %s15649_s16  ;;  %p15654_p6 = scmp.lt.s32.totalorder %s12262_s6, %s12262_s6 }
0x45f7   :  { %p15655_p7 = scmp.lt.s32.totalorder %s15653_s17, %s15649_s16 }
0x45f9   :  { %p15656_p8 = por %p15655_p7, %p15654_p6 }
0x45fb   :  { %p15657_p9 = pnand %p15656_p8, %p15650_p5 }
0x465c   :  { %v12237_v40 = vpop.xlane.xlu1 %12236 }
0x465d   :  { %v12238_v10 = vcvt.f32.s32 %v12237_v40 }
0x465f   :  { %v12241_v27 = vadd.s32 %v12240_v14, %v12238_v10 }
0x4661   :  { %v12251_v46 = vsel %vm12250_vm2, %v12241_v27, %v18480_v59 }
0x4662   :  { %12253 = vst.msk [vmem:[#allocation25] sm:$0x1] %vm5436_vm12, %v12251_v46 }
0x4663   :  { %15660 = shalt.err (!%p15657_p9)
}
0x4664   :  { %12264 = dma.vmem_to_hbm [thread:$0]  %s12262_s6, 16, %s18668_s19, [#allocation4]  }
0x4665   :  { %15685 = dma.done.wait [#allocation4], 16  }
0x4666   :  { %15686 = vsyncadd [#allocation4], 4294967280 }
0x4667   :  { %15687 = dma.done.wait [#allocation27], 16  }
0x4668   :  { %15688 = vsyncadd [#allocation27], 4294967280 }
0x4669   :  { %12281 = vsyncpa [#allocation3], 1 }
0x466a   :  { %12282 = vsyncpa [#allocation6], 1 }
0x466b   :  { %12283 = vsyncpa [#allocation9], 1 }
0x466c   :  { %12284 = vsyncpa [#allocation12], 1 }
0x466d   :  { %12285 = vsyncpa [#allocation15], 1 }
0x466e   :  { %12286 = vsyncpa [#allocation18], 1 }
0x466f   :  { %12287 = vsyncpa [#allocation21], 1 }
0x4670   :  { %12288 = vsyncpa [#allocation24], 1 }
0x4671   :  { %12289 = vsyncpa [#allocation4], 1 }
0x4672   :  { %12290 = vsyncpa [#allocation27], 1 }

</bundles_post_ra>
